<compile_context>
chip_gen: v7x
topology: tpu7x:2x2x1
jax: 0.10.0
libtpu: 0.0.40
codegen_flags: <defaults>
</compile_context>

<pallas_src>
import functools
import math

import numpy as np

import jax
import jax.numpy as jnp
from jax.experimental import pallas as pl
from jax.experimental.pallas import tpu as pltpu  # noqa: F401  (imported per spec)

EPS_LN = 1e-5
EPS_BN = 1e-5
_NEG_INF = -1e30  # bias padding for masked (non-existent) key positions


# ------------------------- host-side constant builders ----------------------

def _build_conv3x3_select(H, W, B):
    """S[t] @ x  gathers tap t of a 3x3 / stride 1 / pad 1 depthwise conv.

    x rows are b*H*W + i*W + j (channels-last, batch folded into rows)."""
    flat = H * W
    mats = np.zeros((9, B * flat, B * flat), np.float32)
    for t in range(9):
        dh, dw = t // 3 - 1, t % 3 - 1
        for i in range(H):
            for j in range(W):
                si, sj = i + dh, j + dw
                if 0 <= si < H and 0 <= sj < W:
                    for b in range(B):
                        mats[t, b * flat + i * W + j, b * flat + si * W + sj] = 1.0
    return jnp.asarray(mats)


def _build_reduction_select(H, W, R, pad, B, lkp):
    """Selection matrices for the k/v depthwise conv (kernel R, stride R, pad)."""
    OH = (H + 2 * pad - R) // R + 1
    OW = (W + 2 * pad - R) // R + 1
    lk = OH * OW
    flat = H * W
    mats = np.zeros((R * R, B * lkp, B * flat), np.float32)
    for t in range(R * R):
        kh, kw = t // R, t % R
        for qi in range(OH):
            for qj in range(OW):
                si, sj = qi * R + kh - pad, qj * R + kw - pad
                if 0 <= si < H and 0 <= sj < W:
                    for b in range(B):
                        mats[t, b * lkp + qi * OW + qj, b * flat + si * W + sj] = 1.0
    return jnp.asarray(mats), lk


def _build_block_mean(B, flat):
    """Block-diagonal averaging matrix: (A @ x)[r] = mean over r's batch block."""
    m = np.zeros((B * flat, B * flat), np.float32)
    for b in range(B):
        m[b * flat:(b + 1) * flat, b * flat:(b + 1) * flat] = 1.0 / flat
    return jnp.asarray(m)


# ------------------------------ in-kernel helpers ---------------------------

def _gelu_exact(x):
    # TODO(synk): exact (erf) GELU is implemented via the Abramowitz&Stegun
    # 7.1.26 polynomial (|erf err| < 1.5e-7) since Mosaic erf lowering is not
    # relied upon; numerically indistinguishable from torch.nn.GELU() in f32.
    z = x * np.float32(1.0 / math.sqrt(2.0))
    az = jnp.abs(z)
    t = 1.0 / (1.0 + np.float32(0.3275911) * az)
    poly = t * (np.float32(0.254829592)
                + t * (np.float32(-0.284496736)
                       + t * (np.float32(1.421413741)
                              + t * (np.float32(-1.453152027)
                                     + t * np.float32(1.061405429)))))
    erf_abs = 1.0 - poly * jnp.exp(-az * az)
    erf = jnp.where(z >= 0, erf_abs, -erf_abs)
    return 0.5 * x * (1.0 + erf)


def _layernorm_rows(x, blkmean, w_rows, b_rows, eps):
    """LayerNorm over the spatial positions of each (batch, channel) column.

    x: (B*flat, C); blkmean: (B*flat, B*flat) block averaging matrix;
    w_rows/b_rows: (B*flat, 1) per-spatial-position affine."""
    mu = jnp.dot(blkmean, x, preferred_element_type=jnp.float32)
    xc = x - mu
    var = jnp.dot(blkmean, xc * xc, preferred_element_type=jnp.float32)
    return xc * jax.lax.rsqrt(var + eps) * w_rows + b_rows


def _batchnorm(x, g, b, eps):
    """Train-mode BatchNorm (batch statistics, biased variance). x: (rows, C)."""
    mu = jnp.mean(x, axis=0, keepdims=True)
    xc = x - mu
    var = jnp.mean(xc * xc, axis=0, keepdims=True)
    return xc * jax.lax.rsqrt(var + eps) * g + b


# --------------------------------- kernel A ---------------------------------
# LPU -> LN1 -> LMHSA (projections, fused k/v reduction conv, attention, fc_o)

def _lpu_ln1_lmhsa_kernel(
    x_ref, s3_ref, s2_ref, blkmean_ref,
    lpu_w_ref, lpu_b_ref, ln1_w_ref, ln1_b_ref,
    k_dw_w_ref, k_dw_b_ref, v_dw_w_ref, v_dw_b_ref,
    wq_ref, bq_ref, wk_ref, bk_ref, wv_ref, bv_ref,
    bias_ref, wo_ref, bo_ref,
    xlpu_ref, atto_ref,
    *, B, flat, C, heads, d_head, lkp, scale, eps_ln,
):
    x = x_ref[...]                                              # (B*flat, C)

    # ---- LocalPerceptionUnit: x + dwconv3x3(x)  (conv as selection matmuls)
    lpu_w = lpu_w_ref[...]                                      # (9, C)
    acc = jnp.zeros_like(x) + lpu_b_ref[...]
    for t in range(9):
        tap = jnp.dot(s3_ref[t], x, preferred_element_type=jnp.float32)
        acc = acc + tap * lpu_w[t:t + 1, :]
    x_lpu = x + acc
    xlpu_ref[...] = x_lpu

    # ---- LayerNorm over (H, W) per (batch, channel)
    x_ln1 = _layernorm_rows(x_lpu, blkmean_ref[...], ln1_w_ref[...],
                            ln1_b_ref[...], eps_ln)

    # ---- q projection
    q = jnp.dot(x_ln1, wq_ref[...], preferred_element_type=jnp.float32) + bq_ref[...]

    # ---- fused k/v reduction depthwise conv (shared taps)
    k_dw_w = k_dw_w_ref[...]                                    # (R*R, C)
    v_dw_w = v_dw_w_ref[...]
    ntap = k_dw_w.shape[0]
    k_sp = jnp.zeros((B * lkp, C), jnp.float32) + k_dw_b_ref[...]
    v_sp = jnp.zeros((B * lkp, C), jnp.float32) + v_dw_b_ref[...]
    for t in range(ntap):
        tap = jnp.dot(s2_ref[t], x_ln1, preferred_element_type=jnp.float32)
        k_sp = k_sp + tap * k_dw_w[t:t + 1, :]
        v_sp = v_sp + tap * v_dw_w[t:t + 1, :]
    k = jnp.dot(k_sp, wk_ref[...], preferred_element_type=jnp.float32) + bk_ref[...]
    v = jnp.dot(v_sp, wv_ref[...], preferred_element_type=jnp.float32) + bv_ref[...]

    # ---- multi-head attention; fc_o folded into the per-head accumulation
    wo = wo_ref[...]                                            # (C, C), input-major
    for b in range(B):
        q_b = q[b * flat:(b + 1) * flat, :]                     # (flat, C)
        k_b = k[b * lkp:(b + 1) * lkp, :]                       # (lkp, C)
        v_b = v[b * lkp:(b + 1) * lkp, :]
        att_b = jnp.zeros((flat, C), jnp.float32) + bo_ref[...]
        for h in range(heads):
            q_h = q_b[:, h * d_head:(h + 1) * d_head]           # (flat, d_head)
            k_h = k_b[:, h * d_head:(h + 1) * d_head]           # (lkp, d_head)
            v_h = v_b[:, h * d_head:(h + 1) * d_head]
            s = jax.lax.dot_general(q_h, k_h, (((1,), (1,)), ((), ())),
                                    preferred_element_type=jnp.float32)  # (flat, lkp)
            s = s * scale + bias_ref[h]        # padded key columns carry -1e30
            m = jnp.max(s, axis=-1, keepdims=True)
            p = jnp.exp(s - m)
            p = p * pl.reciprocal(jnp.sum(p, axis=-1, keepdims=True), approx=True)
            o_h = jnp.dot(p, v_h, preferred_element_type=jnp.float32)    # (flat, d_head)
            att_b = att_b + jnp.dot(o_h, wo[h * d_head:(h + 1) * d_head, :],
                                    preferred_element_type=jnp.float32)
        atto_ref[b * flat:(b + 1) * flat, :] = att_b


# --------------------------------- kernel B ---------------------------------
# residual -> LN2 -> IRFFN (conv1+GELU+BN, dw3x3, GELU(y+t), BN, conv2, BN) -> residual

def _ln2_irffn_kernel(
    att_ref, xlpu_ref, s3_ref, blkmean_ref,
    ln2_w_ref, ln2_b_ref,
    w1_ref, b1_ref, bn1_g_ref, bn1_b_ref,
    dw_w_ref, dw_b_ref, bnr_g_ref, bnr_b_ref,
    w2_ref, b2_ref, bn2_g_ref, bn2_b_ref,
    out_ref,
    *, eps_ln, eps_bn,
):
    x_mhsa = att_ref[...] + xlpu_ref[...]                       # (B*flat, C)
    x_ln2 = _layernorm_rows(x_mhsa, blkmean_ref[...], ln2_w_ref[...],
                            ln2_b_ref[...], eps_ln)

    # conv1 (1x1) -> exact GELU -> BN
    t = jnp.dot(x_ln2, w1_ref[...], preferred_element_type=jnp.float32) + b1_ref[...]
    t = _gelu_exact(t)
    t = _batchnorm(t, bn1_g_ref[...], bn1_b_ref[...], eps_bn)   # (B*flat, E)

    # depthwise 3x3 on expanded features, residual GELU, BN
    dw_w = dw_w_ref[...]                                        # (9, E)
    y = jnp.zeros_like(t) + dw_b_ref[...]
    for tap in range(9):
        y = y + jnp.dot(s3_ref[tap], t,
                        preferred_element_type=jnp.float32) * dw_w[tap:tap + 1, :]
    y = _gelu_exact(y + t)
    y = _batchnorm(y, bnr_g_ref[...], bnr_b_ref[...], eps_bn)

    # conv2 (1x1) -> identity -> BN, then the outer residual
    o = jnp.dot(y, w2_ref[...], preferred_element_type=jnp.float32) + b2_ref[...]
    o = _batchnorm(o, bn2_g_ref[...], bn2_b_ref[...], eps_bn)
    out_ref[...] = o + x_mhsa


# ------------------------------- CMT block -----------------------------------

def init_params(key, C, H, heads, reduction, expansion):
    E = int(expansion * C)
    size = int((H - reduction + 2) / reduction + 1)
    flat = H * H
    ks = jax.random.split(key, 24)

    def rnd(k, shape, scale=0.1):
        return scale * jax.random.normal(k, shape, dtype=jnp.float32)

    p = {}
    # LocalPerceptionUnit
    p["lpu_w"] = rnd(ks[0], (C, 1, 3, 3))
    p["lpu_b"] = rnd(ks[1], (C,))
    # LayerNorms (PyTorch default affine init: ones / zeros)
    p["ln1_w"] = jnp.ones((H, H), jnp.float32)
    p["ln1_b"] = jnp.zeros((H, H), jnp.float32)
    p["ln2_w"] = jnp.ones((H, H), jnp.float32)
    p["ln2_b"] = jnp.zeros((H, H), jnp.float32)
    # LMHSA
    p["k_dw_w"] = rnd(ks[2], (C, 1, reduction, reduction))
    p["k_dw_b"] = rnd(ks[3], (C,))
    p["v_dw_w"] = rnd(ks[4], (C, 1, reduction, reduction))
    p["v_dw_b"] = rnd(ks[5], (C,))
    p["fc_q_w"] = rnd(ks[6], (C, C));  p["fc_q_b"] = rnd(ks[7], (C,))
    p["fc_k_w"] = rnd(ks[8], (C, C));  p["fc_k_b"] = rnd(ks[9], (C,))
    p["fc_v_w"] = rnd(ks[10], (C, C)); p["fc_v_b"] = rnd(ks[11], (C,))
    p["fc_o_w"] = rnd(ks[12], (C, C)); p["fc_o_b"] = rnd(ks[13], (C,))
    p["attn_bias"] = rnd(ks[14], (heads, flat, size * size))
    # IRFFN
    p["conv1_w"] = rnd(ks[15], (E, C, 1, 1)); p["conv1_b"] = rnd(ks[16], (E,))
    p["conv1_bn_g"] = jnp.ones((E,), jnp.float32)
    p["conv1_bn_b"] = jnp.zeros((E,), jnp.float32)
    p["irffn_dw_w"] = rnd(ks[17], (E, 1, 3, 3)); p["irffn_dw_b"] = rnd(ks[18], (E,))
    p["bn_res_g"] = jnp.ones((E,), jnp.float32)
    p["bn_res_b"] = jnp.zeros((E,), jnp.float32)
    p["conv2_w"] = rnd(ks[19], (C, E, 1, 1)); p["conv2_b"] = rnd(ks[20], (C,))
    p["conv2_bn_g"] = jnp.ones((C,), jnp.float32)
    p["conv2_bn_b"] = jnp.zeros((C,), jnp.float32)
    return p


def cmt_block_forward(params, x, heads, reduction, expansion):
    B, C, H, W = x.shape
    flat = H * W
    d_head = C // heads
    E = int(expansion * C)
    scale = float(d_head) ** (-0.5)

    # reduced k/v sequence length, padded to a sublane multiple
    OH = (H + 2 - reduction) // reduction + 1
    OW = (W + 2 - reduction) // reduction + 1
    lk = OH * OW
    lkp = max(8, ((lk + 7) // 8) * 8)

    # precomputed structural constants (baked in at trace time)
    s3 = _build_conv3x3_select(H, W, B)                       # (9, B*flat, B*flat)
    s2, _ = _build_reduction_select(H, W, reduction, 1, B, lkp)  # (R*R, B*lkp, B*flat)
    blkmean = _build_block_mean(B, flat)                      # (B*flat, B*flat)

    # single layout conversion at entry: NCHW -> channels-last rows
    x_cl = jnp.transpose(x, (0, 2, 3, 1)).reshape(B * flat, C)

    # LayerNorm affine per spatial position, tiled across batch rows
    ln1_w = jnp.tile(params["ln1_w"].reshape(flat, 1), (B, 1))
    ln1_b = jnp.tile(params["ln1_b"].reshape(flat, 1), (B, 1))
    ln2_w = jnp.tile(params["ln2_w"].reshape(flat, 1), (B, 1))
    ln2_b = jnp.tile(params["ln2_b"].reshape(flat, 1), (B, 1))

    # depthwise weights as (taps, channels)
    lpu_w = params["lpu_w"].reshape(C, 9).T
    k_dw_w = params["k_dw_w"].reshape(C, reduction * reduction).T
    v_dw_w = params["v_dw_w"].reshape(C, reduction * reduction).T
    irffn_dw_w = params["irffn_dw_w"].reshape(E, 9).T

    # attention bias, padded along the reduced axis so padded keys get ~0 prob
    attn_bias = jnp.pad(params["attn_bias"], ((0, 0), (0, 0), (0, lkp - lk)),
                        constant_values=_NEG_INF)

    kernel_a = functools.partial(
        _lpu_ln1_lmhsa_kernel, B=B, flat=flat, C=C, heads=heads,
        d_head=d_head, lkp=lkp, scale=scale, eps_ln=EPS_LN)
    x_lpu_cl, att_o = pl.pallas_call(
        kernel_a,
        out_shape=(jax.ShapeDtypeStruct((B * flat, C), jnp.float32),
                   jax.ShapeDtypeStruct((B * flat, C), jnp.float32)),
    )(x_cl, s3, s2, blkmean,
      lpu_w, params["lpu_b"].reshape(1, C), ln1_w, ln1_b,
      k_dw_w, params["k_dw_b"].reshape(1, C),
      v_dw_w, params["v_dw_b"].reshape(1, C),
      params["fc_q_w"].T, params["fc_q_b"].reshape(1, C),
      params["fc_k_w"].T, params["fc_k_b"].reshape(1, C),
      params["fc_v_w"].T, params["fc_v_b"].reshape(1, C),
      attn_bias, params["fc_o_w"].T, params["fc_o_b"].reshape(1, C))

    # NOTE: PyTorch does a raw .view(B, C, H, W) on the (B, flat, C) fc_o output
    # (no permute) — reproduce that exactly, then bring it back to channels-last.
    att_scr = jnp.transpose(att_o.reshape(B, C, flat), (0, 2, 1)).reshape(B * flat, C)

    kernel_b = functools.partial(_ln2_irffn_kernel, eps_ln=EPS_LN, eps_bn=EPS_BN)
    y = pl.pallas_call(
        kernel_b,
        out_shape=jax.ShapeDtypeStruct((B * flat, C), jnp.float32),
    )(att_scr, x_lpu_cl, s3, blkmean,
      ln2_w, ln2_b,
      params["conv1_w"][:, :, 0, 0].T, params["conv1_b"].reshape(1, E),
      params["conv1_bn_g"].reshape(1, E), params["conv1_bn_b"].reshape(1, E),
      irffn_dw_w, params["irffn_dw_b"].reshape(1, E),
      params["bn_res_g"].reshape(1, E), params["bn_res_b"].reshape(1, E),
      params["conv2_w"][:, :, 0, 0].T, params["conv2_b"].reshape(1, C),
      params["conv2_bn_g"].reshape(1, C), params["conv2_bn_b"].reshape(1, C))

    # single layout conversion at exit: channels-last rows -> NCHW
    return jnp.transpose(y.reshape(B, H, W, C), (0, 3, 1, 2))


# ---------------------------------- main -------------------------------------

if __name__ == "__main__":
    B, C, H, W = 2, 32, 8, 8          # input_shape = [C, H, W]
    heads, reduction, expansion = 4, 2, 2.0

    key = jax.random.PRNGKey(0)
    kx, kp = jax.random.split(key)
    x = jax.random.normal(kx, (B, C, H, W), dtype=jnp.float32)
    params = init_params(kp, C, H, heads, reduction, expansion)

    fwd = jax.jit(functools.partial(cmt_block_forward, heads=heads,
                                    reduction=reduction, expansion=expansion))
    out = jax.block_until_ready(fwd(params, x))

    assert out.shape == (B, C, H, W), out.shape
    assert bool(jnp.all(jnp.isfinite(out)))
    print("KERNEL_OK")
</pallas_src>

<mosaic_0001>
module attributes {stable_mosaic.version = 11 : i64} {
  func.func @_lpu_ln1_lmhsa_kernel(%arg0: memref<128x32xf32, #tpu.memory_space<vmem>>, %arg1: memref<9x128x128xf32, #tpu.memory_space<vmem>>, %arg2: memref<4x64x128xf32, #tpu.memory_space<vmem>>, %arg3: memref<128x128xf32, #tpu.memory_space<vmem>>, %arg4: memref<9x32xf32, #tpu.memory_space<vmem>>, %arg5: memref<1x32xf32, #tpu.memory_space<vmem>>, %arg6: memref<128x1xf32, #tpu.memory_space<vmem>>, %arg7: memref<128x1xf32, #tpu.memory_space<vmem>>, %arg8: memref<4x32xf32, #tpu.memory_space<vmem>>, %arg9: memref<1x32xf32, #tpu.memory_space<vmem>>, %arg10: memref<4x32xf32, #tpu.memory_space<vmem>>, %arg11: memref<1x32xf32, #tpu.memory_space<vmem>>, %arg12: memref<32x32xf32, #tpu.memory_space<vmem>>, %arg13: memref<1x32xf32, #tpu.memory_space<vmem>>, %arg14: memref<32x32xf32, #tpu.memory_space<vmem>>, %arg15: memref<1x32xf32, #tpu.memory_space<vmem>>, %arg16: memref<32x32xf32, #tpu.memory_space<vmem>>, %arg17: memref<1x32xf32, #tpu.memory_space<vmem>>, %arg18: memref<4x64x32xf32, #tpu.memory_space<vmem>>, %arg19: memref<32x32xf32, #tpu.memory_space<vmem>>, %arg20: memref<1x32xf32, #tpu.memory_space<vmem>>, %arg21: memref<128x32xf32, #tpu.memory_space<vmem>>, %arg22: memref<128x32xf32, #tpu.memory_space<vmem>>) attributes {dimension_semantics = [], scalar_prefetch = 0 : i64, scratch_operands = 0 : i64, tpu.core_type = #tpu.core_type<tc>} {
    %c0 = arith.constant 0 : index
    %c0_0 = arith.constant 0 : index
    %0 = vector.load %arg0[%c0, %c0_0] : memref<128x32xf32, #tpu.memory_space<vmem>>, vector<128x32xf32>
    %c0_1 = arith.constant 0 : index
    %c0_2 = arith.constant 0 : index
    %1 = vector.load %arg4[%c0_1, %c0_2] : memref<9x32xf32, #tpu.memory_space<vmem>>, vector<9x32xf32>
    %cst = arith.constant 0.000000e+00 : f32
    %2 = vector.broadcast %cst : f32 to vector<128x32xf32>
    %c0_3 = arith.constant 0 : index
    %c0_4 = arith.constant 0 : index
    %3 = vector.load %arg5[%c0_3, %c0_4] : memref<1x32xf32, #tpu.memory_space<vmem>>, vector<1x32xf32>
    %4 = vector.broadcast %3 : vector<1x32xf32> to vector<128x32xf32>
    %5 = arith.addf %2, %4 : vector<128x32xf32>
    %c0_5 = arith.constant 0 : index
    %c0_6 = arith.constant 0 : index
    %c0_7 = arith.constant 0 : index
    %6 = vector.load %arg1[%c0_5, %c0_6, %c0_7] : memref<9x128x128xf32, #tpu.memory_space<vmem>>, vector<1x128x128xf32>
    %7 = vector.shape_cast %6 : vector<1x128x128xf32> to vector<128x128xf32>
    %cst_8 = arith.constant dense<0.000000e+00> : vector<128x32xf32>
    %8 = tpu.matmul %7, %0, %cst_8 {dimension_numbers = #tpu.dot_dimension_numbers<[1], [0], [0], [1], [0, 0, 1, 1], [], []>} : vector<128x128xf32>, vector<128x32xf32>, vector<128x32xf32> -> vector<128x32xf32>
    %9 = vector.extract_strided_slice %1 {offsets = [0, 0], sizes = [1, 32], strides = [1, 1]} : vector<9x32xf32> to vector<1x32xf32>
    %10 = vector.broadcast %9 : vector<1x32xf32> to vector<128x32xf32>
    %11 = arith.mulf %8, %10 : vector<128x32xf32>
    %12 = arith.addf %5, %11 : vector<128x32xf32>
    %c1 = arith.constant 1 : index
    %c0_9 = arith.constant 0 : index
    %c0_10 = arith.constant 0 : index
    %13 = vector.load %arg1[%c1, %c0_9, %c0_10] : memref<9x128x128xf32, #tpu.memory_space<vmem>>, vector<1x128x128xf32>
    %14 = vector.shape_cast %13 : vector<1x128x128xf32> to vector<128x128xf32>
    %cst_11 = arith.constant dense<0.000000e+00> : vector<128x32xf32>
    %15 = tpu.matmul %14, %0, %cst_11 {dimension_numbers = #tpu.dot_dimension_numbers<[1], [0], [0], [1], [0, 0, 1, 1], [], []>} : vector<128x128xf32>, vector<128x32xf32>, vector<128x32xf32> -> vector<128x32xf32>
    %16 = vector.extract_strided_slice %1 {offsets = [1, 0], sizes = [1, 32], strides = [1, 1]} : vector<9x32xf32> to vector<1x32xf32>
    %17 = vector.broadcast %16 : vector<1x32xf32> to vector<128x32xf32>
    %18 = arith.mulf %15, %17 : vector<128x32xf32>
    %19 = arith.addf %12, %18 : vector<128x32xf32>
    %c2 = arith.constant 2 : index
    %c0_12 = arith.constant 0 : index
    %c0_13 = arith.constant 0 : index
    %20 = vector.load %arg1[%c2, %c0_12, %c0_13] : memref<9x128x128xf32, #tpu.memory_space<vmem>>, vector<1x128x128xf32>
    %21 = vector.shape_cast %20 : vector<1x128x128xf32> to vector<128x128xf32>
    %cst_14 = arith.constant dense<0.000000e+00> : vector<128x32xf32>
    %22 = tpu.matmul %21, %0, %cst_14 {dimension_numbers = #tpu.dot_dimension_numbers<[1], [0], [0], [1], [0, 0, 1, 1], [], []>} : vector<128x128xf32>, vector<128x32xf32>, vector<128x32xf32> -> vector<128x32xf32>
    %23 = vector.extract_strided_slice %1 {offsets = [2, 0], sizes = [1, 32], strides = [1, 1]} : vector<9x32xf32> to vector<1x32xf32>
    %24 = vector.broadcast %23 : vector<1x32xf32> to vector<128x32xf32>
    %25 = arith.mulf %22, %24 : vector<128x32xf32>
    %26 = arith.addf %19, %25 : vector<128x32xf32>
    %c3 = arith.constant 3 : index
    %c0_15 = arith.constant 0 : index
    %c0_16 = arith.constant 0 : index
    %27 = vector.load %arg1[%c3, %c0_15, %c0_16] : memref<9x128x128xf32, #tpu.memory_space<vmem>>, vector<1x128x128xf32>
    %28 = vector.shape_cast %27 : vector<1x128x128xf32> to vector<128x128xf32>
    %cst_17 = arith.constant dense<0.000000e+00> : vector<128x32xf32>
    %29 = tpu.matmul %28, %0, %cst_17 {dimension_numbers = #tpu.dot_dimension_numbers<[1], [0], [0], [1], [0, 0, 1, 1], [], []>} : vector<128x128xf32>, vector<128x32xf32>, vector<128x32xf32> -> vector<128x32xf32>
    %30 = vector.extract_strided_slice %1 {offsets = [3, 0], sizes = [1, 32], strides = [1, 1]} : vector<9x32xf32> to vector<1x32xf32>
    %31 = vector.broadcast %30 : vector<1x32xf32> to vector<128x32xf32>
    %32 = arith.mulf %29, %31 : vector<128x32xf32>
    %33 = arith.addf %26, %32 : vector<128x32xf32>
    %c4 = arith.constant 4 : index
    %c0_18 = arith.constant 0 : index
    %c0_19 = arith.constant 0 : index
    %34 = vector.load %arg1[%c4, %c0_18, %c0_19] : memref<9x128x128xf32, #tpu.memory_space<vmem>>, vector<1x128x128xf32>
    %35 = vector.shape_cast %34 : vector<1x128x128xf32> to vector<128x128xf32>
    %cst_20 = arith.constant dense<0.000000e+00> : vector<128x32xf32>
    %36 = tpu.matmul %35, %0, %cst_20 {dimension_numbers = #tpu.dot_dimension_numbers<[1], [0], [0], [1], [0, 0, 1, 1], [], []>} : vector<128x128xf32>, vector<128x32xf32>, vector<128x32xf32> -> vector<128x32xf32>
    %37 = vector.extract_strided_slice %1 {offsets = [4, 0], sizes = [1, 32], strides = [1, 1]} : vector<9x32xf32> to vector<1x32xf32>
    %38 = vector.broadcast %37 : vector<1x32xf32> to vector<128x32xf32>
    %39 = arith.mulf %36, %38 : vector<128x32xf32>
    %40 = arith.addf %33, %39 : vector<128x32xf32>
    %c5 = arith.constant 5 : index
    %c0_21 = arith.constant 0 : index
    %c0_22 = arith.constant 0 : index
    %41 = vector.load %arg1[%c5, %c0_21, %c0_22] : memref<9x128x128xf32, #tpu.memory_space<vmem>>, vector<1x128x128xf32>
    %42 = vector.shape_cast %41 : vector<1x128x128xf32> to vector<128x128xf32>
    %cst_23 = arith.constant dense<0.000000e+00> : vector<128x32xf32>
    %43 = tpu.matmul %42, %0, %cst_23 {dimension_numbers = #tpu.dot_dimension_numbers<[1], [0], [0], [1], [0, 0, 1, 1], [], []>} : vector<128x128xf32>, vector<128x32xf32>, vector<128x32xf32> -> vector<128x32xf32>
    %44 = vector.extract_strided_slice %1 {offsets = [5, 0], sizes = [1, 32], strides = [1, 1]} : vector<9x32xf32> to vector<1x32xf32>
    %45 = vector.broadcast %44 : vector<1x32xf32> to vector<128x32xf32>
    %46 = arith.mulf %43, %45 : vector<128x32xf32>
    %47 = arith.addf %40, %46 : vector<128x32xf32>
    %c6 = arith.constant 6 : index
    %c0_24 = arith.constant 0 : index
    %c0_25 = arith.constant 0 : index
    %48 = vector.load %arg1[%c6, %c0_24, %c0_25] : memref<9x128x128xf32, #tpu.memory_space<vmem>>, vector<1x128x128xf32>
    %49 = vector.shape_cast %48 : vector<1x128x128xf32> to vector<128x128xf32>
    %cst_26 = arith.constant dense<0.000000e+00> : vector<128x32xf32>
    %50 = tpu.matmul %49, %0, %cst_26 {dimension_numbers = #tpu.dot_dimension_numbers<[1], [0], [0], [1], [0, 0, 1, 1], [], []>} : vector<128x128xf32>, vector<128x32xf32>, vector<128x32xf32> -> vector<128x32xf32>
    %51 = vector.extract_strided_slice %1 {offsets = [6, 0], sizes = [1, 32], strides = [1, 1]} : vector<9x32xf32> to vector<1x32xf32>
    %52 = vector.broadcast %51 : vector<1x32xf32> to vector<128x32xf32>
    %53 = arith.mulf %50, %52 : vector<128x32xf32>
    %54 = arith.addf %47, %53 : vector<128x32xf32>
    %c7 = arith.constant 7 : index
    %c0_27 = arith.constant 0 : index
    %c0_28 = arith.constant 0 : index
    %55 = vector.load %arg1[%c7, %c0_27, %c0_28] : memref<9x128x128xf32, #tpu.memory_space<vmem>>, vector<1x128x128xf32>
    %56 = vector.shape_cast %55 : vector<1x128x128xf32> to vector<128x128xf32>
    %cst_29 = arith.constant dense<0.000000e+00> : vector<128x32xf32>
    %57 = tpu.matmul %56, %0, %cst_29 {dimension_numbers = #tpu.dot_dimension_numbers<[1], [0], [0], [1], [0, 0, 1, 1], [], []>} : vector<128x128xf32>, vector<128x32xf32>, vector<128x32xf32> -> vector<128x32xf32>
    %58 = vector.extract_strided_slice %1 {offsets = [7, 0], sizes = [1, 32], strides = [1, 1]} : vector<9x32xf32> to vector<1x32xf32>
    %59 = vector.broadcast %58 : vector<1x32xf32> to vector<128x32xf32>
    %60 = arith.mulf %57, %59 : vector<128x32xf32>
    %61 = arith.addf %54, %60 : vector<128x32xf32>
    %c8 = arith.constant 8 : index
    %c0_30 = arith.constant 0 : index
    %c0_31 = arith.constant 0 : index
    %62 = vector.load %arg1[%c8, %c0_30, %c0_31] : memref<9x128x128xf32, #tpu.memory_space<vmem>>, vector<1x128x128xf32>
    %63 = vector.shape_cast %62 : vector<1x128x128xf32> to vector<128x128xf32>
    %cst_32 = arith.constant dense<0.000000e+00> : vector<128x32xf32>
    %64 = tpu.matmul %63, %0, %cst_32 {dimension_numbers = #tpu.dot_dimension_numbers<[1], [0], [0], [1], [0, 0, 1, 1], [], []>} : vector<128x128xf32>, vector<128x32xf32>, vector<128x32xf32> -> vector<128x32xf32>
    %65 = vector.extract_strided_slice %1 {offsets = [8, 0], sizes = [1, 32], strides = [1, 1]} : vector<9x32xf32> to vector<1x32xf32>
    %66 = vector.broadcast %65 : vector<1x32xf32> to vector<128x32xf32>
    %67 = arith.mulf %64, %66 : vector<128x32xf32>
    %68 = arith.addf %61, %67 : vector<128x32xf32>
    %69 = arith.addf %0, %68 : vector<128x32xf32>
    %c0_33 = arith.constant 0 : index
    %c0_34 = arith.constant 0 : index
    %70 = vector.load %arg21[%c0_33, %c0_34] : memref<128x32xf32, #tpu.memory_space<vmem>>, vector<128x32xf32>
    tpu.vector_store %arg21[%c0_33, %c0_34], %69 {strides = array<i32>} : memref<128x32xf32, #tpu.memory_space<vmem>>, vector<128x32xf32>,
    %c0_35 = arith.constant 0 : index
    %c0_36 = arith.constant 0 : index
    %71 = vector.load %arg3[%c0_35, %c0_36] : memref<128x128xf32, #tpu.memory_space<vmem>>, vector<128x128xf32>
    %c0_37 = arith.constant 0 : index
    %c0_38 = arith.constant 0 : index
    %72 = vector.load %arg6[%c0_37, %c0_38] : memref<128x1xf32, #tpu.memory_space<vmem>>, vector<128x1xf32>
    %c0_39 = arith.constant 0 : index
    %c0_40 = arith.constant 0 : index
    %73 = vector.load %arg7[%c0_39, %c0_40] : memref<128x1xf32, #tpu.memory_space<vmem>>, vector<128x1xf32>
    %cst_41 = arith.constant dense<0.000000e+00> : vector<128x32xf32>
    %74 = tpu.matmul %71, %69, %cst_41 {dimension_numbers = #tpu.dot_dimension_numbers<[1], [0], [0], [1], [0, 0, 1, 1], [], []>} : vector<128x128xf32>, vector<128x32xf32>, vector<128x32xf32> -> vector<128x32xf32>
    %75 = arith.subf %69, %74 : vector<128x32xf32>
    %76 = arith.mulf %75, %75 : vector<128x32xf32>
    %cst_42 = arith.constant dense<0.000000e+00> : vector<128x32xf32>
    %77 = tpu.matmul %71, %76, %cst_42 {dimension_numbers = #tpu.dot_dimension_numbers<[1], [0], [0], [1], [0, 0, 1, 1], [], []>} : vector<128x128xf32>, vector<128x32xf32>, vector<128x32xf32> -> vector<128x32xf32>
    %cst_43 = arith.constant 9.99999974E-6 : f32
    %78 = vector.broadcast %cst_43 : f32 to vector<128x32xf32>
    %79 = arith.addf %77, %78 : vector<128x32xf32>
    %80 = math.rsqrt %79 : vector<128x32xf32>
    %81 = arith.mulf %75, %80 : vector<128x32xf32>
    %82 = vector.broadcast %72 : vector<128x1xf32> to vector<128x32xf32>
    %83 = arith.mulf %81, %82 : vector<128x32xf32>
    %84 = vector.broadcast %73 : vector<128x1xf32> to vector<128x32xf32>
    %85 = arith.addf %83, %84 : vector<128x32xf32>
    %c0_44 = arith.constant 0 : index
    %c0_45 = arith.constant 0 : index
    %86 = vector.load %arg12[%c0_44, %c0_45] : memref<32x32xf32, #tpu.memory_space<vmem>>, vector<32x32xf32>
    %cst_46 = arith.constant dense<0.000000e+00> : vector<128x32xf32>
    %87 = tpu.matmul %85, %86, %cst_46 {dimension_numbers = #tpu.dot_dimension_numbers<[1], [0], [0], [1], [0, 0, 1, 1], [], []>} : vector<128x32xf32>, vector<32x32xf32>, vector<128x32xf32> -> vector<128x32xf32>
    %c0_47 = arith.constant 0 : index
    %c0_48 = arith.constant 0 : index
    %88 = vector.load %arg13[%c0_47, %c0_48] : memref<1x32xf32, #tpu.memory_space<vmem>>, vector<1x32xf32>
    %89 = vector.broadcast %88 : vector<1x32xf32> to vector<128x32xf32>
    %90 = arith.addf %87, %89 : vector<128x32xf32>
    %c0_49 = arith.constant 0 : index
    %c0_50 = arith.constant 0 : index
    %91 = vector.load %arg8[%c0_49, %c0_50] : memref<4x32xf32, #tpu.memory_space<vmem>>, vector<4x32xf32>
    %c0_51 = arith.constant 0 : index
    %c0_52 = arith.constant 0 : index
    %92 = vector.load %arg10[%c0_51, %c0_52] : memref<4x32xf32, #tpu.memory_space<vmem>>, vector<4x32xf32>
    %cst_53 = arith.constant 0.000000e+00 : f32
    %93 = vector.broadcast %cst_53 : f32 to vector<64x32xf32>
    %c0_54 = arith.constant 0 : index
    %c0_55 = arith.constant 0 : index
    %94 = vector.load %arg9[%c0_54, %c0_55] : memref<1x32xf32, #tpu.memory_space<vmem>>, vector<1x32xf32>
    %95 = vector.broadcast %94 : vector<1x32xf32> to vector<64x32xf32>
    %96 = arith.addf %93, %95 : vector<64x32xf32>
    %cst_56 = arith.constant 0.000000e+00 : f32
    %97 = vector.broadcast %cst_56 : f32 to vector<64x32xf32>
    %c0_57 = arith.constant 0 : index
    %c0_58 = arith.constant 0 : index
    %98 = vector.load %arg11[%c0_57, %c0_58] : memref<1x32xf32, #tpu.memory_space<vmem>>, vector<1x32xf32>
    %99 = vector.broadcast %98 : vector<1x32xf32> to vector<64x32xf32>
    %100 = arith.addf %97, %99 : vector<64x32xf32>
    %c0_59 = arith.constant 0 : index
    %c0_60 = arith.constant 0 : index
    %c0_61 = arith.constant 0 : index
    %101 = vector.load %arg2[%c0_59, %c0_60, %c0_61] : memref<4x64x128xf32, #tpu.memory_space<vmem>>, vector<1x64x128xf32>
    %102 = vector.shape_cast %101 : vector<1x64x128xf32> to vector<64x128xf32>
    %cst_62 = arith.constant dense<0.000000e+00> : vector<64x32xf32>
    %103 = tpu.matmul %102, %85, %cst_62 {dimension_numbers = #tpu.dot_dimension_numbers<[1], [0], [0], [1], [0, 0, 1, 1], [], []>} : vector<64x128xf32>, vector<128x32xf32>, vector<64x32xf32> -> vector<64x32xf32>
    %104 = vector.extract_strided_slice %91 {offsets = [0, 0], sizes = [1, 32], strides = [1, 1]} : vector<4x32xf32> to vector<1x32xf32>
    %105 = vector.broadcast %104 : vector<1x32xf32> to vector<64x32xf32>
    %106 = arith.mulf %103, %105 : vector<64x32xf32>
    %107 = arith.addf %96, %106 : vector<64x32xf32>
    %108 = vector.extract_strided_slice %92 {offsets = [0, 0], sizes = [1, 32], strides = [1, 1]} : vector<4x32xf32> to vector<1x32xf32>
    %109 = vector.broadcast %108 : vector<1x32xf32> to vector<64x32xf32>
    %110 = arith.mulf %103, %109 : vector<64x32xf32>
    %111 = arith.addf %100, %110 : vector<64x32xf32>
    %c1_63 = arith.constant 1 : index
    %c0_64 = arith.constant 0 : index
    %c0_65 = arith.constant 0 : index
    %112 = vector.load %arg2[%c1_63, %c0_64, %c0_65] : memref<4x64x128xf32, #tpu.memory_space<vmem>>, vector<1x64x128xf32>
    %113 = vector.shape_cast %112 : vector<1x64x128xf32> to vector<64x128xf32>
    %cst_66 = arith.constant dense<0.000000e+00> : vector<64x32xf32>
    %114 = tpu.matmul %113, %85, %cst_66 {dimension_numbers = #tpu.dot_dimension_numbers<[1], [0], [0], [1], [0, 0, 1, 1], [], []>} : vector<64x128xf32>, vector<128x32xf32>, vector<64x32xf32> -> vector<64x32xf32>
    %115 = vector.extract_strided_slice %91 {offsets = [1, 0], sizes = [1, 32], strides = [1, 1]} : vector<4x32xf32> to vector<1x32xf32>
    %116 = vector.broadcast %115 : vector<1x32xf32> to vector<64x32xf32>
    %117 = arith.mulf %114, %116 : vector<64x32xf32>
    %118 = arith.addf %107, %117 : vector<64x32xf32>
    %119 = vector.extract_strided_slice %92 {offsets = [1, 0], sizes = [1, 32], strides = [1, 1]} : vector<4x32xf32> to vector<1x32xf32>
    %120 = vector.broadcast %119 : vector<1x32xf32> to vector<64x32xf32>
    %121 = arith.mulf %114, %120 : vector<64x32xf32>
    %122 = arith.addf %111, %121 : vector<64x32xf32>
    %c2_67 = arith.constant 2 : index
    %c0_68 = arith.constant 0 : index
    %c0_69 = arith.constant 0 : index
    %123 = vector.load %arg2[%c2_67, %c0_68, %c0_69] : memref<4x64x128xf32, #tpu.memory_space<vmem>>, vector<1x64x128xf32>
    %124 = vector.shape_cast %123 : vector<1x64x128xf32> to vector<64x128xf32>
    %cst_70 = arith.constant dense<0.000000e+00> : vector<64x32xf32>
    %125 = tpu.matmul %124, %85, %cst_70 {dimension_numbers = #tpu.dot_dimension_numbers<[1], [0], [0], [1], [0, 0, 1, 1], [], []>} : vector<64x128xf32>, vector<128x32xf32>, vector<64x32xf32> -> vector<64x32xf32>
    %126 = vector.extract_strided_slice %91 {offsets = [2, 0], sizes = [1, 32], strides = [1, 1]} : vector<4x32xf32> to vector<1x32xf32>
    %127 = vector.broadcast %126 : vector<1x32xf32> to vector<64x32xf32>
    %128 = arith.mulf %125, %127 : vector<64x32xf32>
    %129 = arith.addf %118, %128 : vector<64x32xf32>
    %130 = vector.extract_strided_slice %92 {offsets = [2, 0], sizes = [1, 32], strides = [1, 1]} : vector<4x32xf32> to vector<1x32xf32>
    %131 = vector.broadcast %130 : vector<1x32xf32> to vector<64x32xf32>
    %132 = arith.mulf %125, %131 : vector<64x32xf32>
    %133 = arith.addf %122, %132 : vector<64x32xf32>
    %c3_71 = arith.constant 3 : index
    %c0_72 = arith.constant 0 : index
    %c0_73 = arith.constant 0 : index
    %134 = vector.load %arg2[%c3_71, %c0_72, %c0_73] : memref<4x64x128xf32, #tpu.memory_space<vmem>>, vector<1x64x128xf32>
    %135 = vector.shape_cast %134 : vector<1x64x128xf32> to vector<64x128xf32>
    %cst_74 = arith.constant dense<0.000000e+00> : vector<64x32xf32>
    %136 = tpu.matmul %135, %85, %cst_74 {dimension_numbers = #tpu.dot_dimension_numbers<[1], [0], [0], [1], [0, 0, 1, 1], [], []>} : vector<64x128xf32>, vector<128x32xf32>, vector<64x32xf32> -> vector<64x32xf32>
    %137 = vector.extract_strided_slice %91 {offsets = [3, 0], sizes = [1, 32], strides = [1, 1]} : vector<4x32xf32> to vector<1x32xf32>
    %138 = vector.broadcast %137 : vector<1x32xf32> to vector<64x32xf32>
    %139 = arith.mulf %136, %138 : vector<64x32xf32>
    %140 = arith.addf %129, %139 : vector<64x32xf32>
    %141 = vector.extract_strided_slice %92 {offsets = [3, 0], sizes = [1, 32], strides = [1, 1]} : vector<4x32xf32> to vector<1x32xf32>
    %142 = vector.broadcast %141 : vector<1x32xf32> to vector<64x32xf32>
    %143 = arith.mulf %136, %142 : vector<64x32xf32>
    %144 = arith.addf %133, %143 : vector<64x32xf32>
    %c0_75 = arith.constant 0 : index
    %c0_76 = arith.constant 0 : index
    %145 = vector.load %arg14[%c0_75, %c0_76] : memref<32x32xf32, #tpu.memory_space<vmem>>, vector<32x32xf32>
    %cst_77 = arith.constant dense<0.000000e+00> : vector<64x32xf32>
    %146 = tpu.matmul %140, %145, %cst_77 {dimension_numbers = #tpu.dot_dimension_numbers<[1], [0], [0], [1], [0, 0, 1, 1], [], []>} : vector<64x32xf32>, vector<32x32xf32>, vector<64x32xf32> -> vector<64x32xf32>
    %c0_78 = arith.constant 0 : index
    %c0_79 = arith.constant 0 : index
    %147 = vector.load %arg15[%c0_78, %c0_79] : memref<1x32xf32, #tpu.memory_space<vmem>>, vector<1x32xf32>
    %148 = vector.broadcast %147 : vector<1x32xf32> to vector<64x32xf32>
    %149 = arith.addf %146, %148 : vector<64x32xf32>
    %c0_80 = arith.constant 0 : index
    %c0_81 = arith.constant 0 : index
    %150 = vector.load %arg16[%c0_80, %c0_81] : memref<32x32xf32, #tpu.memory_space<vmem>>, vector<32x32xf32>
    %cst_82 = arith.constant dense<0.000000e+00> : vector<64x32xf32>
    %151 = tpu.matmul %144, %150, %cst_82 {dimension_numbers = #tpu.dot_dimension_numbers<[1], [0], [0], [1], [0, 0, 1, 1], [], []>} : vector<64x32xf32>, vector<32x32xf32>, vector<64x32xf32> -> vector<64x32xf32>
    %c0_83 = arith.constant 0 : index
    %c0_84 = arith.constant 0 : index
    %152 = vector.load %arg17[%c0_83, %c0_84] : memref<1x32xf32, #tpu.memory_space<vmem>>, vector<1x32xf32>
    %153 = vector.broadcast %152 : vector<1x32xf32> to vector<64x32xf32>
    %154 = arith.addf %151, %153 : vector<64x32xf32>
    %c0_85 = arith.constant 0 : index
    %c0_86 = arith.constant 0 : index
    %155 = vector.load %arg19[%c0_85, %c0_86] : memref<32x32xf32, #tpu.memory_space<vmem>>, vector<32x32xf32>
    %156 = vector.extract_strided_slice %90 {offsets = [0, 0], sizes = [64, 32], strides = [1, 1]} : vector<128x32xf32> to vector<64x32xf32>
    %157 = vector.extract_strided_slice %149 {offsets = [0, 0], sizes = [32, 32], strides = [1, 1]} : vector<64x32xf32> to vector<32x32xf32>
    %158 = vector.extract_strided_slice %154 {offsets = [0, 0], sizes = [32, 32], strides = [1, 1]} : vector<64x32xf32> to vector<32x32xf32>
    %cst_87 = arith.constant 0.000000e+00 : f32
    %159 = vector.broadcast %cst_87 : f32 to vector<64x32xf32>
    %c0_88 = arith.constant 0 : index
    %c0_89 = arith.constant 0 : index
    %160 = vector.load %arg20[%c0_88, %c0_89] : memref<1x32xf32, #tpu.memory_space<vmem>>, vector<1x32xf32>
    %161 = vector.broadcast %160 : vector<1x32xf32> to vector<64x32xf32>
    %162 = arith.addf %159, %161 : vector<64x32xf32>
    %163 = vector.extract_strided_slice %156 {offsets = [0, 0], sizes = [64, 8], strides = [1, 1]} : vector<64x32xf32> to vector<64x8xf32>
    %164 = vector.extract_strided_slice %157 {offsets = [0, 0], sizes = [32, 8], strides = [1, 1]} : vector<32x32xf32> to vector<32x8xf32>
    %165 = vector.extract_strided_slice %158 {offsets = [0, 0], sizes = [32, 8], strides = [1, 1]} : vector<32x32xf32> to vector<32x8xf32>
    %cst_90 = arith.constant dense<0.000000e+00> : vector<64x32xf32>
    %166 = tpu.matmul %163, %164, %cst_90 {dimension_numbers = #tpu.dot_dimension_numbers<[1], [1], [0], [0], [0, 0, 1, 0], [], []>} : vector<64x8xf32>, vector<32x8xf32>, vector<64x32xf32> -> vector<64x32xf32>
    %cst_91 = arith.constant 0.353553385 : f32
    %167 = vector.broadcast %cst_91 : f32 to vector<64x32xf32>
    %168 = arith.mulf %166, %167 : vector<64x32xf32>
    %c0_92 = arith.constant 0 : index
    %c0_93 = arith.constant 0 : index
    %c0_94 = arith.constant 0 : index
    %169 = vector.load %arg18[%c0_92, %c0_93, %c0_94] : memref<4x64x32xf32, #tpu.memory_space<vmem>>, vector<1x64x32xf32>
    %170 = vector.shape_cast %169 : vector<1x64x32xf32> to vector<64x32xf32>
    %171 = arith.addf %168, %170 : vector<64x32xf32>
    %cst_95 = arith.constant dense<0xFF800000> : vector<64xf32>
    %172 = vector.multi_reduction <maximumf>, %171, %cst_95 [1] : vector<64x32xf32> to vector<64xf32>
    %173 = vector.shape_cast %172 : vector<64xf32> to vector<64x1xf32>
    %174 = vector.broadcast %173 : vector<64x1xf32> to vector<64x32xf32>
    %175 = arith.subf %171, %174 : vector<64x32xf32>
    %176 = math.exp %175 : vector<64x32xf32>
    %cst_96 = arith.constant dense<0.000000e+00> : vector<64xf32>
    %177 = vector.multi_reduction <add>, %176, %cst_96 [1] : vector<64x32xf32> to vector<64xf32>
    %178 = vector.shape_cast %177 : vector<64xf32> to vector<64x1xf32>
    %179 = tpu.reciprocal %178 {approx = true} : vector<64x1xf32> -> vector<64x1xf32>
    %180 = vector.broadcast %179 : vector<64x1xf32> to vector<64x32xf32>
    %181 = arith.mulf %176, %180 : vector<64x32xf32>
    %cst_97 = arith.constant dense<0.000000e+00> : vector<64x8xf32>
    %182 = tpu.matmul %181, %165, %cst_97 {dimension_numbers = #tpu.dot_dimension_numbers<[1], [0], [0], [1], [0, 0, 1, 1], [], []>} : vector<64x32xf32>, vector<32x8xf32>, vector<64x8xf32> -> vector<64x8xf32>
    %183 = vector.extract_strided_slice %155 {offsets = [0, 0], sizes = [8, 32], strides = [1, 1]} : vector<32x32xf32> to vector<8x32xf32>
    %cst_98 = arith.constant dense<0.000000e+00> : vector<64x32xf32>
    %184 = tpu.matmul %182, %183, %cst_98 {dimension_numbers = #tpu.dot_dimension_numbers<[1], [0], [0], [1], [0, 0, 1, 1], [], []>} : vector<64x8xf32>, vector<8x32xf32>, vector<64x32xf32> -> vector<64x32xf32>
    %185 = arith.addf %162, %184 : vector<64x32xf32>
    %186 = vector.extract_strided_slice %156 {offsets = [0, 8], sizes = [64, 8], strides = [1, 1]} : vector<64x32xf32> to vector<64x8xf32>
    %187 = vector.extract_strided_slice %157 {offsets = [0, 8], sizes = [32, 8], strides = [1, 1]} : vector<32x32xf32> to vector<32x8xf32>
    %188 = vector.extract_strided_slice %158 {offsets = [0, 8], sizes = [32, 8], strides = [1, 1]} : vector<32x32xf32> to vector<32x8xf32>
    %cst_99 = arith.constant dense<0.000000e+00> : vector<64x32xf32>
    %189 = tpu.matmul %186, %187, %cst_99 {dimension_numbers = #tpu.dot_dimension_numbers<[1], [1], [0], [0], [0, 0, 1, 0], [], []>} : vector<64x8xf32>, vector<32x8xf32>, vector<64x32xf32> -> vector<64x32xf32>
    %cst_100 = arith.constant 0.353553385 : f32
    %190 = vector.broadcast %cst_100 : f32 to vector<64x32xf32>
    %191 = arith.mulf %189, %190 : vector<64x32xf32>
    %c1_101 = arith.constant 1 : index
    %c0_102 = arith.constant 0 : index
    %c0_103 = arith.constant 0 : index
    %192 = vector.load %arg18[%c1_101, %c0_102, %c0_103] : memref<4x64x32xf32, #tpu.memory_space<vmem>>, vector<1x64x32xf32>
    %193 = vector.shape_cast %192 : vector<1x64x32xf32> to vector<64x32xf32>
    %194 = arith.addf %191, %193 : vector<64x32xf32>
    %cst_104 = arith.constant dense<0xFF800000> : vector<64xf32>
    %195 = vector.multi_reduction <maximumf>, %194, %cst_104 [1] : vector<64x32xf32> to vector<64xf32>
    %196 = vector.shape_cast %195 : vector<64xf32> to vector<64x1xf32>
    %197 = vector.broadcast %196 : vector<64x1xf32> to vector<64x32xf32>
    %198 = arith.subf %194, %197 : vector<64x32xf32>
    %199 = math.exp %198 : vector<64x32xf32>
    %cst_105 = arith.constant dense<0.000000e+00> : vector<64xf32>
    %200 = vector.multi_reduction <add>, %199, %cst_105 [1] : vector<64x32xf32> to vector<64xf32>
    %201 = vector.shape_cast %200 : vector<64xf32> to vector<64x1xf32>
    %202 = tpu.reciprocal %201 {approx = true} : vector<64x1xf32> -> vector<64x1xf32>
    %203 = vector.broadcast %202 : vector<64x1xf32> to vector<64x32xf32>
    %204 = arith.mulf %199, %203 : vector<64x32xf32>
    %cst_106 = arith.constant dense<0.000000e+00> : vector<64x8xf32>
    %205 = tpu.matmul %204, %188, %cst_106 {dimension_numbers = #tpu.dot_dimension_numbers<[1], [0], [0], [1], [0, 0, 1, 1], [], []>} : vector<64x32xf32>, vector<32x8xf32>, vector<64x8xf32> -> vector<64x8xf32>
    %206 = vector.extract_strided_slice %155 {offsets = [8, 0], sizes = [8, 32], strides = [1, 1]} : vector<32x32xf32> to vector<8x32xf32>
    %cst_107 = arith.constant dense<0.000000e+00> : vector<64x32xf32>
    %207 = tpu.matmul %205, %206, %cst_107 {dimension_numbers = #tpu.dot_dimension_numbers<[1], [0], [0], [1], [0, 0, 1, 1], [], []>} : vector<64x8xf32>, vector<8x32xf32>, vector<64x32xf32> -> vector<64x32xf32>
    %208 = arith.addf %185, %207 : vector<64x32xf32>
    %209 = vector.extract_strided_slice %156 {offsets = [0, 16], sizes = [64, 8], strides = [1, 1]} : vector<64x32xf32> to vector<64x8xf32>
    %210 = vector.extract_strided_slice %157 {offsets = [0, 16], sizes = [32, 8], strides = [1, 1]} : vector<32x32xf32> to vector<32x8xf32>
    %211 = vector.extract_strided_slice %158 {offsets = [0, 16], sizes = [32, 8], strides = [1, 1]} : vector<32x32xf32> to vector<32x8xf32>
    %cst_108 = arith.constant dense<0.000000e+00> : vector<64x32xf32>
    %212 = tpu.matmul %209, %210, %cst_108 {dimension_numbers = #tpu.dot_dimension_numbers<[1], [1], [0], [0], [0, 0, 1, 0], [], []>} : vector<64x8xf32>, vector<32x8xf32>, vector<64x32xf32> -> vector<64x32xf32>
    %cst_109 = arith.constant 0.353553385 : f32
    %213 = vector.broadcast %cst_109 : f32 to vector<64x32xf32>
    %214 = arith.mulf %212, %213 : vector<64x32xf32>
    %c2_110 = arith.constant 2 : index
    %c0_111 = arith.constant 0 : index
    %c0_112 = arith.constant 0 : index
    %215 = vector.load %arg18[%c2_110, %c0_111, %c0_112] : memref<4x64x32xf32, #tpu.memory_space<vmem>>, vector<1x64x32xf32>
    %216 = vector.shape_cast %215 : vector<1x64x32xf32> to vector<64x32xf32>
    %217 = arith.addf %214, %216 : vector<64x32xf32>
    %cst_113 = arith.constant dense<0xFF800000> : vector<64xf32>
    %218 = vector.multi_reduction <maximumf>, %217, %cst_113 [1] : vector<64x32xf32> to vector<64xf32>
    %219 = vector.shape_cast %218 : vector<64xf32> to vector<64x1xf32>
    %220 = vector.broadcast %219 : vector<64x1xf32> to vector<64x32xf32>
    %221 = arith.subf %217, %220 : vector<64x32xf32>
    %222 = math.exp %221 : vector<64x32xf32>
    %cst_114 = arith.constant dense<0.000000e+00> : vector<64xf32>
    %223 = vector.multi_reduction <add>, %222, %cst_114 [1] : vector<64x32xf32> to vector<64xf32>
    %224 = vector.shape_cast %223 : vector<64xf32> to vector<64x1xf32>
    %225 = tpu.reciprocal %224 {approx = true} : vector<64x1xf32> -> vector<64x1xf32>
    %226 = vector.broadcast %225 : vector<64x1xf32> to vector<64x32xf32>
    %227 = arith.mulf %222, %226 : vector<64x32xf32>
    %cst_115 = arith.constant dense<0.000000e+00> : vector<64x8xf32>
    %228 = tpu.matmul %227, %211, %cst_115 {dimension_numbers = #tpu.dot_dimension_numbers<[1], [0], [0], [1], [0, 0, 1, 1], [], []>} : vector<64x32xf32>, vector<32x8xf32>, vector<64x8xf32> -> vector<64x8xf32>
    %229 = vector.extract_strided_slice %155 {offsets = [16, 0], sizes = [8, 32], strides = [1, 1]} : vector<32x32xf32> to vector<8x32xf32>
    %cst_116 = arith.constant dense<0.000000e+00> : vector<64x32xf32>
    %230 = tpu.matmul %228, %229, %cst_116 {dimension_numbers = #tpu.dot_dimension_numbers<[1], [0], [0], [1], [0, 0, 1, 1], [], []>} : vector<64x8xf32>, vector<8x32xf32>, vector<64x32xf32> -> vector<64x32xf32>
    %231 = arith.addf %208, %230 : vector<64x32xf32>
    %232 = vector.extract_strided_slice %156 {offsets = [0, 24], sizes = [64, 8], strides = [1, 1]} : vector<64x32xf32> to vector<64x8xf32>
    %233 = vector.extract_strided_slice %157 {offsets = [0, 24], sizes = [32, 8], strides = [1, 1]} : vector<32x32xf32> to vector<32x8xf32>
    %234 = vector.extract_strided_slice %158 {offsets = [0, 24], sizes = [32, 8], strides = [1, 1]} : vector<32x32xf32> to vector<32x8xf32>
    %cst_117 = arith.constant dense<0.000000e+00> : vector<64x32xf32>
    %235 = tpu.matmul %232, %233, %cst_117 {dimension_numbers = #tpu.dot_dimension_numbers<[1], [1], [0], [0], [0, 0, 1, 0], [], []>} : vector<64x8xf32>, vector<32x8xf32>, vector<64x32xf32> -> vector<64x32xf32>
    %cst_118 = arith.constant 0.353553385 : f32
    %236 = vector.broadcast %cst_118 : f32 to vector<64x32xf32>
    %237 = arith.mulf %235, %236 : vector<64x32xf32>
    %c3_119 = arith.constant 3 : index
    %c0_120 = arith.constant 0 : index
    %c0_121 = arith.constant 0 : index
    %238 = vector.load %arg18[%c3_119, %c0_120, %c0_121] : memref<4x64x32xf32, #tpu.memory_space<vmem>>, vector<1x64x32xf32>
    %239 = vector.shape_cast %238 : vector<1x64x32xf32> to vector<64x32xf32>
    %240 = arith.addf %237, %239 : vector<64x32xf32>
    %cst_122 = arith.constant dense<0xFF800000> : vector<64xf32>
    %241 = vector.multi_reduction <maximumf>, %240, %cst_122 [1] : vector<64x32xf32> to vector<64xf32>
    %242 = vector.shape_cast %241 : vector<64xf32> to vector<64x1xf32>
    %243 = vector.broadcast %242 : vector<64x1xf32> to vector<64x32xf32>
    %244 = arith.subf %240, %243 : vector<64x32xf32>
    %245 = math.exp %244 : vector<64x32xf32>
    %cst_123 = arith.constant dense<0.000000e+00> : vector<64xf32>
    %246 = vector.multi_reduction <add>, %245, %cst_123 [1] : vector<64x32xf32> to vector<64xf32>
    %247 = vector.shape_cast %246 : vector<64xf32> to vector<64x1xf32>
    %248 = tpu.reciprocal %247 {approx = true} : vector<64x1xf32> -> vector<64x1xf32>
    %249 = vector.broadcast %248 : vector<64x1xf32> to vector<64x32xf32>
    %250 = arith.mulf %245, %249 : vector<64x32xf32>
    %cst_124 = arith.constant dense<0.000000e+00> : vector<64x8xf32>
    %251 = tpu.matmul %250, %234, %cst_124 {dimension_numbers = #tpu.dot_dimension_numbers<[1], [0], [0], [1], [0, 0, 1, 1], [], []>} : vector<64x32xf32>, vector<32x8xf32>, vector<64x8xf32> -> vector<64x8xf32>
    %252 = vector.extract_strided_slice %155 {offsets = [24, 0], sizes = [8, 32], strides = [1, 1]} : vector<32x32xf32> to vector<8x32xf32>
    %cst_125 = arith.constant dense<0.000000e+00> : vector<64x32xf32>
    %253 = tpu.matmul %251, %252, %cst_125 {dimension_numbers = #tpu.dot_dimension_numbers<[1], [0], [0], [1], [0, 0, 1, 1], [], []>} : vector<64x8xf32>, vector<8x32xf32>, vector<64x32xf32> -> vector<64x32xf32>
    %254 = arith.addf %231, %253 : vector<64x32xf32>
    %c0_126 = arith.constant 0 : index
    %c0_127 = arith.constant 0 : index
    %255 = vector.load %arg22[%c0_126, %c0_127] : memref<128x32xf32, #tpu.memory_space<vmem>>, vector<64x32xf32>
    tpu.vector_store %arg22[%c0_126, %c0_127], %254 {strides = array<i32>} : memref<128x32xf32, #tpu.memory_space<vmem>>, vector<64x32xf32>,
    %256 = vector.extract_strided_slice %90 {offsets = [64, 0], sizes = [64, 32], strides = [1, 1]} : vector<128x32xf32> to vector<64x32xf32>
    %257 = vector.extract_strided_slice %149 {offsets = [32, 0], sizes = [32, 32], strides = [1, 1]} : vector<64x32xf32> to vector<32x32xf32>
    %258 = vector.extract_strided_slice %154 {offsets = [32, 0], sizes = [32, 32], strides = [1, 1]} : vector<64x32xf32> to vector<32x32xf32>
    %cst_128 = arith.constant 0.000000e+00 : f32
    %259 = vector.broadcast %cst_128 : f32 to vector<64x32xf32>
    %c0_129 = arith.constant 0 : index
    %c0_130 = arith.constant 0 : index
    %260 = vector.load %arg20[%c0_129, %c0_130] : memref<1x32xf32, #tpu.memory_space<vmem>>, vector<1x32xf32>
    %261 = vector.broadcast %260 : vector<1x32xf32> to vector<64x32xf32>
    %262 = arith.addf %259, %261 : vector<64x32xf32>
    %263 = vector.extract_strided_slice %256 {offsets = [0, 0], sizes = [64, 8], strides = [1, 1]} : vector<64x32xf32> to vector<64x8xf32>
    %264 = vector.extract_strided_slice %257 {offsets = [0, 0], sizes = [32, 8], strides = [1, 1]} : vector<32x32xf32> to vector<32x8xf32>
    %265 = vector.extract_strided_slice %258 {offsets = [0, 0], sizes = [32, 8], strides = [1, 1]} : vector<32x32xf32> to vector<32x8xf32>
    %cst_131 = arith.constant dense<0.000000e+00> : vector<64x32xf32>
    %266 = tpu.matmul %263, %264, %cst_131 {dimension_numbers = #tpu.dot_dimension_numbers<[1], [1], [0], [0], [0, 0, 1, 0], [], []>} : vector<64x8xf32>, vector<32x8xf32>, vector<64x32xf32> -> vector<64x32xf32>
    %cst_132 = arith.constant 0.353553385 : f32
    %267 = vector.broadcast %cst_132 : f32 to vector<64x32xf32>
    %268 = arith.mulf %266, %267 : vector<64x32xf32>
    %c0_133 = arith.constant 0 : index
    %c0_134 = arith.constant 0 : index
    %c0_135 = arith.constant 0 : index
    %269 = vector.load %arg18[%c0_133, %c0_134, %c0_135] : memref<4x64x32xf32, #tpu.memory_space<vmem>>, vector<1x64x32xf32>
    %270 = vector.shape_cast %269 : vector<1x64x32xf32> to vector<64x32xf32>
    %271 = arith.addf %268, %270 : vector<64x32xf32>
    %cst_136 = arith.constant dense<0xFF800000> : vector<64xf32>
    %272 = vector.multi_reduction <maximumf>, %271, %cst_136 [1] : vector<64x32xf32> to vector<64xf32>
    %273 = vector.shape_cast %272 : vector<64xf32> to vector<64x1xf32>
    %274 = vector.broadcast %273 : vector<64x1xf32> to vector<64x32xf32>
    %275 = arith.subf %271, %274 : vector<64x32xf32>
    %276 = math.exp %275 : vector<64x32xf32>
    %cst_137 = arith.constant dense<0.000000e+00> : vector<64xf32>
    %277 = vector.multi_reduction <add>, %276, %cst_137 [1] : vector<64x32xf32> to vector<64xf32>
    %278 = vector.shape_cast %277 : vector<64xf32> to vector<64x1xf32>
    %279 = tpu.reciprocal %278 {approx = true} : vector<64x1xf32> -> vector<64x1xf32>
    %280 = vector.broadcast %279 : vector<64x1xf32> to vector<64x32xf32>
    %281 = arith.mulf %276, %280 : vector<64x32xf32>
    %cst_138 = arith.constant dense<0.000000e+00> : vector<64x8xf32>
    %282 = tpu.matmul %281, %265, %cst_138 {dimension_numbers = #tpu.dot_dimension_numbers<[1], [0], [0], [1], [0, 0, 1, 1], [], []>} : vector<64x32xf32>, vector<32x8xf32>, vector<64x8xf32> -> vector<64x8xf32>
    %283 = vector.extract_strided_slice %155 {offsets = [0, 0], sizes = [8, 32], strides = [1, 1]} : vector<32x32xf32> to vector<8x32xf32>
    %cst_139 = arith.constant dense<0.000000e+00> : vector<64x32xf32>
    %284 = tpu.matmul %282, %283, %cst_139 {dimension_numbers = #tpu.dot_dimension_numbers<[1], [0], [0], [1], [0, 0, 1, 1], [], []>} : vector<64x8xf32>, vector<8x32xf32>, vector<64x32xf32> -> vector<64x32xf32>
    %285 = arith.addf %262, %284 : vector<64x32xf32>
    %286 = vector.extract_strided_slice %256 {offsets = [0, 8], sizes = [64, 8], strides = [1, 1]} : vector<64x32xf32> to vector<64x8xf32>
    %287 = vector.extract_strided_slice %257 {offsets = [0, 8], sizes = [32, 8], strides = [1, 1]} : vector<32x32xf32> to vector<32x8xf32>
    %288 = vector.extract_strided_slice %258 {offsets = [0, 8], sizes = [32, 8], strides = [1, 1]} : vector<32x32xf32> to vector<32x8xf32>
    %cst_140 = arith.constant dense<0.000000e+00> : vector<64x32xf32>
    %289 = tpu.matmul %286, %287, %cst_140 {dimension_numbers = #tpu.dot_dimension_numbers<[1], [1], [0], [0], [0, 0, 1, 0], [], []>} : vector<64x8xf32>, vector<32x8xf32>, vector<64x32xf32> -> vector<64x32xf32>
    %cst_141 = arith.constant 0.353553385 : f32
    %290 = vector.broadcast %cst_141 : f32 to vector<64x32xf32>
    %291 = arith.mulf %289, %290 : vector<64x32xf32>
    %c1_142 = arith.constant 1 : index
    %c0_143 = arith.constant 0 : index
    %c0_144 = arith.constant 0 : index
    %292 = vector.load %arg18[%c1_142, %c0_143, %c0_144] : memref<4x64x32xf32, #tpu.memory_space<vmem>>, vector<1x64x32xf32>
    %293 = vector.shape_cast %292 : vector<1x64x32xf32> to vector<64x32xf32>
    %294 = arith.addf %291, %293 : vector<64x32xf32>
    %cst_145 = arith.constant dense<0xFF800000> : vector<64xf32>
    %295 = vector.multi_reduction <maximumf>, %294, %cst_145 [1] : vector<64x32xf32> to vector<64xf32>
    %296 = vector.shape_cast %295 : vector<64xf32> to vector<64x1xf32>
    %297 = vector.broadcast %296 : vector<64x1xf32> to vector<64x32xf32>
    %298 = arith.subf %294, %297 : vector<64x32xf32>
    %299 = math.exp %298 : vector<64x32xf32>
    %cst_146 = arith.constant dense<0.000000e+00> : vector<64xf32>
    %300 = vector.multi_reduction <add>, %299, %cst_146 [1] : vector<64x32xf32> to vector<64xf32>
    %301 = vector.shape_cast %300 : vector<64xf32> to vector<64x1xf32>
    %302 = tpu.reciprocal %301 {approx = true} : vector<64x1xf32> -> vector<64x1xf32>
    %303 = vector.broadcast %302 : vector<64x1xf32> to vector<64x32xf32>
    %304 = arith.mulf %299, %303 : vector<64x32xf32>
    %cst_147 = arith.constant dense<0.000000e+00> : vector<64x8xf32>
    %305 = tpu.matmul %304, %288, %cst_147 {dimension_numbers = #tpu.dot_dimension_numbers<[1], [0], [0], [1], [0, 0, 1, 1], [], []>} : vector<64x32xf32>, vector<32x8xf32>, vector<64x8xf32> -> vector<64x8xf32>
    %306 = vector.extract_strided_slice %155 {offsets = [8, 0], sizes = [8, 32], strides = [1, 1]} : vector<32x32xf32> to vector<8x32xf32>
    %cst_148 = arith.constant dense<0.000000e+00> : vector<64x32xf32>
    %307 = tpu.matmul %305, %306, %cst_148 {dimension_numbers = #tpu.dot_dimension_numbers<[1], [0], [0], [1], [0, 0, 1, 1], [], []>} : vector<64x8xf32>, vector<8x32xf32>, vector<64x32xf32> -> vector<64x32xf32>
    %308 = arith.addf %285, %307 : vector<64x32xf32>
    %309 = vector.extract_strided_slice %256 {offsets = [0, 16], sizes = [64, 8], strides = [1, 1]} : vector<64x32xf32> to vector<64x8xf32>
    %310 = vector.extract_strided_slice %257 {offsets = [0, 16], sizes = [32, 8], strides = [1, 1]} : vector<32x32xf32> to vector<32x8xf32>
    %311 = vector.extract_strided_slice %258 {offsets = [0, 16], sizes = [32, 8], strides = [1, 1]} : vector<32x32xf32> to vector<32x8xf32>
    %cst_149 = arith.constant dense<0.000000e+00> : vector<64x32xf32>
    %312 = tpu.matmul %309, %310, %cst_149 {dimension_numbers = #tpu.dot_dimension_numbers<[1], [1], [0], [0], [0, 0, 1, 0], [], []>} : vector<64x8xf32>, vector<32x8xf32>, vector<64x32xf32> -> vector<64x32xf32>
    %cst_150 = arith.constant 0.353553385 : f32
    %313 = vector.broadcast %cst_150 : f32 to vector<64x32xf32>
    %314 = arith.mulf %312, %313 : vector<64x32xf32>
    %c2_151 = arith.constant 2 : index
    %c0_152 = arith.constant 0 : index
    %c0_153 = arith.constant 0 : index
    %315 = vector.load %arg18[%c2_151, %c0_152, %c0_153] : memref<4x64x32xf32, #tpu.memory_space<vmem>>, vector<1x64x32xf32>
    %316 = vector.shape_cast %315 : vector<1x64x32xf32> to vector<64x32xf32>
    %317 = arith.addf %314, %316 : vector<64x32xf32>
    %cst_154 = arith.constant dense<0xFF800000> : vector<64xf32>
    %318 = vector.multi_reduction <maximumf>, %317, %cst_154 [1] : vector<64x32xf32> to vector<64xf32>
    %319 = vector.shape_cast %318 : vector<64xf32> to vector<64x1xf32>
    %320 = vector.broadcast %319 : vector<64x1xf32> to vector<64x32xf32>
    %321 = arith.subf %317, %320 : vector<64x32xf32>
    %322 = math.exp %321 : vector<64x32xf32>
    %cst_155 = arith.constant dense<0.000000e+00> : vector<64xf32>
    %323 = vector.multi_reduction <add>, %322, %cst_155 [1] : vector<64x32xf32> to vector<64xf32>
    %324 = vector.shape_cast %323 : vector<64xf32> to vector<64x1xf32>
    %325 = tpu.reciprocal %324 {approx = true} : vector<64x1xf32> -> vector<64x1xf32>
    %326 = vector.broadcast %325 : vector<64x1xf32> to vector<64x32xf32>
    %327 = arith.mulf %322, %326 : vector<64x32xf32>
    %cst_156 = arith.constant dense<0.000000e+00> : vector<64x8xf32>
    %328 = tpu.matmul %327, %311, %cst_156 {dimension_numbers = #tpu.dot_dimension_numbers<[1], [0], [0], [1], [0, 0, 1, 1], [], []>} : vector<64x32xf32>, vector<32x8xf32>, vector<64x8xf32> -> vector<64x8xf32>
    %329 = vector.extract_strided_slice %155 {offsets = [16, 0], sizes = [8, 32], strides = [1, 1]} : vector<32x32xf32> to vector<8x32xf32>
    %cst_157 = arith.constant dense<0.000000e+00> : vector<64x32xf32>
    %330 = tpu.matmul %328, %329, %cst_157 {dimension_numbers = #tpu.dot_dimension_numbers<[1], [0], [0], [1], [0, 0, 1, 1], [], []>} : vector<64x8xf32>, vector<8x32xf32>, vector<64x32xf32> -> vector<64x32xf32>
    %331 = arith.addf %308, %330 : vector<64x32xf32>
    %332 = vector.extract_strided_slice %256 {offsets = [0, 24], sizes = [64, 8], strides = [1, 1]} : vector<64x32xf32> to vector<64x8xf32>
    %333 = vector.extract_strided_slice %257 {offsets = [0, 24], sizes = [32, 8], strides = [1, 1]} : vector<32x32xf32> to vector<32x8xf32>
    %334 = vector.extract_strided_slice %258 {offsets = [0, 24], sizes = [32, 8], strides = [1, 1]} : vector<32x32xf32> to vector<32x8xf32>
    %cst_158 = arith.constant dense<0.000000e+00> : vector<64x32xf32>
    %335 = tpu.matmul %332, %333, %cst_158 {dimension_numbers = #tpu.dot_dimension_numbers<[1], [1], [0], [0], [0, 0, 1, 0], [], []>} : vector<64x8xf32>, vector<32x8xf32>, vector<64x32xf32> -> vector<64x32xf32>
    %cst_159 = arith.constant 0.353553385 : f32
    %336 = vector.broadcast %cst_159 : f32 to vector<64x32xf32>
    %337 = arith.mulf %335, %336 : vector<64x32xf32>
    %c3_160 = arith.constant 3 : index
    %c0_161 = arith.constant 0 : index
    %c0_162 = arith.constant 0 : index
    %338 = vector.load %arg18[%c3_160, %c0_161, %c0_162] : memref<4x64x32xf32, #tpu.memory_space<vmem>>, vector<1x64x32xf32>
    %339 = vector.shape_cast %338 : vector<1x64x32xf32> to vector<64x32xf32>
    %340 = arith.addf %337, %339 : vector<64x32xf32>
    %cst_163 = arith.constant dense<0xFF800000> : vector<64xf32>
    %341 = vector.multi_reduction <maximumf>, %340, %cst_163 [1] : vector<64x32xf32> to vector<64xf32>
    %342 = vector.shape_cast %341 : vector<64xf32> to vector<64x1xf32>
    %343 = vector.broadcast %342 : vector<64x1xf32> to vector<64x32xf32>
    %344 = arith.subf %340, %343 : vector<64x32xf32>
    %345 = math.exp %344 : vector<64x32xf32>
    %cst_164 = arith.constant dense<0.000000e+00> : vector<64xf32>
    %346 = vector.multi_reduction <add>, %345, %cst_164 [1] : vector<64x32xf32> to vector<64xf32>
    %347 = vector.shape_cast %346 : vector<64xf32> to vector<64x1xf32>
    %348 = tpu.reciprocal %347 {approx = true} : vector<64x1xf32> -> vector<64x1xf32>
    %349 = vector.broadcast %348 : vector<64x1xf32> to vector<64x32xf32>
    %350 = arith.mulf %345, %349 : vector<64x32xf32>
    %cst_165 = arith.constant dense<0.000000e+00> : vector<64x8xf32>
    %351 = tpu.matmul %350, %334, %cst_165 {dimension_numbers = #tpu.dot_dimension_numbers<[1], [0], [0], [1], [0, 0, 1, 1], [], []>} : vector<64x32xf32>, vector<32x8xf32>, vector<64x8xf32> -> vector<64x8xf32>
    %352 = vector.extract_strided_slice %155 {offsets = [24, 0], sizes = [8, 32], strides = [1, 1]} : vector<32x32xf32> to vector<8x32xf32>
    %cst_166 = arith.constant dense<0.000000e+00> : vector<64x32xf32>
    %353 = tpu.matmul %351, %352, %cst_166 {dimension_numbers = #tpu.dot_dimension_numbers<[1], [0], [0], [1], [0, 0, 1, 1], [], []>} : vector<64x8xf32>, vector<8x32xf32>, vector<64x32xf32> -> vector<64x32xf32>
    %354 = arith.addf %331, %353 : vector<64x32xf32>
    %c64 = arith.constant 64 : index
    %c0_167 = arith.constant 0 : index
    %355 = vector.load %arg22[%c64, %c0_167] : memref<128x32xf32, #tpu.memory_space<vmem>>, vector<64x32xf32>
    tpu.vector_store %arg22[%c64, %c0_167], %354 {strides = array<i32>} : memref<128x32xf32, #tpu.memory_space<vmem>>, vector<64x32xf32>,
    return
  }
}

module attributes {stable_mosaic.version = 11 : i64} {
  func.func @_ln2_irffn_kernel(%arg0: memref<128x32xf32, #tpu.memory_space<vmem>>, %arg1: memref<128x32xf32, #tpu.memory_space<vmem>>, %arg2: memref<9x128x128xf32, #tpu.memory_space<vmem>>, %arg3: memref<128x128xf32, #tpu.memory_space<vmem>>, %arg4: memref<128x1xf32, #tpu.memory_space<vmem>>, %arg5: memref<128x1xf32, #tpu.memory_space<vmem>>, %arg6: memref<32x64xf32, #tpu.memory_space<vmem>>, %arg7: memref<1x64xf32, #tpu.memory_space<vmem>>, %arg8: memref<1x64xf32, #tpu.memory_space<vmem>>, %arg9: memref<1x64xf32, #tpu.memory_space<vmem>>, %arg10: memref<9x64xf32, #tpu.memory_space<vmem>>, %arg11: memref<1x64xf32, #tpu.memory_space<vmem>>, %arg12: memref<1x64xf32, #tpu.memory_space<vmem>>, %arg13: memref<1x64xf32, #tpu.memory_space<vmem>>, %arg14: memref<64x32xf32, #tpu.memory_space<vmem>>, %arg15: memref<1x32xf32, #tpu.memory_space<vmem>>, %arg16: memref<1x32xf32, #tpu.memory_space<vmem>>, %arg17: memref<1x32xf32, #tpu.memory_space<vmem>>, %arg18: memref<128x32xf32, #tpu.memory_space<vmem>>) attributes {dimension_semantics = [], scalar_prefetch = 0 : i64, scratch_operands = 0 : i64, tpu.core_type = #tpu.core_type<tc>} {
    %c0 = arith.constant 0 : index
    %c0_0 = arith.constant 0 : index
    %0 = vector.load %arg0[%c0, %c0_0] : memref<128x32xf32, #tpu.memory_space<vmem>>, vector<128x32xf32>
    %c0_1 = arith.constant 0 : index
    %c0_2 = arith.constant 0 : index
    %1 = vector.load %arg1[%c0_1, %c0_2] : memref<128x32xf32, #tpu.memory_space<vmem>>, vector<128x32xf32>
    %2 = arith.addf %0, %1 : vector<128x32xf32>
    %c0_3 = arith.constant 0 : index
    %c0_4 = arith.constant 0 : index
    %3 = vector.load %arg3[%c0_3, %c0_4] : memref<128x128xf32, #tpu.memory_space<vmem>>, vector<128x128xf32>
    %c0_5 = arith.constant 0 : index
    %c0_6 = arith.constant 0 : index
    %4 = vector.load %arg4[%c0_5, %c0_6] : memref<128x1xf32, #tpu.memory_space<vmem>>, vector<128x1xf32>
    %c0_7 = arith.constant 0 : index
    %c0_8 = arith.constant 0 : index
    %5 = vector.load %arg5[%c0_7, %c0_8] : memref<128x1xf32, #tpu.memory_space<vmem>>, vector<128x1xf32>
    %cst = arith.constant dense<0.000000e+00> : vector<128x32xf32>
    %6 = tpu.matmul %3, %2, %cst {dimension_numbers = #tpu.dot_dimension_numbers<[1], [0], [0], [1], [0, 0, 1, 1], [], []>} : vector<128x128xf32>, vector<128x32xf32>, vector<128x32xf32> -> vector<128x32xf32>
    %7 = arith.subf %2, %6 : vector<128x32xf32>
    %8 = arith.mulf %7, %7 : vector<128x32xf32>
    %cst_9 = arith.constant dense<0.000000e+00> : vector<128x32xf32>
    %9 = tpu.matmul %3, %8, %cst_9 {dimension_numbers = #tpu.dot_dimension_numbers<[1], [0], [0], [1], [0, 0, 1, 1], [], []>} : vector<128x128xf32>, vector<128x32xf32>, vector<128x32xf32> -> vector<128x32xf32>
    %cst_10 = arith.constant 9.99999974E-6 : f32
    %10 = vector.broadcast %cst_10 : f32 to vector<128x32xf32>
    %11 = arith.addf %9, %10 : vector<128x32xf32>
    %12 = math.rsqrt %11 : vector<128x32xf32>
    %13 = arith.mulf %7, %12 : vector<128x32xf32>
    %14 = vector.broadcast %4 : vector<128x1xf32> to vector<128x32xf32>
    %15 = arith.mulf %13, %14 : vector<128x32xf32>
    %16 = vector.broadcast %5 : vector<128x1xf32> to vector<128x32xf32>
    %17 = arith.addf %15, %16 : vector<128x32xf32>
    %c0_11 = arith.constant 0 : index
    %c0_12 = arith.constant 0 : index
    %18 = vector.load %arg6[%c0_11, %c0_12] : memref<32x64xf32, #tpu.memory_space<vmem>>, vector<32x64xf32>
    %cst_13 = arith.constant dense<0.000000e+00> : vector<128x64xf32>
    %19 = tpu.matmul %17, %18, %cst_13 {dimension_numbers = #tpu.dot_dimension_numbers<[1], [0], [0], [1], [0, 0, 1, 1], [], []>} : vector<128x32xf32>, vector<32x64xf32>, vector<128x64xf32> -> vector<128x64xf32>
    %c0_14 = arith.constant 0 : index
    %c0_15 = arith.constant 0 : index
    %20 = vector.load %arg7[%c0_14, %c0_15] : memref<1x64xf32, #tpu.memory_space<vmem>>, vector<1x64xf32>
    %21 = vector.broadcast %20 : vector<1x64xf32> to vector<128x64xf32>
    %22 = arith.addf %19, %21 : vector<128x64xf32>
    %cst_16 = arith.constant 0.707106769 : f32
    %23 = vector.broadcast %cst_16 : f32 to vector<128x64xf32>
    %24 = arith.mulf %22, %23 : vector<128x64xf32>
    %25 = math.absf %24 : vector<128x64xf32>
    %cst_17 = arith.constant 0.327591091 : f32
    %26 = vector.broadcast %cst_17 : f32 to vector<128x64xf32>
    %27 = arith.mulf %26, %25 : vector<128x64xf32>
    %cst_18 = arith.constant 1.000000e+00 : f32
    %28 = vector.broadcast %cst_18 : f32 to vector<128x64xf32>
    %29 = arith.addf %28, %27 : vector<128x64xf32>
    %cst_19 = arith.constant 1.000000e+00 : f32
    %30 = vector.broadcast %cst_19 : f32 to vector<128x64xf32>
    %31 = arith.divf %30, %29 : vector<128x64xf32>
    %cst_20 = arith.constant 1.06140542 : f32
    %32 = vector.broadcast %cst_20 : f32 to vector<128x64xf32>
    %33 = arith.mulf %31, %32 : vector<128x64xf32>
    %cst_21 = arith.constant -1.45315206 : f32
    %34 = vector.broadcast %cst_21 : f32 to vector<128x64xf32>
    %35 = arith.addf %34, %33 : vector<128x64xf32>
    %36 = arith.mulf %31, %35 : vector<128x64xf32>
    %cst_22 = arith.constant 1.42141378 : f32
    %37 = vector.broadcast %cst_22 : f32 to vector<128x64xf32>
    %38 = arith.addf %37, %36 : vector<128x64xf32>
    %39 = arith.mulf %31, %38 : vector<128x64xf32>
    %cst_23 = arith.constant -0.284496725 : f32
    %40 = vector.broadcast %cst_23 : f32 to vector<128x64xf32>
    %41 = arith.addf %40, %39 : vector<128x64xf32>
    %42 = arith.mulf %31, %41 : vector<128x64xf32>
    %cst_24 = arith.constant 0.254829586 : f32
    %43 = vector.broadcast %cst_24 : f32 to vector<128x64xf32>
    %44 = arith.addf %43, %42 : vector<128x64xf32>
    %45 = arith.mulf %31, %44 : vector<128x64xf32>
    %cst_25 = arith.constant 0.000000e+00 : f32
    %46 = vector.broadcast %cst_25 : f32 to vector<128x64xf32>
    %47 = arith.subf %46, %25 : vector<128x64xf32>
    %48 = arith.mulf %47, %25 : vector<128x64xf32>
    %49 = math.exp %48 : vector<128x64xf32>
    %50 = arith.mulf %45, %49 : vector<128x64xf32>
    %cst_26 = arith.constant 1.000000e+00 : f32
    %51 = vector.broadcast %cst_26 : f32 to vector<128x64xf32>
    %52 = arith.subf %51, %50 : vector<128x64xf32>
    %cst_27 = arith.constant 0.000000e+00 : f32
    %53 = vector.broadcast %cst_27 : f32 to vector<128x64xf32>
    %54 = arith.cmpf oge, %24, %53 : vector<128x64xf32>
    %cst_28 = arith.constant 0.000000e+00 : f32
    %55 = vector.broadcast %cst_28 : f32 to vector<128x64xf32>
    %56 = arith.subf %55, %52 : vector<128x64xf32>
    %57 = arith.select %54, %52, %56 : vector<128x64xi1>, vector<128x64xf32>
    %cst_29 = arith.constant 5.000000e-01 : f32
    %58 = vector.broadcast %cst_29 : f32 to vector<128x64xf32>
    %59 = arith.mulf %58, %22 : vector<128x64xf32>
    %cst_30 = arith.constant 1.000000e+00 : f32
    %60 = vector.broadcast %cst_30 : f32 to vector<128x64xf32>
    %61 = arith.addf %60, %57 : vector<128x64xf32>
    %62 = arith.mulf %59, %61 : vector<128x64xf32>
    %c0_31 = arith.constant 0 : index
    %c0_32 = arith.constant 0 : index
    %63 = vector.load %arg8[%c0_31, %c0_32] : memref<1x64xf32, #tpu.memory_space<vmem>>, vector<1x64xf32>
    %c0_33 = arith.constant 0 : index
    %c0_34 = arith.constant 0 : index
    %64 = vector.load %arg9[%c0_33, %c0_34] : memref<1x64xf32, #tpu.memory_space<vmem>>, vector<1x64xf32>
    %cst_35 = arith.constant dense<0.000000e+00> : vector<64xf32>
    %65 = vector.multi_reduction <add>, %62, %cst_35 [0] : vector<128x64xf32> to vector<64xf32>
    %66 = vector.shape_cast %65 : vector<64xf32> to vector<1x64xf32>
    %cst_36 = arith.constant 1.280000e+02 : f32
    %67 = vector.broadcast %cst_36 : f32 to vector<1x64xf32>
    %68 = arith.divf %66, %67 : vector<1x64xf32>
    %69 = vector.broadcast %68 : vector<1x64xf32> to vector<128x64xf32>
    %70 = arith.subf %62, %69 : vector<128x64xf32>
    %71 = arith.mulf %70, %70 : vector<128x64xf32>
    %cst_37 = arith.constant dense<0.000000e+00> : vector<64xf32>
    %72 = vector.multi_reduction <add>, %71, %cst_37 [0] : vector<128x64xf32> to vector<64xf32>
    %73 = vector.shape_cast %72 : vector<64xf32> to vector<1x64xf32>
    %cst_38 = arith.constant 1.280000e+02 : f32
    %74 = vector.broadcast %cst_38 : f32 to vector<1x64xf32>
    %75 = arith.divf %73, %74 : vector<1x64xf32>
    %cst_39 = arith.constant 9.99999974E-6 : f32
    %76 = vector.broadcast %cst_39 : f32 to vector<1x64xf32>
    %77 = arith.addf %75, %76 : vector<1x64xf32>
    %78 = math.rsqrt %77 : vector<1x64xf32>
    %79 = vector.broadcast %78 : vector<1x64xf32> to vector<128x64xf32>
    %80 = arith.mulf %70, %79 : vector<128x64xf32>
    %81 = vector.broadcast %63 : vector<1x64xf32> to vector<128x64xf32>
    %82 = arith.mulf %80, %81 : vector<128x64xf32>
    %83 = vector.broadcast %64 : vector<1x64xf32> to vector<128x64xf32>
    %84 = arith.addf %82, %83 : vector<128x64xf32>
    %c0_40 = arith.constant 0 : index
    %c0_41 = arith.constant 0 : index
    %85 = vector.load %arg10[%c0_40, %c0_41] : memref<9x64xf32, #tpu.memory_space<vmem>>, vector<9x64xf32>
    %cst_42 = arith.constant 0.000000e+00 : f32
    %86 = vector.broadcast %cst_42 : f32 to vector<128x64xf32>
    %c0_43 = arith.constant 0 : index
    %c0_44 = arith.constant 0 : index
    %87 = vector.load %arg11[%c0_43, %c0_44] : memref<1x64xf32, #tpu.memory_space<vmem>>, vector<1x64xf32>
    %88 = vector.broadcast %87 : vector<1x64xf32> to vector<128x64xf32>
    %89 = arith.addf %86, %88 : vector<128x64xf32>
    %c0_45 = arith.constant 0 : index
    %c0_46 = arith.constant 0 : index
    %c0_47 = arith.constant 0 : index
    %90 = vector.load %arg2[%c0_45, %c0_46, %c0_47] : memref<9x128x128xf32, #tpu.memory_space<vmem>>, vector<1x128x128xf32>
    %91 = vector.shape_cast %90 : vector<1x128x128xf32> to vector<128x128xf32>
    %cst_48 = arith.constant dense<0.000000e+00> : vector<128x64xf32>
    %92 = tpu.matmul %91, %84, %cst_48 {dimension_numbers = #tpu.dot_dimension_numbers<[1], [0], [0], [1], [0, 0, 1, 1], [], []>} : vector<128x128xf32>, vector<128x64xf32>, vector<128x64xf32> -> vector<128x64xf32>
    %93 = vector.extract_strided_slice %85 {offsets = [0, 0], sizes = [1, 64], strides = [1, 1]} : vector<9x64xf32> to vector<1x64xf32>
    %94 = vector.broadcast %93 : vector<1x64xf32> to vector<128x64xf32>
    %95 = arith.mulf %92, %94 : vector<128x64xf32>
    %96 = arith.addf %89, %95 : vector<128x64xf32>
    %c1 = arith.constant 1 : index
    %c0_49 = arith.constant 0 : index
    %c0_50 = arith.constant 0 : index
    %97 = vector.load %arg2[%c1, %c0_49, %c0_50] : memref<9x128x128xf32, #tpu.memory_space<vmem>>, vector<1x128x128xf32>
    %98 = vector.shape_cast %97 : vector<1x128x128xf32> to vector<128x128xf32>
    %cst_51 = arith.constant dense<0.000000e+00> : vector<128x64xf32>
    %99 = tpu.matmul %98, %84, %cst_51 {dimension_numbers = #tpu.dot_dimension_numbers<[1], [0], [0], [1], [0, 0, 1, 1], [], []>} : vector<128x128xf32>, vector<128x64xf32>, vector<128x64xf32> -> vector<128x64xf32>
    %100 = vector.extract_strided_slice %85 {offsets = [1, 0], sizes = [1, 64], strides = [1, 1]} : vector<9x64xf32> to vector<1x64xf32>
    %101 = vector.broadcast %100 : vector<1x64xf32> to vector<128x64xf32>
    %102 = arith.mulf %99, %101 : vector<128x64xf32>
    %103 = arith.addf %96, %102 : vector<128x64xf32>
    %c2 = arith.constant 2 : index
    %c0_52 = arith.constant 0 : index
    %c0_53 = arith.constant 0 : index
    %104 = vector.load %arg2[%c2, %c0_52, %c0_53] : memref<9x128x128xf32, #tpu.memory_space<vmem>>, vector<1x128x128xf32>
    %105 = vector.shape_cast %104 : vector<1x128x128xf32> to vector<128x128xf32>
    %cst_54 = arith.constant dense<0.000000e+00> : vector<128x64xf32>
    %106 = tpu.matmul %105, %84, %cst_54 {dimension_numbers = #tpu.dot_dimension_numbers<[1], [0], [0], [1], [0, 0, 1, 1], [], []>} : vector<128x128xf32>, vector<128x64xf32>, vector<128x64xf32> -> vector<128x64xf32>
    %107 = vector.extract_strided_slice %85 {offsets = [2, 0], sizes = [1, 64], strides = [1, 1]} : vector<9x64xf32> to vector<1x64xf32>
    %108 = vector.broadcast %107 : vector<1x64xf32> to vector<128x64xf32>
    %109 = arith.mulf %106, %108 : vector<128x64xf32>
    %110 = arith.addf %103, %109 : vector<128x64xf32>
    %c3 = arith.constant 3 : index
    %c0_55 = arith.constant 0 : index
    %c0_56 = arith.constant 0 : index
    %111 = vector.load %arg2[%c3, %c0_55, %c0_56] : memref<9x128x128xf32, #tpu.memory_space<vmem>>, vector<1x128x128xf32>
    %112 = vector.shape_cast %111 : vector<1x128x128xf32> to vector<128x128xf32>
    %cst_57 = arith.constant dense<0.000000e+00> : vector<128x64xf32>
    %113 = tpu.matmul %112, %84, %cst_57 {dimension_numbers = #tpu.dot_dimension_numbers<[1], [0], [0], [1], [0, 0, 1, 1], [], []>} : vector<128x128xf32>, vector<128x64xf32>, vector<128x64xf32> -> vector<128x64xf32>
    %114 = vector.extract_strided_slice %85 {offsets = [3, 0], sizes = [1, 64], strides = [1, 1]} : vector<9x64xf32> to vector<1x64xf32>
    %115 = vector.broadcast %114 : vector<1x64xf32> to vector<128x64xf32>
    %116 = arith.mulf %113, %115 : vector<128x64xf32>
    %117 = arith.addf %110, %116 : vector<128x64xf32>
    %c4 = arith.constant 4 : index
    %c0_58 = arith.constant 0 : index
    %c0_59 = arith.constant 0 : index
    %118 = vector.load %arg2[%c4, %c0_58, %c0_59] : memref<9x128x128xf32, #tpu.memory_space<vmem>>, vector<1x128x128xf32>
    %119 = vector.shape_cast %118 : vector<1x128x128xf32> to vector<128x128xf32>
    %cst_60 = arith.constant dense<0.000000e+00> : vector<128x64xf32>
    %120 = tpu.matmul %119, %84, %cst_60 {dimension_numbers = #tpu.dot_dimension_numbers<[1], [0], [0], [1], [0, 0, 1, 1], [], []>} : vector<128x128xf32>, vector<128x64xf32>, vector<128x64xf32> -> vector<128x64xf32>
    %121 = vector.extract_strided_slice %85 {offsets = [4, 0], sizes = [1, 64], strides = [1, 1]} : vector<9x64xf32> to vector<1x64xf32>
    %122 = vector.broadcast %121 : vector<1x64xf32> to vector<128x64xf32>
    %123 = arith.mulf %120, %122 : vector<128x64xf32>
    %124 = arith.addf %117, %123 : vector<128x64xf32>
    %c5 = arith.constant 5 : index
    %c0_61 = arith.constant 0 : index
    %c0_62 = arith.constant 0 : index
    %125 = vector.load %arg2[%c5, %c0_61, %c0_62] : memref<9x128x128xf32, #tpu.memory_space<vmem>>, vector<1x128x128xf32>
    %126 = vector.shape_cast %125 : vector<1x128x128xf32> to vector<128x128xf32>
    %cst_63 = arith.constant dense<0.000000e+00> : vector<128x64xf32>
    %127 = tpu.matmul %126, %84, %cst_63 {dimension_numbers = #tpu.dot_dimension_numbers<[1], [0], [0], [1], [0, 0, 1, 1], [], []>} : vector<128x128xf32>, vector<128x64xf32>, vector<128x64xf32> -> vector<128x64xf32>
    %128 = vector.extract_strided_slice %85 {offsets = [5, 0], sizes = [1, 64], strides = [1, 1]} : vector<9x64xf32> to vector<1x64xf32>
    %129 = vector.broadcast %128 : vector<1x64xf32> to vector<128x64xf32>
    %130 = arith.mulf %127, %129 : vector<128x64xf32>
    %131 = arith.addf %124, %130 : vector<128x64xf32>
    %c6 = arith.constant 6 : index
    %c0_64 = arith.constant 0 : index
    %c0_65 = arith.constant 0 : index
    %132 = vector.load %arg2[%c6, %c0_64, %c0_65] : memref<9x128x128xf32, #tpu.memory_space<vmem>>, vector<1x128x128xf32>
    %133 = vector.shape_cast %132 : vector<1x128x128xf32> to vector<128x128xf32>
    %cst_66 = arith.constant dense<0.000000e+00> : vector<128x64xf32>
    %134 = tpu.matmul %133, %84, %cst_66 {dimension_numbers = #tpu.dot_dimension_numbers<[1], [0], [0], [1], [0, 0, 1, 1], [], []>} : vector<128x128xf32>, vector<128x64xf32>, vector<128x64xf32> -> vector<128x64xf32>
    %135 = vector.extract_strided_slice %85 {offsets = [6, 0], sizes = [1, 64], strides = [1, 1]} : vector<9x64xf32> to vector<1x64xf32>
    %136 = vector.broadcast %135 : vector<1x64xf32> to vector<128x64xf32>
    %137 = arith.mulf %134, %136 : vector<128x64xf32>
    %138 = arith.addf %131, %137 : vector<128x64xf32>
    %c7 = arith.constant 7 : index
    %c0_67 = arith.constant 0 : index
    %c0_68 = arith.constant 0 : index
    %139 = vector.load %arg2[%c7, %c0_67, %c0_68] : memref<9x128x128xf32, #tpu.memory_space<vmem>>, vector<1x128x128xf32>
    %140 = vector.shape_cast %139 : vector<1x128x128xf32> to vector<128x128xf32>
    %cst_69 = arith.constant dense<0.000000e+00> : vector<128x64xf32>
    %141 = tpu.matmul %140, %84, %cst_69 {dimension_numbers = #tpu.dot_dimension_numbers<[1], [0], [0], [1], [0, 0, 1, 1], [], []>} : vector<128x128xf32>, vector<128x64xf32>, vector<128x64xf32> -> vector<128x64xf32>
    %142 = vector.extract_strided_slice %85 {offsets = [7, 0], sizes = [1, 64], strides = [1, 1]} : vector<9x64xf32> to vector<1x64xf32>
    %143 = vector.broadcast %142 : vector<1x64xf32> to vector<128x64xf32>
    %144 = arith.mulf %141, %143 : vector<128x64xf32>
    %145 = arith.addf %138, %144 : vector<128x64xf32>
    %c8 = arith.constant 8 : index
    %c0_70 = arith.constant 0 : index
    %c0_71 = arith.constant 0 : index
    %146 = vector.load %arg2[%c8, %c0_70, %c0_71] : memref<9x128x128xf32, #tpu.memory_space<vmem>>, vector<1x128x128xf32>
    %147 = vector.shape_cast %146 : vector<1x128x128xf32> to vector<128x128xf32>
    %cst_72 = arith.constant dense<0.000000e+00> : vector<128x64xf32>
    %148 = tpu.matmul %147, %84, %cst_72 {dimension_numbers = #tpu.dot_dimension_numbers<[1], [0], [0], [1], [0, 0, 1, 1], [], []>} : vector<128x128xf32>, vector<128x64xf32>, vector<128x64xf32> -> vector<128x64xf32>
    %149 = vector.extract_strided_slice %85 {offsets = [8, 0], sizes = [1, 64], strides = [1, 1]} : vector<9x64xf32> to vector<1x64xf32>
    %150 = vector.broadcast %149 : vector<1x64xf32> to vector<128x64xf32>
    %151 = arith.mulf %148, %150 : vector<128x64xf32>
    %152 = arith.addf %145, %151 : vector<128x64xf32>
    %153 = arith.addf %152, %84 : vector<128x64xf32>
    %cst_73 = arith.constant 0.707106769 : f32
    %154 = vector.broadcast %cst_73 : f32 to vector<128x64xf32>
    %155 = arith.mulf %153, %154 : vector<128x64xf32>
    %156 = math.absf %155 : vector<128x64xf32>
    %cst_74 = arith.constant 0.327591091 : f32
    %157 = vector.broadcast %cst_74 : f32 to vector<128x64xf32>
    %158 = arith.mulf %157, %156 : vector<128x64xf32>
    %cst_75 = arith.constant 1.000000e+00 : f32
    %159 = vector.broadcast %cst_75 : f32 to vector<128x64xf32>
    %160 = arith.addf %159, %158 : vector<128x64xf32>
    %cst_76 = arith.constant 1.000000e+00 : f32
    %161 = vector.broadcast %cst_76 : f32 to vector<128x64xf32>
    %162 = arith.divf %161, %160 : vector<128x64xf32>
    %cst_77 = arith.constant 1.06140542 : f32
    %163 = vector.broadcast %cst_77 : f32 to vector<128x64xf32>
    %164 = arith.mulf %162, %163 : vector<128x64xf32>
    %cst_78 = arith.constant -1.45315206 : f32
    %165 = vector.broadcast %cst_78 : f32 to vector<128x64xf32>
    %166 = arith.addf %165, %164 : vector<128x64xf32>
    %167 = arith.mulf %162, %166 : vector<128x64xf32>
    %cst_79 = arith.constant 1.42141378 : f32
    %168 = vector.broadcast %cst_79 : f32 to vector<128x64xf32>
    %169 = arith.addf %168, %167 : vector<128x64xf32>
    %170 = arith.mulf %162, %169 : vector<128x64xf32>
    %cst_80 = arith.constant -0.284496725 : f32
    %171 = vector.broadcast %cst_80 : f32 to vector<128x64xf32>
    %172 = arith.addf %171, %170 : vector<128x64xf32>
    %173 = arith.mulf %162, %172 : vector<128x64xf32>
    %cst_81 = arith.constant 0.254829586 : f32
    %174 = vector.broadcast %cst_81 : f32 to vector<128x64xf32>
    %175 = arith.addf %174, %173 : vector<128x64xf32>
    %176 = arith.mulf %162, %175 : vector<128x64xf32>
    %cst_82 = arith.constant 0.000000e+00 : f32
    %177 = vector.broadcast %cst_82 : f32 to vector<128x64xf32>
    %178 = arith.subf %177, %156 : vector<128x64xf32>
    %179 = arith.mulf %178, %156 : vector<128x64xf32>
    %180 = math.exp %179 : vector<128x64xf32>
    %181 = arith.mulf %176, %180 : vector<128x64xf32>
    %cst_83 = arith.constant 1.000000e+00 : f32
    %182 = vector.broadcast %cst_83 : f32 to vector<128x64xf32>
    %183 = arith.subf %182, %181 : vector<128x64xf32>
    %cst_84 = arith.constant 0.000000e+00 : f32
    %184 = vector.broadcast %cst_84 : f32 to vector<128x64xf32>
    %185 = arith.cmpf oge, %155, %184 : vector<128x64xf32>
    %cst_85 = arith.constant 0.000000e+00 : f32
    %186 = vector.broadcast %cst_85 : f32 to vector<128x64xf32>
    %187 = arith.subf %186, %183 : vector<128x64xf32>
    %188 = arith.select %185, %183, %187 : vector<128x64xi1>, vector<128x64xf32>
    %cst_86 = arith.constant 5.000000e-01 : f32
    %189 = vector.broadcast %cst_86 : f32 to vector<128x64xf32>
    %190 = arith.mulf %189, %153 : vector<128x64xf32>
    %cst_87 = arith.constant 1.000000e+00 : f32
    %191 = vector.broadcast %cst_87 : f32 to vector<128x64xf32>
    %192 = arith.addf %191, %188 : vector<128x64xf32>
    %193 = arith.mulf %190, %192 : vector<128x64xf32>
    %c0_88 = arith.constant 0 : index
    %c0_89 = arith.constant 0 : index
    %194 = vector.load %arg12[%c0_88, %c0_89] : memref<1x64xf32, #tpu.memory_space<vmem>>, vector<1x64xf32>
    %c0_90 = arith.constant 0 : index
    %c0_91 = arith.constant 0 : index
    %195 = vector.load %arg13[%c0_90, %c0_91] : memref<1x64xf32, #tpu.memory_space<vmem>>, vector<1x64xf32>
    %cst_92 = arith.constant dense<0.000000e+00> : vector<64xf32>
    %196 = vector.multi_reduction <add>, %193, %cst_92 [0] : vector<128x64xf32> to vector<64xf32>
    %197 = vector.shape_cast %196 : vector<64xf32> to vector<1x64xf32>
    %cst_93 = arith.constant 1.280000e+02 : f32
    %198 = vector.broadcast %cst_93 : f32 to vector<1x64xf32>
    %199 = arith.divf %197, %198 : vector<1x64xf32>
    %200 = vector.broadcast %199 : vector<1x64xf32> to vector<128x64xf32>
    %201 = arith.subf %193, %200 : vector<128x64xf32>
    %202 = arith.mulf %201, %201 : vector<128x64xf32>
    %cst_94 = arith.constant dense<0.000000e+00> : vector<64xf32>
    %203 = vector.multi_reduction <add>, %202, %cst_94 [0] : vector<128x64xf32> to vector<64xf32>
    %204 = vector.shape_cast %203 : vector<64xf32> to vector<1x64xf32>
    %cst_95 = arith.constant 1.280000e+02 : f32
    %205 = vector.broadcast %cst_95 : f32 to vector<1x64xf32>
    %206 = arith.divf %204, %205 : vector<1x64xf32>
    %cst_96 = arith.constant 9.99999974E-6 : f32
    %207 = vector.broadcast %cst_96 : f32 to vector<1x64xf32>
    %208 = arith.addf %206, %207 : vector<1x64xf32>
    %209 = math.rsqrt %208 : vector<1x64xf32>
    %210 = vector.broadcast %209 : vector<1x64xf32> to vector<128x64xf32>
    %211 = arith.mulf %201, %210 : vector<128x64xf32>
    %212 = vector.broadcast %194 : vector<1x64xf32> to vector<128x64xf32>
    %213 = arith.mulf %211, %212 : vector<128x64xf32>
    %214 = vector.broadcast %195 : vector<1x64xf32> to vector<128x64xf32>
    %215 = arith.addf %213, %214 : vector<128x64xf32>
    %c0_97 = arith.constant 0 : index
    %c0_98 = arith.constant 0 : index
    %216 = vector.load %arg14[%c0_97, %c0_98] : memref<64x32xf32, #tpu.memory_space<vmem>>, vector<64x32xf32>
    %cst_99 = arith.constant dense<0.000000e+00> : vector<128x32xf32>
    %217 = tpu.matmul %215, %216, %cst_99 {dimension_numbers = #tpu.dot_dimension_numbers<[1], [0], [0], [1], [0, 0, 1, 1], [], []>} : vector<128x64xf32>, vector<64x32xf32>, vector<128x32xf32> -> vector<128x32xf32>
    %c0_100 = arith.constant 0 : index
    %c0_101 = arith.constant 0 : index
    %218 = vector.load %arg15[%c0_100, %c0_101] : memref<1x32xf32, #tpu.memory_space<vmem>>, vector<1x32xf32>
    %219 = vector.broadcast %218 : vector<1x32xf32> to vector<128x32xf32>
    %220 = arith.addf %217, %219 : vector<128x32xf32>
    %c0_102 = arith.constant 0 : index
    %c0_103 = arith.constant 0 : index
    %221 = vector.load %arg16[%c0_102, %c0_103] : memref<1x32xf32, #tpu.memory_space<vmem>>, vector<1x32xf32>
    %c0_104 = arith.constant 0 : index
    %c0_105 = arith.constant 0 : index
    %222 = vector.load %arg17[%c0_104, %c0_105] : memref<1x32xf32, #tpu.memory_space<vmem>>, vector<1x32xf32>
    %cst_106 = arith.constant dense<0.000000e+00> : vector<32xf32>
    %223 = vector.multi_reduction <add>, %220, %cst_106 [0] : vector<128x32xf32> to vector<32xf32>
    %224 = vector.shape_cast %223 : vector<32xf32> to vector<1x32xf32>
    %cst_107 = arith.constant 1.280000e+02 : f32
    %225 = vector.broadcast %cst_107 : f32 to vector<1x32xf32>
    %226 = arith.divf %224, %225 : vector<1x32xf32>
    %227 = vector.broadcast %226 : vector<1x32xf32> to vector<128x32xf32>
    %228 = arith.subf %220, %227 : vector<128x32xf32>
    %229 = arith.mulf %228, %228 : vector<128x32xf32>
    %cst_108 = arith.constant dense<0.000000e+00> : vector<32xf32>
    %230 = vector.multi_reduction <add>, %229, %cst_108 [0] : vector<128x32xf32> to vector<32xf32>
    %231 = vector.shape_cast %230 : vector<32xf32> to vector<1x32xf32>
    %cst_109 = arith.constant 1.280000e+02 : f32
    %232 = vector.broadcast %cst_109 : f32 to vector<1x32xf32>
    %233 = arith.divf %231, %232 : vector<1x32xf32>
    %cst_110 = arith.constant 9.99999974E-6 : f32
    %234 = vector.broadcast %cst_110 : f32 to vector<1x32xf32>
    %235 = arith.addf %233, %234 : vector<1x32xf32>
    %236 = math.rsqrt %235 : vector<1x32xf32>
    %237 = vector.broadcast %236 : vector<1x32xf32> to vector<128x32xf32>
    %238 = arith.mulf %228, %237 : vector<128x32xf32>
    %239 = vector.broadcast %221 : vector<1x32xf32> to vector<128x32xf32>
    %240 = arith.mulf %238, %239 : vector<128x32xf32>
    %241 = vector.broadcast %222 : vector<1x32xf32> to vector<128x32xf32>
    %242 = arith.addf %240, %241 : vector<128x32xf32>
    %243 = arith.addf %242, %2 : vector<128x32xf32>
    %c0_111 = arith.constant 0 : index
    %c0_112 = arith.constant 0 : index
    %244 = vector.load %arg18[%c0_111, %c0_112] : memref<128x32xf32, #tpu.memory_space<vmem>>, vector<128x32xf32>
    tpu.vector_store %arg18[%c0_111, %c0_112], %243 {strides = array<i32>} : memref<128x32xf32, #tpu.memory_space<vmem>>, vector<128x32xf32>,
    return
  }
}

</mosaic_0001>

<bundles_post_ra>
// kernel: cmt_block_forward.3
= control target key start
LH: loop header
LB: loop body
LE: loop exit
PB: predicated region body
PF: predicated region fallthrough
CT: control target
= control target key end

     0   :  { %s9066_s0 = inlined_call_operand.vmem [shape: f32[128,32], index: 0, kind: input, shape index: {}]   ;;  %s9067_s1 = inlined_call_operand.vmem [shape: f32[128,32], index: 1, kind: input, shape index: {}]   ;;  %s9068_s2 = inlined_call_operand.vmem [shape: f32[9,128,128], index: 2, kind: input, shape index: {}]   ;;  %s9069_s3 = inlined_call_operand.vmem [shape: f32[128,128], index: 3, kind: input, shape index: {}]   ;;  %s9070_s4 = inlined_call_operand.vmem [shape: f32[128,1], index: 4, kind: input, shape index: {}]   ;;  %s9071_s5 = inlined_call_operand.vmem [shape: f32[128,1], index: 5, kind: input, shape index: {}]   ;;  %s9072_s6 = inlined_call_operand.vmem [shape: f32[32,64], index: 6, kind: input, shape index: {}]   ;;  %s9073_s7 = inlined_call_operand.vmem [shape: f32[1,64], index: 7, kind: input, shape index: {}]   ;;  %s9074_s8 = inlined_call_operand.vmem [shape: f32[1,64], index: 8, kind: input, shape index: {}]   ;;  %s9075_s9 = inlined_call_operand.vmem [shape: f32[1,64], index: 9, kind: input, shape index: {}]   ;;  %s9076_s10 = inlined_call_operand.vmem [shape: f32[9,64], index: 10, kind: input, shape index: {}]   ;;  %s9077_s11 = inlined_call_operand.vmem [shape: f32[1,64], index: 11, kind: input, shape index: {}]   ;;  %s9078_s12 = inlined_call_operand.vmem [shape: f32[1,64], index: 12, kind: input, shape index: {}]   ;;  %s9079_s13 = inlined_call_operand.vmem [shape: f32[1,64], index: 13, kind: input, shape index: {}]   ;;  %s9080_s14 = inlined_call_operand.vmem [shape: f32[64,32], index: 14, kind: input, shape index: {}]   ;;  %s9081_s15 = inlined_call_operand.vmem [shape: f32[1,32], index: 15, kind: input, shape index: {}]   ;;  %s9082_s16 = inlined_call_operand.vmem [shape: f32[1,32], index: 16, kind: input, shape index: {}]   ;;  %s9083_s17 = inlined_call_operand.vmem [shape: f32[1,32], index: 17, kind: input, shape index: {}]   ;;  %s9084_s18 = inlined_call_operand.hbm [shape: f32[128,32], index: 18, kind: output, shape index: {}]  }
   0x1   :  { %9109 = sst [smem:[#allocation28_spill]] %s9066_s0 }
   0x2   :  { %9110 = sst [smem:[#allocation29_spill]] %s9067_s1 }
   0x3   :  { %9111 = sst [smem:[#allocation30_spill]] %s9068_s2 }
   0x4   :  { %s9112_s29 = sld [smem:[#allocation28_spill]]  ;;  %s9113_s20 = sld [smem:[#allocation29_spill]]  ;;  %v108_v31 = vld [vmem:[%s9069_s3] sm:$0xff] }
   0x5   :  { %4950 = vmatprep.mubr.f32.mxu0 %v108_v31  ;;  %5006 = vmatprep.mubr.f32.mxu1 %v108_v31 }
   0xa   :  { %v60_v0 = vld [vmem:[%s9112_s29] sm:$0xff]  ;;  %v61_v1 = vld [vmem:[%s9112_s29 + $0x8] sm:$0xff]  ;;  %v62_v5 = vld [vmem:[%s9112_s29 + $0x10] sm:$0xff] }
   0xb   :  { %v76_v2 = vld [vmem:[%s9113_s20] sm:$0xff]  ;;  %v77_v3 = vld [vmem:[%s9113_s20 + $0x8] sm:$0xff]  ;;  %v63_v6 = vld [vmem:[%s9112_s29 + $0x18] sm:$0xff] }
   0xc   :  { %v6297_v4 = vadd.f32 %v76_v2, %v60_v0  ;;  %v6305_v7 = vadd.f32 %v77_v3, %v61_v1  ;;  %v78_v8 = vld [vmem:[%s9113_s20 + $0x10] sm:$0xff]  ;;  %v79_v9 = vld [vmem:[%s9113_s20 + $0x18] sm:$0xff]  ;;  %v64_v10 = vld [vmem:[%s9112_s29 + $0x20] sm:$0xff] }
   0xd   :  { %v6316_v11 = vadd.f32 %v78_v8, %v62_v5  ;;  %v6318_v12 = vadd.f32 %v79_v9, %v63_v6  ;;  %v65_v13 = vld [vmem:[%s9112_s29 + $0x28] sm:$0xff]  ;;  %v80_v14 = vld [vmem:[%s9113_s20 + $0x20] sm:$0xff]  ;;  %v66_v19 = vld [vmem:[%s9112_s29 + $0x30] sm:$0xff] }
   0xe   :  { %9114 = vst [vmem:[#allocation5_spill] sm:$0xff] %v6297_v4  ;;  %9115 = vst [vmem:[#allocation6_spill] sm:$0xff] %v6305_v7  ;;  %v81_v15 = vld [vmem:[%s9113_s20 + $0x28] sm:$0xff]  ;;  %v5606_v16 = vpack.c.bf16 %v6305_v7, %v6297_v4  ;;  %v6331_v17 = vadd.f32 %v80_v14, %v64_v10  ;;  %v67_v21 = vld [vmem:[%s9112_s29 + $0x38] sm:$0xff] }
   0xf   :  { %9116 = vst [vmem:[#allocation7_spill] sm:$0xff] %v6316_v11  ;;  %9117 = vst [vmem:[#allocation8_spill] sm:$0xff] %v6318_v12  ;;  %v6333_v18 = vadd.f32 %v81_v15, %v65_v13  ;;  %v5610_v20 = vpack.c.bf16 %v6318_v12, %v6316_v11  ;;  %v82_v22 = vld [vmem:[%s9113_s20 + $0x30] sm:$0xff]  ;;  %v83_v23 = vld [vmem:[%s9113_s20 + $0x38] sm:$0xff] }
  0x10   :  { %9118 = vst [vmem:[#allocation9_spill] sm:$0xff] %v6331_v17  ;;  %5607 = vmatprep.subr.bf16.mxu0 %v5606_v16  ;;  %v6351_v25 = vadd.f32 %v82_v22, %v66_v19  ;;  %v6353_v26 = vadd.f32 %v83_v23, %v67_v21  ;;  %v68_v27 = vld [vmem:[%s9112_s29 + $0x40] sm:$0xff]  ;;  %v69_v28 = vld [vmem:[%s9112_s29 + $0x48] sm:$0xff]  ;;  %v70_v35 = vld [vmem:[%s9112_s29 + $0x50] sm:$0xff] }
  0x11   :  { %9119 = vst [vmem:[#allocation10_spill] sm:$0xff] %v6333_v18  ;;  %5609 = vmatpush3.bf16.msra.mxu0 %v5606_v16  ;;  %v5614_v24 = vpack.c.bf16 %v6333_v18, %v6331_v17  ;;  %v84_v29 = vld [vmem:[%s9113_s20 + $0x40] sm:$0xff]  ;;  %v85_v30 = vld [vmem:[%s9113_s20 + $0x48] sm:$0xff]  ;;  %v71_v36 = vld [vmem:[%s9112_s29 + $0x58] sm:$0xff] }
  0x12   :  { %5611 = vmatprep.subr.bf16.mxu0 %v5610_v20  ;;  %9120 = vst [vmem:[#allocation11_spill] sm:$0xff] %v6351_v25  ;;  %9121 = vst [vmem:[#allocation12_spill] sm:$0xff] %v6353_v26  ;;  %v5618_v32 = vpack.c.bf16 %v6353_v26, %v6351_v25  ;;  %v6372_v33 = vadd.f32 %v84_v29, %v68_v27  ;;  %v6374_v34 = vadd.f32 %v85_v30, %v69_v28  ;;  %v86_v37 = vld [vmem:[%s9113_s20 + $0x50] sm:$0xff]  ;;  %v87_v38 = vld [vmem:[%s9113_s20 + $0x58] sm:$0xff] }
  0x13   :  { %v6390_v40 = vadd.f32 %v86_v37, %v70_v35  ;;  %v6392_v41 = vadd.f32 %v87_v38, %v71_v36  ;;  %v72_v42 = vld [vmem:[%s9112_s29 + $0x60] sm:$0xff] }
  0x14   :  { %9122 = vst [vmem:[#allocation13_spill] sm:$0xff] %v6372_v33  ;;  %9123 = vst [vmem:[#allocation14_spill] sm:$0xff] %v6374_v34  ;;  %v5622_v39 = vpack.c.bf16 %v6374_v34, %v6372_v33 }
  0x15   :  { %5613 = vmatpush3.bf16.msra.mxu0 %v5610_v20  ;;  %9124 = vst [vmem:[#allocation15_spill] sm:$0xff] %v6390_v40  ;;  %9125 = vst [vmem:[#allocation16_spill] sm:$0xff] %v6392_v41 }
  0x16   :  { %5615 = vmatprep.subr.bf16.mxu0 %v5614_v24 }
  0x19   :  { %5617 = vmatpush3.bf16.msra.mxu0 %v5614_v24 }
  0x1a   :  { %5619 = vmatprep.subr.bf16.mxu0 %v5618_v32 }
  0x1b   :  { %23 = vsyncpa [#allocation3], 0  ;;  %v73_v43 = vld [vmem:[%s9112_s29 + $0x68] sm:$0xff]  ;;  %v88_v44 = vld [vmem:[%s9113_s20 + $0x60] sm:$0xff]  ;;  %v5626_v46 = vpack.c.bf16 %v6392_v41, %v6390_v40  ;;  %v6186_v14 = vmov 0   ;;  %vm713_vm0 = vcmask 261120  }
  0x1c   :  { %v89_v45 = vld [vmem:[%s9113_s20 + $0x68] sm:$0xff]  ;;  %v6408_v47 = vadd.f32 %v88_v44, %v72_v42  ;;  %v74_v49 = vld [vmem:[%s9112_s29 + $0x70] sm:$0xff]  ;;  %v75_v50 = vld [vmem:[%s9112_s29 + $0x78] sm:$0xff]  ;;  %5994 = vset.pattern.permute.xlu0 %v6186_v14  ;;  %5995 = vset.pattern.permute.xlu1 %v6186_v14  ;;  %vm1341_vm3 = vcmask 523264   ;;  %s9130_s21 = sld [smem:[#allocation30_spill]] }
  0x1d   :  { %5621 = vmatpush3.bf16.msra.mxu0 %v5618_v32  ;;  %v6410_v48 = vadd.f32 %v89_v45, %v73_v43  ;;  %v90_v51 = vld [vmem:[%s9113_s20 + $0x70] sm:$0xff]  ;;  %v91_v52 = vld [vmem:[%s9113_s20 + $0x78] sm:$0xff]  ;;  %v6435_v57 = vld [vmem:[%s9069_s3 + $0x8] sm:$0xff] }
  0x1e   :  { %5623 = vmatprep.subr.bf16.mxu0 %v5622_v39  ;;  %9126 = vst [vmem:[#allocation17_spill] sm:$0xff] %v6408_v47  ;;  %v6426_v54 = vadd.f32 %v90_v51, %v74_v49  ;;  %v6428_v55 = vadd.f32 %v91_v52, %v75_v50  ;;  %v6440_v58 = vld [vmem:[%s9069_s3 + $0x10] sm:$0xff]  ;;  %v6447_v59 = vld [vmem:[%s9069_s3 + $0x18] sm:$0xff]  ;;  %v6452_v60 = vld [vmem:[%s9069_s3 + $0x20] sm:$0xff] }
  0x1f   :  { %9127 = vst [vmem:[#allocation18_spill] sm:$0xff] %v6410_v48  ;;  %v5630_v53 = vpack.c.bf16 %v6410_v48, %v6408_v47  ;;  %v6459_v61 = vld [vmem:[%s9069_s3 + $0x28] sm:$0xff]  ;;  %v6464_v62 = vld [vmem:[%s9069_s3 + $0x30] sm:$0xff]  ;;  %v6471_v63 = vld [vmem:[%s9069_s3 + $0x38] sm:$0xff] }
  0x20   :  { %9128 = vst [vmem:[#allocation19_spill] sm:$0xff] %v6426_v54  ;;  %9129 = vst [vmem:[#allocation20_spill] sm:$0xff] %v6428_v55  ;;  %v5634_v56 = vpack.c.bf16 %v6428_v55, %v6426_v54  ;;  %v6476_v0 = vld [vmem:[%s9069_s3 + $0x40] sm:$0xff]  ;;  %v6483_v1 = vld [vmem:[%s9069_s3 + $0x48] sm:$0xff] }
  0x21   :  { %5625 = vmatpush3.bf16.msra.mxu0 %v5622_v39  ;;  %v6488_v2 = vld [vmem:[%s9069_s3 + $0x50] sm:$0xff]  ;;  %v6495_v3 = vld [vmem:[%s9069_s3 + $0x58] sm:$0xff]  ;;  %v6500_v5 = vld [vmem:[%s9069_s3 + $0x60] sm:$0xff] }
  0x22   :  { %5627 = vmatprep.subr.bf16.mxu0 %v5626_v46  ;;  %v6507_v6 = vld [vmem:[%s9069_s3 + $0x68] sm:$0xff]  ;;  %v6512_v8 = vld [vmem:[%s9069_s3 + $0x70] sm:$0xff]  ;;  %v6519_v9 = vld [vmem:[%s9069_s3 + $0x78] sm:$0xff] }
  0x23   :  { %v124_v10 = vld [vmem:[%s9070_s4] sm:$0xff]  ;;  %v125_v15 = vld [vmem:[%s9070_s4 + $0x8] sm:$0xff]  ;;  %v126_v19 = vld [vmem:[%s9070_s4 + $0x10] sm:$0xff] }
  0x24   :  { %v140_v13 = vld [vmem:[%s9071_s5] sm:$0xff]  ;;  %512 = vperm.xlu0 %5994, %v124_v10   ;;  %v141_v16 = vld [vmem:[%s9071_s5 + $0x8] sm:$0xff]  ;;  %v127_v20 = vld [vmem:[%s9070_s4 + $0x18] sm:$0xff] }
  0x25   :  { %5629 = vmatpush3.bf16.msra.mxu0 %v5626_v46  ;;  %608 = vperm.xlu1 %5995, %v140_v13   ;;  %v142_v21 = vld [vmem:[%s9071_s5 + $0x10] sm:$0xff]  ;;  %v143_v22 = vld [vmem:[%s9071_s5 + $0x18] sm:$0xff]  ;;  %v128_v23 = vld [vmem:[%s9070_s4 + $0x20] sm:$0xff] }
  0x26   :  { %5631 = vmatprep.subr.bf16.mxu0 %v5630_v53  ;;  %v129_v24 = vld [vmem:[%s9070_s4 + $0x28] sm:$0xff]  ;;  %v144_v27 = vld [vmem:[%s9071_s5 + $0x20] sm:$0xff]  ;;  %v130_v29 = vld [vmem:[%s9070_s4 + $0x30] sm:$0xff] }
  0x27   :  { %v145_v28 = vld [vmem:[%s9071_s5 + $0x28] sm:$0xff]  ;;  %v131_v30 = vld [vmem:[%s9070_s4 + $0x38] sm:$0xff]  ;;  %v146_v31 = vld [vmem:[%s9071_s5 + $0x30] sm:$0xff] }
  0x28   :  { %517 = vperm.xlu0 %5994, %v125_v15   ;;  %v147_v32 = vld [vmem:[%s9071_s5 + $0x38] sm:$0xff]  ;;  %v132_v35 = vld [vmem:[%s9070_s4 + $0x40] sm:$0xff]  ;;  %v133_v36 = vld [vmem:[%s9070_s4 + $0x48] sm:$0xff] }
  0x29   :  { %5633 = vmatpush3.bf16.msra.mxu0 %v5630_v53  ;;  %613 = vperm.xlu1 %5995, %v141_v16   ;;  %v148_v37 = vld [vmem:[%s9071_s5 + $0x40] sm:$0xff]  ;;  %v149_v38 = vld [vmem:[%s9071_s5 + $0x48] sm:$0xff]  ;;  %v134_v39 = vld [vmem:[%s9070_s4 + $0x50] sm:$0xff] }
  0x2a   :  { %5635 = vmatprep.subr.bf16.mxu0 %v5634_v56  ;;  %v135_v42 = vld [vmem:[%s9070_s4 + $0x58] sm:$0xff]  ;;  %v150_v43 = vld [vmem:[%s9071_s5 + $0x50] sm:$0xff]  ;;  %v136_v45 = vld [vmem:[%s9070_s4 + $0x60] sm:$0xff] }
  0x2b   :  { %v151_v44 = vld [vmem:[%s9071_s5 + $0x58] sm:$0xff]  ;;  %v137_v46 = vld [vmem:[%s9070_s4 + $0x68] sm:$0xff]  ;;  %v152_v49 = vld [vmem:[%s9071_s5 + $0x60] sm:$0xff] }
  0x2c   :  { %522 = vperm.xlu0 %5994, %v126_v19   ;;  %v153_v50 = vld [vmem:[%s9071_s5 + $0x68] sm:$0xff]  ;;  %v138_v51 = vld [vmem:[%s9070_s4 + $0x70] sm:$0xff]  ;;  %v139_v52 = vld [vmem:[%s9070_s4 + $0x78] sm:$0xff] }
  0x2d   :  { %5637 = vmatpush3.bf16.msra.mxu0 %v5634_v56  ;;  %527 = vperm.xlu1 %5995, %v127_v20   ;;  %v154_v53 = vld [vmem:[%s9071_s5 + $0x70] sm:$0xff]  ;;  %v155_v56 = vld [vmem:[%s9071_s5 + $0x78] sm:$0xff]  ;;  %v702_v10 = vld [vmem:[%s9072_s6] sm:$0xff] }
  0x2e   :  { %v703_v13 = vld [vmem:[%s9072_s6 + $0x8] sm:$0xff] }
  0x2f   :  { %v5670_v14 = vpack.c.bf16 %v703_v13, %v702_v10 }
  0x30   :  { %4951 = vmatmul.mubr.f32.vlgmr.msra.gmra.mrb[0].mxu0 %v6435_v57  ;;  %618 = vperm.xlu0 %5994, %v142_v21  }
  0x31   :  { %4953 = vmatprep.mubr.f32.mxu0 %v6440_v58  ;;  %623 = vperm.xlu1 %5995, %v143_v22  }
  0x32   :  { %5671 = vmatprep.subr.bf16.mxu0 %v5670_v14 }
  0x33   :  { %5673 = vmatpush3.bf16.msra.mxu0 %v5670_v14 }
  0x34   :  { %4954 = vmatmul.mubr.f32.gmra.mrb[2].mxu0 %v6447_v59  ;;  %532 = vperm.xlu0 %5994, %v128_v23  }
  0x35   :  { %4956 = vmatprep.mubr.f32.mxu0 %v6452_v60  ;;  %537 = vperm.xlu1 %5995, %v129_v24  }
  0x38   :  { %4957 = vmatmul.mubr.f32.gmra.mrb[4].mxu0 %v6459_v61  ;;  %628 = vperm.xlu0 %5994, %v144_v27  }
  0x39   :  { %4959 = vmatprep.mubr.f32.mxu0 %v6464_v62  ;;  %633 = vperm.xlu1 %5995, %v145_v28  }
  0x3c   :  { %4960 = vmatmul.mubr.f32.gmra.mrb[6].mxu0 %v6471_v63  ;;  %542 = vperm.xlu0 %5994, %v130_v29  }
  0x3d   :  { %4962 = vmatprep.mubr.f32.mxu0 %v6476_v0  ;;  %547 = vperm.xlu1 %5995, %v131_v30  }
  0x40   :  { %4963 = vmatmul.mubr.f32.gmra.mrb[8].mxu0 %v6483_v1  ;;  %638 = vperm.xlu0 %5994, %v146_v31  }
  0x41   :  { %4965 = vmatprep.mubr.f32.mxu0 %v6488_v2  ;;  %643 = vperm.xlu1 %5995, %v147_v32  }
  0x44   :  { %4966 = vmatmul.mubr.f32.gmra.mrb[10].mxu0 %v6495_v3  ;;  %552 = vperm.xlu0 %5994, %v132_v35  }
  0x45   :  { %4968 = vmatprep.mubr.f32.mxu0 %v6500_v5  ;;  %557 = vperm.xlu1 %5995, %v133_v36  }
  0x48   :  { %4969 = vmatmul.mubr.f32.gmra.mrb[12].mxu0 %v6507_v6  ;;  %648 = vperm.xlu0 %5994, %v148_v37  }
  0x49   :  { %4971 = vmatprep.mubr.f32.mxu0 %v6512_v8  ;;  %653 = vperm.xlu1 %5995, %v149_v38  }
  0x4c   :  { %4972 = vmatmul.mubr.f32.gmra.mrb[14].mxu0 %v6519_v9  ;;  %562 = vperm.xlu0 %5994, %v134_v39  }
  0x4d   :  { %567 = vperm.xlu1 %5995, %v135_v42  }
  0x50   :  { %658 = vperm.xlu0 %5994, %v150_v43  }
  0x51   :  { %663 = vperm.xlu1 %5995, %v151_v44  }
  0x54   :  { %572 = vperm.xlu0 %5994, %v136_v45  }
  0x55   :  { %577 = vperm.xlu1 %5995, %v137_v46  }
  0x58   :  { %668 = vperm.xlu0 %5994, %v152_v49  }
  0x59   :  { %673 = vperm.xlu1 %5995, %v153_v50  }
  0x5c   :  { %582 = vperm.xlu0 %5994, %v138_v51  }
  0x5d   :  { %587 = vperm.xlu1 %5995, %v139_v52  }
  0x60   :  { %678 = vperm.xlu0 %5994, %v154_v53  }
  0x61   :  { %683 = vperm.xlu1 %5995, %v155_v56  }
 0x103   :  { %v4952_v15 = vpop.f32.mrb[0].mxu0 }
 0x104   :  { %v6625_v16 = vsub.f32 %v6305_v7, %v4952_v15  ;;  %v222_v19 = vpop.f32.mrb[1].mxu0 }
 0x105   :  { %v6628_v20 = vsub.f32 %v6297_v4, %v222_v19 }
 0x106   :  { %v318_v21 = vmul.f32 %v6625_v16, %v6625_v16 }
 0x107   :  { %v317_v22 = vmul.f32 %v6628_v20, %v6628_v20  ;;  %v4955_v23 = vpop.f32.mrb[2].mxu0 }
 0x108   :  { %v6635_v24 = vsub.f32 %v6318_v12, %v4955_v23  ;;  %v232_v27 = vpop.f32.mrb[3].mxu0 }
 0x109   :  { %v6638_v28 = vsub.f32 %v6316_v11, %v232_v27  ;;  %v5638_v29 = vpack.c.bf16 %v318_v21, %v317_v22 }
 0x10a   :  { %v320_v30 = vmul.f32 %v6635_v24, %v6635_v24 }
 0x10b   :  { %v319_v31 = vmul.f32 %v6638_v28, %v6638_v28  ;;  %v4958_v32 = vpop.f32.mrb[4].mxu0  ;;  %5639 = vmatprep.subr.bf16.mxu1 %v5638_v29 }
 0x10c   :  { %v6645_v35 = vsub.f32 %v6333_v18, %v4958_v32  ;;  %v242_v36 = vpop.f32.mrb[5].mxu0  ;;  %5641 = vmatpush3.bf16.msra.mxu1 %v5638_v29 }
 0x10d   :  { %v6648_v37 = vsub.f32 %v6331_v17, %v242_v36  ;;  %v5642_v38 = vpack.c.bf16 %v320_v30, %v319_v31 }
 0x10e   :  { %v322_v39 = vmul.f32 %v6645_v35, %v6645_v35 }
 0x10f   :  { %v321_v42 = vmul.f32 %v6648_v37, %v6648_v37  ;;  %v4961_v43 = vpop.f32.mrb[6].mxu0  ;;  %5643 = vmatprep.subr.bf16.mxu1 %v5642_v38 }
 0x110   :  { %v6655_v44 = vsub.f32 %v6353_v26, %v4961_v43  ;;  %v252_v45 = vpop.f32.mrb[7].mxu0  ;;  %5645 = vmatpush3.bf16.msra.mxu1 %v5642_v38 }
 0x111   :  { %v6658_v46 = vsub.f32 %v6351_v25, %v252_v45  ;;  %v5646_v49 = vpack.c.bf16 %v322_v39, %v321_v42 }
 0x112   :  { %v324_v50 = vmul.f32 %v6655_v44, %v6655_v44 }
 0x113   :  { %v323_v51 = vmul.f32 %v6658_v46, %v6658_v46  ;;  %v4964_v52 = vpop.f32.mrb[8].mxu0  ;;  %5647 = vmatprep.subr.bf16.mxu1 %v5646_v49 }
 0x114   :  { %v6665_v53 = vsub.f32 %v6374_v34, %v4964_v52  ;;  %v262_v56 = vpop.f32.mrb[9].mxu0  ;;  %5649 = vmatpush3.bf16.msra.mxu1 %v5646_v49 }
 0x115   :  { %v6668_v10 = vsub.f32 %v6372_v33, %v262_v56  ;;  %v5650_v13 = vpack.c.bf16 %v324_v50, %v323_v51 }
 0x116   :  { %v326_v14 = vmul.f32 %v6665_v53, %v6665_v53 }
 0x117   :  { %v325_v15 = vmul.f32 %v6668_v10, %v6668_v10  ;;  %v4967_v19 = vpop.f32.mrb[10].mxu0  ;;  %5651 = vmatprep.subr.bf16.mxu1 %v5650_v13 }
 0x118   :  { %v6675_v21 = vsub.f32 %v6392_v41, %v4967_v19  ;;  %v272_v22 = vpop.f32.mrb[11].mxu0  ;;  %5653 = vmatpush3.bf16.msra.mxu1 %v5650_v13 }
 0x119   :  { %v6678_v23 = vsub.f32 %v6390_v40, %v272_v22  ;;  %v5654_v27 = vpack.c.bf16 %v326_v14, %v325_v15 }
 0x11a   :  { %v328_v29 = vmul.f32 %v6675_v21, %v6675_v21 }
 0x11b   :  { %v327_v30 = vmul.f32 %v6678_v23, %v6678_v23  ;;  %v4970_v31 = vpop.f32.mrb[12].mxu0  ;;  %5655 = vmatprep.subr.bf16.mxu1 %v5654_v27 }
 0x11c   :  { %v6685_v32 = vsub.f32 %v6410_v48, %v4970_v31  ;;  %v282_v36 = vpop.f32.mrb[13].mxu0  ;;  %5657 = vmatpush3.bf16.msra.mxu1 %v5654_v27 }
 0x11d   :  { %v6688_v38 = vsub.f32 %v6408_v47, %v282_v36  ;;  %v5658_v39 = vpack.c.bf16 %v328_v29, %v327_v30 }
 0x11e   :  { %v330_v42 = vmul.f32 %v6685_v32, %v6685_v32 }
 0x11f   :  { %v329_v43 = vmul.f32 %v6688_v38, %v6688_v38  ;;  %v4973_v45 = vpop.f32.mrb[14].mxu0  ;;  %5659 = vmatprep.subr.bf16.mxu1 %v5658_v39 }
 0x120   :  { %v6695_v49 = vsub.f32 %v6428_v55, %v4973_v45  ;;  %v292_v50 = vpop.f32.mrb[15].mxu0  ;;  %5661 = vmatpush3.bf16.msra.mxu1 %v5658_v39 }
 0x121   :  { %v6698_v51 = vsub.f32 %v6426_v54, %v292_v50  ;;  %v5662_v52 = vpack.c.bf16 %v330_v42, %v329_v43 }
 0x122   :  { %v332_v56 = vmul.f32 %v6695_v49, %v6695_v49 }
 0x123   :  { %v331_v13 = vmul.f32 %v6698_v51, %v6698_v51  ;;  %5663 = vmatprep.subr.bf16.mxu1 %v5662_v52 }
 0x124   :  { %5665 = vmatpush3.bf16.msra.mxu1 %v5662_v52 }
 0x125   :  { %v5666_v14 = vpack.c.bf16 %v332_v56, %v331_v13 }
 0x127   :  { %5667 = vmatprep.subr.bf16.mxu1 %v5666_v14 }
 0x128   :  { %5669 = vmatpush3.bf16.msra.mxu1 %v5666_v14 }
 0x12b   :  { %5007 = vmatmul.mubr.f32.vlgmr.msra.gmra.mrb[0].mxu1 %v6435_v57  ;;  %v704_v57 = vld [vmem:[%s9072_s6 + $0x10] sm:$0xff] }
 0x12c   :  { %5009 = vmatprep.mubr.f32.mxu1 %v6440_v58  ;;  %v705_v58 = vld [vmem:[%s9072_s6 + $0x18] sm:$0xff] }
 0x12f   :  { %5010 = vmatmul.mubr.f32.gmra.mrb[2].mxu1 %v6447_v59  ;;  %v5674_v59 = vpack.c.bf16 %v705_v58, %v704_v57 }
 0x130   :  { %5012 = vmatprep.mubr.f32.mxu1 %v6452_v60  ;;  %v513_v60 = vpop.permute.xlu0 %512 }
 0x131   :  { %5675 = vmatprep.subr.bf16.mxu0 %v5674_v59 }
 0x132   :  { %5677 = vmatpush3.bf16.msra.mxu0 %v5674_v59 }
 0x133   :  { %5013 = vmatmul.mubr.f32.gmra.mrb[4].mxu1 %v6459_v61  ;;  %v609_v61 = vpop.permute.xlu1 %608 }
 0x134   :  { %5015 = vmatprep.mubr.f32.mxu1 %v6464_v62  ;;  %v518_v62 = vpop.permute.xlu0 %517 }
 0x137   :  { %5016 = vmatmul.mubr.f32.gmra.mrb[6].mxu1 %v6471_v63  ;;  %v614_v63 = vpop.permute.xlu1 %613 }
 0x138   :  { %5018 = vmatprep.mubr.f32.mxu1 %v6476_v0  ;;  %v6725_v0 = vpop.permute.xlu0 %522 }
 0x13b   :  { %5019 = vmatmul.mubr.f32.gmra.mrb[8].mxu1 %v6483_v1  ;;  %v528_v1 = vpop.permute.xlu1 %527 }
 0x13c   :  { %5021 = vmatprep.mubr.f32.mxu1 %v6488_v2  ;;  %v6727_v2 = vpop.permute.xlu0 %618 }
 0x13f   :  { %5022 = vmatmul.mubr.f32.gmra.mrb[10].mxu1 %v6495_v3  ;;  %v6729_v3 = vpop.permute.xlu1 %623 }
 0x140   :  { %5024 = vmatprep.mubr.f32.mxu1 %v6500_v5  ;;  %v6731_v5 = vpop.permute.xlu0 %532 }
 0x143   :  { %5025 = vmatmul.mubr.f32.gmra.mrb[12].mxu1 %v6507_v6  ;;  %v6733_v6 = vpop.permute.xlu1 %537 }
 0x144   :  { %5027 = vmatprep.mubr.f32.mxu1 %v6512_v8  ;;  %v6735_v8 = vpop.permute.xlu0 %628 }
 0x147   :  { %5028 = vmatmul.mubr.f32.gmra.mrb[14].mxu1 %v6519_v9  ;;  %v6737_v9 = vpop.permute.xlu1 %633 }
 0x148   :  { %v6739_v15 = vpop.permute.xlu0 %542 }
 0x14b   :  { %v6741_v19 = vpop.permute.xlu1 %547 }
 0x14c   :  { %v6743_v22 = vpop.permute.xlu0 %638 }
 0x14f   :  { %v6745_v27 = vpop.permute.xlu1 %643 }
 0x150   :  { %v6747_v39 = vpop.permute.xlu0 %552 }
 0x153   :  { %v6749_v43 = vpop.permute.xlu1 %557 }
 0x154   :  { %v6751_v57 = vpop.permute.xlu0 %648 }
 0x157   :  { %v6753_v59 = vpop.permute.xlu1 %653 }
 0x15b   :  { %v6759_v48 = vpop.permute.xlu1 %567 }
 0x1fe   :  { %v5008_v29 = vpop.f32.mrb[0].mxu1 }
 0x1ff   :  { %v405_v30 = vadd.f32 1e-05, %v5008_v29  ;;  %v399_v31 = vpop.f32.mrb[1].mxu1 }
 0x200   :  { %v400_v36 = vadd.f32 1e-05, %v399_v31 }
 0x201   :  { %5996 = vrsqrt.f32 %v405_v30 }
 0x202   :  { %5998 = vrsqrt.f32 %v400_v36  ;;  %v5011_v42 = vpop.f32.mrb[2].mxu1 }
 0x203   :  { %v415_v45 = vadd.f32 1e-05, %v5011_v42  ;;  %v409_v50 = vpop.f32.mrb[3].mxu1 }
 0x204   :  { %v410_v52 = vadd.f32 1e-05, %v409_v50 }
 0x205   :  { %6000 = vrsqrt.f32 %v415_v45 }
 0x206   :  { %6002 = vrsqrt.f32 %v410_v52  ;;  %v5014_v56 = vpop.f32.mrb[4].mxu1  ;;  %v6757_v52 = vpop.permute.xlu0 %562 }
 0x207   :  { %v425_v13 = vadd.f32 1e-05, %v5014_v56  ;;  %v419_v14 = vpop.f32.mrb[5].mxu1 }
 0x208   :  { %v420_v58 = vadd.f32 1e-05, %v419_v14 }
 0x209   :  { %6004 = vrsqrt.f32 %v425_v13 }
 0x20a   :  { %6006 = vrsqrt.f32 %v420_v58  ;;  %v5017_v29 = vpop.f32.mrb[6].mxu1 }
 0x20b   :  { %v5997_v30 = vpop.eup %5996  ;;  %v435_v31 = vadd.f32 1e-05, %v5017_v29  ;;  %v429_v36 = vpop.f32.mrb[7].mxu1 }
 0x20c   :  { %v5999_v55 = vpop.eup %5998  ;;  %v495_v42 = vmul.f32 %v5997_v30, %v6625_v16  ;;  %v430_v50 = vadd.f32 1e-05, %v429_v36 }
 0x20d   :  { %6008 = vrsqrt.f32 %v435_v31  ;;  %v494_v45 = vmul.f32 %v5999_v55, %v6628_v20 }
 0x20e   :  { %v591_v56 = vmul.f32 %v518_v62, %v495_v42  ;;  %6010 = vrsqrt.f32 %v430_v50  ;;  %v5020_v14 = vpop.f32.mrb[8].mxu1 }
 0x20f   :  { %v6001_v54 = vpop.eup %6000  ;;  %v445_v13 = vadd.f32 1e-05, %v5020_v14  ;;  %v439_v58 = vpop.f32.mrb[9].mxu1  ;;  %v590_v47 = vmul.f32 %v513_v60, %v494_v45 }
 0x210   :  { %v6003_v29 = vpop.eup %6002  ;;  %v440_v41 = vadd.f32 1e-05, %v439_v58  ;;  %v497_v16 = vmul.f32 %v6001_v54, %v6635_v24  ;;  %v687_v20 = vadd.f32 %v614_v63, %v591_v56  ;;  %v6765_v14 = vpop.permute.xlu0 %658 }
 0x211   :  { %6012 = vrsqrt.f32 %v445_v13  ;;  %v686_v30 = vadd.f32 %v609_v61, %v590_v47  ;;  %v496_v55 = vmul.f32 %v6003_v29, %v6638_v28  ;;  %v664_v54 = vpop.permute.xlu1 %663 }
 0x212   :  { %6014 = vrsqrt.f32 %v440_v41  ;;  %v5023_v62 = vpop.f32.mrb[10].mxu1  ;;  %v593_v31 = vmul.f32 %v528_v1, %v497_v16 }
 0x213   :  { %v6005_v36 = vpop.eup %6004  ;;  %v455_v42 = vadd.f32 1e-05, %v5023_v62  ;;  %v449_v50 = vpop.f32.mrb[11].mxu1  ;;  %5038 = vmatprep.mubr.msk.f32.mxu0 %vm713_vm0, %v686_v30  ;;  %v592_v60 = vmul.f32 %v6725_v0, %v496_v55 }
 0x214   :  { %v6007_v45 = vpop.eup %6006  ;;  %v450_v58 = vadd.f32 1e-05, %v449_v50  ;;  %5039 = vmatmul.mubr.msk.f32.vlgmr.msra.gmra.mrb[16].mxu0 %vm713_vm0, %v687_v20  ;;  %v499_v47 = vmul.f32 %v6005_v36, %v6645_v35  ;;  %v689_v61 = vadd.f32 %v6729_v3, %v593_v31  ;;  %v573_v16 = vpop.permute.xlu0 %572 }
 0x215   :  { %6016 = vrsqrt.f32 %v455_v42  ;;  %v688_v41 = vadd.f32 %v6727_v2, %v592_v60  ;;  %v498_v24 = vmul.f32 %v6007_v45, %v6648_v37 }
 0x216   :  { %6018 = vrsqrt.f32 %v450_v58  ;;  %v5026_v28 = vpop.f32.mrb[12].mxu1  ;;  %v595_v63 = vmul.f32 %v6733_v6, %v499_v47 }
 0x217   :  { %v6009_v0 = vpop.eup %6008  ;;  %v465_v1 = vadd.f32 1e-05, %v5026_v28  ;;  %v459_v56 = vpop.f32.mrb[13].mxu1  ;;  %5041 = vmatprep.mubr.msk.f32.mxu0 %vm713_vm0, %v688_v41  ;;  %v594_v13 = vmul.f32 %v6731_v5, %v498_v24 }
 0x218   :  { %v6011_v35 = vpop.eup %6010  ;;  %v460_v29 = vadd.f32 1e-05, %v459_v56  ;;  %5042 = vmatmul.mubr.msk.f32.gmra.mrb[18].mxu0 %vm713_vm0, %v689_v61  ;;  %v501_v2 = vmul.f32 %v6009_v0, %v6655_v44  ;;  %v691_v30 = vadd.f32 %v6737_v9, %v595_v63  ;;  %v578_v5 = vpop.permute.xlu1 %577 }
 0x219   :  { %6020 = vrsqrt.f32 %v465_v1  ;;  %v690_v37 = vadd.f32 %v6735_v8, %v594_v13  ;;  %v500_v3 = vmul.f32 %v6011_v35, %v6658_v46  ;;  %v669_v58 = vpop.permute.xlu0 %668 }
 0x21a   :  { %6022 = vrsqrt.f32 %v460_v29  ;;  %v5029_v6 = vpop.f32.mrb[14].mxu1  ;;  %v597_v55 = vmul.f32 %v6741_v19, %v501_v2 }
 0x21b   :  { %v6013_v20 = vpop.eup %6012  ;;  %v475_v62 = vadd.f32 1e-05, %v5029_v6  ;;  %v469_v31 = vpop.f32.mrb[15].mxu1  ;;  %5044 = vmatprep.mubr.msk.f32.mxu0 %vm713_vm0, %v690_v37  ;;  %v596_v44 = vmul.f32 %v6739_v15, %v500_v3 }
 0x21c   :  { %v6015_v36 = vpop.eup %6014  ;;  %v470_v42 = vadd.f32 1e-05, %v469_v31  ;;  %5045 = vmatmul.mubr.msk.f32.gmra.mrb[20].mxu0 %vm713_vm0, %v691_v30  ;;  %v503_v46 = vmul.f32 %v6013_v20, %v6665_v53  ;;  %v693_v19 = vadd.f32 %v6745_v27, %v597_v55  ;;  %v674_v47 = vpop.permute.xlu1 %673 }
 0x21d   :  { %6024 = vrsqrt.f32 %v475_v62  ;;  %v692_v8 = vadd.f32 %v6743_v22, %v596_v44  ;;  %v502_v9 = vmul.f32 %v6015_v36, %v6668_v10  ;;  %v583_v61 = vpop.permute.xlu0 %582 }
 0x21e   :  { %6026 = vrsqrt.f32 %v470_v42  ;;  %v599_v50 = vmul.f32 %v6749_v43, %v503_v46 }
 0x21f   :  { %v6017_v60 = vpop.eup %6016  ;;  %5047 = vmatprep.mubr.msk.f32.mxu0 %vm713_vm0, %v692_v8  ;;  %v598_v15 = vmul.f32 %v6747_v39, %v502_v9 }
 0x220   :  { %v6019_v45 = vpop.eup %6018  ;;  %5048 = vmatmul.mubr.msk.f32.gmra.mrb[22].mxu0 %vm713_vm0, %v693_v19  ;;  %v505_v53 = vmul.f32 %v6017_v60, %v6675_v21  ;;  %v695_v27 = vadd.f32 %v6753_v59, %v599_v50  ;;  %v588_v0 = vpop.permute.xlu1 %587 }
 0x221   :  { %v694_v22 = vadd.f32 %v6751_v57, %v598_v15  ;;  %v504_v10 = vmul.f32 %v6019_v45, %v6678_v23 }
 0x222   :  { %v601_v43 = vmul.f32 %v6759_v48, %v505_v53 }
 0x223   :  { %v6021_v41 = vpop.eup %6020  ;;  %5050 = vmatprep.mubr.msk.f32.mxu0 %vm713_vm0, %v694_v22  ;;  %v600_v39 = vmul.f32 %v6757_v52, %v504_v10 }
 0x224   :  { %v6023_v24 = vpop.eup %6022  ;;  %5051 = vmatmul.mubr.msk.f32.gmra.mrb[24].mxu0 %vm713_vm0, %v695_v27  ;;  %v507_v28 = vmul.f32 %v6021_v41, %v6685_v32  ;;  %v697_v23 = vadd.f32 %v664_v54, %v601_v43  ;;  %v679_v54 = vpop.permute.xlu0 %678 }
 0x225   :  { %v696_v21 = vadd.f32 %v6765_v14, %v600_v39  ;;  %v506_v57 = vmul.f32 %v6023_v24, %v6688_v38  ;;  %v684_v35 = vpop.permute.xlu1 %683 }
 0x226   :  { %v603_v63 = vmul.f32 %v578_v5, %v507_v28 }
 0x227   :  { %v6025_v59 = vpop.eup %6024  ;;  %5053 = vmatprep.mubr.msk.f32.mxu0 %vm713_vm0, %v696_v21  ;;  %v602_v48 = vmul.f32 %v573_v16, %v506_v57 }
 0x228   :  { %v6027_v1 = vpop.eup %6026  ;;  %5054 = vmatmul.mubr.msk.f32.gmra.mrb[26].mxu0 %vm713_vm0, %v697_v23  ;;  %v509_v52 = vmul.f32 %v6025_v59, %v6695_v49  ;;  %v699_v13 = vadd.f32 %v674_v47, %v603_v63  ;;  %v6814_v49 = vld [vmem:[%s9073_s7] ss:$0 sm:$0xff] }
 0x229   :  { %v698_v56 = vadd.f32 %v669_v58, %v602_v48  ;;  %v508_v32 = vmul.f32 %v6027_v1, %v6698_v51 }
 0x22a   :  { %v605_v14 = vmul.f32 %v588_v0, %v509_v52 }
 0x22b   :  { %5056 = vmatprep.mubr.msk.f32.mxu0 %vm713_vm0, %v698_v56  ;;  %v604_v38 = vmul.f32 %v583_v61, %v508_v32 }
 0x22c   :  { %5057 = vmatmul.mubr.msk.f32.gmra.mrb[28].mxu0 %vm713_vm0, %v699_v13  ;;  %v701_v2 = vadd.f32 %v684_v35, %v605_v14 }
 0x22d   :  { %v700_v29 = vadd.f32 %v679_v54, %v604_v38 }
 0x22f   :  { %5059 = vmatprep.mubr.msk.f32.mxu0 %vm713_vm0, %v700_v29 }
 0x230   :  { %5060 = vmatmul.mubr.msk.f32.gmra.mrb[30].mxu0 %vm713_vm0, %v701_v2 }
 0x2e7   :  { %v5040_v51 = vpop.f32.mrb[16].mxu0 }
 0x2e8   :  { %v834_v37 = vadd.f32 %v5040_v51, %v6814_v49  ;;  %v828_v3 = vpop.f32.mrb[17].mxu0 }
 0x2e9   :  { %v829_v16 = vadd.f32 %v6814_v49, %v828_v3 }
 0x2ea   :  { %v6818_v6 = vmul.f32 0.70710677, %v834_v37  ;;  %v6844_v59 = vmul.f32 0.5, %v834_v37 }
 0x2eb   :  { %v6820_v30 = vmul.f32 0.70710677, %v829_v16  ;;  %v5043_v55 = vpop.f32.mrb[18].mxu0  ;;  %v6855_v14 = vmul.f32 0.5, %v829_v16 }
 0x2ec   :  { %v924_v20 = vand.u32 2147483647, %v6818_v6  ;;  %v844_v5 = vadd.f32 %v5043_v55, %v6814_v49  ;;  %v838_v62 = vpop.f32.mrb[19].mxu0  ;;  %vm1244_vm1 = vcmp.ge.f32.partialorder %v6818_v6, 0.0 }
 0x2ed   :  { %v923_v31 = vand.u32 2147483647, %v6820_v30  ;;  %v6826_v44 = vadd.f32 %v6814_v49, %v838_v62  ;;  %vm1243_vm2 = vcmp.ge.f32.partialorder %v6820_v30, 0.0 }
 0x2ee   :  { %v940_v36 = vmul.f32 0.3275911, %v924_v20  ;;  %v6828_v42 = vmul.f32 0.70710677, %v844_v5  ;;  %v1148_v46 = vsub.f32 0.0, %v924_v20  ;;  %v6857_v38 = vmul.f32 0.5, %v844_v5 }
 0x2ef   :  { %v939_v8 = vmul.f32 0.3275911, %v923_v31  ;;  %v6831_v9 = vmul.f32 0.70710677, %v6826_v44  ;;  %v1147_v50 = vsub.f32 0.0, %v923_v31  ;;  %v5046_v15 = vpop.f32.mrb[20].mxu0 }
 0x2f0   :  { %v956_v19 = vadd.f32 1.0, %v940_v36  ;;  %v926_v60 = vand.u32 2147483647, %v6828_v42  ;;  %v848_v53 = vpop.f32.mrb[21].mxu0  ;;  %v1164_v22 = vmul.f32 %v1148_v46, %v924_v20  ;;  %v6836_v24 = vadd.f32 %v5046_v15, %v6814_v49 }
 0x2f1   :  { %v955_v45 = vadd.f32 1.0, %v939_v8  ;;  %v925_v58 = vand.u32 2147483647, %v6831_v9  ;;  %v1163_v43 = vmul.f32 %v1147_v50, %v923_v31  ;;  %v6839_v57 = vadd.f32 %v6814_v49, %v848_v53 }
 0x2f2   :  { %6028 = vrcp.f32 %v956_v19  ;;  %v942_v47 = vmul.f32 0.3275911, %v926_v60  ;;  %v1150_v39 = vsub.f32 0.0, %v926_v60  ;;  %v6842_v23 = vmul.f32 0.70710677, %v6836_v24 }
 0x2f3   :  { %6030 = vrcp.f32 %v955_v45  ;;  %v941_v10 = vmul.f32 0.3275911, %v925_v58  ;;  %v5049_v27 = vpop.f32.mrb[22].mxu0  ;;  %v1149_v61 = vsub.f32 0.0, %v925_v58  ;;  %v1181_v63 = vmul.f32 1.442695, %v1164_v22 }
 0x2f4   :  { %v958_v41 = vadd.f32 1.0, %v942_v47  ;;  %v858_v28 = vpop.f32.mrb[23].mxu0  ;;  %v6847_v0 = vmul.f32 0.70710677, %v6839_v57  ;;  %v1179_v1 = vmul.f32 1.442695, %v1163_v43  ;;  %v1166_v52 = vmul.f32 %v1150_v39, %v926_v60 }
 0x2f5   :  { %v957_v21 = vadd.f32 1.0, %v941_v10  ;;  %v928_v56 = vand.u32 2147483647, %v6842_v23  ;;  %v6851_v32 = vadd.f32 %v5049_v27, %v6814_v49  ;;  %v6861_v35 = vadd.f32 %v6814_v49, %v858_v28 }
 0x2f6   :  { %6032 = vrcp.f32 %v958_v41  ;;  %v927_v54 = vand.u32 2147483647, %v6847_v0  ;;  %v1165_v29 = vmul.f32 %v1149_v61, %v925_v58  ;;  %v1185_v5 = vmul.f32 1.442695, %v1166_v52 }
 0x2f7   :  { %6034 = vrcp.f32 %v957_v21  ;;  %v5052_v48 = vpop.f32.mrb[24].mxu0  ;;  %v944_v2 = vmul.f32 0.3275911, %v928_v56  ;;  %v1152_v51 = vsub.f32 0.0, %v928_v56  ;;  %v6864_v37 = vmul.f32 0.70710677, %v6851_v32 }
 0x2f8   :  { %v6853_v13 = vpop.f32.mrb[25].mxu0  ;;  %6036 = vpow2.f32 %v1181_v63  ;;  %v943_v3 = vmul.f32 0.3275911, %v927_v54  ;;  %v1151_v55 = vsub.f32 0.0, %v927_v54  ;;  %v6867_v20 = vmul.f32 0.70710677, %v6861_v35 }
 0x2f9   :  { %6038 = vpow2.f32 %v1179_v1  ;;  %v960_v62 = vadd.f32 1.0, %v944_v2  ;;  %v930_v31 = vand.u32 2147483647, %v6864_v37  ;;  %v1168_v19 = vmul.f32 %v1152_v51, %v928_v56 }
 0x2fa   :  { %v959_v50 = vadd.f32 1.0, %v943_v3  ;;  %v929_v60 = vand.u32 2147483647, %v6867_v20  ;;  %v1183_v58 = vmul.f32 1.442695, %v1165_v29  ;;  %v1167_v22 = vmul.f32 %v1151_v55, %v927_v54 }
 0x2fb   :  { %v6872_v36 = vpop.f32.mrb[26].mxu0  ;;  %6040 = vrcp.f32 %v960_v62  ;;  %v946_v53 = vmul.f32 0.3275911, %v930_v31  ;;  %v1154_v10 = vsub.f32 0.0, %v930_v31  ;;  %v1189_v52 = vmul.f32 1.442695, %v1168_v19 }
 0x2fc   :  { %v6869_v16 = vpop.eup %6028  ;;  %v6878_v15 = vpop.f32.mrb[27].mxu0  ;;  %6042 = vrcp.f32 %v959_v50  ;;  %v945_v28 = vmul.f32 0.3275911, %v929_v60  ;;  %v1187_v55 = vmul.f32 1.442695, %v1167_v22  ;;  %v1153_v50 = vsub.f32 0.0, %v929_v60 }
 0x2fd   :  { %v6874_v46 = vpop.eup %6030  ;;  %v1004_v8 = vmul.f32 1.0614054, %v6869_v16  ;;  %6044 = vpow2.f32 %v1185_v5  ;;  %v962_v39 = vadd.f32 1.0, %v946_v53  ;;  %v1170_v56 = vmul.f32 %v1154_v10, %v930_v31 }
 0x2fe   :  { %v1003_v45 = vmul.f32 1.0614054, %v6874_v46  ;;  %v961_v2 = vadd.f32 1.0, %v945_v28  ;;  %v6894_v5 = vadd.f32 %v5052_v48, %v6814_v49  ;;  %vm1246_vm4 = vcmp.ge.f32.partialorder %v6828_v42, 0.0 }
 0x2ff   :  { %v1020_v47 = vadd.f32 -1.4531521, %v1004_v8  ;;  %v6881_v27 = vpop.f32.mrb[28].mxu0  ;;  %6046 = vrcp.f32 %v962_v39  ;;  %v1169_v39 = vmul.f32 %v1153_v50, %v929_v60  ;;  %vm1245_vm5 = vcmp.ge.f32.partialorder %v6831_v9, 0.0 }
 0x300   :  { %v6883_v43 = vpop.eup %6032  ;;  %v1019_v41 = vadd.f32 -1.4531521, %v1003_v45  ;;  %v6885_v21 = vpop.f32.mrb[29].mxu0  ;;  %6048 = vrcp.f32 %v961_v2  ;;  %v6905_v28 = vmul.f32 0.70710677, %v6894_v5  ;;  %vm1248_vm6 = vcmp.ge.f32.partialorder %v6842_v23, 0.0 }
 0x301   :  { %v6887_v61 = vpop.eup %6034  ;;  %v1036_v63 = vmul.f32 %v6869_v16, %v1020_v47  ;;  %v1006_v1 = vmul.f32 1.0614054, %v6883_v43  ;;  %6050 = vpow2.f32 %v1183_v58  ;;  %v1193_v47 = vmul.f32 1.442695, %v1170_v56 }
 0x302   :  { %v1035_v54 = vmul.f32 %v6874_v46, %v1019_v41  ;;  %v1005_v29 = vmul.f32 1.0614054, %v6887_v61  ;;  %v6037_v19 = vpop.eup %6036  ;;  %6052 = vpow2.f32 %v1189_v52  ;;  %v1191_v2 = vmul.f32 1.442695, %v1169_v39 }
 0x303   :  { %v1052_v51 = vadd.f32 1.4214138, %v1036_v63  ;;  %v1022_v3 = vadd.f32 -1.4531521, %v1006_v1  ;;  %v6896_v45 = vpop.f32.mrb[30].mxu0  ;;  %v6039_v41 = vpop.eup %6038  ;;  %6054 = vpow2.f32 %v1187_v55  ;;  %vm1247_vm7 = vcmp.ge.f32.partialorder %v6847_v0, 0.0 }
 0x304   :  { %v1051_v62 = vadd.f32 1.4214138, %v1035_v54  ;;  %v1021_v8 = vadd.f32 -1.4531521, %v1005_v29  ;;  %v6900_v10 = vpop.f32.mrb[31].mxu0  ;;  %v6908_v54 = vmul.f32 0.5, %v6826_v44  ;;  %6056 = vpow2.f32 %v1193_v47 }
 0x305   :  { %v1068_v31 = vmul.f32 %v6869_v16, %v1052_v51  ;;  %v1038_v53 = vmul.f32 %v6883_v43, %v1022_v3  ;;  %v6910_v29 = vpop.eup %6040  ;;  %6058 = vpow2.f32 %v1191_v2  ;;  %vm1250_vm8 = vcmp.ge.f32.partialorder %v6864_v37, 0.0 }
 0x306   :  { %v1067_v22 = vmul.f32 %v6874_v46, %v1051_v62  ;;  %v1037_v48 = vmul.f32 %v6887_v61, %v1021_v8  ;;  %v6912_v51 = vpop.eup %6042  ;;  %v1008_v62 = vmul.f32 1.0614054, %v6910_v29  ;;  %vm1249_vm9 = vcmp.ge.f32.partialorder %v6867_v20, 0.0 }
 0x307   :  { %v1084_v63 = vadd.f32 -0.28449672, %v1068_v31  ;;  %v1054_v1 = vadd.f32 1.4214138, %v1038_v53  ;;  %v6045_v8 = vpop.eup %6044  ;;  %v1007_v50 = vmul.f32 1.0614054, %v6912_v51 }
 0x308   :  { %v1083_v58 = vadd.f32 -0.28449672, %v1067_v22  ;;  %v1053_v56 = vadd.f32 1.4214138, %v1037_v48  ;;  %v6921_v31 = vand.u32 2147483647, %v6905_v28  ;;  %v6925_v48 = vadd.f32 %v6814_v49, %v6853_v13 }
 0x309   :  { %v1100_v3 = vmul.f32 %v6869_v16, %v1084_v63  ;;  %v1070_v60 = vmul.f32 %v6883_v43, %v1054_v1  ;;  %v1024_v22 = vadd.f32 -1.4531521, %v1008_v62  ;;  %v6927_v39 = vpop.eup %6046  ;;  %v1023_v1 = vadd.f32 -1.4531521, %v1007_v50 }
 0x30a   :  { %v1099_v44 = vmul.f32 %v6874_v46, %v1083_v58  ;;  %v1069_v52 = vmul.f32 %v6887_v61, %v1053_v56  ;;  %v6935_v13 = vpop.eup %6048  ;;  %v6941_v2 = vmul.f32 0.3275911, %v6921_v31  ;;  %vm1252_vm10 = vcmp.ge.f32.partialorder %v6905_v28, 0.0 }
 0x30b   :  { %v1116_v55 = vadd.f32 0.2548296, %v1100_v3  ;;  %v1086_v53 = vadd.f32 -0.28449672, %v1070_v60  ;;  %v1040_v3 = vmul.f32 %v6910_v29, %v1024_v22  ;;  %v1010_v60 = vmul.f32 1.0614054, %v6927_v39 }
 0x30c   :  { %v1115_v47 = vadd.f32 0.2548296, %v1099_v44  ;;  %v1085_v63 = vadd.f32 -0.28449672, %v1069_v52  ;;  %v1039_v44 = vmul.f32 %v6912_v51, %v1023_v1 }
 0x30d   :  { %v1132_v58 = vmul.f32 %v6869_v16, %v1116_v55  ;;  %v1102_v56 = vmul.f32 %v6883_v43, %v1086_v53  ;;  %v6051_v16 = vpop.eup %6050  ;;  %v1056_v55 = vadd.f32 1.4214138, %v1040_v3  ;;  %v1026_v53 = vadd.f32 -1.4531521, %v1010_v60 }
 0x30e   :  { %v1131_v62 = vmul.f32 %v6874_v46, %v1115_v47  ;;  %v1101_v40 = vmul.f32 %v6887_v61, %v1085_v63  ;;  %v1055_v33 = vadd.f32 1.4214138, %v1039_v44  ;;  %v1009_v46 = vmul.f32 1.0614054, %v6935_v13  ;;  %v6053_v47 = vpop.eup %6052 }
 0x30f   :  { %v1212_v52 = vmul.f32 %v6037_v19, %v1132_v58  ;;  %v1118_v50 = vadd.f32 0.2548296, %v1102_v56  ;;  %v1072_v26 = vmul.f32 %v6910_v29, %v1056_v55  ;;  %v1042_v19 = vmul.f32 %v6927_v39, %v1026_v53  ;;  %v6055_v58 = vpop.eup %6054 }
 0x310   :  { %v1211_v22 = vmul.f32 %v6039_v41, %v1131_v62  ;;  %v1117_v34 = vadd.f32 0.2548296, %v1101_v40  ;;  %v1071_v3 = vmul.f32 %v6912_v51, %v1055_v33  ;;  %v1025_v40 = vadd.f32 -1.4531521, %v1009_v46  ;;  %v6057_v60 = vpop.eup %6056 }
 0x311   :  { %v1228_v63 = vsub.f32 1.0, %v1212_v52  ;;  %v1134_v1 = vmul.f32 %v6883_v43, %v1118_v50  ;;  %v1088_v25 = vadd.f32 -0.28449672, %v1072_v26  ;;  %v1058_v52 = vadd.f32 1.4214138, %v1042_v19  ;;  %v6956_v33 = vpop.eup %6058 }
 0x312   :  { %v1227_v56 = vsub.f32 1.0, %v1211_v22  ;;  %v1133_v41 = vmul.f32 %v6887_v61, %v1117_v34  ;;  %v1087_v50 = vadd.f32 -0.28449672, %v1071_v3  ;;  %v1041_v17 = vmul.f32 %v6935_v13, %v1025_v40 }
 0x313   :  { %v1260_v62 = vsub.f32 0.0, %v1228_v63  ;;  %v1214_v44 = vmul.f32 %v6045_v8, %v1134_v1  ;;  %v1104_v22 = vmul.f32 %v6910_v29, %v1088_v25  ;;  %v1074_v34 = vmul.f32 %v6927_v39, %v1058_v52 }
 0x314   :  { %v1259_v18 = vsub.f32 0.0, %v1227_v56  ;;  %v1213_v43 = vmul.f32 %v6051_v16, %v1133_v41  ;;  %v1103_v16 = vmul.f32 %v6912_v51, %v1087_v50  ;;  %v1057_v3 = vadd.f32 1.4214138, %v1041_v17 }
 0x315   :  { %v1276_v55 = vsel %vm1244_vm1, %v1228_v63, %v1260_v62  ;;  %v1230_v53 = vsub.f32 1.0, %v1214_v44  ;;  %v1120_v19 = vadd.f32 0.2548296, %v1104_v22  ;;  %v1090_v41 = vadd.f32 -0.28449672, %v1074_v34 }
 0x316   :  { %v1308_v61 = vadd.f32 1.0, %v1276_v55  ;;  %v1275_v26 = vsel %vm1243_vm2, %v1227_v56, %v1259_v18  ;;  %v1229_v8 = vsub.f32 1.0, %v1213_v43  ;;  %v1119_v25 = vadd.f32 0.2548296, %v1103_v16 }
 0x317   :  { %v1307_v46 = vadd.f32 1.0, %v1275_v26  ;;  %v1262_v1 = vsub.f32 0.0, %v1230_v53  ;;  %v1136_v18 = vmul.f32 %v6910_v29, %v1120_v19  ;;  %v1106_v56 = vmul.f32 %v6927_v39, %v1090_v41 }
 0x318   :  { %v6962_v6 = vmul.f32 %v1308_v61, %v6844_v59  ;;  %v1261_v63 = vsub.f32 0.0, %v1229_v8  ;;  %v1135_v52 = vmul.f32 %v6912_v51, %v1119_v25  ;;  %v964_v51 = vadd.f32 1.0, %v6941_v2 }
 0x319   :  { %v6965_v40 = vmul.f32 %v1307_v46, %v6855_v14  ;;  %v1278_v30 = vsel %vm1246_vm4, %v1230_v53, %v1262_v1  ;;  %v1216_v43 = vmul.f32 %v6053_v47, %v1136_v18  ;;  %v1122_v42 = vadd.f32 0.2548296, %v1106_v56 }
 0x31a   :  { %v1343_v62 = vsel %vm1341_vm3, %v6962_v6, 0.0  ;;  %v1310_v44 = vadd.f32 1.0, %v1278_v30  ;;  %v1277_v59 = vsel %vm1245_vm5, %v1229_v8, %v1261_v63  ;;  %v1215_v55 = vmul.f32 %v6055_v58, %v1135_v52 }
 0x31b   :  { %v1342_v17 = vsel %vm1341_vm3, %v6965_v40, 0.0  ;;  %v1309_v14 = vadd.f32 1.0, %v1277_v59  ;;  %v1073_v53 = vmul.f32 %v6935_v13, %v1057_v3  ;;  %v1232_v9 = vsub.f32 1.0, %v1216_v43 }
 0x31c   :  { %v1344_v50 = vadd.f32 %v1343_v62, %v1342_v17  ;;  %v6979_v29 = vmul.f32 %v1310_v44, %v6857_v38  ;;  %v1138_v34 = vmul.f32 %v6927_v39, %v1122_v42  ;;  %v1296_v47 = vmul.f32 0.5, %v6836_v24 }
 0x31d   :  { %v6983_v22 = vmul.f32 %v1309_v14, %v6908_v54  ;;  %v1231_v61 = vsub.f32 1.0, %v1215_v55  ;;  %v1089_v26 = vadd.f32 -0.28449672, %v1073_v53  ;;  %v1264_v58 = vsub.f32 0.0, %v1232_v9 }
 0x31e   :  { %v1218_v8 = vmul.f32 %v6057_v60, %v1138_v34  ;;  %6060 = vrcp.f32 %v964_v51  ;;  %v1347_v2 = vsel %vm1341_vm3, %v6979_v29, 0.0  ;;  %v6996_v24 = vmul.f32 0.70710677, %v6925_v48 }
 0x31f   :  { %v1345_v38 = vsel %vm1341_vm3, %v6983_v22, 0.0  ;;  %v1263_v54 = vsub.f32 0.0, %v1231_v61  ;;  %v1105_v39 = vmul.f32 %v6935_v13, %v1089_v26  ;;  %v1280_v23 = vsel %vm1248_vm6, %v1232_v9, %v1264_v58 }
 0x320   :  { %v1346_v16 = vadd.f32 %v1345_v38, %v1344_v50  ;;  %v1234_v46 = vsub.f32 1.0, %v1218_v8  ;;  %v1312_v1 = vadd.f32 1.0, %v1280_v23  ;;  %v1295_v60 = vmul.f32 0.5, %v6839_v57 }
 0x321   :  { %v1279_v19 = vsel %vm1247_vm7, %v1231_v61, %v1263_v54  ;;  %v1121_v63 = vadd.f32 0.2548296, %v1105_v39  ;;  %v931_v0 = vand.u32 2147483647, %v6996_v24  ;;  %v7002_v3 = vadd.f32 %v6872_v36, %v6814_v49 }
 0x322   :  { %v1348_v41 = vadd.f32 %v1347_v2, %v1346_v16  ;;  %v1311_v25 = vadd.f32 1.0, %v1279_v19  ;;  %v1266_v30 = vsub.f32 0.0, %v1234_v46  ;;  %v1156_v56 = vsub.f32 0.0, %v6921_v31 }
 0x323   :  { %v1137_v18 = vmul.f32 %v6935_v13, %v1121_v63  ;;  %v7006_v62 = vmul.f32 %v1312_v1, %v1296_v47  ;;  %v947_v59 = vmul.f32 0.3275911, %v931_v0  ;;  %v7012_v57 = vadd.f32 %v6814_v49, %v6878_v15 }
 0x324   :  { %v7008_v44 = vmul.f32 %v1311_v25, %v1295_v60  ;;  %v7019_v13 = vmul.f32 0.70710677, %v7002_v3  ;;  %v1282_v43 = vsel %vm1250_vm8, %v1234_v46, %v1266_v30  ;;  %v1172_v50 = vmul.f32 %v1156_v56, %v6921_v31 }
 0x325   :  { %v1217_v52 = vmul.f32 %v6956_v33, %v1137_v18  ;;  %v963_v17 = vadd.f32 1.0, %v947_v59  ;;  %v1351_v15 = vsel %vm1341_vm3, %v7006_v62, 0.0  ;;  %v7028_v53 = vmul.f32 0.70710677, %v7012_v57 }
 0x326   :  { %v1349_v36 = vsel %vm1341_vm3, %v7008_v44, 0.0  ;;  %v934_v33 = vand.u32 2147483647, %v7019_v13  ;;  %v7033_v51 = vadd.f32 %v6881_v27, %v6814_v49  ;;  %v1298_v31 = vmul.f32 0.5, %v6851_v32 }
 0x327   :  { %v1350_v14 = vadd.f32 %v1349_v36, %v1348_v41  ;;  %v1233_v42 = vsub.f32 1.0, %v1217_v52  ;;  %6062 = vrcp.f32 %v963_v17  ;;  %v1314_v47 = vadd.f32 1.0, %v1282_v43 }
 0x328   :  { %v7022_v55 = vpop.eup %6060  ;;  %v950_v61 = vmul.f32 0.3275911, %v934_v33  ;;  %v1155_v58 = vsub.f32 0.0, %v931_v0  ;;  %v933_v8 = vand.u32 2147483647, %v7028_v53  ;;  %v1297_v16 = vmul.f32 0.5, %v6861_v35 }
 0x329   :  { %v1265_v37 = vsub.f32 0.0, %v1233_v42  ;;  %v1352_v9 = vadd.f32 %v1351_v15, %v1350_v14  ;;  %v1012_v34 = vmul.f32 1.0614054, %v7022_v55  ;;  %v1197_v39 = vmul.f32 1.442695, %v1172_v50 }
 0x32a   :  { %v966_v2 = vadd.f32 1.0, %v950_v61  ;;  %v949_v27 = vmul.f32 0.3275911, %v933_v8  ;;  %v7041_v46 = vmul.f32 0.70710677, %v7033_v51  ;;  %v7043_v32 = vmul.f32 %v1314_v47, %v1298_v31 }
 0x32b   :  { %v1281_v26 = vsel %vm1249_vm9, %v1233_v42, %v1265_v37  ;;  %v1028_v38 = vadd.f32 -1.4531521, %v1012_v34  ;;  %v1171_v19 = vmul.f32 %v1155_v58, %v931_v0  ;;  %v1158_v60 = vsub.f32 0.0, %v934_v33 }
 0x32c   :  { %v1313_v54 = vadd.f32 1.0, %v1281_v26  ;;  %6064 = vrcp.f32 %v966_v2  ;;  %v965_v41 = vadd.f32 1.0, %v949_v27  ;;  %v936_v63 = vand.u32 2147483647, %v7041_v46 }
 0x32d   :  { %v1044_v23 = vmul.f32 %v7022_v55, %v1028_v38  ;;  %6066 = vpow2.f32 %v1197_v39  ;;  %v7052_v25 = vadd.f32 %v6814_v49, %v6885_v21  ;;  %v1355_v0 = vsel %vm1341_vm3, %v7043_v32, 0.0 }
 0x32e   :  { %v7045_v20 = vmul.f32 %v1313_v54, %v1297_v16  ;;  %6068 = vrcp.f32 %v965_v41  ;;  %v952_v59 = vmul.f32 0.3275911, %v936_v63  ;;  %v1195_v14 = vmul.f32 1.442695, %v1171_v19 }
 0x32f   :  { %v1060_v1 = vadd.f32 1.4214138, %v1044_v23  ;;  %v7060_v52 = vmul.f32 0.70710677, %v7052_v25  ;;  %v1174_v21 = vmul.f32 %v1158_v60, %v934_v33  ;;  %v1157_v42 = vsub.f32 0.0, %v933_v8 }
 0x330   :  { %v1353_v35 = vsel %vm1341_vm3, %v7045_v20, 0.0  ;;  %v968_v50 = vadd.f32 1.0, %v952_v59  ;;  %v7069_v34 = vadd.f32 %v6896_v45, %v6814_v49  ;;  %v7073_v31 = vadd.f32 %v6814_v49, %v6900_v10 }
 0x331   :  { %v1354_v30 = vadd.f32 %v1353_v35, %v1352_v9  ;;  %v1076_v18 = vmul.f32 %v7022_v55, %v1060_v1  ;;  %v7055_v56 = vpop.eup %6062  ;;  %v935_v15 = vand.u32 2147483647, %v7060_v52  ;;  %v1201_v58 = vmul.f32 1.442695, %v1174_v21 }
 0x332   :  { %v1011_v17 = vmul.f32 1.0614054, %v7055_v56  ;;  %6070 = vrcp.f32 %v968_v50  ;;  %v7077_v26 = vmul.f32 0.70710677, %v7069_v34  ;;  %v1173_v16 = vmul.f32 %v1157_v42, %v933_v8 }
 0x333   :  { %v1092_v36 = vadd.f32 -0.28449672, %v1076_v18  ;;  %v7063_v43 = vadd.f32 %v1355_v0, %v1354_v30  ;;  %v951_v47 = vmul.f32 0.3275911, %v935_v15  ;;  %6072 = vpow2.f32 %v1195_v14 }
 0x334   :  { %v1027_v9 = vadd.f32 -1.4531521, %v1011_v17  ;;  %v7082_v45 = vmul.f32 0.70710677, %v7073_v31  ;;  %v938_v2 = vand.u32 2147483647, %v7077_v26 }
 0x335   :  { %v1108_v37 = vmul.f32 %v7022_v55, %v1092_v36  ;;  %v967_v54 = vadd.f32 1.0, %v951_v47  ;;  %v1160_v27 = vsub.f32 0.0, %v936_v63  ;;  %v1159_v1 = vsub.f32 0.0, %v935_v15 }
 0x336   :  { %v1043_v33 = vmul.f32 %v7055_v56, %v1027_v9  ;;  %v7079_v38 = vpop.eup %6064  ;;  %v937_v19 = vand.u32 2147483647, %v7082_v45  ;;  %v954_v30 = vmul.f32 0.3275911, %v938_v2  ;;  %v1162_v18 = vsub.f32 0.0, %v938_v2 }
 0x337   :  { %v1124_v61 = vadd.f32 0.2548296, %v1108_v37  ;;  %v1014_v39 = vmul.f32 1.0614054, %v7079_v38  ;;  %v6067_v23 = vpop.eup %6066  ;;  %6074 = vrcp.f32 %v967_v54  ;;  %v1199_v42 = vmul.f32 1.442695, %v1173_v16 }
 0x338   :  { %v1059_v10 = vadd.f32 1.4214138, %v1043_v33  ;;  %v7088_v41 = vpop.eup %6068  ;;  %6076 = vpow2.f32 %v1201_v58  ;;  %v953_v0 = vmul.f32 0.3275911, %v937_v19  ;;  %v970_v14 = vadd.f32 1.0, %v954_v30 }
 0x339   :  { %v1140_v49 = vmul.f32 %v7022_v55, %v1124_v61  ;;  %v1030_v60 = vadd.f32 -1.4531521, %v1014_v39  ;;  %v1013_v55 = vmul.f32 1.0614054, %v7088_v41  ;;  %v1176_v50 = vmul.f32 %v1160_v27, %v936_v63 }
 0x33a   :  { %v1075_v35 = vmul.f32 %v7055_v56, %v1059_v10  ;;  %v969_v37 = vadd.f32 1.0, %v953_v0  ;;  %v1175_v61 = vmul.f32 %v1159_v1, %v935_v15  ;;  %6078 = vrcp.f32 %v970_v14 }
 0x33b   :  { %v1220_v8 = vmul.f32 %v6067_v23, %v1140_v49  ;;  %v1046_v17 = vmul.f32 %v7079_v38, %v1030_v60  ;;  %v1029_v21 = vadd.f32 -1.4531521, %v1013_v55  ;;  %v1178_v49 = vmul.f32 %v1162_v18, %v938_v2 }
 0x33c   :  { %v1091_v36 = vadd.f32 -0.28449672, %v1075_v35  ;;  %v7094_v33 = vpop.eup %6070  ;;  %6080 = vrcp.f32 %v969_v37  ;;  %v1300_v39 = vmul.f32 0.5, %v6894_v5  ;;  %v1161_v15 = vsub.f32 0.0, %v937_v19 }
 0x33d   :  { %v1236_v59 = vsub.f32 1.0, %v1220_v8  ;;  %v1062_v47 = vadd.f32 1.4214138, %v1046_v17  ;;  %v1045_v54 = vmul.f32 %v7088_v41, %v1029_v21  ;;  %v6073_v10 = vpop.eup %6072  ;;  %v1016_v63 = vmul.f32 1.0614054, %v7094_v33 }
 0x33e   :  { %v1107_v9 = vmul.f32 %v7055_v56, %v1091_v36  ;;  %6082 = vpow2.f32 %v1199_v42  ;;  %v1205_v60 = vmul.f32 1.442695, %v1176_v50  ;;  %v1203_v55 = vmul.f32 1.442695, %v1175_v61 }
 0x33f   :  { %v1268_v58 = vsub.f32 0.0, %v1236_v59  ;;  %v1078_v16 = vmul.f32 %v7079_v38, %v1062_v47  ;;  %v1061_v27 = vadd.f32 1.4214138, %v1045_v54  ;;  %v1032_v35 = vadd.f32 -1.4531521, %v1016_v63 }
 0x340   :  { %v1123_v23 = vadd.f32 0.2548296, %v1107_v9  ;;  %v1209_v18 = vmul.f32 1.442695, %v1178_v49  ;;  %vm1251_vm11 = vcmp.ge.f32.partialorder %v6996_v24, 0.0  ;;  %v1177_v42 = vmul.f32 %v1161_v15, %v937_v19 }
 0x341   :  { %v1094_v8 = vadd.f32 -0.28449672, %v1078_v16  ;;  %v7102_v2 = vpop.eup %6074  ;;  %v1284_v30 = vsel %vm1252_vm10, %v1236_v59, %v1268_v58  ;;  %v1077_v5 = vmul.f32 %v7088_v41, %v1061_v27  ;;  %v1048_v28 = vmul.f32 %v7094_v33, %v1032_v35 }
 0x342   :  { %v1139_v1 = vmul.f32 %v7055_v56, %v1123_v23  ;;  %v1015_v17 = vmul.f32 1.0614054, %v7102_v2  ;;  %v6077_v14 = vpop.eup %6076  ;;  %v1299_v56 = vmul.f32 0.5, %v6925_v48  ;;  %6084 = vpow2.f32 %v1205_v60 }
 0x343   :  { %v1110_v36 = vmul.f32 %v7079_v38, %v1094_v8  ;;  %v1093_v21 = vadd.f32 -0.28449672, %v1077_v5  ;;  %v1064_v37 = vadd.f32 1.4214138, %v1048_v28  ;;  %v1316_v9 = vadd.f32 1.0, %v1284_v30 }
 0x344   :  { %v1219_v0 = vmul.f32 %v6073_v10, %v1139_v1  ;;  %vm1254_vm12 = vcmp.ge.f32.partialorder %v7019_v13, 0.0  ;;  %v1031_v61 = vadd.f32 -1.4531521, %v1015_v17  ;;  %6086 = vpow2.f32 %v1203_v55  ;;  %v7112_v58 = vpop.eup %6078 }
 0x345   :  { %v1126_v59 = vadd.f32 0.2548296, %v1110_v36  ;;  %v1109_v47 = vmul.f32 %v7088_v41, %v1093_v21  ;;  %v1080_v48 = vmul.f32 %v7094_v33, %v1064_v37  ;;  %6088 = vpow2.f32 %v1209_v18 }
 0x346   :  { %v1235_v50 = vsub.f32 1.0, %v1219_v0  ;;  %v7116_v19 = vpop.eup %6080  ;;  %v1047_v23 = vmul.f32 %v7102_v2, %v1031_v61  ;;  %v1018_v16 = vmul.f32 1.0614054, %v7112_v58  ;;  %v1207_v63 = vmul.f32 1.442695, %v1177_v42 }
 0x347   :  { %v1142_v49 = vmul.f32 %v7079_v38, %v1126_v59  ;;  %v1125_v10 = vadd.f32 0.2548296, %v1109_v47  ;;  %vm1253_vm13 = vcmp.ge.f32.partialorder %v7028_v53, 0.0  ;;  %v1096_v1 = vadd.f32 -0.28449672, %v1080_v48 }
 0x348   :  { %v1267_v54 = vsub.f32 0.0, %v1235_v50  ;;  %v1017_v38 = vmul.f32 1.0614054, %v7116_v19  ;;  %v6083_v8 = vpop.eup %6082  ;;  %v1063_v30 = vadd.f32 1.4214138, %v1047_v23  ;;  %v7125_v55 = vmul.f32 %v1316_v9, %v1300_v39 }
 0x349   :  { %v1222_v15 = vmul.f32 %v6077_v14, %v1142_v49  ;;  %v1141_v60 = vmul.f32 %v7088_v41, %v1125_v10  ;;  %v1034_v5 = vadd.f32 -1.4531521, %v1018_v16  ;;  %v1112_v0 = vmul.f32 %v7094_v33, %v1096_v1 }
 0x34a   :  { %v1283_v27 = vsel %vm1251_vm11, %v1235_v50, %v1267_v54  ;;  %v1033_v36 = vadd.f32 -1.4531521, %v1017_v38  ;;  %v1079_v17 = vmul.f32 %v7102_v2, %v1063_v30  ;;  %6090 = vpow2.f32 %v1207_v63 }
 0x34b   :  { %v1315_v35 = vadd.f32 1.0, %v1283_v27  ;;  %v1238_v18 = vsub.f32 1.0, %v1222_v15  ;;  %v1221_v28 = vmul.f32 %v6083_v8, %v1141_v60  ;;  %v1050_v14 = vmul.f32 %v7112_v58, %v1034_v5 }
 0x34c   :  { %v1128_v42 = vadd.f32 0.2548296, %v1112_v0  ;;  %v1049_v50 = vmul.f32 %v7116_v19, %v1033_v36  ;;  %v1095_v59 = vadd.f32 -0.28449672, %v1079_v17  ;;  %v6085_v9 = vpop.eup %6084  ;;  %v1359_v48 = vsel %vm1341_vm3, %v7125_v55, 0.0 }
 0x34d   :  { %v7128_v24 = vmul.f32 %v1315_v35, %v1299_v56  ;;  %v1270_v21 = vsub.f32 0.0, %v1238_v18  ;;  %v1237_v39 = vsub.f32 1.0, %v1221_v28  ;;  %v1066_v37 = vadd.f32 1.4214138, %v1050_v14 }
 0x34e   :  { %v1144_v61 = vmul.f32 %v7094_v33, %v1128_v42  ;;  %v1065_v54 = vadd.f32 1.4214138, %v1049_v50  ;;  %v6087_v49 = vpop.eup %6086  ;;  %v1111_v23 = vmul.f32 %v7102_v2, %v1095_v59  ;;  %v1302_v13 = vmul.f32 0.5, %v7002_v3 }
 0x34f   :  { %v1357_v41 = vsel %vm1341_vm3, %v7128_v24, 0.0  ;;  %v1286_v47 = vsel %vm1254_vm12, %v1238_v18, %v1270_v21  ;;  %v1269_v10 = vsub.f32 0.0, %v1237_v39  ;;  %v1082_v16 = vmul.f32 %v7112_v58, %v1066_v37  ;;  %v6089_v63 = vpop.eup %6088 }
 0x350   :  { %v1358_v56 = vadd.f32 %v1357_v41, %v7063_v43  ;;  %v1318_v27 = vadd.f32 1.0, %v1286_v47  ;;  %v1224_v1 = vmul.f32 %v6085_v9, %v1144_v61  ;;  %v1081_v43 = vmul.f32 %v7116_v19, %v1065_v54 }
 0x351   :  { %v1285_v33 = vsel %vm1253_vm13, %v1237_v39, %v1269_v10  ;;  %v1127_v38 = vadd.f32 0.2548296, %v1111_v23  ;;  %v1098_v8 = vadd.f32 -0.28449672, %v1082_v16  ;;  %v1301_v35 = vmul.f32 0.5, %v7012_v57 }
 0x352   :  { %v1360_v15 = vadd.f32 %v1359_v48, %v1358_v56  ;;  %v1317_v60 = vadd.f32 1.0, %v1285_v33  ;;  %v1240_v30 = vsub.f32 1.0, %v1224_v1  ;;  %v1097_v5 = vadd.f32 -0.28449672, %v1081_v43 }
 0x353   :  { %v1143_v18 = vmul.f32 %v7102_v2, %v1127_v38  ;;  %v1114_v0 = vmul.f32 %v7112_v58, %v1098_v8  ;;  %v7150_v36 = vmul.f32 %v1318_v27, %v1302_v13  ;;  %vm1256_vm14 = vcmp.ge.f32.partialorder %v7041_v46, 0.0 }
 0x354   :  { %v7152_v28 = vmul.f32 %v1317_v60, %v1301_v35  ;;  %v1272_v17 = vsub.f32 0.0, %v1240_v30  ;;  %v1113_v3 = vmul.f32 %v7116_v19, %v1097_v5  ;;  %v6091_v21 = vpop.eup %6090  ;;  %vm1255_vm15 = vcmp.ge.f32.partialorder %v7060_v52, 0.0 }
 0x355   :  { %v1223_v53 = vmul.f32 %v6087_v49, %v1143_v18  ;;  %v1130_v14 = vadd.f32 0.2548296, %v1114_v0  ;;  %v1363_v59 = vsel %vm1341_vm3, %v7150_v36, 0.0  ;;  %v1304_v48 = vmul.f32 0.5, %v7033_v51 }
 0x356   :  { %v1361_v57 = vsel %vm1341_vm3, %v7152_v28, 0.0  ;;  %v1129_v42 = vadd.f32 0.2548296, %v1113_v3  ;;  %v1288_v2 = vsel %vm1256_vm14, %v1240_v30, %v1272_v17  ;;  %v1303_v10 = vmul.f32 0.5, %v7052_v25 }
 0x357   :  { %v1362_v50 = vadd.f32 %v1361_v57, %v1360_v15  ;;  %v1239_v41 = vsub.f32 1.0, %v1223_v53  ;;  %v1146_v39 = vmul.f32 %v7112_v58, %v1130_v14  ;;  %v1320_v61 = vadd.f32 1.0, %v1288_v2 }
 0x358   :  { %v1145_v37 = vmul.f32 %v7116_v19, %v1129_v42  ;;  %vm1258_vm1 = vcmp.ge.f32.partialorder %v7077_v26, 0.0  ;;  %vm1257_vm2 = vcmp.ge.f32.partialorder %v7082_v45, 0.0  ;;  %v1306_v51 = vmul.f32 0.5, %v7069_v34  ;;  %v1523_v45 = vld [vmem:[%s9130_s21] sm:$0xff] }
 0x359   :  { %v1271_v9 = vsub.f32 0.0, %v1239_v41  ;;  %v1364_v56 = vadd.f32 %v1363_v59, %v1362_v50  ;;  %v1226_v47 = vmul.f32 %v6089_v63, %v1146_v39  ;;  %v1336_v27 = vmul.f32 %v1320_v61, %v1304_v48  ;;  %5094 = vmatprep.mubr.f32.mxu1 %v1523_v45  ;;  %v4372_v34 = vld [vmem:[%s9130_s21 + $0x80] sm:$0xff] }
 0x35a   :  { %v1225_v54 = vmul.f32 %v6091_v21, %v1145_v37  ;;  %v1305_v25 = vmul.f32 0.5, %v7073_v31  ;;  %5150 = vmatprep.mubr.f32.mxu0 %v4372_v34 }
 0x35b   :  { %v1287_v49 = vsel %vm1255_vm15, %v1239_v41, %v1271_v9  ;;  %v1242_v46 = vsub.f32 1.0, %v1226_v47  ;;  %v1367_v38 = vsel %vm1341_vm3, %v1336_v27, 0.0 }
 0x35c   :  { %v1319_v23 = vadd.f32 1.0, %v1287_v49  ;;  %v1241_v58 = vsub.f32 1.0, %v1225_v54 }
 0x35d   :  { %v1274_v16 = vsub.f32 0.0, %v1242_v46 }
 0x35e   :  { %v1335_v15 = vmul.f32 %v1319_v23, %v1303_v10  ;;  %v1273_v19 = vsub.f32 0.0, %v1241_v58 }
 0x35f   :  { %v1290_v1 = vsel %vm1258_vm1, %v1242_v46, %v1274_v16 }
 0x360   :  { %v1365_v52 = vsel %vm1341_vm3, %v1335_v15, 0.0  ;;  %v1322_v63 = vadd.f32 1.0, %v1290_v1  ;;  %v1289_v43 = vsel %vm1257_vm2, %v1241_v58, %v1273_v19 }
 0x361   :  { %v1366_v13 = vadd.f32 %v1365_v52, %v1364_v56  ;;  %v1321_v33 = vadd.f32 1.0, %v1289_v43 }
 0x362   :  { %v1338_v8 = vmul.f32 %v1322_v63, %v1306_v51 }
 0x363   :  { %v1337_v35 = vmul.f32 %v1321_v33, %v1305_v25  ;;  %v1368_v60 = vadd.f32 %v1367_v38, %v1366_v13 }
 0x364   :  { %v1371_v5 = vsel %vm1341_vm3, %v1338_v8, 0.0 }
 0x365   :  { %v1369_v26 = vsel %vm1341_vm3, %v1337_v35, 0.0 }
 0x366   :  { %v1370_v30 = vadd.f32 %v1369_v26, %v1368_v60 }
 0x368   :  { %v1372_v18 = vadd.f32 %v1371_v5, %v1370_v30 }
 0x36a   :  { %v1373_v31 = vrot.slane %v1372_v18, 4 }
 0x36c   :  { %v1374_v0 = vadd.f32 %v1373_v31, %v1372_v18 }
 0x36e   :  { %v1375_v17 = vrot.slane %v1374_v0, 2 }
 0x370   :  { %v1376_v3 = vadd.f32 %v1375_v17, %v1374_v0 }
 0x372   :  { %v1377_v53 = vrot.slane %v1376_v3, 1 }
 0x374   :  { %v1378_v14 = vadd.f32 %v1377_v53, %v1376_v3 }
 0x376   :  { %v1380_v21 = vmul.f32 0.0078125, %v1378_v14 }
 0x378   :  { %v7180_v57 = vsub.f32 %v6965_v40, %v1380_v21  ;;  %v7183_v42 = vsub.f32 %v6962_v6, %v1380_v21  ;;  %v7186_v50 = vsub.f32 %v6983_v22, %v1380_v21  ;;  %v7189_v2 = vsub.f32 %v6979_v29, %v1380_v21 }
 0x379   :  { %v7192_v41 = vsub.f32 %v7008_v44, %v1380_v21  ;;  %v7195_v39 = vsub.f32 %v7006_v62, %v1380_v21  ;;  %v7198_v59 = vsub.f32 %v7045_v20, %v1380_v21  ;;  %v7201_v40 = vsub.f32 %v7043_v32, %v1380_v21 }
 0x37a   :  { %v7204_v6 = vsub.f32 %v7128_v24, %v1380_v21  ;;  %v7207_v22 = vsub.f32 %v7125_v55, %v1380_v21  ;;  %v7210_v29 = vsub.f32 %v7152_v28, %v1380_v21  ;;  %v7213_v44 = vsub.f32 %v7150_v36, %v1380_v21 }
 0x37b   :  { %v7215_v62 = vsub.f32 %v1335_v15, %v1380_v21  ;;  %v7217_v37 = vsub.f32 %v1336_v27, %v1380_v21  ;;  %v7219_v20 = vsub.f32 %v1337_v35, %v1380_v21  ;;  %v7221_v32 = vsub.f32 %v1338_v8, %v1380_v21 }
 0x37c   :  { %v1397_v24 = vmul.f32 %v7180_v57, %v7180_v57  ;;  %v1398_v55 = vmul.f32 %v7183_v42, %v7183_v42  ;;  %v1399_v28 = vmul.f32 %v7186_v50, %v7186_v50  ;;  %v1400_v36 = vmul.f32 %v7189_v2, %v7189_v2 }
 0x37d   :  { %v1401_v61 = vmul.f32 %v7192_v41, %v7192_v41  ;;  %v1402_v46 = vmul.f32 %v7195_v39, %v7195_v39  ;;  %v1403_v23 = vmul.f32 %v7198_v59, %v7198_v59  ;;  %v1404_v27 = vmul.f32 %v7201_v40, %v7201_v40 }
 0x37e   :  { %v1413_v9 = vsel %vm1341_vm3, %v1397_v24, 0.0  ;;  %v1414_v56 = vsel %vm1341_vm3, %v1398_v55, 0.0  ;;  %v1416_v54 = vsel %vm1341_vm3, %v1399_v28, 0.0  ;;  %v1418_v48 = vsel %vm1341_vm3, %v1400_v36, 0.0 }
 0x37f   :  { %v1415_v47 = vadd.f32 %v1414_v56, %v1413_v9  ;;  %v1420_v58 = vsel %vm1341_vm3, %v1401_v61, 0.0  ;;  %v1422_v15 = vsel %vm1341_vm3, %v1402_v46, 0.0  ;;  %v1405_v1 = vmul.f32 %v7204_v6, %v7204_v6 }
 0x380   :  { %v1424_v52 = vsel %vm1341_vm3, %v1403_v23, 0.0  ;;  %v1406_v43 = vmul.f32 %v7207_v22, %v7207_v22  ;;  %v1426_v13 = vsel %vm1341_vm3, %v1404_v27, 0.0  ;;  %v1407_v25 = vmul.f32 %v7210_v29, %v7210_v29  ;;  %v7278_v27 = vld [vmem:[%s9074_s8] ss:$0 sm:$0xff] }
 0x381   :  { %v1417_v49 = vadd.f32 %v1416_v54, %v1415_v47  ;;  %v1428_v33 = vsel %vm1341_vm3, %v1405_v1, 0.0  ;;  %v1408_v8 = vmul.f32 %v7213_v44, %v7213_v44  ;;  %v1409_v26 = vmul.f32 %v7215_v62, %v7215_v62 }
 0x382   :  { %v1430_v35 = vsel %vm1341_vm3, %v1406_v43, 0.0  ;;  %v1432_v30 = vsel %vm1341_vm3, %v1407_v25, 0.0  ;;  %v1410_v5 = vmul.f32 %v7217_v37, %v7217_v37  ;;  %v1411_v31 = vmul.f32 %v7219_v20, %v7219_v20 }
 0x383   :  { %v1419_v10 = vadd.f32 %v1418_v48, %v1417_v49  ;;  %v1434_v18 = vsel %vm1341_vm3, %v1408_v8, 0.0  ;;  %v1436_v0 = vsel %vm1341_vm3, %v1409_v26, 0.0  ;;  %v1412_v3 = vmul.f32 %v7221_v32, %v7221_v32 }
 0x384   :  { %v1438_v53 = vsel %vm1341_vm3, %v1410_v5, 0.0  ;;  %v1440_v21 = vsel %vm1341_vm3, %v1411_v31, 0.0 }
 0x385   :  { %v1421_v16 = vadd.f32 %v1420_v58, %v1419_v10  ;;  %v1442_v55 = vsel %vm1341_vm3, %v1412_v3, 0.0 }
 0x387   :  { %v1423_v19 = vadd.f32 %v1422_v15, %v1421_v16 }
 0x389   :  { %v1425_v63 = vadd.f32 %v1424_v52, %v1423_v19 }
 0x38b   :  { %v1427_v51 = vadd.f32 %v1426_v13, %v1425_v63 }
 0x38d   :  { %v1429_v38 = vadd.f32 %v1428_v33, %v1427_v51 }
 0x38f   :  { %v1431_v60 = vadd.f32 %v1430_v35, %v1429_v38 }
 0x391   :  { %v1433_v45 = vadd.f32 %v1432_v30, %v1431_v60 }
 0x393   :  { %v1435_v34 = vadd.f32 %v1434_v18, %v1433_v45 }
 0x395   :  { %v1437_v17 = vadd.f32 %v1436_v0, %v1435_v34 }
 0x397   :  { %v1439_v14 = vadd.f32 %v1438_v53, %v1437_v17 }
 0x399   :  { %v1441_v24 = vadd.f32 %v1440_v21, %v1439_v14 }
 0x39b   :  { %v1443_v28 = vadd.f32 %v1442_v55, %v1441_v24 }
 0x39d   :  { %v1444_v36 = vrot.slane %v1443_v28, 4 }
 0x39f   :  { %v1445_v9 = vadd.f32 %v1444_v36, %v1443_v28 }
 0x3a1   :  { %v1446_v56 = vrot.slane %v1445_v9, 2 }
 0x3a3   :  { %v1447_v47 = vadd.f32 %v1446_v56, %v1445_v9 }
 0x3a5   :  { %v1448_v61 = vrot.slane %v1447_v47, 1 }
 0x3a7   :  { %v1449_v54 = vadd.f32 %v1448_v61, %v1447_v47 }
 0x3a9   :  { %v1450_v49 = vmul.f32 0.0078125, %v1449_v54 }
 0x3ab   :  { %v1451_v46 = vadd.f32 1e-05, %v1450_v49 }
 0x3ad   :  { %6092 = vrsqrt.f32 %v1451_v46  ;;  %v1524_v46 = vld [vmem:[%s9130_s21 + $0x8] sm:$0xff] }
 0x3b7   :  { %v6093_v48 = vpop.eup %6092 }
 0x3b8   :  { %v1453_v10 = vmul.f32 %v6093_v48, %v7180_v57  ;;  %v1454_v23 = vmul.f32 %v6093_v48, %v7183_v42  ;;  %v1455_v58 = vmul.f32 %v6093_v48, %v7186_v50  ;;  %v1456_v16 = vmul.f32 %v6093_v48, %v7189_v2 }
 0x3b9   :  { %v1457_v15 = vmul.f32 %v6093_v48, %v7192_v41  ;;  %v1458_v19 = vmul.f32 %v6093_v48, %v7195_v39  ;;  %v1459_v1 = vmul.f32 %v6093_v48, %v7198_v59  ;;  %v1460_v52 = vmul.f32 %v6093_v48, %v7201_v40 }
 0x3ba   :  { %v1461_v57 = vmul.f32 %v6093_v48, %v7204_v6  ;;  %v1462_v42 = vmul.f32 %v6093_v48, %v7207_v22  ;;  %v1463_v50 = vmul.f32 %v6093_v48, %v7210_v29  ;;  %v1464_v2 = vmul.f32 %v6093_v48, %v7213_v44  ;;  %v4370_v6 = vld [vmem:[%s9075_s9] ss:$0 sm:$0xff] }
 0x3bb   :  { %v1465_v63 = vmul.f32 %v6093_v48, %v7215_v62  ;;  %v1466_v43 = vmul.f32 %v6093_v48, %v7217_v37  ;;  %v1467_v41 = vmul.f32 %v6093_v48, %v7219_v20  ;;  %v1468_v39 = vmul.f32 %v6093_v48, %v7221_v32  ;;  %v4373_v48 = vld [vmem:[%s9130_s21 + $0x88] sm:$0xff] }
 0x3bc   :  { %v1475_v59 = vmul.f32 %v7278_v27, %v1453_v10  ;;  %v1476_v40 = vmul.f32 %v7278_v27, %v1454_v23  ;;  %v1477_v22 = vmul.f32 %v7278_v27, %v1455_v58  ;;  %v1478_v29 = vmul.f32 %v7278_v27, %v1456_v16  ;;  %v1525_v10 = vld [vmem:[%s9130_s21 + $0x10] sm:$0xff]  ;;  %v1526_v58 = vld [vmem:[%s9130_s21 + $0x18] sm:$0xff] }
 0x3bd   :  { %v1479_v37 = vmul.f32 %v7278_v27, %v1457_v15  ;;  %v1480_v20 = vmul.f32 %v7278_v27, %v1458_v19  ;;  %v1481_v25 = vmul.f32 %v7278_v27, %v1459_v1  ;;  %v1482_v33 = vmul.f32 %v7278_v27, %v1460_v52  ;;  %v4374_v23 = vld [vmem:[%s9130_s21 + $0x90] sm:$0xff]  ;;  %v4375_v16 = vld [vmem:[%s9130_s21 + $0x98] sm:$0xff]  ;;  %v4376_v15 = vld [vmem:[%s9130_s21 + $0xa0] sm:$0xff] }
 0x3be   :  { %v7299_v44 = vadd.f32 %v4370_v6, %v1475_v59  ;;  %v7301_v62 = vadd.f32 %v4370_v6, %v1476_v40  ;;  %v7305_v32 = vadd.f32 %v4370_v6, %v1477_v22  ;;  %v7307_v13 = vadd.f32 %v4370_v6, %v1478_v29  ;;  %v1528_v19 = vld [vmem:[%s9130_s21 + $0x28] sm:$0xff]  ;;  %v1529_v52 = vld [vmem:[%s9130_s21 + $0x30] sm:$0xff]  ;;  %v1534_v40 = vld [vmem:[%s9130_s21 + $0x58] sm:$0xff] }
 0x3bf   :  { %v7315_v38 = vadd.f32 %v4370_v6, %v1479_v37  ;;  %v7317_v8 = vadd.f32 %v4370_v6, %v1480_v20  ;;  %v1483_v60 = vmul.f32 %v7278_v27, %v1461_v57  ;;  %v1484_v26 = vmul.f32 %v7278_v27, %v1462_v42  ;;  %v4377_v1 = vld [vmem:[%s9130_s21 + $0xa8] sm:$0xff]  ;;  %v4378_v57 = vld [vmem:[%s9130_s21 + $0xb0] sm:$0xff]  ;;  %v1530_v42 = vld [vmem:[%s9130_s21 + $0x38] sm:$0xff] }
 0x3c0   :  { %v7311_v51 = vpack.c.bf16 %v7301_v62, %v7299_v44  ;;  %v7321_v35 = vpack.c.bf16 %v7307_v13, %v7305_v32  ;;  %v7331_v30 = vadd.f32 %v4370_v6, %v1481_v25  ;;  %v7333_v45 = vadd.f32 %v4370_v6, %v1482_v33  ;;  %v4382_v59 = vld [vmem:[%s9130_s21 + $0xd0] sm:$0xff]  ;;  %v1535_v22 = vld [vmem:[%s9130_s21 + $0x60] sm:$0xff]  ;;  %v1536_v37 = vld [vmem:[%s9130_s21 + $0x68] sm:$0xff] }
 0x3c1   :  { %v7337_v5 = vpack.c.bf16 %v7317_v8, %v7315_v38  ;;  %v1485_v18 = vmul.f32 %v7278_v27, %v1463_v50  ;;  %v1486_v34 = vmul.f32 %v7278_v27, %v1464_v2  ;;  %v7345_v31 = vadd.f32 %v4370_v6, %v1483_v60  ;;  %v4379_v50 = vld [vmem:[%s9130_s21 + $0xb8] sm:$0xff]  ;;  %v1531_v2 = vld [vmem:[%s9130_s21 + $0x40] sm:$0xff]  ;;  %v4385_v20 = vld [vmem:[%s9130_s21 + $0xe8] sm:$0xff] }
 0x3c2   :  { %5679 = vmatprep.subr.bf16.mxu1 %v7311_v51  ;;  %5711 = vmatprep.subr.bf16.mxu0 %v7311_v51  ;;  %v7347_v0 = vadd.f32 %v4370_v6, %v1484_v26  ;;  %v7351_v17 = vpack.c.bf16 %v7333_v45, %v7331_v30  ;;  %v1487_v3 = vmul.f32 %v7278_v27, %v1465_v63  ;;  %v4380_v63 = vld [vmem:[%s9130_s21 + $0xc0] sm:$0xff]  ;;  %v1537_v25 = vld [vmem:[%s9130_s21 + $0x70] sm:$0xff]  ;;  %v1538_v60 = vld [vmem:[%s9130_s21 + $0x78] sm:$0xff] }
 0x3c3   :  { %5681 = vmatpush3.bf16.msra.mxu1 %v7311_v51  ;;  %5713 = vmatpush3.bf16.msra.mxu0 %v7311_v51  ;;  %v1488_v53 = vmul.f32 %v7278_v27, %v1466_v43  ;;  %v7359_v14 = vadd.f32 %v4370_v6, %v1485_v18  ;;  %v7361_v21 = vadd.f32 %v4370_v6, %v1486_v34  ;;  %v1532_v43 = vld [vmem:[%s9130_s21 + $0x48] sm:$0xff]  ;;  %v4384_v29 = vld [vmem:[%s9130_s21 + $0xe0] sm:$0xff]  ;;  %v4386_v33 = vld [vmem:[%s9130_s21 + $0xf0] sm:$0xff] }
 0x3c4   :  { %5683 = vmatprep.subr.bf16.mxu1 %v7321_v35  ;;  %5715 = vmatprep.subr.bf16.mxu0 %v7321_v35  ;;  %v7365_v24 = vpack.c.bf16 %v7347_v0, %v7345_v31  ;;  %v1489_v55 = vmul.f32 %v7278_v27, %v1467_v41  ;;  %v1490_v28 = vmul.f32 %v7278_v27, %v1468_v39  ;;  %v1527_v27 = vld [vmem:[%s9130_s21 + $0x20] sm:$0xff]  ;;  %v4381_v41 = vld [vmem:[%s9130_s21 + $0xc8] sm:$0xff]  ;;  %v1533_v39 = vld [vmem:[%s9130_s21 + $0x50] sm:$0xff] }
 0x3c5   :  { %v7373_v36 = vadd.f32 %v4370_v6, %v1487_v3  ;;  %v7375_v9 = vadd.f32 %v4370_v6, %v1488_v53  ;;  %v7379_v56 = vpack.c.bf16 %v7361_v21, %v7359_v14  ;;  %v4387_v26 = vld [vmem:[%s9130_s21 + $0xf8] sm:$0xff]  ;;  %v4388_v18 = vld [vmem:[%s9130_s21 + $0x100] sm:$0xff]  ;;  %v4389_v3 = vld [vmem:[%s9130_s21 + $0x108] sm:$0xff] }
 0x3c6   :  { %v7385_v47 = vadd.f32 %v4370_v6, %v1489_v55  ;;  %v7387_v61 = vadd.f32 %v4370_v6, %v1490_v28  ;;  %v4383_v6 = vld [vmem:[%s9130_s21 + $0xd8] sm:$0xff]  ;;  %v4404_v34 = vld [vmem:[%s9130_s21 + $0x180] sm:$0xff]  ;;  %v4405_v53 = vld [vmem:[%s9130_s21 + $0x188] sm:$0xff] }
 0x3c7   :  { %5685 = vmatpush3.bf16.msra.mxu1 %v7321_v35  ;;  %5717 = vmatpush3.bf16.msra.mxu0 %v7321_v35  ;;  %v7391_v54 = vpack.c.bf16 %v7375_v9, %v7373_v36  ;;  %v4390_v55 = vld [vmem:[%s9130_s21 + $0x110] sm:$0xff] }
 0x3c8   :  { %5687 = vmatprep.subr.bf16.mxu1 %v7337_v5  ;;  %5719 = vmatprep.subr.bf16.mxu0 %v7337_v5  ;;  %9131 = vst [vmem:[#allocation21_spill] sm:$0xff] %v7385_v47  ;;  %9132 = vst [vmem:[#allocation22_spill] sm:$0xff] %v7387_v61  ;;  %v7399_v49 = vpack.c.bf16 %v7387_v61, %v7385_v47  ;;  %v4406_v28 = vld [vmem:[%s9130_s21 + $0x190] sm:$0xff] }
 0x3cb   :  { %5689 = vmatpush3.bf16.msra.mxu1 %v7337_v5  ;;  %5721 = vmatpush3.bf16.msra.mxu0 %v7337_v5 }
 0x3cc   :  { %5691 = vmatprep.subr.bf16.mxu1 %v7351_v17  ;;  %5723 = vmatprep.subr.bf16.mxu0 %v7351_v17 }
 0x3cf   :  { %5693 = vmatpush3.bf16.msra.mxu1 %v7351_v17  ;;  %5725 = vmatpush3.bf16.msra.mxu0 %v7351_v17 }
 0x3d0   :  { %5695 = vmatprep.subr.bf16.mxu1 %v7365_v24  ;;  %5727 = vmatprep.subr.bf16.mxu0 %v7365_v24 }
 0x3d3   :  { %5697 = vmatpush3.bf16.msra.mxu1 %v7365_v24  ;;  %5729 = vmatpush3.bf16.msra.mxu0 %v7365_v24 }
 0x3d4   :  { %5699 = vmatprep.subr.bf16.mxu1 %v7379_v56  ;;  %5731 = vmatprep.subr.bf16.mxu0 %v7379_v56 }
 0x3d7   :  { %5701 = vmatpush3.bf16.msra.mxu1 %v7379_v56  ;;  %5733 = vmatpush3.bf16.msra.mxu0 %v7379_v56 }
 0x3d8   :  { %5703 = vmatprep.subr.bf16.mxu1 %v7391_v54  ;;  %5735 = vmatprep.subr.bf16.mxu0 %v7391_v54 }
 0x3db   :  { %5705 = vmatpush3.bf16.msra.mxu1 %v7391_v54  ;;  %5737 = vmatpush3.bf16.msra.mxu0 %v7391_v54 }
 0x3dc   :  { %5707 = vmatprep.subr.bf16.mxu1 %v7399_v49  ;;  %5739 = vmatprep.subr.bf16.mxu0 %v7399_v49 }
 0x3df   :  { %5709 = vmatpush3.bf16.msra.mxu1 %v7399_v49  ;;  %5741 = vmatpush3.bf16.msra.mxu0 %v7399_v49 }
 0x3e0   :  { %5743 = vmatprep.subr.bf16.mxu1 %v7311_v51  ;;  %5775 = vmatprep.subr.bf16.mxu0 %v7311_v51 }
 0x3e2   :  { %5095 = vmatmul.mubr.f32.vlgmr.msra.gmra.mrb[16].mxu1 %v1524_v46  ;;  %5151 = vmatmul.mubr.f32.vlgmr.msra.gmra.mrb[32].mxu0 %v4373_v48  ;;  %v4391_v46 = vld [vmem:[%s9130_s21 + $0x118] sm:$0xff] }
 0x3e3   :  { %5745 = vmatpush3.bf16.msra.mxu1 %v7311_v51  ;;  %5777 = vmatpush3.bf16.msra.mxu0 %v7311_v51  ;;  %v4407_v48 = vld [vmem:[%s9130_s21 + $0x198] sm:$0xff] }
 0x3e4   :  { %5747 = vmatprep.subr.bf16.mxu1 %v7321_v35  ;;  %5779 = vmatprep.subr.bf16.mxu0 %v7321_v35 }
 0x3e5   :  { %5097 = vmatprep.mubr.f32.mxu1 %v1525_v10  ;;  %5153 = vmatprep.mubr.f32.mxu0 %v4374_v23  ;;  %v4392_v10 = vld [vmem:[%s9130_s21 + $0x120] sm:$0xff] }
 0x3e6   :  { %5098 = vmatmul.mubr.f32.gmra.mrb[18].mxu1 %v1526_v58  ;;  %5154 = vmatmul.mubr.f32.gmra.mrb[34].mxu0 %v4375_v16  ;;  %v4408_v23 = vld [vmem:[%s9130_s21 + $0x1a0] sm:$0xff]  ;;  %v4393_v58 = vld [vmem:[%s9130_s21 + $0x128] sm:$0xff] }
 0x3e7   :  { %5749 = vmatpush3.bf16.msra.mxu1 %v7321_v35  ;;  %5781 = vmatpush3.bf16.msra.mxu0 %v7321_v35  ;;  %v4409_v16 = vld [vmem:[%s9130_s21 + $0x1a8] sm:$0xff] }
 0x3e8   :  { %5751 = vmatprep.subr.bf16.mxu1 %v7337_v5  ;;  %5783 = vmatprep.subr.bf16.mxu0 %v7337_v5 }
 0x3e9   :  { %5100 = vmatprep.mubr.f32.mxu1 %v1527_v27  ;;  %5156 = vmatprep.mubr.f32.mxu0 %v4376_v15  ;;  %v4394_v27 = vld [vmem:[%s9130_s21 + $0x130] sm:$0xff] }
 0x3ea   :  { %5101 = vmatmul.mubr.f32.gmra.mrb[20].mxu1 %v1528_v19  ;;  %5157 = vmatmul.mubr.f32.gmra.mrb[36].mxu0 %v4377_v1  ;;  %v4410_v15 = vld [vmem:[%s9130_s21 + $0x1b0] sm:$0xff]  ;;  %v4395_v19 = vld [vmem:[%s9130_s21 + $0x138] sm:$0xff] }
 0x3eb   :  { %5753 = vmatpush3.bf16.msra.mxu1 %v7337_v5  ;;  %5785 = vmatpush3.bf16.msra.mxu0 %v7337_v5  ;;  %v4411_v1 = vld [vmem:[%s9130_s21 + $0x1b8] sm:$0xff] }
 0x3ec   :  { %5755 = vmatprep.subr.bf16.mxu1 %v7351_v17  ;;  %5787 = vmatprep.subr.bf16.mxu0 %v7351_v17 }
 0x3ed   :  { %5103 = vmatprep.mubr.f32.mxu1 %v1529_v52  ;;  %5159 = vmatprep.mubr.f32.mxu0 %v4378_v57  ;;  %v4396_v52 = vld [vmem:[%s9130_s21 + $0x140] sm:$0xff] }
 0x3ee   :  { %5104 = vmatmul.mubr.f32.gmra.mrb[22].mxu1 %v1530_v42  ;;  %5160 = vmatmul.mubr.f32.gmra.mrb[38].mxu0 %v4379_v50  ;;  %v4412_v57 = vld [vmem:[%s9130_s21 + $0x1c0] sm:$0xff]  ;;  %v4397_v42 = vld [vmem:[%s9130_s21 + $0x148] sm:$0xff] }
 0x3ef   :  { %5757 = vmatpush3.bf16.msra.mxu1 %v7351_v17  ;;  %5789 = vmatpush3.bf16.msra.mxu0 %v7351_v17  ;;  %v4413_v50 = vld [vmem:[%s9130_s21 + $0x1c8] sm:$0xff] }
 0x3f0   :  { %5759 = vmatprep.subr.bf16.mxu1 %v7365_v24  ;;  %5791 = vmatprep.subr.bf16.mxu0 %v7365_v24 }
 0x3f1   :  { %5106 = vmatprep.mubr.f32.mxu1 %v1531_v2  ;;  %5162 = vmatprep.mubr.f32.mxu0 %v4380_v63  ;;  %v4398_v2 = vld [vmem:[%s9130_s21 + $0x150] sm:$0xff] }
 0x3f2   :  { %5107 = vmatmul.mubr.f32.gmra.mrb[24].mxu1 %v1532_v43  ;;  %5163 = vmatmul.mubr.f32.gmra.mrb[40].mxu0 %v4381_v41  ;;  %v4414_v63 = vld [vmem:[%s9130_s21 + $0x1d0] sm:$0xff]  ;;  %v4399_v43 = vld [vmem:[%s9130_s21 + $0x158] sm:$0xff] }
 0x3f3   :  { %5761 = vmatpush3.bf16.msra.mxu1 %v7365_v24  ;;  %5793 = vmatpush3.bf16.msra.mxu0 %v7365_v24  ;;  %v4415_v41 = vld [vmem:[%s9130_s21 + $0x1d8] sm:$0xff] }
 0x3f4   :  { %5763 = vmatprep.subr.bf16.mxu1 %v7379_v56  ;;  %5795 = vmatprep.subr.bf16.mxu0 %v7379_v56 }
 0x3f5   :  { %5109 = vmatprep.mubr.f32.mxu1 %v1533_v39  ;;  %5165 = vmatprep.mubr.f32.mxu0 %v4382_v59  ;;  %v4400_v39 = vld [vmem:[%s9130_s21 + $0x160] sm:$0xff] }
 0x3f6   :  { %5110 = vmatmul.mubr.f32.gmra.mrb[26].mxu1 %v1534_v40  ;;  %5166 = vmatmul.mubr.f32.gmra.mrb[42].mxu0 %v4383_v6  ;;  %v4416_v59 = vld [vmem:[%s9130_s21 + $0x1e0] sm:$0xff]  ;;  %v4401_v40 = vld [vmem:[%s9130_s21 + $0x168] sm:$0xff] }
 0x3f7   :  { %5765 = vmatpush3.bf16.msra.mxu1 %v7379_v56  ;;  %5797 = vmatpush3.bf16.msra.mxu0 %v7379_v56  ;;  %v4417_v6 = vld [vmem:[%s9130_s21 + $0x1e8] sm:$0xff] }
 0x3f8   :  { %5767 = vmatprep.subr.bf16.mxu1 %v7391_v54  ;;  %5799 = vmatprep.subr.bf16.mxu0 %v7391_v54 }
 0x3f9   :  { %5112 = vmatprep.mubr.f32.mxu1 %v1535_v22  ;;  %5168 = vmatprep.mubr.f32.mxu0 %v4384_v29  ;;  %v4402_v22 = vld [vmem:[%s9130_s21 + $0x170] sm:$0xff] }
 0x3fa   :  { %5113 = vmatmul.mubr.f32.gmra.mrb[28].mxu1 %v1536_v37  ;;  %5169 = vmatmul.mubr.f32.gmra.mrb[44].mxu0 %v4385_v20  ;;  %v4418_v29 = vld [vmem:[%s9130_s21 + $0x1f0] sm:$0xff]  ;;  %v4403_v37 = vld [vmem:[%s9130_s21 + $0x178] sm:$0xff] }
 0x3fb   :  { %5769 = vmatpush3.bf16.msra.mxu1 %v7391_v54  ;;  %5801 = vmatpush3.bf16.msra.mxu0 %v7391_v54  ;;  %v4419_v20 = vld [vmem:[%s9130_s21 + $0x1f8] sm:$0xff] }
 0x3fc   :  { %5771 = vmatprep.subr.bf16.mxu1 %v7399_v49  ;;  %5803 = vmatprep.subr.bf16.mxu0 %v7399_v49 }
 0x3fd   :  { %5115 = vmatprep.mubr.f32.mxu1 %v1537_v25  ;;  %5171 = vmatprep.mubr.f32.mxu0 %v4386_v33  ;;  %v4420_v25 = vld [vmem:[%s9130_s21 + $0x200] sm:$0xff] }
 0x3fe   :  { %5116 = vmatmul.mubr.f32.gmra.mrb[30].mxu1 %v1538_v60  ;;  %5172 = vmatmul.mubr.f32.gmra.mrb[46].mxu0 %v4387_v26  ;;  %v4436_v33 = vld [vmem:[%s9130_s21 + $0x280] sm:$0xff]  ;;  %v4421_v60 = vld [vmem:[%s9130_s21 + $0x208] sm:$0xff] }
 0x3ff   :  { %5773 = vmatpush3.bf16.msra.mxu1 %v7399_v49  ;;  %5805 = vmatpush3.bf16.msra.mxu0 %v7399_v49  ;;  %v4437_v26 = vld [vmem:[%s9130_s21 + $0x288] sm:$0xff] }
 0x400   :  { %5807 = vmatprep.subr.bf16.mxu1 %v7311_v51  ;;  %5839 = vmatprep.subr.bf16.mxu0 %v7311_v51 }
 0x401   :  { %5206 = vmatprep.mubr.f32.mxu1 %v4388_v18  ;;  %5262 = vmatprep.mubr.f32.mxu0 %v4404_v34  ;;  %v4422_v18 = vld [vmem:[%s9130_s21 + $0x210] sm:$0xff] }
 0x402   :  { %5207 = vmatmul.mubr.f32.vlgmr.msra.gmra.mrb[32].mxu1 %v4389_v3  ;;  %5263 = vmatmul.mubr.f32.vlgmr.msra.gmra.mrb[48].mxu0 %v4405_v53  ;;  %v4438_v34 = vld [vmem:[%s9130_s21 + $0x290] sm:$0xff]  ;;  %v4423_v3 = vld [vmem:[%s9130_s21 + $0x218] sm:$0xff] }
 0x403   :  { %5809 = vmatpush3.bf16.msra.mxu1 %v7311_v51  ;;  %5841 = vmatpush3.bf16.msra.mxu0 %v7311_v51  ;;  %v4439_v53 = vld [vmem:[%s9130_s21 + $0x298] sm:$0xff] }
 0x404   :  { %5811 = vmatprep.subr.bf16.mxu1 %v7321_v35  ;;  %5843 = vmatprep.subr.bf16.mxu0 %v7321_v35 }
 0x405   :  { %5209 = vmatprep.mubr.f32.mxu1 %v4390_v55  ;;  %5265 = vmatprep.mubr.f32.mxu0 %v4406_v28  ;;  %v4424_v55 = vld [vmem:[%s9130_s21 + $0x220] sm:$0xff] }
 0x406   :  { %5210 = vmatmul.mubr.f32.gmra.mrb[34].mxu1 %v4391_v46  ;;  %5266 = vmatmul.mubr.f32.gmra.mrb[50].mxu0 %v4407_v48  ;;  %v4440_v28 = vld [vmem:[%s9130_s21 + $0x2a0] sm:$0xff]  ;;  %v4425_v46 = vld [vmem:[%s9130_s21 + $0x228] sm:$0xff] }
 0x407   :  { %5813 = vmatpush3.bf16.msra.mxu1 %v7321_v35  ;;  %5845 = vmatpush3.bf16.msra.mxu0 %v7321_v35  ;;  %v4441_v48 = vld [vmem:[%s9130_s21 + $0x2a8] sm:$0xff] }
 0x408   :  { %5815 = vmatprep.subr.bf16.mxu1 %v7337_v5  ;;  %5847 = vmatprep.subr.bf16.mxu0 %v7337_v5 }
 0x409   :  { %5212 = vmatprep.mubr.f32.mxu1 %v4392_v10  ;;  %5268 = vmatprep.mubr.f32.mxu0 %v4408_v23  ;;  %v4426_v10 = vld [vmem:[%s9130_s21 + $0x230] sm:$0xff] }
 0x40a   :  { %5213 = vmatmul.mubr.f32.gmra.mrb[36].mxu1 %v4393_v58  ;;  %5269 = vmatmul.mubr.f32.gmra.mrb[52].mxu0 %v4409_v16  ;;  %v4442_v23 = vld [vmem:[%s9130_s21 + $0x2b0] sm:$0xff]  ;;  %v4427_v58 = vld [vmem:[%s9130_s21 + $0x238] sm:$0xff] }
 0x40b   :  { %5817 = vmatpush3.bf16.msra.mxu1 %v7337_v5  ;;  %5849 = vmatpush3.bf16.msra.mxu0 %v7337_v5  ;;  %v4443_v16 = vld [vmem:[%s9130_s21 + $0x2b8] sm:$0xff] }
 0x40c   :  { %5819 = vmatprep.subr.bf16.mxu1 %v7351_v17  ;;  %5851 = vmatprep.subr.bf16.mxu0 %v7351_v17 }
 0x40d   :  { %5215 = vmatprep.mubr.f32.mxu1 %v4394_v27  ;;  %5271 = vmatprep.mubr.f32.mxu0 %v4410_v15  ;;  %v4428_v27 = vld [vmem:[%s9130_s21 + $0x240] sm:$0xff] }
 0x40e   :  { %5216 = vmatmul.mubr.f32.gmra.mrb[38].mxu1 %v4395_v19  ;;  %5272 = vmatmul.mubr.f32.gmra.mrb[54].mxu0 %v4411_v1  ;;  %v4444_v15 = vld [vmem:[%s9130_s21 + $0x2c0] sm:$0xff]  ;;  %v4429_v19 = vld [vmem:[%s9130_s21 + $0x248] sm:$0xff] }
 0x40f   :  { %5821 = vmatpush3.bf16.msra.mxu1 %v7351_v17  ;;  %5853 = vmatpush3.bf16.msra.mxu0 %v7351_v17  ;;  %v4445_v1 = vld [vmem:[%s9130_s21 + $0x2c8] sm:$0xff] }
 0x410   :  { %5823 = vmatprep.subr.bf16.mxu1 %v7365_v24  ;;  %5855 = vmatprep.subr.bf16.mxu0 %v7365_v24 }
 0x411   :  { %5218 = vmatprep.mubr.f32.mxu1 %v4396_v52  ;;  %5274 = vmatprep.mubr.f32.mxu0 %v4412_v57  ;;  %v4430_v52 = vld [vmem:[%s9130_s21 + $0x250] sm:$0xff] }
 0x412   :  { %5219 = vmatmul.mubr.f32.gmra.mrb[40].mxu1 %v4397_v42  ;;  %5275 = vmatmul.mubr.f32.gmra.mrb[56].mxu0 %v4413_v50  ;;  %v4446_v57 = vld [vmem:[%s9130_s21 + $0x2d0] sm:$0xff]  ;;  %v4431_v42 = vld [vmem:[%s9130_s21 + $0x258] sm:$0xff] }
 0x413   :  { %5825 = vmatpush3.bf16.msra.mxu1 %v7365_v24  ;;  %5857 = vmatpush3.bf16.msra.mxu0 %v7365_v24  ;;  %v4447_v50 = vld [vmem:[%s9130_s21 + $0x2d8] sm:$0xff] }
 0x414   :  { %5827 = vmatprep.subr.bf16.mxu1 %v7379_v56  ;;  %5859 = vmatprep.subr.bf16.mxu0 %v7379_v56 }
 0x415   :  { %5221 = vmatprep.mubr.f32.mxu1 %v4398_v2  ;;  %5277 = vmatprep.mubr.f32.mxu0 %v4414_v63  ;;  %v4432_v2 = vld [vmem:[%s9130_s21 + $0x260] sm:$0xff] }
 0x416   :  { %5222 = vmatmul.mubr.f32.gmra.mrb[42].mxu1 %v4399_v43  ;;  %5278 = vmatmul.mubr.f32.gmra.mrb[58].mxu0 %v4415_v41  ;;  %v4448_v63 = vld [vmem:[%s9130_s21 + $0x2e0] sm:$0xff]  ;;  %v4433_v43 = vld [vmem:[%s9130_s21 + $0x268] sm:$0xff] }
 0x417   :  { %5829 = vmatpush3.bf16.msra.mxu1 %v7379_v56  ;;  %5861 = vmatpush3.bf16.msra.mxu0 %v7379_v56  ;;  %v4449_v41 = vld [vmem:[%s9130_s21 + $0x2e8] sm:$0xff] }
 0x418   :  { %5831 = vmatprep.subr.bf16.mxu1 %v7391_v54  ;;  %5863 = vmatprep.subr.bf16.mxu0 %v7391_v54 }
 0x419   :  { %5224 = vmatprep.mubr.f32.mxu1 %v4400_v39  ;;  %5280 = vmatprep.mubr.f32.mxu0 %v4416_v59  ;;  %v4434_v39 = vld [vmem:[%s9130_s21 + $0x270] sm:$0xff] }
 0x41a   :  { %5225 = vmatmul.mubr.f32.gmra.mrb[44].mxu1 %v4401_v40  ;;  %5281 = vmatmul.mubr.f32.gmra.mrb[60].mxu0 %v4417_v6  ;;  %v4450_v59 = vld [vmem:[%s9130_s21 + $0x2f0] sm:$0xff]  ;;  %v4435_v40 = vld [vmem:[%s9130_s21 + $0x278] sm:$0xff] }
 0x41b   :  { %5833 = vmatpush3.bf16.msra.mxu1 %v7391_v54  ;;  %5865 = vmatpush3.bf16.msra.mxu0 %v7391_v54  ;;  %v4451_v6 = vld [vmem:[%s9130_s21 + $0x2f8] sm:$0xff] }
 0x41c   :  { %5835 = vmatprep.subr.bf16.mxu1 %v7399_v49  ;;  %5867 = vmatprep.subr.bf16.mxu0 %v7399_v49 }
 0x41d   :  { %5227 = vmatprep.mubr.f32.mxu1 %v4402_v22  ;;  %5283 = vmatprep.mubr.f32.mxu0 %v4418_v29  ;;  %v4452_v22 = vld [vmem:[%s9130_s21 + $0x300] sm:$0xff] }
 0x41e   :  { %5228 = vmatmul.mubr.f32.gmra.mrb[46].mxu1 %v4403_v37  ;;  %5284 = vmatmul.mubr.f32.gmra.mrb[62].mxu0 %v4419_v20  ;;  %v4468_v29 = vld [vmem:[%s9130_s21 + $0x380] sm:$0xff]  ;;  %v4453_v37 = vld [vmem:[%s9130_s21 + $0x308] sm:$0xff] }
 0x41f   :  { %5837 = vmatpush3.bf16.msra.mxu1 %v7399_v49  ;;  %5869 = vmatpush3.bf16.msra.mxu0 %v7399_v49  ;;  %v4469_v20 = vld [vmem:[%s9130_s21 + $0x388] sm:$0xff] }
 0x420   :  { %5871 = vmatprep.subr.bf16.mxu1 %v7311_v51  ;;  %5903 = vmatprep.subr.bf16.mxu0 %v7311_v51 }
 0x421   :  { %5318 = vmatprep.mubr.f32.mxu1 %v4420_v25  ;;  %5374 = vmatprep.mubr.f32.mxu0 %v4436_v33  ;;  %v4454_v25 = vld [vmem:[%s9130_s21 + $0x310] sm:$0xff] }
 0x422   :  { %5319 = vmatmul.mubr.f32.vlgmr.msra.gmra.mrb[48].mxu1 %v4421_v60  ;;  %5375 = vmatmul.mubr.f32.vlgmr.msra.gmra.mrb[64].mxu0 %v4437_v26  ;;  %v4470_v33 = vld [vmem:[%s9130_s21 + $0x390] sm:$0xff]  ;;  %v4455_v60 = vld [vmem:[%s9130_s21 + $0x318] sm:$0xff] }
 0x423   :  { %5873 = vmatpush3.bf16.msra.mxu1 %v7311_v51  ;;  %5905 = vmatpush3.bf16.msra.mxu0 %v7311_v51  ;;  %v4471_v26 = vld [vmem:[%s9130_s21 + $0x398] sm:$0xff] }
 0x424   :  { %5875 = vmatprep.subr.bf16.mxu1 %v7321_v35  ;;  %5907 = vmatprep.subr.bf16.mxu0 %v7321_v35 }
 0x425   :  { %5321 = vmatprep.mubr.f32.mxu1 %v4422_v18  ;;  %5377 = vmatprep.mubr.f32.mxu0 %v4438_v34  ;;  %v4456_v18 = vld [vmem:[%s9130_s21 + $0x320] sm:$0xff]  ;;  %v4457_v34 = vld [vmem:[%s9130_s21 + $0x328] sm:$0xff] }
 0x426   :  { %5322 = vmatmul.mubr.f32.gmra.mrb[50].mxu1 %v4423_v3  ;;  %5378 = vmatmul.mubr.f32.gmra.mrb[66].mxu0 %v4439_v53  ;;  %v4473_v3 = vld [vmem:[%s9130_s21 + $0x3a8] sm:$0xff]  ;;  %v4458_v53 = vld [vmem:[%s9130_s21 + $0x330] sm:$0xff] }
 0x427   :  { %5877 = vmatpush3.bf16.msra.mxu1 %v7321_v35  ;;  %5909 = vmatpush3.bf16.msra.mxu0 %v7321_v35 }
 0x428   :  { %5879 = vmatprep.subr.bf16.mxu1 %v7337_v5  ;;  %5911 = vmatprep.subr.bf16.mxu0 %v7337_v5 }
 0x429   :  { %5324 = vmatprep.mubr.f32.mxu1 %v4424_v55  ;;  %5380 = vmatprep.mubr.f32.mxu0 %v4440_v28  ;;  %v4459_v55 = vld [vmem:[%s9130_s21 + $0x338] sm:$0xff] }
 0x42a   :  { %5325 = vmatmul.mubr.f32.gmra.mrb[52].mxu1 %v4425_v46  ;;  %5381 = vmatmul.mubr.f32.gmra.mrb[68].mxu0 %v4441_v48  ;;  %v4475_v28 = vld [vmem:[%s9130_s21 + $0x3b8] sm:$0xff]  ;;  %v4460_v46 = vld [vmem:[%s9130_s21 + $0x340] sm:$0xff]  ;;  %v4461_v48 = vld [vmem:[%s9130_s21 + $0x348] sm:$0xff] }
 0x42b   :  { %5881 = vmatpush3.bf16.msra.mxu1 %v7337_v5  ;;  %5913 = vmatpush3.bf16.msra.mxu0 %v7337_v5 }
 0x42c   :  { %5883 = vmatprep.subr.bf16.mxu1 %v7351_v17  ;;  %5915 = vmatprep.subr.bf16.mxu0 %v7351_v17 }
 0x42d   :  { %5327 = vmatprep.mubr.f32.mxu1 %v4426_v10  ;;  %5383 = vmatprep.mubr.f32.mxu0 %v4442_v23  ;;  %v4477_v10 = vld [vmem:[%s9130_s21 + $0x3c8] sm:$0xff]  ;;  %v4462_v23 = vld [vmem:[%s9130_s21 + $0x350] sm:$0xff] }
 0x42e   :  { %5328 = vmatmul.mubr.f32.gmra.mrb[54].mxu1 %v4427_v58  ;;  %5384 = vmatmul.mubr.f32.gmra.mrb[70].mxu0 %v4443_v16  ;;  %v4463_v58 = vld [vmem:[%s9130_s21 + $0x358] sm:$0xff] }
 0x42f   :  { %5885 = vmatpush3.bf16.msra.mxu1 %v7351_v17  ;;  %5917 = vmatpush3.bf16.msra.mxu0 %v7351_v17  ;;  %v4479_v16 = vld [vmem:[%s9130_s21 + $0x3d8] sm:$0xff] }
 0x430   :  { %5887 = vmatprep.subr.bf16.mxu1 %v7365_v24  ;;  %5919 = vmatprep.subr.bf16.mxu0 %v7365_v24 }
 0x431   :  { %5330 = vmatprep.mubr.f32.mxu1 %v4428_v27  ;;  %5386 = vmatprep.mubr.f32.mxu0 %v4444_v15  ;;  %v4464_v27 = vld [vmem:[%s9130_s21 + $0x360] sm:$0xff]  ;;  %v4465_v15 = vld [vmem:[%s9130_s21 + $0x368] sm:$0xff] }
 0x432   :  { %5331 = vmatmul.mubr.f32.gmra.mrb[56].mxu1 %v4429_v19  ;;  %5387 = vmatmul.mubr.f32.gmra.mrb[72].mxu0 %v4445_v1  ;;  %v4481_v19 = vld [vmem:[%s9130_s21 + $0x3e8] sm:$0xff]  ;;  %v4466_v1 = vld [vmem:[%s9130_s21 + $0x370] sm:$0xff] }
 0x433   :  { %5889 = vmatpush3.bf16.msra.mxu1 %v7365_v24  ;;  %5921 = vmatpush3.bf16.msra.mxu0 %v7365_v24 }
 0x434   :  { %5891 = vmatprep.subr.bf16.mxu1 %v7379_v56  ;;  %5923 = vmatprep.subr.bf16.mxu0 %v7379_v56 }
 0x435   :  { %5333 = vmatprep.mubr.f32.mxu1 %v4430_v52  ;;  %5389 = vmatprep.mubr.f32.mxu0 %v4446_v57  ;;  %v4467_v52 = vld [vmem:[%s9130_s21 + $0x378] sm:$0xff] }
 0x436   :  { %5334 = vmatmul.mubr.f32.gmra.mrb[58].mxu1 %v4431_v42  ;;  %5390 = vmatmul.mubr.f32.gmra.mrb[74].mxu0 %v4447_v50  ;;  %v4483_v57 = vld [vmem:[%s9130_s21 + $0x3f8] sm:$0xff]  ;;  %v4484_v42 = vld [vmem:[%s9130_s21 + $0x400] sm:$0xff]  ;;  %v4486_v50 = vld [vmem:[%s9130_s21 + $0x410] sm:$0xff] }
 0x437   :  { %5893 = vmatpush3.bf16.msra.mxu1 %v7379_v56  ;;  %5925 = vmatpush3.bf16.msra.mxu0 %v7379_v56 }
 0x438   :  { %5895 = vmatprep.subr.bf16.mxu1 %v7391_v54  ;;  %5927 = vmatprep.subr.bf16.mxu0 %v7391_v54 }
 0x439   :  { %5336 = vmatprep.mubr.f32.mxu1 %v4432_v2  ;;  %5392 = vmatprep.mubr.f32.mxu0 %v4448_v63  ;;  %v4487_v2 = vld [vmem:[%s9130_s21 + $0x418] sm:$0xff]  ;;  %v4488_v63 = vld [vmem:[%s9130_s21 + $0x420] sm:$0xff] }
 0x43a   :  { %5337 = vmatmul.mubr.f32.gmra.mrb[60].mxu1 %v4433_v43  ;;  %5393 = vmatmul.mubr.f32.gmra.mrb[76].mxu0 %v4449_v41  ;;  %v4490_v43 = vld [vmem:[%s9130_s21 + $0x430] sm:$0xff]  ;;  %v4491_v41 = vld [vmem:[%s9130_s21 + $0x438] sm:$0xff] }
 0x43b   :  { %5897 = vmatpush3.bf16.msra.mxu1 %v7391_v54  ;;  %5929 = vmatpush3.bf16.msra.mxu0 %v7391_v54 }
 0x43c   :  { %5899 = vmatprep.subr.bf16.mxu1 %v7399_v49  ;;  %5931 = vmatprep.subr.bf16.mxu0 %v7399_v49 }
 0x43d   :  { %5339 = vmatprep.mubr.f32.mxu1 %v4434_v39  ;;  %5395 = vmatprep.mubr.f32.mxu0 %v4450_v59  ;;  %v4492_v39 = vld [vmem:[%s9130_s21 + $0x440] sm:$0xff]  ;;  %v4493_v59 = vld [vmem:[%s9130_s21 + $0x448] sm:$0xff] }
 0x43e   :  { %5340 = vmatmul.mubr.f32.gmra.mrb[62].mxu1 %v4435_v40  ;;  %5396 = vmatmul.mubr.f32.gmra.mrb[78].mxu0 %v4451_v6  ;;  %v4494_v40 = vld [vmem:[%s9130_s21 + $0x450] sm:$0xff]  ;;  %v4495_v6 = vld [vmem:[%s9130_s21 + $0x458] sm:$0xff] }
 0x43f   :  { %5901 = vmatpush3.bf16.msra.mxu1 %v7399_v49  ;;  %5933 = vmatpush3.bf16.msra.mxu0 %v7399_v49 }
 0x440   :  { %5935 = vmatprep.subr.bf16.mxu1 %v7311_v51  ;;  %5430 = vmatprep.mubr.f32.mxu1 %v4452_v22  ;;  %v4496_v22 = vld [vmem:[%s9130_s21 + $0x460] sm:$0xff] }
 0x441   :  { %5486 = vmatprep.mubr.f32.mxu0 %v4468_v29  ;;  %v4497_v29 = vld [vmem:[%s9130_s21 + $0x468] sm:$0xff] }
 0x442   :  { %5431 = vmatmul.mubr.f32.vlgmr.msra.gmra.mrb[64].mxu1 %v4453_v37  ;;  %5487 = vmatmul.mubr.f32.vlgmr.msra.gmra.mrb[80].mxu0 %v4469_v20  ;;  %v4498_v37 = vld [vmem:[%s9130_s21 + $0x470] sm:$0xff]  ;;  %v4499_v20 = vld [vmem:[%s9130_s21 + $0x478] sm:$0xff] }
 0x443   :  { %5937 = vmatpush3.bf16.msra.mxu1 %v7311_v51  ;;  %5433 = vmatprep.mubr.f32.mxu1 %v4454_v25  ;;  %v4472_v51 = vld [vmem:[%s9130_s21 + $0x3a0] sm:$0xff]  ;;  %v1684_v25 = vlaneseq }
 0x444   :  { %5939 = vmatprep.subr.bf16.mxu1 %v7321_v35  ;;  %5489 = vmatprep.mubr.f32.mxu0 %v4470_v33 }
 0x445   :  { %v7945_v33 = vshrl.u32 %v1684_v25, 7 }
 0x446   :  { %5434 = vmatmul.mubr.f32.gmra.mrb[66].mxu1 %v4455_v60  ;;  %5490 = vmatmul.mubr.f32.gmra.mrb[82].mxu0 %v4471_v26 }
 0x447   :  { %5941 = vmatpush3.bf16.msra.mxu1 %v7321_v35  ;;  %5436 = vmatprep.mubr.f32.mxu1 %v4456_v18  ;;  %v4474_v35 = vld [vmem:[%s9130_s21 + $0x3b0] sm:$0xff]  ;;  %v1686_v60 = vsub.s32 0, %v7945_v33  ;;  %v1884_v26 = vsub.s32 1, %v7945_v33  ;;  %v7952_v18 = vld [vmem:[%s9076_s10] sm:$0xff] }
 0x448   :  { %5943 = vmatprep.subr.bf16.mxu1 %v7337_v5  ;;  %5492 = vmatprep.mubr.f32.mxu0 %v4472_v51 }
 0x449   :  { %v7955_v51 = vrot.slane %v7952_v18, %v1686_v60 }
 0x44a   :  { %5437 = vmatmul.mubr.f32.gmra.mrb[68].mxu1 %v4457_v34  ;;  %5493 = vmatmul.mubr.f32.gmra.mrb[84].mxu0 %v4473_v3  ;;  %v7958_v34 = vrot.slane %v7952_v18, %v1884_v26  ;;  %v7963_v3 = vld [vmem:[%s9077_s11] ss:$0 sm:$0xff] }
 0x44b   :  { %5945 = vmatpush3.bf16.msra.mxu1 %v7337_v5  ;;  %5439 = vmatprep.mubr.f32.mxu1 %v4458_v53  ;;  %v4476_v5 = vld [vmem:[%s9130_s21 + $0x3c0] sm:$0xff] }
 0x44c   :  { %5947 = vmatprep.subr.bf16.mxu1 %v7351_v17  ;;  %5495 = vmatprep.mubr.f32.mxu0 %v4474_v35 }
 0x44e   :  { %5440 = vmatmul.mubr.f32.gmra.mrb[70].mxu1 %v4459_v55  ;;  %5496 = vmatmul.mubr.f32.gmra.mrb[86].mxu0 %v4475_v28 }
 0x44f   :  { %5949 = vmatpush3.bf16.msra.mxu1 %v7351_v17  ;;  %5442 = vmatprep.mubr.f32.mxu1 %v4460_v46  ;;  %v4478_v17 = vld [vmem:[%s9130_s21 + $0x3d0] sm:$0xff] }
 0x450   :  { %5951 = vmatprep.subr.bf16.mxu1 %v7365_v24  ;;  %5498 = vmatprep.mubr.f32.mxu0 %v4476_v5 }
 0x452   :  { %5443 = vmatmul.mubr.f32.gmra.mrb[72].mxu1 %v4461_v48  ;;  %5499 = vmatmul.mubr.f32.gmra.mrb[88].mxu0 %v4477_v10 }
 0x453   :  { %5953 = vmatpush3.bf16.msra.mxu1 %v7365_v24  ;;  %5445 = vmatprep.mubr.f32.mxu1 %v4462_v23  ;;  %v4480_v24 = vld [vmem:[%s9130_s21 + $0x3e0] sm:$0xff] }
 0x454   :  { %5955 = vmatprep.subr.bf16.mxu1 %v7379_v56  ;;  %5501 = vmatprep.mubr.f32.mxu0 %v4478_v17 }
 0x456   :  { %5446 = vmatmul.mubr.f32.gmra.mrb[74].mxu1 %v4463_v58  ;;  %5502 = vmatmul.mubr.f32.gmra.mrb[90].mxu0 %v4479_v16 }
 0x457   :  { %5957 = vmatpush3.bf16.msra.mxu1 %v7379_v56  ;;  %5448 = vmatprep.mubr.f32.mxu1 %v4464_v27  ;;  %v4482_v56 = vld [vmem:[%s9130_s21 + $0x3f0] sm:$0xff] }
 0x458   :  { %5959 = vmatprep.subr.bf16.mxu1 %v7391_v54  ;;  %5504 = vmatprep.mubr.f32.mxu0 %v4480_v24 }
 0x45a   :  { %5449 = vmatmul.mubr.f32.gmra.mrb[76].mxu1 %v4465_v15  ;;  %5505 = vmatmul.mubr.f32.gmra.mrb[92].mxu0 %v4481_v19 }
 0x45b   :  { %5961 = vmatpush3.bf16.msra.mxu1 %v7391_v54  ;;  %5451 = vmatprep.mubr.f32.mxu1 %v4466_v1  ;;  %v4485_v54 = vld [vmem:[%s9130_s21 + $0x408] sm:$0xff] }
 0x45c   :  { %5963 = vmatprep.subr.bf16.mxu1 %v7399_v49  ;;  %5507 = vmatprep.mubr.f32.mxu0 %v4482_v56 }
 0x45e   :  { %5452 = vmatmul.mubr.f32.gmra.mrb[78].mxu1 %v4467_v52  ;;  %5508 = vmatmul.mubr.f32.gmra.mrb[94].mxu0 %v4483_v57 }
 0x45f   :  { %5965 = vmatpush3.bf16.msra.mxu1 %v7399_v49  ;;  %5542 = vmatprep.mubr.f32.mxu1 %v4484_v42  ;;  %v4489_v49 = vld [vmem:[%s9130_s21 + $0x428] sm:$0xff] }
 0x462   :  { %5543 = vmatmul.mubr.f32.vlgmr.msra.gmra.mrb[80].mxu1 %v4485_v54 }
 0x463   :  { %5545 = vmatprep.mubr.f32.mxu1 %v4486_v50 }
 0x466   :  { %5546 = vmatmul.mubr.f32.gmra.mrb[82].mxu1 %v4487_v2 }
 0x467   :  { %5548 = vmatprep.mubr.f32.mxu1 %v4488_v63 }
 0x46a   :  { %5549 = vmatmul.mubr.f32.gmra.mrb[84].mxu1 %v4489_v49 }
 0x46b   :  { %5551 = vmatprep.mubr.f32.mxu1 %v4490_v43 }
 0x46e   :  { %5552 = vmatmul.mubr.f32.gmra.mrb[86].mxu1 %v4491_v41 }
 0x46f   :  { %5554 = vmatprep.mubr.f32.mxu1 %v4492_v39 }
 0x472   :  { %5555 = vmatmul.mubr.f32.gmra.mrb[88].mxu1 %v4493_v59 }
 0x473   :  { %5557 = vmatprep.mubr.f32.mxu1 %v4494_v40 }
 0x476   :  { %5558 = vmatmul.mubr.f32.gmra.mrb[90].mxu1 %v4495_v6 }
 0x477   :  { %5560 = vmatprep.mubr.f32.mxu1 %v4496_v22 }
 0x47a   :  { %5561 = vmatmul.mubr.f32.gmra.mrb[92].mxu1 %v4497_v29 }
 0x47b   :  { %5563 = vmatprep.mubr.f32.mxu1 %v4498_v37 }
 0x47e   :  { %5564 = vmatmul.mubr.f32.gmra.mrb[94].mxu1 %v4499_v20 }
 0x4b5   :  { %v5096_v53 = vpop.f32.mrb[16].mxu1  ;;  %v5152_v35 = vpop.f32.mrb[32].mxu0 }
 0x4b6   :  { %v1689_v55 = vmul.f32 %v5096_v53, %v7955_v51  ;;  %v1605_v28 = vpop.f32.mrb[17].mxu1  ;;  %v1887_v46 = vmul.f32 %v5152_v35, %v7958_v34  ;;  %v1803_v5 = vpop.f32.mrb[33].mxu0 }
 0x4b7   :  { %v1688_v48 = vmul.f32 %v7955_v51, %v1605_v28  ;;  %v1886_v10 = vmul.f32 %v7958_v34, %v1803_v5 }
 0x4b8   :  { %v1705_v23 = vadd.f32 %v7963_v3, %v1689_v55 }
 0x4b9   :  { %v1704_v17 = vadd.f32 %v7963_v3, %v1688_v48  ;;  %v5099_v58 = vpop.f32.mrb[18].mxu1  ;;  %v5155_v16 = vpop.f32.mrb[34].mxu0 }
 0x4ba   :  { %v7971_v27 = vadd.f32 %v1887_v46, %v1705_v23  ;;  %v1691_v24 = vmul.f32 %v5099_v58, %v7955_v51  ;;  %v1615_v15 = vpop.f32.mrb[19].mxu1  ;;  %v1889_v19 = vmul.f32 %v5155_v16, %v7958_v34  ;;  %v1813_v1 = vpop.f32.mrb[35].mxu0 }
 0x4bb   :  { %v7975_v56 = vadd.f32 %v1886_v10, %v1704_v17  ;;  %v1690_v52 = vmul.f32 %v7955_v51, %v1615_v15  ;;  %v1888_v57 = vmul.f32 %v7958_v34, %v1813_v1 }
 0x4bc   :  { %v1707_v42 = vadd.f32 %v7963_v3, %v1691_v24 }
 0x4bd   :  { %v1706_v54 = vadd.f32 %v7963_v3, %v1690_v52  ;;  %v5102_v50 = vpop.f32.mrb[20].mxu1  ;;  %v5158_v2 = vpop.f32.mrb[36].mxu0 }
 0x4be   :  { %v7981_v63 = vadd.f32 %v1889_v19, %v1707_v42  ;;  %v1693_v49 = vmul.f32 %v5102_v50, %v7955_v51  ;;  %v1625_v43 = vpop.f32.mrb[21].mxu1  ;;  %v1891_v41 = vmul.f32 %v5158_v2, %v7958_v34  ;;  %v1823_v39 = vpop.f32.mrb[37].mxu0 }
 0x4bf   :  { %v7985_v59 = vadd.f32 %v1888_v57, %v1706_v54  ;;  %v1692_v40 = vmul.f32 %v7955_v51, %v1625_v43  ;;  %v1890_v6 = vmul.f32 %v7958_v34, %v1823_v39 }
 0x4c0   :  { %v1709_v22 = vadd.f32 %v7963_v3, %v1693_v49 }
 0x4c1   :  { %v1708_v29 = vadd.f32 %v7963_v3, %v1692_v40  ;;  %v5105_v37 = vpop.f32.mrb[22].mxu1  ;;  %v5161_v20 = vpop.f32.mrb[38].mxu0 }
 0x4c2   :  { %v7991_v25 = vadd.f32 %v1891_v41, %v1709_v22  ;;  %v1695_v60 = vmul.f32 %v5105_v37, %v7955_v51  ;;  %v1635_v26 = vpop.f32.mrb[23].mxu1  ;;  %v1893_v53 = vmul.f32 %v5161_v20, %v7958_v34  ;;  %v1833_v35 = vpop.f32.mrb[39].mxu0 }
 0x4c3   :  { %v7995_v55 = vadd.f32 %v1890_v6, %v1708_v29  ;;  %v1694_v28 = vmul.f32 %v7955_v51, %v1635_v26  ;;  %v1892_v46 = vmul.f32 %v7958_v34, %v1833_v35  ;;  %v2082_v26 = vsub.s32 2, %v7945_v33 }
 0x4c4   :  { %v1711_v5 = vadd.f32 %v7963_v3, %v1695_v60 }
 0x4c5   :  { %v1710_v48 = vadd.f32 %v7963_v3, %v1694_v28  ;;  %v5108_v10 = vpop.f32.mrb[24].mxu1  ;;  %v5164_v23 = vpop.f32.mrb[40].mxu0 }
 0x4c6   :  { %v8001_v17 = vadd.f32 %v1893_v53, %v1711_v5  ;;  %v1697_v58 = vmul.f32 %v5108_v10, %v7955_v51  ;;  %v1645_v16 = vpop.f32.mrb[25].mxu1  ;;  %v1895_v24 = vmul.f32 %v5164_v23, %v7958_v34  ;;  %v1843_v15 = vpop.f32.mrb[41].mxu0 }
 0x4c7   :  { %v8005_v19 = vadd.f32 %v1892_v46, %v1710_v48  ;;  %v1696_v1 = vmul.f32 %v7955_v51, %v1645_v16  ;;  %v1894_v52 = vmul.f32 %v7958_v34, %v1843_v15  ;;  %v2280_v48 = vsub.s32 3, %v7945_v33 }
 0x4c8   :  { %v1713_v57 = vadd.f32 %v7963_v3, %v1697_v58 }
 0x4c9   :  { %v1712_v42 = vadd.f32 %v7963_v3, %v1696_v1  ;;  %v5111_v54 = vpop.f32.mrb[26].mxu1  ;;  %v5167_v50 = vpop.f32.mrb[42].mxu0 }
 0x4ca   :  { %v8011_v2 = vadd.f32 %v1895_v24, %v1713_v57  ;;  %v1699_v49 = vmul.f32 %v5111_v54, %v7955_v51  ;;  %v1655_v43 = vpop.f32.mrb[27].mxu1  ;;  %v1897_v41 = vmul.f32 %v5167_v50, %v7958_v34  ;;  %v1853_v39 = vpop.f32.mrb[43].mxu0 }
 0x4cb   :  { %v8015_v40 = vadd.f32 %v1894_v52, %v1712_v42  ;;  %v1698_v6 = vmul.f32 %v7955_v51, %v1655_v43  ;;  %v1896_v22 = vmul.f32 %v7958_v34, %v1853_v39  ;;  %v8034_v52 = vrot.slane %v7952_v18, %v2082_v26 }
 0x4cc   :  { %v1715_v29 = vadd.f32 %v7963_v3, %v1699_v49  ;;  %v8041_v43 = vrot.slane %v7952_v18, %v2280_v48 }
 0x4cd   :  { %v1714_v37 = vadd.f32 %v7963_v3, %v1698_v6  ;;  %v5114_v20 = vpop.f32.mrb[28].mxu1  ;;  %v5170_v60 = vpop.f32.mrb[44].mxu0 }
 0x4ce   :  { %v8022_v53 = vadd.f32 %v1897_v41, %v1715_v29  ;;  %v1701_v35 = vmul.f32 %v5114_v20, %v7955_v51  ;;  %v1665_v28 = vpop.f32.mrb[29].mxu1  ;;  %v1899_v46 = vmul.f32 %v5170_v60, %v7958_v34  ;;  %v1863_v5 = vpop.f32.mrb[45].mxu0 }
 0x4cf   :  { %v8027_v10 = vadd.f32 %v1896_v22, %v1714_v37  ;;  %v1700_v23 = vmul.f32 %v7955_v51, %v1665_v28  ;;  %v1898_v58 = vmul.f32 %v7958_v34, %v1863_v5 }
 0x4d0   :  { %v1717_v16 = vadd.f32 %v7963_v3, %v1701_v35 }
 0x4d1   :  { %v1716_v24 = vadd.f32 %v7963_v3, %v1700_v23  ;;  %v5117_v15 = vpop.f32.mrb[30].mxu1  ;;  %v5173_v1 = vpop.f32.mrb[46].mxu0 }
 0x4d2   :  { %v8036_v57 = vadd.f32 %v1899_v46, %v1717_v16  ;;  %v1703_v42 = vmul.f32 %v5117_v15, %v7955_v51  ;;  %v1675_v54 = vpop.f32.mrb[31].mxu1  ;;  %v1901_v50 = vmul.f32 %v5173_v1, %v7958_v34  ;;  %v1873_v49 = vpop.f32.mrb[47].mxu0 }
 0x4d3   :  { %v8043_v41 = vadd.f32 %v1898_v58, %v1716_v24  ;;  %v1702_v39 = vmul.f32 %v7955_v51, %v1675_v54  ;;  %v1900_v6 = vmul.f32 %v7958_v34, %v1873_v49 }
 0x4d4   :  { %v1719_v22 = vadd.f32 %v7963_v3, %v1703_v42 }
 0x4d5   :  { %v1718_v29 = vadd.f32 %v7963_v3, %v1702_v39  ;;  %v5208_v37 = vpop.f32.mrb[32].mxu1  ;;  %v5264_v20 = vpop.f32.mrb[48].mxu0 }
 0x4d6   :  { %v8049_v60 = vadd.f32 %v1901_v50, %v1719_v22  ;;  %v2085_v26 = vmul.f32 %v5208_v37, %v8034_v52  ;;  %v2001_v35 = vpop.f32.mrb[33].mxu1  ;;  %v2283_v28 = vmul.f32 %v5264_v20, %v8041_v43  ;;  %v2199_v46 = vpop.f32.mrb[49].mxu0 }
 0x4d7   :  { %v8053_v5 = vadd.f32 %v1900_v6, %v1718_v29  ;;  %v2084_v51 = vmul.f32 %v8034_v52, %v2001_v35  ;;  %v2282_v34 = vmul.f32 %v8041_v43, %v2199_v46 }
 0x4d8   :  { %v2101_v48 = vadd.f32 %v2085_v26, %v7971_v27 }
 0x4d9   :  { %v2100_v3 = vadd.f32 %v2084_v51, %v7975_v56  ;;  %v5211_v23 = vpop.f32.mrb[34].mxu1  ;;  %v5267_v58 = vpop.f32.mrb[50].mxu0 }
 0x4da   :  { %v8059_v16 = vadd.f32 %v2283_v28, %v2101_v48  ;;  %v2087_v24 = vmul.f32 %v5211_v23, %v8034_v52  ;;  %v2011_v15 = vpop.f32.mrb[35].mxu1  ;;  %v2285_v1 = vmul.f32 %v5267_v58, %v8041_v43  ;;  %v2209_v42 = vpop.f32.mrb[51].mxu0 }
 0x4db   :  { %v8063_v54 = vadd.f32 %v2282_v34, %v2100_v3  ;;  %v2086_v50 = vmul.f32 %v8034_v52, %v2011_v15  ;;  %v2284_v49 = vmul.f32 %v8041_v43, %v2209_v42 }
 0x4dc   :  { %v2103_v27 = vadd.f32 %v2087_v24, %v7981_v63 }
 0x4dd   :  { %v2102_v56 = vadd.f32 %v2086_v50, %v7985_v59  ;;  %v5214_v39 = vpop.f32.mrb[36].mxu1  ;;  %v5270_v6 = vpop.f32.mrb[52].mxu0 }
 0x4de   :  { %v8069_v22 = vadd.f32 %v2285_v1, %v2103_v27  ;;  %v2089_v29 = vmul.f32 %v5214_v39, %v8034_v52  ;;  %v2021_v37 = vpop.f32.mrb[37].mxu1  ;;  %v2287_v20 = vmul.f32 %v5270_v6, %v8041_v43  ;;  %v2219_v26 = vpop.f32.mrb[53].mxu0 }
 0x4df   :  { %v8073_v35 = vadd.f32 %v2284_v49, %v2102_v56  ;;  %v2088_v28 = vmul.f32 %v8034_v52, %v2021_v37  ;;  %v2286_v46 = vmul.f32 %v8041_v43, %v2219_v26 }
 0x4e0   :  { %v2105_v63 = vadd.f32 %v2089_v29, %v7991_v25 }
 0x4e1   :  { %v2104_v59 = vadd.f32 %v2088_v28, %v7995_v55  ;;  %v5217_v51 = vpop.f32.mrb[38].mxu1  ;;  %v5273_v34 = vpop.f32.mrb[54].mxu0 }
 0x4e2   :  { %v8079_v48 = vadd.f32 %v2287_v20, %v2105_v63  ;;  %v2091_v3 = vmul.f32 %v5217_v51, %v8034_v52  ;;  %v2031_v23 = vpop.f32.mrb[39].mxu1  ;;  %v2289_v58 = vmul.f32 %v5273_v34, %v8041_v43  ;;  %v2229_v24 = vpop.f32.mrb[55].mxu0 }
 0x4e3   :  { %v8083_v15 = vadd.f32 %v2286_v46, %v2104_v59  ;;  %v2090_v1 = vmul.f32 %v8034_v52, %v2031_v23  ;;  %v2288_v42 = vmul.f32 %v8041_v43, %v2229_v24 }
 0x4e4   :  { %v2107_v25 = vadd.f32 %v2091_v3, %v8001_v17 }
 0x4e5   :  { %v2106_v55 = vadd.f32 %v2090_v1, %v8005_v19  ;;  %v5220_v50 = vpop.f32.mrb[40].mxu1  ;;  %v5276_v49 = vpop.f32.mrb[56].mxu0 }
 0x4e6   :  { %v8089_v27 = vadd.f32 %v2289_v58, %v2107_v25  ;;  %v2093_v56 = vmul.f32 %v5220_v50, %v8034_v52  ;;  %v2041_v39 = vpop.f32.mrb[41].mxu1  ;;  %v2291_v6 = vmul.f32 %v5276_v49, %v8041_v43  ;;  %v2239_v29 = vpop.f32.mrb[57].mxu0  ;;  %v2478_v25 = vsub.s32 4, %v7945_v33 }
 0x4e7   :  { %v8093_v37 = vadd.f32 %v2288_v42, %v2106_v55  ;;  %v2092_v20 = vmul.f32 %v8034_v52, %v2041_v39  ;;  %v2290_v26 = vmul.f32 %v8041_v43, %v2239_v29 }
 0x4e8   :  { %v2109_v17 = vadd.f32 %v2093_v56, %v8011_v2 }
 0x4e9   :  { %v2108_v19 = vadd.f32 %v2092_v20, %v8015_v40  ;;  %v5223_v28 = vpop.f32.mrb[42].mxu1  ;;  %v5279_v46 = vpop.f32.mrb[58].mxu0 }
 0x4ea   :  { %v8099_v63 = vadd.f32 %v2291_v6, %v2109_v17  ;;  %v2095_v59 = vmul.f32 %v5223_v28, %v8034_v52  ;;  %v2051_v51 = vpop.f32.mrb[43].mxu1  ;;  %v2293_v34 = vmul.f32 %v5279_v46, %v8041_v43  ;;  %v2249_v3 = vpop.f32.mrb[59].mxu0  ;;  %v2676_v6 = vsub.s32 5, %v7945_v33 }
 0x4eb   :  { %v8103_v23 = vadd.f32 %v2290_v26, %v2108_v19  ;;  %v2094_v58 = vmul.f32 %v8034_v52, %v2051_v51  ;;  %v2292_v24 = vmul.f32 %v8041_v43, %v2249_v3  ;;  %v8122_v28 = vrot.slane %v7952_v18, %v2478_v25 }
 0x4ec   :  { %v2111_v2 = vadd.f32 %v2095_v59, %v8022_v53 }
 0x4ed   :  { %v2110_v40 = vadd.f32 %v2094_v58, %v8027_v10  ;;  %v5226_v1 = vpop.f32.mrb[44].mxu1  ;;  %v5282_v42 = vpop.f32.mrb[60].mxu0  ;;  %v8129_v58 = vrot.slane %v7952_v18, %v2676_v6 }
 0x4ee   :  { %v8110_v55 = vadd.f32 %v2293_v34, %v2111_v2  ;;  %v2097_v50 = vmul.f32 %v5226_v1, %v8034_v52  ;;  %v2061_v49 = vpop.f32.mrb[45].mxu1  ;;  %v2295_v56 = vmul.f32 %v5282_v42, %v8041_v43  ;;  %v2259_v39 = vpop.f32.mrb[61].mxu0 }
 0x4ef   :  { %v8115_v29 = vadd.f32 %v2292_v24, %v2110_v40  ;;  %v2096_v53 = vmul.f32 %v8034_v52, %v2061_v49  ;;  %v2294_v10 = vmul.f32 %v8041_v43, %v2259_v39 }
 0x4f0   :  { %v2113_v20 = vadd.f32 %v2097_v50, %v8036_v57 }
 0x4f1   :  { %v2112_v26 = vadd.f32 %v2096_v53, %v8043_v41  ;;  %v5229_v17 = vpop.f32.mrb[46].mxu1  ;;  %v5285_v19 = vpop.f32.mrb[62].mxu0 }
 0x4f2   :  { %v8124_v46 = vadd.f32 %v2295_v56, %v2113_v20  ;;  %v2099_v59 = vmul.f32 %v5229_v17, %v8034_v52  ;;  %v2071_v51 = vpop.f32.mrb[47].mxu1  ;;  %v2297_v34 = vmul.f32 %v5285_v19, %v8041_v43  ;;  %v2269_v3 = vpop.f32.mrb[63].mxu0 }
 0x4f3   :  { %v8131_v24 = vadd.f32 %v2294_v10, %v2112_v26  ;;  %v2098_v57 = vmul.f32 %v8034_v52, %v2071_v51  ;;  %v2296_v41 = vmul.f32 %v8041_v43, %v2269_v3 }
 0x4f4   :  { %v2115_v2 = vadd.f32 %v2099_v59, %v8049_v60 }
 0x4f5   :  { %v2114_v40 = vadd.f32 %v2098_v57, %v8053_v5  ;;  %v5320_v1 = vpop.f32.mrb[48].mxu1  ;;  %v5376_v42 = vpop.f32.mrb[64].mxu0 }
 0x4f6   :  { %v8137_v25 = vadd.f32 %v2297_v34, %v2115_v2  ;;  %v2481_v50 = vmul.f32 %v5320_v1, %v8122_v28  ;;  %v2397_v49 = vpop.f32.mrb[49].mxu1  ;;  %v2679_v56 = vmul.f32 %v5376_v42, %v8129_v58  ;;  %v2595_v39 = vpop.f32.mrb[65].mxu0 }
 0x4f7   :  { %v8141_v6 = vadd.f32 %v2296_v41, %v2114_v40  ;;  %v2480_v52 = vmul.f32 %v8122_v28, %v2397_v49  ;;  %v2678_v43 = vmul.f32 %v8129_v58, %v2595_v39 }
 0x4f8   :  { %v2497_v60 = vadd.f32 %v2481_v50, %v8059_v16 }
 0x4f9   :  { %v2496_v5 = vadd.f32 %v2480_v52, %v8063_v54  ;;  %v5323_v53 = vpop.f32.mrb[50].mxu1  ;;  %v5379_v10 = vpop.f32.mrb[66].mxu0 }
 0x4fa   :  { %v8147_v20 = vadd.f32 %v2679_v56, %v2497_v60  ;;  %v2483_v26 = vmul.f32 %v5323_v53, %v8122_v28  ;;  %v2407_v17 = vpop.f32.mrb[51].mxu1  ;;  %v2681_v19 = vmul.f32 %v5379_v10, %v8129_v58  ;;  %v2605_v59 = vpop.f32.mrb[67].mxu0 }
 0x4fb   :  { %v8151_v51 = vadd.f32 %v2678_v43, %v2496_v5  ;;  %v2482_v34 = vmul.f32 %v8122_v28, %v2407_v17  ;;  %v2680_v3 = vmul.f32 %v8129_v58, %v2605_v59 }
 0x4fc   :  { %v2499_v16 = vadd.f32 %v2483_v26, %v8069_v22 }
 0x4fd   :  { %v2498_v54 = vadd.f32 %v2482_v34, %v8073_v35  ;;  %v5326_v57 = vpop.f32.mrb[52].mxu1  ;;  %v5382_v41 = vpop.f32.mrb[68].mxu0 }
 0x4fe   :  { %v8157_v2 = vadd.f32 %v2681_v19, %v2499_v16  ;;  %v2485_v40 = vmul.f32 %v5326_v57, %v8122_v28  ;;  %v2417_v1 = vpop.f32.mrb[53].mxu1  ;;  %v2683_v42 = vmul.f32 %v5382_v41, %v8129_v58  ;;  %v2615_v50 = vpop.f32.mrb[69].mxu0 }
 0x4ff   :  { %v8161_v49 = vadd.f32 %v2680_v3, %v2498_v54  ;;  %v2484_v56 = vmul.f32 %v8122_v28, %v2417_v1  ;;  %v2682_v39 = vmul.f32 %v8129_v58, %v2615_v50 }
 0x500   :  { %v2501_v22 = vadd.f32 %v2485_v40, %v8079_v48 }
 0x501   :  { %v2500_v35 = vadd.f32 %v2484_v56, %v8083_v15  ;;  %v5329_v52 = vpop.f32.mrb[54].mxu1  ;;  %v5385_v43 = vpop.f32.mrb[70].mxu0 }
 0x502   :  { %v8167_v60 = vadd.f32 %v2683_v42, %v2501_v22  ;;  %v2487_v5 = vmul.f32 %v5329_v52, %v8122_v28  ;;  %v2427_v53 = vpop.f32.mrb[55].mxu1  ;;  %v2685_v10 = vmul.f32 %v5385_v43, %v8129_v58  ;;  %v2625_v26 = vpop.f32.mrb[71].mxu0 }
 0x503   :  { %v8171_v17 = vadd.f32 %v2682_v39, %v2500_v35  ;;  %v2486_v19 = vmul.f32 %v8122_v28, %v2427_v53  ;;  %v2684_v59 = vmul.f32 %v8129_v58, %v2625_v26 }
 0x504   :  { %v2503_v48 = vadd.f32 %v2487_v5, %v8089_v27 }
 0x505   :  { %v2502_v15 = vadd.f32 %v2486_v19, %v8093_v37  ;;  %v5332_v34 = vpop.f32.mrb[56].mxu1  ;;  %v5388_v3 = vpop.f32.mrb[72].mxu0 }
 0x506   :  { %v8177_v16 = vadd.f32 %v2685_v10, %v2503_v48  ;;  %v2489_v54 = vmul.f32 %v5332_v34, %v8122_v28  ;;  %v2437_v57 = vpop.f32.mrb[57].mxu1  ;;  %v2687_v41 = vmul.f32 %v5388_v3, %v8129_v58  ;;  %v2635_v40 = vpop.f32.mrb[73].mxu0  ;;  %v2874_v48 = vsub.s32 6, %v7945_v33 }
 0x507   :  { %v8181_v1 = vadd.f32 %v2684_v59, %v2502_v15  ;;  %v2488_v42 = vmul.f32 %v8122_v28, %v2437_v57  ;;  %v2686_v50 = vmul.f32 %v8129_v58, %v2635_v40 }
 0x508   :  { %v2505_v27 = vadd.f32 %v2489_v54, %v8099_v63 }
 0x509   :  { %v2504_v37 = vadd.f32 %v2488_v42, %v8103_v23  ;;  %v5335_v56 = vpop.f32.mrb[58].mxu1  ;;  %v5391_v39 = vpop.f32.mrb[74].mxu0 }
 0x50a   :  { %v8187_v22 = vadd.f32 %v2687_v41, %v2505_v27  ;;  %v2491_v35 = vmul.f32 %v5335_v56, %v8122_v28  ;;  %v2447_v52 = vpop.f32.mrb[59].mxu1  ;;  %v2689_v43 = vmul.f32 %v5391_v39, %v8129_v58  ;;  %v2645_v5 = vpop.f32.mrb[75].mxu0  ;;  %v3072_v41 = vsub.s32 7, %v7945_v33 }
 0x50b   :  { %v8191_v53 = vadd.f32 %v2686_v50, %v2504_v37  ;;  %v2490_v10 = vmul.f32 %v8122_v28, %v2447_v52  ;;  %v2688_v26 = vmul.f32 %v8129_v58, %v2645_v5  ;;  %v8210_v56 = vrot.slane %v7952_v18, %v2874_v48 }
 0x50c   :  { %v2507_v63 = vadd.f32 %v2491_v35, %v8110_v55  ;;  %v8217_v5 = vrot.slane %v7952_v18, %v3072_v41 }
 0x50d   :  { %v2506_v23 = vadd.f32 %v2490_v10, %v8115_v29  ;;  %v5338_v19 = vpop.f32.mrb[60].mxu1  ;;  %v5394_v59 = vpop.f32.mrb[76].mxu0 }
 0x50e   :  { %v8198_v15 = vadd.f32 %v2689_v43, %v2507_v63  ;;  %v2493_v34 = vmul.f32 %v5338_v19, %v8122_v28  ;;  %v2457_v3 = vpop.f32.mrb[61].mxu1  ;;  %v2691_v54 = vmul.f32 %v5394_v59, %v8129_v58  ;;  %v2655_v57 = vpop.f32.mrb[77].mxu0 }
 0x50f   :  { %v8203_v40 = vadd.f32 %v2688_v26, %v2506_v23  ;;  %v2492_v55 = vmul.f32 %v8122_v28, %v2457_v3  ;;  %v2690_v29 = vmul.f32 %v8129_v58, %v2655_v57 }
 0x510   :  { %v2509_v42 = vadd.f32 %v2493_v34, %v8124_v46 }
 0x511   :  { %v2508_v50 = vadd.f32 %v2492_v55, %v8131_v24  ;;  %v5341_v27 = vpop.f32.mrb[62].mxu1  ;;  %v5397_v37 = vpop.f32.mrb[78].mxu0 }
 0x512   :  { %v8212_v39 = vadd.f32 %v2691_v54, %v2509_v42  ;;  %v2495_v35 = vmul.f32 %v5341_v27, %v8122_v28  ;;  %v2467_v33 = vpop.f32.mrb[63].mxu1  ;;  %v2693_v52 = vmul.f32 %v5397_v37, %v8129_v58  ;;  %v2665_v43 = vpop.f32.mrb[79].mxu0 }
 0x513   :  { %v8219_v10 = vadd.f32 %v2690_v29, %v2508_v50  ;;  %v2494_v46 = vmul.f32 %v8122_v28, %v2467_v33  ;;  %v2692_v24 = vmul.f32 %v8129_v58, %v2665_v43 }
 0x514   :  { %v2511_v26 = vadd.f32 %v2495_v35, %v8137_v25 }
 0x515   :  { %v2510_v63 = vadd.f32 %v2494_v46, %v8141_v6  ;;  %v5432_v23 = vpop.f32.mrb[64].mxu1  ;;  %v5488_v19 = vpop.f32.mrb[80].mxu0 }
 0x516   :  { %v8225_v59 = vadd.f32 %v2693_v52, %v2511_v26  ;;  %v2877_v48 = vmul.f32 %v5432_v23, %v8210_v56  ;;  %v2793_v34 = vpop.f32.mrb[65].mxu1  ;;  %v3075_v18 = vmul.f32 %v5488_v19, %v8217_v5  ;;  %v2991_v3 = vpop.f32.mrb[81].mxu0 }
 0x517   :  { %v8229_v54 = vadd.f32 %v2692_v24, %v2510_v63  ;;  %v2876_v28 = vmul.f32 %v8210_v56, %v2793_v34  ;;  %v3074_v58 = vmul.f32 %v8217_v5, %v2991_v3 }
 0x518   :  { %v2893_v25 = vadd.f32 %v2877_v48, %v8147_v20 }
 0x519   :  { %v2892_v6 = vadd.f32 %v2876_v28, %v8151_v51  ;;  %v5435_v57 = vpop.f32.mrb[66].mxu1  ;;  %v5491_v41 = vpop.f32.mrb[82].mxu0 }
 0x51a   :  { %v8235_v55 = vadd.f32 %v3075_v18, %v2893_v25  ;;  %v2879_v29 = vmul.f32 %v5435_v57, %v8210_v56  ;;  %v2803_v42 = vpop.f32.mrb[67].mxu1  ;;  %v3077_v50 = vmul.f32 %v5491_v41, %v8217_v5  ;;  %v3001_v27 = vpop.f32.mrb[83].mxu0 }
 0x51b   :  { %v8239_v37 = vadd.f32 %v3074_v58, %v2892_v6  ;;  %v2878_v35 = vmul.f32 %v8210_v56, %v2803_v42  ;;  %v3076_v33 = vmul.f32 %v8217_v5, %v3001_v27 }
 0x51c   :  { %v2895_v20 = vadd.f32 %v2879_v29, %v8157_v2 }
 0x51d   :  { %v2894_v51 = vadd.f32 %v2878_v35, %v8161_v49  ;;  %v5438_v52 = vpop.f32.mrb[68].mxu1  ;;  %v5494_v43 = vpop.f32.mrb[84].mxu0 }
 0x51e   :  { %v8245_v46 = vadd.f32 %v3077_v50, %v2895_v20  ;;  %v2881_v24 = vmul.f32 %v5438_v52, %v8210_v56  ;;  %v2813_v26 = vpop.f32.mrb[69].mxu1  ;;  %v3079_v63 = vmul.f32 %v5494_v43, %v8217_v5  ;;  %v3011_v23 = vpop.f32.mrb[85].mxu0 }
 0x51f   :  { %v8249_v19 = vadd.f32 %v3076_v33, %v2894_v51  ;;  %v2880_v48 = vmul.f32 %v8210_v56, %v2813_v26  ;;  %v3078_v34 = vmul.f32 %v8217_v5, %v3011_v23 }
 0x520   :  { %v2897_v2 = vadd.f32 %v2881_v24, %v8167_v60 }
 0x521   :  { %v2896_v49 = vadd.f32 %v2880_v48, %v8171_v17  ;;  %v5441_v18 = vpop.f32.mrb[70].mxu1  ;;  %v5497_v3 = vpop.f32.mrb[86].mxu0 }
 0x522   :  { %v8255_v28 = vadd.f32 %v3079_v63, %v2897_v2  ;;  %v2883_v58 = vmul.f32 %v5441_v18, %v8210_v56  ;;  %v2823_v25 = vpop.f32.mrb[71].mxu1  ;;  %v3081_v6 = vmul.f32 %v5497_v3, %v8217_v5  ;;  %v3021_v57 = vpop.f32.mrb[87].mxu0 }
 0x523   :  { %v8259_v41 = vadd.f32 %v3078_v34, %v2896_v49  ;;  %v2882_v29 = vmul.f32 %v8210_v56, %v2823_v25  ;;  %v3080_v42 = vmul.f32 %v8217_v5, %v3021_v57 }
 0x524   :  { %v2899_v60 = vadd.f32 %v2883_v58, %v8177_v16 }
 0x525   :  { %v2898_v17 = vadd.f32 %v2882_v29, %v8181_v1  ;;  %v5444_v50 = vpop.f32.mrb[72].mxu1  ;;  %v5500_v27 = vpop.f32.mrb[88].mxu0 }
 0x526   :  { %v8265_v35 = vadd.f32 %v3081_v6, %v2899_v60  ;;  %v2885_v33 = vmul.f32 %v5444_v50, %v8210_v56  ;;  %v2833_v20 = vpop.f32.mrb[73].mxu1  ;;  %v3083_v51 = vmul.f32 %v5500_v27, %v8217_v5  ;;  %v3031_v52 = vpop.f32.mrb[89].mxu0 }
 0x527   :  { %v8269_v43 = vadd.f32 %v3080_v42, %v2898_v17  ;;  %v2884_v24 = vmul.f32 %v8210_v56, %v2833_v20  ;;  %v3082_v26 = vmul.f32 %v8217_v5, %v3031_v52 }
 0x528   :  { %v2901_v16 = vadd.f32 %v2885_v33, %v8187_v22 }
 0x529   :  { %v2900_v1 = vadd.f32 %v2884_v24, %v8191_v53  ;;  %v5447_v63 = vpop.f32.mrb[74].mxu1  ;;  %v5503_v23 = vpop.f32.mrb[90].mxu0 }
 0x52a   :  { %v8275_v48 = vadd.f32 %v3083_v51, %v2901_v16  ;;  %v2887_v34 = vmul.f32 %v5447_v63, %v8210_v56  ;;  %v2843_v2 = vpop.f32.mrb[75].mxu1  ;;  %v3085_v49 = vmul.f32 %v5503_v23, %v8217_v5  ;;  %v3041_v18 = vpop.f32.mrb[91].mxu0 }
 0x52b   :  { %v8279_v3 = vadd.f32 %v3082_v26, %v2900_v1  ;;  %v2886_v58 = vmul.f32 %v8210_v56, %v2843_v2  ;;  %v3084_v25 = vmul.f32 %v8217_v5, %v3041_v18 }
 0x52c   :  { %v2903_v22 = vadd.f32 %v2887_v34, %v8198_v15 }
 0x52d   :  { %v2902_v53 = vadd.f32 %v2886_v58, %v8203_v40  ;;  %v5450_v6 = vpop.f32.mrb[76].mxu1  ;;  %v5506_v57 = vpop.f32.mrb[92].mxu0 }
 0x52e   :  { %v8285_v29 = vadd.f32 %v3085_v49, %v2903_v22  ;;  %v2889_v42 = vmul.f32 %v5450_v6, %v8210_v56  ;;  %v2853_v60 = vpop.f32.mrb[77].mxu1  ;;  %v3087_v17 = vmul.f32 %v5506_v57, %v8217_v5  ;;  %v3051_v50 = vpop.f32.mrb[93].mxu0 }
 0x52f   :  { %v8289_v27 = vadd.f32 %v3084_v25, %v2902_v53  ;;  %v2888_v33 = vmul.f32 %v8210_v56, %v2853_v60  ;;  %v3086_v20 = vmul.f32 %v8217_v5, %v3051_v50 }
 0x530   :  { %v2905_v15 = vadd.f32 %v2889_v42, %v8212_v39  ;;  %v8306_v39 = vld [vmem:[%s9076_s10 + $0x8] ss:$0 sm:$0xff] }
 0x531   :  { %v2904_v40 = vadd.f32 %v2888_v33, %v8219_v10  ;;  %v5453_v51 = vpop.f32.mrb[78].mxu1  ;;  %v5509_v52 = vpop.f32.mrb[94].mxu0 }
 0x532   :  { %v8295_v24 = vadd.f32 %v3087_v17, %v2905_v15  ;;  %v2891_v26 = vmul.f32 %v5453_v51, %v8210_v56  ;;  %v2863_v16 = vpop.f32.mrb[79].mxu1  ;;  %v3089_v1 = vmul.f32 %v5509_v52, %v8217_v5  ;;  %v3061_v63 = vpop.f32.mrb[95].mxu0 }
 0x533   :  { %v8299_v23 = vadd.f32 %v3086_v20, %v2904_v40  ;;  %v2890_v34 = vmul.f32 %v8210_v56, %v2863_v16  ;;  %v3088_v2 = vmul.f32 %v8217_v5, %v3061_v63 }
 0x534   :  { %v2907_v10 = vadd.f32 %v2891_v26, %v8225_v59 }
 0x535   :  { %v2906_v49 = vadd.f32 %v2890_v34, %v8229_v54  ;;  %v5544_v18 = vpop.f32.mrb[80].mxu1 }
 0x536   :  { %v8310_v58 = vadd.f32 %v3089_v1, %v2907_v10  ;;  %v3273_v25 = vmul.f32 %v5544_v18, %v8306_v39  ;;  %v3189_v22 = vpop.f32.mrb[81].mxu1 }
 0x537   :  { %v8313_v53 = vadd.f32 %v3088_v2, %v2906_v49  ;;  %v3272_v56 = vmul.f32 %v8306_v39, %v3189_v22 }
 0x538   :  { %9133 = vst [vmem:[#allocation23_spill] sm:$0xff] %v8310_v58  ;;  %v3289_v5 = vadd.f32 %v3273_v25, %v8235_v55 }
 0x539   :  { %9134 = vst [vmem:[#allocation24_spill] sm:$0xff] %v8313_v53  ;;  %v3288_v6 = vadd.f32 %v3272_v56, %v8239_v37  ;;  %v5547_v57 = vpop.f32.mrb[82].mxu1 }
 0x53a   :  { %v3305_v42 = vadd.f32 %v3289_v5, %v7301_v62  ;;  %v3275_v59 = vmul.f32 %v5547_v57, %v8306_v39  ;;  %v3199_v54 = vpop.f32.mrb[83].mxu1 }
 0x53b   :  { %v3304_v60 = vadd.f32 %v3288_v6, %v7299_v44  ;;  %v3274_v17 = vmul.f32 %v8306_v39, %v3199_v54 }
 0x53c   :  { %v8322_v50 = vmul.f32 0.70710677, %v3305_v42  ;;  %v3291_v33 = vadd.f32 %v3275_v59, %v8245_v46 }
 0x53d   :  { %v8325_v20 = vmul.f32 0.70710677, %v3304_v60  ;;  %v3290_v55 = vadd.f32 %v3274_v17, %v8249_v19  ;;  %v5550_v15 = vpop.f32.mrb[84].mxu1 }
 0x53e   :  { %v3337_v37 = vand.u32 2147483647, %v8322_v50  ;;  %v3307_v62 = vadd.f32 %v3291_v33, %v7307_v13  ;;  %v3209_v40 = vpop.f32.mrb[85].mxu1  ;;  %v3277_v2 = vmul.f32 %v5550_v15, %v8306_v39  ;;  %vm3657_vm4 = vcmp.ge.f32.partialorder %v8322_v50, 0.0 }
 0x53f   :  { %v3336_v51 = vand.u32 2147483647, %v8325_v20  ;;  %v3306_v44 = vadd.f32 %v3290_v55, %v7305_v32  ;;  %v3276_v18 = vmul.f32 %v8306_v39, %v3209_v40  ;;  %vm3656_vm5 = vcmp.ge.f32.partialorder %v8325_v20, 0.0 }
 0x540   :  { %v3353_v52 = vmul.f32 0.3275911, %v3337_v37  ;;  %v3561_v26 = vsub.f32 0.0, %v3337_v37  ;;  %v8332_v16 = vmul.f32 0.70710677, %v3307_v62  ;;  %v3293_v33 = vadd.f32 %v3277_v2, %v8255_v28 }
 0x541   :  { %v3352_v1 = vmul.f32 0.3275911, %v3336_v51  ;;  %v3560_v46 = vsub.f32 0.0, %v3336_v51  ;;  %v8334_v63 = vmul.f32 0.70710677, %v3306_v44  ;;  %v5553_v10 = vpop.f32.mrb[86].mxu1  ;;  %v3292_v40 = vadd.f32 %v3276_v18, %v8259_v41 }
 0x542   :  { %v3369_v34 = vadd.f32 1.0, %v3353_v52  ;;  %v3339_v19 = vand.u32 2147483647, %v8332_v16  ;;  %v3219_v32 = vpop.f32.mrb[87].mxu1  ;;  %v3577_v25 = vmul.f32 %v3561_v26, %v3337_v37  ;;  %v8345_v37 = vadd.f32 %v3293_v33, %v7317_v8 }
 0x543   :  { %v3368_v13 = vadd.f32 1.0, %v3352_v1  ;;  %v3338_v49 = vand.u32 2147483647, %v8334_v63  ;;  %v3576_v5 = vmul.f32 %v3560_v46, %v3336_v51  ;;  %v3279_v51 = vmul.f32 %v5553_v10, %v8306_v39 }
 0x544   :  { %6094 = vrcp.f32 %v3369_v34  ;;  %v3355_v22 = vmul.f32 0.3275911, %v3339_v19  ;;  %v3563_v56 = vsub.f32 0.0, %v3339_v19  ;;  %v3594_v1 = vmul.f32 1.442695, %v3577_v25 }
 0x545   :  { %6096 = vrcp.f32 %v3368_v13  ;;  %v3354_v6 = vmul.f32 0.3275911, %v3338_v49  ;;  %v3562_v57 = vsub.f32 0.0, %v3338_v49  ;;  %v5556_v59 = vpop.f32.mrb[88].mxu1  ;;  %v3592_v26 = vmul.f32 1.442695, %v3576_v5 }
 0x546   :  { %v3371_v54 = vadd.f32 1.0, %v3355_v22  ;;  %v3579_v17 = vmul.f32 %v3563_v56, %v3339_v19  ;;  %v8341_v55 = vpop.f32.mrb[89].mxu1  ;;  %v8349_v46 = vadd.f32 %v3292_v40, %v7315_v38  ;;  %v3278_v28 = vmul.f32 %v8306_v39, %v3219_v32 }
 0x547   :  { %v3370_v15 = vadd.f32 1.0, %v3354_v6  ;;  %v3578_v52 = vmul.f32 %v3562_v57, %v3338_v49  ;;  %v8355_v2 = vmul.f32 0.70710677, %v8345_v37  ;;  %v3295_v41 = vadd.f32 %v3279_v51, %v8265_v35 }
 0x548   :  { %6098 = vrcp.f32 %v3371_v54  ;;  %v3598_v19 = vmul.f32 1.442695, %v3579_v17  ;;  %v8360_v8 = vmul.f32 0.5, %v3305_v42  ;;  %v8363_v49 = vmul.f32 0.70710677, %v8349_v46 }
 0x549   :  { %6100 = vrcp.f32 %v3370_v15  ;;  %v8352_v34 = vpop.f32.mrb[90].mxu1  ;;  %v3596_v10 = vmul.f32 1.442695, %v3578_v52  ;;  %v3294_v38 = vadd.f32 %v3278_v28, %v8269_v43  ;;  %v8366_v18 = vmul.f32 0.5, %v3304_v60 }
 0x54a   :  { %v8358_v13 = vpop.f32.mrb[91].mxu1  ;;  %6102 = vpow2.f32 %v3594_v1  ;;  %v3341_v32 = vand.u32 2147483647, %v8355_v2  ;;  %v8370_v25 = vadd.f32 %v3295_v41, %v7333_v45  ;;  %v8372_v35 = vmul.f32 0.5, %v3307_v62 }
 0x54b   :  { %6104 = vpow2.f32 %v3592_v26  ;;  %v8374_v22 = vmul.f32 0.5, %v3306_v44  ;;  %v3340_v42 = vand.u32 2147483647, %v8363_v49  ;;  %v3281_v26 = vmul.f32 %v5556_v59, %v8306_v39 }
 0x54c   :  { %6106 = vpow2.f32 %v3598_v19  ;;  %v3357_v43 = vmul.f32 0.3275911, %v3341_v32  ;;  %v3565_v60 = vsub.f32 0.0, %v3341_v32  ;;  %v8382_v6 = vmul.f32 0.70710677, %v8370_v25 }
 0x54d   :  { %v8377_v56 = vpop.f32.mrb[92].mxu1  ;;  %6108 = vpow2.f32 %v3596_v10  ;;  %v3356_v62 = vmul.f32 0.3275911, %v3340_v42  ;;  %v3564_v44 = vsub.f32 0.0, %v3340_v42  ;;  %v8397_v12 = vadd.f32 %v3294_v38, %v7331_v30 }
 0x54e   :  { %v8379_v5 = vpop.eup %6094  ;;  %v3373_v17 = vadd.f32 1.0, %v3357_v43  ;;  %v3581_v33 = vmul.f32 %v3565_v60, %v3341_v32  ;;  %v3343_v15 = vand.u32 2147483647, %v8382_v6  ;;  %v8389_v52 = vpop.f32.mrb[93].mxu1  ;;  %v3280_v38 = vmul.f32 %v8306_v39, %v8341_v55 }
 0x54f   :  { %v8384_v57 = vpop.eup %6096  ;;  %v3417_v45 = vmul.f32 1.0614054, %v8379_v5  ;;  %v3372_v1 = vadd.f32 1.0, %v3356_v62  ;;  %v3580_v51 = vmul.f32 %v3564_v44, %v3340_v42  ;;  %vm3659_vm6 = vcmp.ge.f32.partialorder %v8332_v16, 0.0 }
 0x550   :  { %v3416_v54 = vmul.f32 1.0614054, %v8384_v57  ;;  %6110 = vrcp.f32 %v3373_v17  ;;  %v3359_v10 = vmul.f32 0.3275911, %v3343_v15  ;;  %v3567_v30 = vsub.f32 0.0, %v3343_v15 }
 0x551   :  { %v3433_v40 = vadd.f32 -1.4531521, %v3417_v45  ;;  %v8392_v28 = vpop.f32.mrb[94].mxu1  ;;  %v3602_v45 = vmul.f32 1.442695, %v3581_v33  ;;  %6112 = vrcp.f32 %v3372_v1  ;;  %vm3658_vm7 = vcmp.ge.f32.partialorder %v8334_v63, 0.0 }
 0x552   :  { %v8394_v19 = vpop.eup %6098  ;;  %v3432_v41 = vadd.f32 -1.4531521, %v3416_v54  ;;  %v8403_v42 = vpop.f32.mrb[95].mxu1  ;;  %v3600_v44 = vmul.f32 1.442695, %v3580_v51  ;;  %v3375_v54 = vadd.f32 1.0, %v3359_v10  ;;  %v3583_v51 = vmul.f32 %v3567_v30, %v3343_v15 }
 0x553   :  { %v8399_v32 = vpop.eup %6100  ;;  %v3449_v43 = vmul.f32 %v8379_v5, %v3433_v40  ;;  %v3419_v60 = vmul.f32 1.0614054, %v8394_v19  ;;  %9135 = vst [vmem:[#allocation25_spill] sm:$0xff] %v8403_v42  ;;  %v8410_v33 = vmul.f32 0.70710677, %v8397_v12  ;;  %v3297_v10 = vadd.f32 %v3281_v26, %v8275_v48 }
 0x554   :  { %v3448_v59 = vmul.f32 %v8384_v57, %v3432_v41  ;;  %v3418_v62 = vmul.f32 1.0614054, %v8399_v32  ;;  %v6103_v7 = vpop.eup %6102  ;;  %6114 = vrcp.f32 %v3375_v54  ;;  %v8426_v26 = vadd.f32 %v3280_v38, %v8279_v3 }
 0x555   :  { %v3465_v17 = vadd.f32 1.4214138, %v3449_v43  ;;  %v3435_v11 = vadd.f32 -1.4531521, %v3419_v60  ;;  %v6105_v1 = vpop.eup %6104  ;;  %6116 = vpow2.f32 %v3602_v45  ;;  %v3606_v45 = vmul.f32 1.442695, %v3583_v51 }
 0x556   :  { %v3464_v40 = vadd.f32 1.4214138, %v3448_v59  ;;  %v3434_v4 = vadd.f32 -1.4531521, %v3418_v62  ;;  %v8415_v43 = vpop.eup %6106  ;;  %v3342_v59 = vand.u32 2147483647, %v8410_v33  ;;  %6118 = vpow2.f32 %v3600_v44 }
 0x557   :  { %v3481_v41 = vmul.f32 %v8379_v5, %v3465_v17  ;;  %v3451_v47 = vmul.f32 %v8394_v19, %v3435_v11  ;;  %v8420_v62 = vpop.eup %6108  ;;  %v8423_v17 = vadd.f32 %v3297_v10, %v7347_v0  ;;  %vm3661_vm8 = vcmp.ge.f32.partialorder %v8355_v2, 0.0 }
 0x558   :  { %v3480_v60 = vmul.f32 %v8384_v57, %v3464_v40  ;;  %v3450_v55 = vmul.f32 %v8399_v32, %v3434_v4  ;;  %v3358_v48 = vmul.f32 0.3275911, %v3342_v59  ;;  %v3566_v40 = vsub.f32 0.0, %v3342_v59 }
 0x559   :  { %v3497_v54 = vadd.f32 -0.28449672, %v3481_v41  ;;  %v3467_v61 = vadd.f32 1.4214138, %v3451_v47  ;;  %9136 = vst [vmem:[#allocation26_spill] sm:$0xff] %v8423_v17  ;;  %vm3660_vm9 = vcmp.ge.f32.partialorder %v8363_v49, 0.0  ;;  %v3283_v49 = vmul.f32 %v8352_v34, %v8306_v39 }
 0x55a   :  { %v3496_v11 = vadd.f32 -0.28449672, %v3480_v60  ;;  %v3466_v15 = vadd.f32 1.4214138, %v3450_v55  ;;  %v8430_v53 = vpop.eup %6110  ;;  %v3374_v0 = vadd.f32 1.0, %v3358_v48  ;;  %v3582_v55 = vmul.f32 %v3566_v40, %v3342_v59 }
 0x55b   :  { %v3513_v30 = vmul.f32 %v8379_v5, %v3497_v54  ;;  %v3483_v4 = vmul.f32 %v8394_v19, %v3467_v61  ;;  %v8435_v41 = vmul.f32 0.70710677, %v8423_v17  ;;  %v8437_v10 = vpop.eup %6112  ;;  %v3421_v60 = vmul.f32 1.0614054, %v8430_v53 }
 0x55c   :  { %v3512_v47 = vmul.f32 %v8384_v57, %v3496_v11  ;;  %v3482_v44 = vmul.f32 %v8399_v32, %v3466_v15  ;;  %v3420_v54 = vmul.f32 1.0614054, %v8437_v10  ;;  %6120 = vrcp.f32 %v3374_v0 }
 0x55d   :  { %9137 = vst [vmem:[#allocation27_spill] sm:$0xff] %v8435_v41  ;;  %v3529_v3 = vadd.f32 0.2548296, %v3513_v30  ;;  %v3499_v38 = vadd.f32 -0.28449672, %v3483_v4  ;;  %6122 = vpow2.f32 %v3606_v45  ;;  %vm3663_vm10 = vcmp.ge.f32.partialorder %v8382_v6, 0.0 }
 0x55e   :  { %v3528_v61 = vadd.f32 0.2548296, %v3512_v47  ;;  %v3498_v51 = vadd.f32 -0.28449672, %v3482_v44  ;;  %v3437_v48 = vadd.f32 -1.4531521, %v3421_v60  ;;  %v8445_v30 = vpop.eup %6114 }
 0x55f   :  { %v3545_v11 = vmul.f32 %v8379_v5, %v3529_v3  ;;  %v3515_v15 = vmul.f32 %v8394_v19, %v3499_v38  ;;  %v3436_v40 = vadd.f32 -1.4531521, %v3420_v54  ;;  %v8450_v47 = vand.u32 2147483647, %v8435_v41  ;;  %v6117_v17 = vpop.eup %6116 }
 0x560   :  { %v3544_v4 = vmul.f32 %v8384_v57, %v3528_v61  ;;  %v3514_v59 = vmul.f32 %v8399_v32, %v3498_v51  ;;  %v3453_v5 = vmul.f32 %v8430_v53, %v3437_v48  ;;  %v3423_v3 = vmul.f32 1.0614054, %v8445_v30  ;;  %v6119_v61 = vpop.eup %6118 }
 0x561   :  { %v3625_v44 = vmul.f32 %v6103_v7, %v3545_v11  ;;  %v3531_v0 = vadd.f32 0.2548296, %v3515_v15  ;;  %v3452_v60 = vmul.f32 %v8437_v10, %v3436_v40  ;;  %v8456_v57 = vmul.f32 1.442695, %v3582_v55 }
 0x562   :  { %v3624_v38 = vmul.f32 %v6105_v1, %v3544_v4  ;;  %v3530_v45 = vadd.f32 0.2548296, %v3514_v59  ;;  %v3469_v7 = vadd.f32 1.4214138, %v3453_v5  ;;  %v3439_v11 = vadd.f32 -1.4531521, %v3423_v3 }
 0x563   :  { %v3641_v51 = vsub.f32 1.0, %v3625_v44  ;;  %v3547_v54 = vmul.f32 %v8394_v19, %v3531_v0  ;;  %v3468_v58 = vadd.f32 1.4214138, %v3452_v60  ;;  %v3361_v1 = vmul.f32 0.3275911, %v8450_v47 }
 0x564   :  { %v3640_v15 = vsub.f32 1.0, %v3624_v38  ;;  %v3546_v48 = vmul.f32 %v8399_v32, %v3530_v45  ;;  %v3485_v55 = vmul.f32 %v8430_v53, %v3469_v7  ;;  %v3455_v40 = vmul.f32 %v8445_v30, %v3439_v11 }
 0x565   :  { %v3673_v4 = vsub.f32 0.0, %v3641_v51  ;;  %v3627_v59 = vmul.f32 %v8415_v43, %v3547_v54  ;;  %v3484_v0 = vmul.f32 %v8437_v10, %v3468_v58  ;;  %v3377_v5 = vadd.f32 1.0, %v3361_v1 }
 0x566   :  { %v3672_v44 = vsub.f32 0.0, %v3640_v15  ;;  %v3626_v19 = vmul.f32 %v8420_v62, %v3546_v48  ;;  %v3501_v38 = vadd.f32 -0.28449672, %v3485_v55  ;;  %v3471_v45 = vadd.f32 1.4214138, %v3455_v40  ;;  %v8469_v60 = vpop.eup %6120 }
 0x567   :  { %v3689_v3 = vsel %vm3657_vm4, %v3641_v51, %v3673_v4  ;;  %v3643_v32 = vsub.f32 1.0, %v3627_v59  ;;  %v3500_v7 = vadd.f32 -0.28449672, %v3484_v0  ;;  %v6123_v11 = vpop.eup %6122  ;;  %v3422_v4 = vmul.f32 1.0614054, %v8469_v60 }
 0x568   :  { %v3721_v41 = vadd.f32 1.0, %v3689_v3  ;;  %v3688_v43 = vsel %vm3656_vm5, %v3640_v15, %v3672_v44  ;;  %v3642_v54 = vsub.f32 1.0, %v3626_v19  ;;  %v3517_v58 = vmul.f32 %v8430_v53, %v3501_v38 }
 0x569   :  { %v3720_v42 = vadd.f32 1.0, %v3688_v43  ;;  %v3675_v62 = vsub.f32 0.0, %v3643_v32  ;;  %v3487_v48 = vmul.f32 %v8445_v30, %v3471_v45  ;;  %v3516_v1 = vmul.f32 %v8437_v10, %v3500_v7 }
 0x56a   :  { %v8476_v50 = vmul.f32 %v3721_v41, %v8360_v8  ;;  %v3674_v51 = vsub.f32 0.0, %v3642_v54  ;;  %v3533_v59 = vadd.f32 0.2548296, %v3517_v58  ;;  %v3438_v38 = vadd.f32 -1.4531521, %v3422_v4 }
 0x56b   :  { %v8481_v20 = vmul.f32 %v3720_v42, %v8366_v18  ;;  %v3691_v15 = vsel %vm3659_vm6, %v3643_v32, %v3675_v62  ;;  %v3503_v55 = vadd.f32 -0.28449672, %v3487_v48  ;;  %v3532_v41 = vadd.f32 0.2548296, %v3516_v1 }
 0x56c   :  { %v3755_v40 = vsel %vm1341_vm3, %v8476_v50, 0.0  ;;  %v3723_v44 = vadd.f32 1.0, %v3691_v15  ;;  %v3690_v8 = vsel %vm3658_vm7, %v3642_v54, %v3674_v51  ;;  %v3549_v18 = vmul.f32 %v8430_v53, %v3533_v59 }
 0x56d   :  { %v3754_v19 = vsel %vm1341_vm3, %v8481_v20, 0.0  ;;  %v3722_v0 = vadd.f32 1.0, %v3690_v8  ;;  %v3519_v42 = vmul.f32 %v8445_v30, %v3503_v55  ;;  %v3548_v32 = vmul.f32 %v8437_v10, %v3532_v41 }
 0x56e   :  { %v3756_v16 = vadd.f32 %v3755_v40, %v3754_v19  ;;  %v8494_v3 = vmul.f32 %v3723_v44, %v8372_v35  ;;  %v3629_v63 = vmul.f32 %v6117_v17, %v3549_v18  ;;  %6124 = vrcp.f32 %v3377_v5 }
 0x56f   :  { %v8498_v45 = vmul.f32 %v3722_v0, %v8374_v22  ;;  %v3535_v43 = vadd.f32 0.2548296, %v3519_v42  ;;  %v3628_v54 = vmul.f32 %v6119_v61, %v3548_v32  ;;  %v3454_v7 = vmul.f32 %v8469_v60, %v3438_v38 }
 0x570   :  { %v3645_v62 = vsub.f32 1.0, %v3629_v63  ;;  %6126 = vpow2.f32 %v8456_v57  ;;  %v3759_v22 = vsel %vm1341_vm3, %v8494_v3, 0.0  ;;  %v8510_v5 = vadd.f32 %v8426_v26, %v7345_v31 }
 0x571   :  { %v3757_v53 = vsel %vm1341_vm3, %v8498_v45, 0.0  ;;  %v3551_v35 = vmul.f32 %v8445_v30, %v3535_v43  ;;  %v3644_v10 = vsub.f32 1.0, %v3628_v54  ;;  %v3470_v48 = vadd.f32 1.4214138, %v3454_v7 }
 0x572   :  { %v3758_v58 = vadd.f32 %v3757_v53, %v3756_v16  ;;  %v3677_v17 = vsub.f32 0.0, %v3645_v62  ;;  %v3569_v30 = vsub.f32 0.0, %v8450_v47  ;;  %v8516_v57 = vmul.f32 0.70710677, %v8510_v5 }
 0x573   :  { %v3631_v61 = vmul.f32 %v6123_v11, %v3551_v35  ;;  %v3676_v51 = vsub.f32 0.0, %v3644_v10  ;;  %v3486_v2 = vmul.f32 %v8469_v60, %v3470_v48  ;;  %v3709_v15 = vmul.f32 0.5, %v8345_v37 }
 0x574   :  { %v3760_v1 = vadd.f32 %v3759_v22, %v3758_v58  ;;  %v3693_v4 = vsel %vm3661_vm8, %v3645_v62, %v3677_v17  ;;  %v3708_v31 = vmul.f32 0.5, %v8349_v46  ;;  %v3344_v44 = vand.u32 2147483647, %v8516_v57 }
 0x575   :  { %v3725_v59 = vadd.f32 1.0, %v3693_v4  ;;  %v3692_v11 = vsel %vm3660_vm9, %v3644_v10, %v3676_v51  ;;  %v3502_v55 = vadd.f32 -0.28449672, %v3486_v2  ;;  %v3647_v40 = vsub.f32 1.0, %v3631_v61 }
 0x576   :  { %v3724_v26 = vadd.f32 1.0, %v3692_v11  ;;  %v3585_v41 = vmul.f32 %v3569_v30, %v8450_v47  ;;  %v3360_v18 = vmul.f32 0.3275911, %v3344_v44  ;;  %v3282_v46 = vmul.f32 %v8306_v39, %v8358_v13 }
 0x577   :  { %v3518_v8 = vmul.f32 %v8469_v60, %v3502_v55  ;;  %v8527_v0 = vmul.f32 %v3725_v59, %v3709_v15  ;;  %v3711_v42 = vmul.f32 0.5, %v8370_v25  ;;  %v3679_v38 = vsub.f32 0.0, %v3647_v40 }
 0x578   :  { %v8525_v19 = vpop.eup %6124  ;;  %v8529_v37 = vmul.f32 %v3724_v26, %v3708_v31  ;;  %v3376_v34 = vadd.f32 1.0, %v3360_v18  ;;  %v3299_v63 = vadd.f32 %v3283_v49, %v8285_v29  ;;  %v3610_v62 = vmul.f32 1.442695, %v3585_v41 }
 0x579   :  { %v3534_v16 = vadd.f32 0.2548296, %v3518_v8  ;;  %v3425_v32 = vmul.f32 1.0614054, %v8525_v19  ;;  %v3763_v13 = vsel %vm1341_vm3, %v8527_v0, 0.0  ;;  %v3298_v35 = vadd.f32 %v3282_v46, %v8289_v27 }
 0x57a   :  { %v3761_v47 = vsel %vm1341_vm3, %v8529_v37, 0.0  ;;  %v6127_v43 = vpop.eup %6126  ;;  %6128 = vrcp.f32 %v3376_v34  ;;  %v8542_v25 = vadd.f32 %v3299_v63, %v7361_v21  ;;  %v3695_v48 = vsel %vm3663_vm10, %v3647_v40, %v3679_v38 }
 0x57b   :  { %v3762_v54 = vadd.f32 %v3761_v47, %v3760_v1  ;;  %v3550_v7 = vmul.f32 %v8469_v60, %v3534_v16  ;;  %v3441_v53 = vadd.f32 -1.4531521, %v3425_v32  ;;  %v3568_v22 = vsub.f32 0.0, %v3344_v44 }
 0x57c   :  { %v8548_v60 = vmul.f32 0.70710677, %v8542_v25  ;;  %v8551_v17 = vadd.f32 %v3298_v35, %v7359_v14  ;;  %v3285_v21 = vmul.f32 %v8377_v56, %v8306_v39  ;;  %v3284_v27 = vmul.f32 %v8306_v39, %v8389_v52 }
 0x57d   :  { %v3630_v58 = vmul.f32 %v6127_v43, %v3550_v7  ;;  %v3764_v10 = vadd.f32 %v3763_v13, %v3762_v54  ;;  %v3457_v29 = vmul.f32 %v8525_v19, %v3441_v53  ;;  %v3710_v6 = vmul.f32 0.5, %v8397_v12 }
 0x57e   :  { %6130 = vpow2.f32 %v3610_v62  ;;  %v3347_v1 = vand.u32 2147483647, %v8548_v60  ;;  %v8560_v2 = vmul.f32 0.70710677, %v8551_v17  ;;  %v3301_v4 = vadd.f32 %v3285_v21, %v8295_v24  ;;  %v9138_v21 = vld [vmem:[#allocation25_spill] sm:$0xff] }
 0x57f   :  { %v3646_v61 = vsub.f32 1.0, %v3630_v58  ;;  %v3473_v51 = vadd.f32 1.4214138, %v3457_v29  ;;  %v3300_v15 = vadd.f32 %v3284_v27, %v8299_v23  ;;  %v3727_v59 = vadd.f32 1.0, %v3695_v48  ;;  %v3924_v48 = vld [vmem:[%s9080_s14] sm:$0xff] }
 0x580   :  { %vm3662_vm11 = vcmp.ge.f32.partialorder %v8410_v33, 0.0  ;;  %v3363_v56 = vmul.f32 0.3275911, %v3347_v1  ;;  %v3346_v52 = vand.u32 2147483647, %v8560_v2  ;;  %v3584_v55 = vmul.f32 %v3568_v22, %v3344_v44  ;;  %v3925_v22 = vld [vmem:[%s9080_s14 + $0x8] sm:$0xff] }
 0x581   :  { %v3678_v30 = vsub.f32 0.0, %v3646_v61  ;;  %v3489_v14 = vmul.f32 %v8525_v19, %v3473_v51  ;;  %v8568_v31 = vadd.f32 %v3301_v4, %v7375_v9  ;;  %v8571_v41 = vadd.f32 %v3300_v15, %v7373_v36 }
 0x582   :  { %v3379_v40 = vadd.f32 1.0, %v3363_v56  ;;  %v3362_v8 = vmul.f32 0.3275911, %v3346_v52  ;;  %v8579_v49 = vmul.f32 %v3727_v59, %v3711_v42  ;;  %v3608_v32 = vmul.f32 1.442695, %v3584_v55  ;;  %v9140_v56 = vld [vmem:[#allocation23_spill] sm:$0xff] }
 0x583   :  { %v3694_v12 = vsel %vm3662_vm11, %v3646_v61, %v3678_v30  ;;  %v3505_v11 = vadd.f32 -0.28449672, %v3489_v14  ;;  %v8575_v23 = vmul.f32 0.70710677, %v8568_v31  ;;  %v8590_v47 = vmul.f32 0.70710677, %v8571_v41 }
 0x584   :  { %v3726_v26 = vadd.f32 1.0, %v3694_v12  ;;  %v8577_v33 = vpop.eup %6128  ;;  %6132 = vrcp.f32 %v3379_v40  ;;  %v3378_v9 = vadd.f32 1.0, %v3362_v8  ;;  %v3767_v43 = vsel %vm1341_vm3, %v8579_v49, 0.0 }
 0x585   :  { %v3521_v24 = vmul.f32 %v8525_v19, %v3505_v11  ;;  %v3424_v46 = vmul.f32 1.0614054, %v8577_v33  ;;  %v8585_v16 = vand.u32 2147483647, %v8575_v23  ;;  %v3571_v54 = vsub.f32 0.0, %v3347_v1 }
 0x586   :  { %v8581_v18 = vmul.f32 %v3726_v26, %v3710_v6  ;;  %6134 = vrcp.f32 %v3378_v9  ;;  %v3570_v13 = vsub.f32 0.0, %v3346_v52  ;;  %v8600_v35 = vand.u32 2147483647, %v8590_v47  ;;  %v9139_v6 = vld [vmem:[#allocation27_spill] sm:$0xff]  ;;  %v9142_v26 = vld [vmem:[#allocation26_spill] sm:$0xff] }
 0x587   :  { %v3537_v44 = vadd.f32 0.2548296, %v3521_v24  ;;  %v3440_v34 = vadd.f32 -1.4531521, %v3424_v46  ;;  %v3365_v7 = vmul.f32 0.3275911, %v8585_v16  ;;  %6136 = vpow2.f32 %v3608_v32 }
 0x588   :  { %v3765_v36 = vsel %vm1341_vm3, %v8581_v18, 0.0  ;;  %v6131_v63 = vpop.eup %6130  ;;  %v3364_v29 = vmul.f32 0.3275911, %v8600_v35  ;;  %v3587_v61 = vmul.f32 %v3571_v54, %v3347_v1  ;;  %v3287_v51 = vmul.f32 %v8392_v28, %v8306_v39  ;;  %v9141_v1 = vld [vmem:[#allocation24_spill] sm:$0xff]  ;;  %v3926_v28 = vld [vmem:[%s9080_s14 + $0x10] sm:$0xff]  ;;  %v3929_v9 = vld [vmem:[%s9080_s14 + $0x28] sm:$0xff] }
 0x589   :  { %v3766_v38 = vadd.f32 %v3765_v36, %v3764_v10  ;;  %v3553_v42 = vmul.f32 %v8525_v19, %v3537_v44  ;;  %v3456_v53 = vmul.f32 %v8577_v33, %v3440_v34  ;;  %v3381_v19 = vadd.f32 1.0, %v3365_v7  ;;  %v9143_v36 = vld [vmem:[#allocation22_spill] sm:$0xff] }
 0x58a   :  { %v3286_v27 = vmul.f32 %v8306_v39, %v9138_v21  ;;  %vm3665_vm12 = vcmp.ge.f32.partialorder %v9139_v6, 0.0  ;;  %v3586_v14 = vmul.f32 %v3570_v13, %v3346_v52  ;;  %v3380_v4 = vadd.f32 1.0, %v3364_v29  ;;  %v3927_v39 = vld [vmem:[%s9080_s14 + $0x18] sm:$0xff]  ;;  %v3928_v52 = vld [vmem:[%s9080_s14 + $0x20] sm:$0xff] }
 0x58b   :  { %v8597_v62 = vadd.f32 %v3767_v43, %v3766_v38  ;;  %v8602_v58 = vmul.f32 %v6131_v63, %v3553_v42  ;;  %v3472_v10 = vadd.f32 1.4214138, %v3456_v53  ;;  %6138 = vrcp.f32 %v3381_v19  ;;  %v9144_v38 = vld [vmem:[#allocation21_spill] sm:$0xff] }
 0x58c   :  { %v3303_v12 = vadd.f32 %v3287_v51, %v9140_v56  ;;  %v3302_v11 = vadd.f32 %v3286_v27, %v9141_v1  ;;  %v5966_v55 = vpack.c.bf16 %v3925_v22, %v3924_v48  ;;  %v8632_v40 = vmul.f32 0.5, %v9142_v26 }
 0x58d   :  { %v3488_v30 = vmul.f32 %v8577_v33, %v3472_v10  ;;  %v3649_v59 = vsub.f32 1.0, %v8602_v58  ;;  %6140 = vrcp.f32 %v3380_v4  ;;  %v3614_v44 = vmul.f32 1.442695, %v3587_v61 }
 0x58e   :  { %v8617_v15 = vpop.eup %6132  ;;  %v3573_v46 = vsub.f32 0.0, %v8585_v16  ;;  %v8640_v32 = vadd.f32 %v3303_v12, %v9143_v36  ;;  %v8643_v42 = vadd.f32 %v3302_v11, %v9144_v38  ;;  %5967 = vmatprep.subr.bf16.mxu0 %v5966_v55  ;;  %5982 = vmatprep.subr.bf16.mxu1 %v5966_v55  ;;  %v3612_v54 = vmul.f32 1.442695, %v3586_v14 }
 0x58f   :  { %v3504_v8 = vadd.f32 -0.28449672, %v3488_v30  ;;  %v3427_v24 = vmul.f32 1.0614054, %v8617_v15  ;;  %5969 = vmatpush3.bf16.msra.mxu0 %v5966_v55  ;;  %v5970_v7 = vpack.c.bf16 %v3927_v39, %v3926_v28  ;;  %5986 = vmatpush3.bf16.msra.mxu1 %v5966_v55  ;;  %v3681_v53 = vsub.f32 0.0, %v3649_v59 }
 0x590   :  { %v8645_v34 = vpop.eup %6134  ;;  %v8650_v58 = vmul.f32 0.70710677, %v8640_v32  ;;  %v5974_v19 = vpack.c.bf16 %v3929_v9, %v3928_v52  ;;  %v8653_v29 = vmul.f32 0.5, %v8510_v5  ;;  %v8657_v22 = vmul.f32 0.70710677, %v8643_v42 }
 0x591   :  { %v3520_v63 = vmul.f32 %v8577_v33, %v3504_v8  ;;  %v3443_v43 = vadd.f32 -1.4531521, %v3427_v24  ;;  %v3426_v13 = vmul.f32 1.0614054, %v8645_v34  ;;  %5971 = vmatprep.subr.bf16.mxu0 %v5970_v7  ;;  %5983 = vmatprep.subr.bf16.mxu1 %v5970_v7  ;;  %vm3664_vm13 = vcmp.ge.f32.partialorder %v8516_v57, 0.0  ;;  %v6137_v30 = vpop.eup %6136 }
 0x592   :  { %v3589_v51 = vmul.f32 %v3573_v46, %v8585_v16  ;;  %v3572_v21 = vsub.f32 0.0, %v8600_v35  ;;  %v8663_v27 = vand.u32 2147483647, %v8650_v58  ;;  %6142 = vpow2.f32 %v3614_v44 }
 0x593   :  { %v3536_v10 = vadd.f32 0.2548296, %v3520_v63  ;;  %v3459_v48 = vmul.f32 %v8617_v15, %v3443_v43  ;;  %v3442_v61 = vadd.f32 -1.4531521, %v3426_v13  ;;  %v8667_v4 = vand.u32 2147483647, %v8657_v22  ;;  %5973 = vmatpush3.bf16.msra.mxu0 %v5970_v7  ;;  %5987 = vmatpush3.bf16.msra.mxu1 %v5970_v7 }
 0x594   :  { %v3697_v16 = vsel %vm3665_vm12, %v3649_v59, %v3681_v53  ;;  %6144 = vpow2.f32 %v3612_v54  ;;  %v3367_v1 = vmul.f32 0.3275911, %v8663_v27  ;;  %5975 = vmatprep.subr.bf16.mxu0 %v5974_v19  ;;  %5984 = vmatprep.subr.bf16.mxu1 %v5974_v19  ;;  %v3618_v52 = vmul.f32 1.442695, %v3589_v51  ;;  %v3930_v63 = vld [vmem:[%s9080_s14 + $0x30] sm:$0xff] }
 0x595   :  { %v3552_v5 = vmul.f32 %v8577_v33, %v3536_v10  ;;  %v3475_v14 = vadd.f32 1.4214138, %v3459_v48  ;;  %v8669_v56 = vpop.eup %6138  ;;  %v3458_v12 = vmul.f32 %v8645_v34, %v3442_v61  ;;  %v3366_v28 = vmul.f32 0.3275911, %v8667_v4 }
 0x596   :  { %v3429_v55 = vmul.f32 1.0614054, %v8669_v56  ;;  %v3588_v26 = vmul.f32 %v3572_v21, %v8600_v35  ;;  %v3383_v6 = vadd.f32 1.0, %v3367_v1  ;;  %v3729_v46 = vadd.f32 1.0, %v3697_v16  ;;  %v3931_v35 = vld [vmem:[%s9080_s14 + $0x38] sm:$0xff] }
 0x597   :  { %v3632_v33 = vmul.f32 %v6137_v30, %v3552_v5  ;;  %v3491_v11 = vmul.f32 %v8617_v15, %v3475_v14  ;;  %v3474_v39 = vadd.f32 1.4214138, %v3458_v12  ;;  %v8679_v59 = vpop.eup %6140  ;;  %v3382_v44 = vadd.f32 1.0, %v3366_v28  ;;  %5977 = vmatpush3.bf16.msra.mxu0 %v5974_v19  ;;  %5988 = vmatpush3.bf16.msra.mxu1 %v5974_v19 }
 0x598   :  { %v3445_v9 = vadd.f32 -1.4531521, %v3429_v55  ;;  %v3428_v38 = vmul.f32 1.0614054, %v8679_v59  ;;  %6146 = vrcp.f32 %v3383_v6  ;;  %v3616_v19 = vmul.f32 1.442695, %v3588_v26 }
 0x599   :  { %v3648_v8 = vsub.f32 1.0, %v3632_v33  ;;  %v3507_v24 = vadd.f32 -0.28449672, %v3491_v11  ;;  %v3490_v36 = vmul.f32 %v8645_v34, %v3474_v39  ;;  %6148 = vrcp.f32 %v3382_v44 }
 0x59a   :  { %v3461_v7 = vmul.f32 %v8669_v56, %v3445_v9  ;;  %6150 = vpow2.f32 %v3618_v52  ;;  %v3444_v13 = vadd.f32 -1.4531521, %v3428_v38  ;;  %v5978_v51 = vpack.c.bf16 %v3931_v35, %v3930_v63 }
 0x59b   :  { %v3680_v43 = vsub.f32 0.0, %v3648_v8  ;;  %v3523_v54 = vmul.f32 %v8617_v15, %v3507_v24  ;;  %v3506_v53 = vadd.f32 -0.28449672, %v3490_v36  ;;  %v3575_v14 = vsub.f32 0.0, %v8663_v27 }
 0x59c   :  { %v3477_v61 = vadd.f32 1.4214138, %v3461_v7  ;;  %v3460_v5 = vmul.f32 %v8679_v59, %v3444_v13  ;;  %v6143_v16 = vpop.eup %6142  ;;  %v3574_v33 = vsub.f32 0.0, %v8667_v4  ;;  %5979 = vmatprep.subr.bf16.mxu0 %v5978_v51  ;;  %5985 = vmatprep.subr.bf16.mxu1 %v5978_v51  ;;  %v8700_v11 = vmul.f32 %v3729_v46, %v8632_v40 }
 0x59d   :  { %v3696_v10 = vsel %vm3664_vm13, %v3648_v8, %v3680_v43  ;;  %v3539_v48 = vadd.f32 0.2548296, %v3523_v54  ;;  %v3522_v30 = vmul.f32 %v8645_v34, %v3506_v53  ;;  %5981 = vmatpush3.bf16.msra.mxu0 %v5978_v51  ;;  %5989 = vmatpush3.bf16.msra.mxu1 %v5978_v51  ;;  %6152 = vpow2.f32 %v3616_v19 }
 0x59e   :  { %v3728_v21 = vadd.f32 1.0, %v3696_v10  ;;  %v3493_v1 = vmul.f32 %v8669_v56, %v3477_v61  ;;  %v6145_v57 = vpop.eup %6144  ;;  %v3476_v39 = vadd.f32 1.4214138, %v3460_v5  ;;  %v3591_v40 = vmul.f32 %v3575_v14, %v8663_v27 }
 0x59f   :  { %v3555_v12 = vmul.f32 %v8617_v15, %v3539_v48  ;;  %v3538_v28 = vadd.f32 0.2548296, %v3522_v30  ;;  %v3590_v44 = vmul.f32 %v3574_v33, %v8667_v4  ;;  %v3771_v36 = vsel %vm1341_vm3, %v8700_v11, 0.0 }
 0x5a0   :  { %v8703_v55 = vmul.f32 %v3728_v21, %v8653_v29  ;;  %v3509_v26 = vadd.f32 -0.28449672, %v3493_v1  ;;  %v3492_v8 = vmul.f32 %v8679_v59, %v3476_v39  ;;  %vm3667_vm14 = vcmp.ge.f32.partialorder %v8548_v60, 0.0 }
 0x5a1   :  { %v3635_v52 = vmul.f32 %v6143_v16, %v3555_v12  ;;  %v3554_v6 = vmul.f32 %v8645_v34, %v3538_v28  ;;  %v3622_v53 = vmul.f32 1.442695, %v3591_v40  ;;  %v3620_v48 = vmul.f32 1.442695, %v3590_v44 }
 0x5a2   :  { %v3769_v15 = vsel %vm1341_vm3, %v8703_v55, 0.0  ;;  %v3525_v9 = vmul.f32 %v8669_v56, %v3509_v26  ;;  %v8713_v46 = vpop.eup %6146  ;;  %v3508_v34 = vadd.f32 -0.28449672, %v3492_v8  ;;  %v3715_v61 = vmul.f32 0.5, %v8542_v25 }
 0x5a3   :  { %v3770_v24 = vadd.f32 %v3769_v15, %v8597_v62  ;;  %v3651_v29 = vsub.f32 1.0, %v3635_v52  ;;  %v3634_v38 = vmul.f32 %v6145_v57, %v3554_v6  ;;  %v8718_v63 = vpop.eup %6148  ;;  %v3431_v62 = vmul.f32 1.0614054, %v8713_v46 }
 0x5a4   :  { %v3541_v43 = vadd.f32 0.2548296, %v3525_v9  ;;  %v6151_v54 = vpop.eup %6150  ;;  %v3524_v4 = vmul.f32 %v8679_v59, %v3508_v34  ;;  %v3430_v13 = vmul.f32 1.0614054, %v8718_v63  ;;  %vm3666_vm15 = vcmp.ge.f32.partialorder %v8560_v2, 0.0 }
 0x5a5   :  { %v3683_v35 = vsub.f32 0.0, %v3651_v29  ;;  %v3772_v27 = vadd.f32 %v3771_v36, %v3770_v24  ;;  %v3650_v7 = vsub.f32 1.0, %v3634_v38  ;;  %v3447_v60 = vadd.f32 -1.4531521, %v3431_v62 }
 0x5a6   :  { %v3557_v10 = vmul.f32 %v8669_v56, %v3541_v43  ;;  %v3540_v21 = vadd.f32 0.2548296, %v3524_v4  ;;  %v3446_v30 = vadd.f32 -1.4531521, %v3430_v13  ;;  %v3714_v1 = vmul.f32 0.5, %v8551_v17 }
 0x5a7   :  { %v3699_v19 = vsel %vm3667_vm14, %v3651_v29, %v3683_v35  ;;  %v3682_v51 = vsub.f32 0.0, %v3650_v7  ;;  %v3463_v16 = vmul.f32 %v8713_v46, %v3447_v60  ;;  %v6153_v57 = vpop.eup %6152  ;;  %6154 = vpow2.f32 %v3622_v53 }
 0x5a8   :  { %v3731_v5 = vadd.f32 1.0, %v3699_v19  ;;  %v3637_v14 = vmul.f32 %v6151_v54, %v3557_v10  ;;  %v3556_v33 = vmul.f32 %v8679_v59, %v3540_v21  ;;  %v3462_v56 = vmul.f32 %v8718_v63, %v3446_v30 }
 0x5a9   :  { %v3698_v12 = vsel %vm3666_vm15, %v3650_v7, %v3682_v51  ;;  %v3479_v25 = vadd.f32 1.4214138, %v3463_v16  ;;  %6156 = vpow2.f32 %v3620_v48  ;;  %vm3669_vm1 = vcmp.ge.f32.partialorder %v8575_v23, 0.0 }
 0x5aa   :  { %v3730_v28 = vadd.f32 1.0, %v3698_v12  ;;  %v3653_v39 = vsub.f32 1.0, %v3637_v14  ;;  %v3636_v52 = vmul.f32 %v6153_v57, %v3556_v33  ;;  %v3478_v26 = vadd.f32 1.4214138, %v3462_v56 }
 0x5ab   :  { %v8730_v15 = vmul.f32 %v3731_v5, %v3715_v61  ;;  %v3495_v8 = vmul.f32 %v8713_v46, %v3479_v25  ;;  %vm3668_vm2 = vcmp.ge.f32.partialorder %v8590_v47, 0.0  ;;  %v3717_v54 = vmul.f32 0.5, %v8568_v31 }
 0x5ac   :  { %v8732_v2 = vmul.f32 %v3730_v28, %v3714_v1  ;;  %v3685_v6 = vsub.f32 0.0, %v3653_v39  ;;  %v3652_v17 = vsub.f32 1.0, %v3636_v52  ;;  %v3494_v59 = vmul.f32 %v8718_v63, %v3478_v26 }
 0x5ad   :  { %v3511_v29 = vadd.f32 -0.28449672, %v3495_v8  ;;  %v3775_v38 = vsel %vm1341_vm3, %v8730_v15, 0.0  ;;  %v3716_v7 = vmul.f32 0.5, %v8571_v41  ;;  %vm3671_vm4 = vcmp.ge.f32.partialorder %v8650_v58, 0.0 }
 0x5ae   :  { %v3773_v40 = vsel %vm1341_vm3, %v8732_v2, 0.0  ;;  %v3701_v24 = vsel %vm3669_vm1, %v3653_v39, %v3685_v6  ;;  %v3684_v44 = vsub.f32 0.0, %v3652_v17  ;;  %v3510_v36 = vadd.f32 -0.28449672, %v3494_v59 }
 0x5af   :  { %v3774_v9 = vadd.f32 %v3773_v40, %v3772_v27  ;;  %v3733_v34 = vadd.f32 1.0, %v3701_v24  ;;  %v3527_v35 = vmul.f32 %v8713_v46, %v3511_v29  ;;  %vm3670_vm5 = vcmp.ge.f32.partialorder %v8657_v22, 0.0 }
 0x5b0   :  { %v3700_v23 = vsel %vm3668_vm2, %v3652_v17, %v3684_v44  ;;  %v3526_v62 = vmul.f32 %v8718_v63, %v3510_v36  ;;  %v3718_v56 = vmul.f32 0.5, %v8643_v42 }
 0x5b1   :  { %v3776_v43 = vadd.f32 %v3775_v38, %v3774_v9  ;;  %v3732_v4 = vadd.f32 1.0, %v3700_v23  ;;  %v3543_v27 = vadd.f32 0.2548296, %v3527_v35  ;;  %v6155_v13 = vpop.eup %6154  ;;  %v3749_v19 = vmul.f32 %v3733_v34, %v3717_v54 }
 0x5b2   :  { %v3542_v53 = vadd.f32 0.2548296, %v3526_v62 }
 0x5b3   :  { %v3748_v10 = vmul.f32 %v3732_v4, %v3716_v7  ;;  %v3559_v60 = vmul.f32 %v8713_v46, %v3543_v27  ;;  %v6157_v48 = vpop.eup %6156  ;;  %v3779_v31 = vsel %vm1341_vm3, %v3749_v19, 0.0 }
 0x5b4   :  { %v3558_v47 = vmul.f32 %v8718_v63, %v3542_v53  ;;  %v3719_v63 = vmul.f32 0.5, %v8640_v32 }
 0x5b5   :  { %v3777_v61 = vsel %vm1341_vm3, %v3748_v10, 0.0  ;;  %v3639_v51 = vmul.f32 %v6155_v13, %v3559_v60 }
 0x5b6   :  { %v3778_v21 = vadd.f32 %v3777_v61, %v3776_v43  ;;  %v3638_v30 = vmul.f32 %v6157_v48, %v3558_v47 }
 0x5b7   :  { %v3655_v5 = vsub.f32 1.0, %v3639_v51 }
 0x5b8   :  { %v3654_v41 = vsub.f32 1.0, %v3638_v30  ;;  %v3780_v14 = vadd.f32 %v3779_v31, %v3778_v21 }
 0x5b9   :  { %v3687_v16 = vsub.f32 0.0, %v3655_v5 }
 0x5ba   :  { %v3686_v12 = vsub.f32 0.0, %v3654_v41 }
 0x5bb   :  { %v3703_v1 = vsel %vm3671_vm4, %v3655_v5, %v3687_v16 }
 0x5bc   :  { %v3735_v46 = vadd.f32 1.0, %v3703_v1  ;;  %v3702_v33 = vsel %vm3670_vm5, %v3654_v41, %v3686_v12 }
 0x5bd   :  { %v3734_v57 = vadd.f32 1.0, %v3702_v33 }
 0x5be   :  { %v3751_v28 = vmul.f32 %v3735_v46, %v3719_v63 }
 0x5bf   :  { %v3750_v39 = vmul.f32 %v3734_v57, %v3718_v56 }
 0x5c0   :  { %v3783_v26 = vsel %vm1341_vm3, %v3751_v28, 0.0 }
 0x5c1   :  { %v3781_v25 = vsel %vm1341_vm3, %v3750_v39, 0.0 }
 0x5c2   :  { %v3782_v52 = vadd.f32 %v3781_v25, %v3780_v14 }
 0x5c4   :  { %v3784_v6 = vadd.f32 %v3783_v26, %v3782_v52 }
 0x5c6   :  { %v3785_v58 = vrot.slane %v3784_v6, 4 }
 0x5c8   :  { %v3786_v8 = vadd.f32 %v3785_v58, %v3784_v6 }
 0x5ca   :  { %v3787_v17 = vrot.slane %v3786_v8, 2 }
 0x5cc   :  { %v3788_v59 = vadd.f32 %v3787_v17, %v3786_v8 }
 0x5ce   :  { %v3789_v22 = vrot.slane %v3788_v59, 1 }
 0x5d0   :  { %v3790_v40 = vadd.f32 %v3789_v22, %v3788_v59 }
 0x5d2   :  { %v3791_v24 = vmul.f32 0.0078125, %v3790_v40 }
 0x5d4   :  { %v8756_v29 = vsub.f32 %v3750_v39, %v3791_v24  ;;  %v8759_v32 = vsub.f32 %v8481_v20, %v3791_v24  ;;  %v8762_v42 = vsub.f32 %v8476_v50, %v3791_v24  ;;  %v8765_v9 = vsub.f32 %v8498_v45, %v3791_v24 }
 0x5d5   :  { %v8768_v44 = vsub.f32 %v8494_v3, %v3791_v24  ;;  %v8771_v36 = vsub.f32 %v8529_v37, %v3791_v24  ;;  %v8774_v38 = vsub.f32 %v8527_v0, %v3791_v24  ;;  %v8777_v34 = vsub.f32 %v8581_v18, %v3791_v24 }
 0x5d6   :  { %v8780_v20 = vsub.f32 %v8579_v49, %v3791_v24  ;;  %v8783_v50 = vsub.f32 %v8703_v55, %v3791_v24  ;;  %v8786_v45 = vsub.f32 %v8700_v11, %v3791_v24  ;;  %v8789_v3 = vsub.f32 %v8732_v2, %v3791_v24 }
 0x5d7   :  { %v8792_v37 = vsub.f32 %v8730_v15, %v3791_v24  ;;  %v8794_v0 = vsub.f32 %v3748_v10, %v3791_v24  ;;  %v8796_v35 = vsub.f32 %v3749_v19, %v3791_v24  ;;  %v8798_v18 = vsub.f32 %v3751_v28, %v3791_v24 }
 0x5d8   :  { %v3808_v49 = vmul.f32 %v8759_v32, %v8759_v32  ;;  %v3809_v55 = vmul.f32 %v8762_v42, %v8762_v42  ;;  %v3810_v11 = vmul.f32 %v8765_v9, %v8765_v9  ;;  %v3811_v2 = vmul.f32 %v8768_v44, %v8768_v44 }
 0x5d9   :  { %v3812_v62 = vmul.f32 %v8771_v36, %v8771_v36  ;;  %v3813_v4 = vmul.f32 %v8774_v38, %v8774_v38  ;;  %v3814_v13 = vmul.f32 %v8777_v34, %v8777_v34  ;;  %v3815_v60 = vmul.f32 %v8780_v20, %v8780_v20 }
 0x5da   :  { %v3824_v15 = vsel %vm1341_vm3, %v3808_v49, 0.0  ;;  %v3825_v23 = vsel %vm1341_vm3, %v3809_v55, 0.0  ;;  %v3827_v54 = vsel %vm1341_vm3, %v3810_v11, 0.0  ;;  %v3829_v27 = vsel %vm1341_vm3, %v3811_v2, 0.0 }
 0x5db   :  { %v3826_v43 = vadd.f32 %v3825_v23, %v3824_v15  ;;  %v3831_v19 = vsel %vm1341_vm3, %v3812_v62, 0.0  ;;  %v3833_v48 = vsel %vm1341_vm3, %v3813_v4, 0.0  ;;  %v3816_v61 = vmul.f32 %v8783_v50, %v8783_v50 }
 0x5dc   :  { %v3835_v51 = vsel %vm1341_vm3, %v3814_v13, 0.0  ;;  %v3817_v30 = vmul.f32 %v8786_v45, %v8786_v45  ;;  %v3837_v31 = vsel %vm1341_vm3, %v3815_v60, 0.0  ;;  %v3818_v41 = vmul.f32 %v8789_v3, %v8789_v3  ;;  %v4502_v13 = vld [vmem:[%s9079_s13] ss:$0 sm:$0xff] }
 0x5dd   :  { %v3828_v7 = vadd.f32 %v3827_v54, %v3826_v43  ;;  %v3839_v14 = vsel %vm1341_vm3, %v3816_v61, 0.0  ;;  %v3819_v12 = vmul.f32 %v8792_v37, %v8792_v37  ;;  %v3820_v33 = vmul.f32 %v8794_v0, %v8794_v0  ;;  %v4501_v54 = vld [vmem:[%s9078_s12] ss:$0 sm:$0xff] }
 0x5de   :  { %v3841_v1 = vsel %vm1341_vm3, %v3817_v30, 0.0  ;;  %v3843_v63 = vsel %vm1341_vm3, %v3818_v41, 0.0  ;;  %v3821_v57 = vmul.f32 %v8796_v35, %v8796_v35  ;;  %v3822_v25 = vmul.f32 %v8756_v29, %v8756_v29 }
 0x5df   :  { %v3830_v53 = vadd.f32 %v3829_v27, %v3828_v7  ;;  %v3845_v28 = vsel %vm1341_vm3, %v3819_v12, 0.0  ;;  %v3847_v52 = vsel %vm1341_vm3, %v3820_v33, 0.0  ;;  %v3823_v6 = vmul.f32 %v8798_v18, %v8798_v18 }
 0x5e0   :  { %v3849_v58 = vsel %vm1341_vm3, %v3821_v57, 0.0  ;;  %v3851_v17 = vsel %vm1341_vm3, %v3822_v25, 0.0 }
 0x5e1   :  { %v3832_v10 = vadd.f32 %v3831_v19, %v3830_v53  ;;  %v3853_v22 = vsel %vm1341_vm3, %v3823_v6, 0.0 }
 0x5e3   :  { %v3834_v47 = vadd.f32 %v3833_v48, %v3832_v10 }
 0x5e5   :  { %v3836_v21 = vadd.f32 %v3835_v51, %v3834_v47 }
 0x5e7   :  { %v3838_v5 = vadd.f32 %v3837_v31, %v3836_v21 }
 0x5e9   :  { %v3840_v16 = vadd.f32 %v3839_v14, %v3838_v5 }
 0x5eb   :  { %v3842_v46 = vadd.f32 %v3841_v1, %v3840_v16 }
 0x5ed   :  { %v3844_v56 = vadd.f32 %v3843_v63, %v3842_v46 }
 0x5ef   :  { %v3846_v39 = vadd.f32 %v3845_v28, %v3844_v56 }
 0x5f1   :  { %v3848_v26 = vadd.f32 %v3847_v52, %v3846_v39 }
 0x5f3   :  { %v3850_v8 = vadd.f32 %v3849_v58, %v3848_v26 }
 0x5f5   :  { %v3852_v59 = vadd.f32 %v3851_v17, %v3850_v8  ;;  %v4503_v8 = vld [vmem:[%s9081_s15] ss:$0 sm:$0xff] }
 0x5f7   :  { %v3854_v40 = vadd.f32 %v3853_v22, %v3852_v59 }
 0x5f9   :  { %v3855_v24 = vrot.slane %v3854_v40, 4 }
 0x5fb   :  { %v3856_v49 = vadd.f32 %v3855_v24, %v3854_v40 }
 0x5fd   :  { %v3857_v55 = vrot.slane %v3856_v49, 2 }
 0x5ff   :  { %v3858_v11 = vadd.f32 %v3857_v55, %v3856_v49 }
 0x601   :  { %v3859_v2 = vrot.slane %v3858_v11, 1 }
 0x603   :  { %v3860_v15 = vadd.f32 %v3859_v2, %v3858_v11 }
 0x605   :  { %v3861_v23 = vmul.f32 0.0078125, %v3860_v15 }
 0x607   :  { %v3862_v43 = vadd.f32 1e-05, %v3861_v23 }
 0x609   :  { %6158 = vrsqrt.f32 %v3862_v43 }
 0x613   :  { %v6159_v62 = vpop.eup %6158 }
 0x614   :  { %v3864_v7 = vmul.f32 %v6159_v62, %v8759_v32  ;;  %v3872_v4 = vmul.f32 %v6159_v62, %v8783_v50  ;;  %v3865_v27 = vmul.f32 %v6159_v62, %v8762_v42  ;;  %v3873_v53 = vmul.f32 %v6159_v62, %v8786_v45 }
 0x615   :  { %v3866_v19 = vmul.f32 %v6159_v62, %v8765_v9  ;;  %v3874_v10 = vmul.f32 %v6159_v62, %v8789_v3  ;;  %v3867_v60 = vmul.f32 %v6159_v62, %v8768_v44  ;;  %v3875_v48 = vmul.f32 %v6159_v62, %v8792_v37 }
 0x616   :  { %v3886_v47 = vmul.f32 %v4501_v54, %v3864_v7  ;;  %v3894_v32 = vmul.f32 %v4501_v54, %v3872_v4  ;;  %v3887_v61 = vmul.f32 %v4501_v54, %v3865_v27  ;;  %v3895_v50 = vmul.f32 %v4501_v54, %v3873_v53 }
 0x617   :  { %v3888_v51 = vmul.f32 %v4501_v54, %v3866_v19  ;;  %v3896_v42 = vmul.f32 %v4501_v54, %v3874_v10  ;;  %v3889_v21 = vmul.f32 %v4501_v54, %v3867_v60  ;;  %v3897_v45 = vmul.f32 %v4501_v54, %v3875_v48 }
 0x618   :  { %v3908_v30 = vadd.f32 %v4502_v13, %v3886_v47  ;;  %v3916_v31 = vadd.f32 %v4502_v13, %v3894_v32  ;;  %v3909_v5 = vadd.f32 %v4502_v13, %v3887_v61  ;;  %v3917_v41 = vadd.f32 %v4502_v13, %v3895_v50 }
 0x619   :  { %v3910_v14 = vadd.f32 %v4502_v13, %v3888_v51  ;;  %v3918_v9 = vadd.f32 %v4502_v13, %v3896_v42  ;;  %v3911_v16 = vadd.f32 %v4502_v13, %v3889_v21  ;;  %v3868_v44 = vmul.f32 %v6159_v62, %v8771_v36 }
 0x61a   :  { %5582 = vmatprep.mubr.msk.f32.mxu0 %vm1341_vm3, %v3908_v30  ;;  %5594 = vmatprep.mubr.msk.f32.mxu1 %vm1341_vm3, %v3916_v31  ;;  %v3876_v3 = vmul.f32 %v6159_v62, %v8794_v0  ;;  %v3869_v37 = vmul.f32 %v6159_v62, %v8774_v38  ;;  %v3877_v12 = vmul.f32 %v6159_v62, %v8796_v35 }
 0x61b   :  { %5583 = vmatmul.mubr.msk.f32.vlgmr.msra.gmra.mrb[96].mxu0 %vm1341_vm3, %v3909_v5  ;;  %5595 = vmatmul.mubr.msk.f32.vlgmr.msra.gmra.mrb[96].mxu1 %vm1341_vm3, %v3917_v41  ;;  %v3870_v1 = vmul.f32 %v6159_v62, %v8777_v34  ;;  %v3878_v46 = vmul.f32 %v6159_v62, %v8756_v29  ;;  %v3919_v33 = vadd.f32 %v4502_v13, %v3897_v45 }
 0x61c   :  { %5585 = vmatprep.mubr.msk.f32.mxu0 %vm1341_vm3, %v3910_v14  ;;  %5597 = vmatprep.mubr.msk.f32.mxu1 %vm1341_vm3, %v3918_v9  ;;  %v3890_v36 = vmul.f32 %v4501_v54, %v3868_v44  ;;  %v3898_v63 = vmul.f32 %v4501_v54, %v3876_v3  ;;  %v3891_v0 = vmul.f32 %v4501_v54, %v3869_v37 }
 0x61d   :  { %v3899_v56 = vmul.f32 %v4501_v54, %v3877_v12  ;;  %v3892_v38 = vmul.f32 %v4501_v54, %v3870_v1  ;;  %v3871_v57 = vmul.f32 %v6159_v62, %v8780_v20  ;;  %v3900_v25 = vmul.f32 %v4501_v54, %v3878_v46 }
 0x61e   :  { %v3912_v28 = vadd.f32 %v4502_v13, %v3890_v36  ;;  %v3920_v39 = vadd.f32 %v4502_v13, %v3898_v63  ;;  %v3879_v35 = vmul.f32 %v6159_v62, %v8798_v18  ;;  %v3913_v29 = vadd.f32 %v4502_v13, %v3891_v0 }
 0x61f   :  { %5586 = vmatmul.mubr.msk.f32.gmra.mrb[98].mxu0 %vm1341_vm3, %v3911_v16  ;;  %5598 = vmatmul.mubr.msk.f32.gmra.mrb[98].mxu1 %vm1341_vm3, %v3919_v33  ;;  %v3921_v34 = vadd.f32 %v4502_v13, %v3899_v56  ;;  %v3893_v52 = vmul.f32 %v4501_v54, %v3871_v57  ;;  %v3914_v6 = vadd.f32 %v4502_v13, %v3892_v38 }
 0x620   :  { %5588 = vmatprep.mubr.msk.f32.mxu0 %vm1341_vm3, %v3912_v28  ;;  %5600 = vmatprep.mubr.msk.f32.mxu1 %vm1341_vm3, %v3920_v39  ;;  %v3901_v26 = vmul.f32 %v4501_v54, %v3879_v35  ;;  %v3922_v58 = vadd.f32 %v4502_v13, %v3900_v25 }
 0x621   :  { %v3915_v20 = vadd.f32 %v4502_v13, %v3893_v52 }
 0x622   :  { %v3923_v18 = vadd.f32 %v4502_v13, %v3901_v26 }
 0x623   :  { %5589 = vmatmul.mubr.msk.f32.gmra.mrb[100].mxu0 %vm1341_vm3, %v3913_v29  ;;  %5601 = vmatmul.mubr.msk.f32.gmra.mrb[100].mxu1 %vm1341_vm3, %v3921_v34 }
 0x624   :  { %5591 = vmatprep.mubr.msk.f32.mxu0 %vm1341_vm3, %v3914_v6  ;;  %5603 = vmatprep.mubr.msk.f32.mxu1 %vm1341_vm3, %v3922_v58 }
 0x627   :  { %5592 = vmatmul.mubr.msk.f32.gmra.mrb[102].mxu0 %vm1341_vm3, %v3915_v20  ;;  %5604 = vmatmul.mubr.msk.f32.gmra.mrb[102].mxu1 %vm1341_vm3, %v3923_v18 }
 0x6ee   :  { %v5584_v17 = vpop.f32.mrb[96].mxu0  ;;  %v5596_v59 = vpop.f32.mrb[96].mxu1 }
 0x6ef   :  { %v8889_v22 = vadd.f32 %v5584_v17, %v4503_v8  ;;  %v4053_v40 = vpop.f32.mrb[97].mxu0  ;;  %v4093_v24 = vpop.f32.mrb[97].mxu1  ;;  %v4099_v44 = vadd.f32 %v5596_v59, %v4503_v8 }
 0x6f0   :  { %v8891_v49 = vadd.f32 %v4503_v8, %v4053_v40  ;;  %v4094_v14 = vadd.f32 %v4503_v8, %v4093_v24 }
 0x6f1   :  { %v4135_v55 = vsel %vm713_vm0, %v8889_v22, 0.0  ;;  %v4151_v33 = vsel %vm713_vm0, %v4099_v44, 0.0 }
 0x6f2   :  { %v4134_v11 = vsel %vm713_vm0, %v8891_v49, 0.0  ;;  %v5587_v2 = vpop.f32.mrb[98].mxu0  ;;  %v5599_v15 = vpop.f32.mrb[98].mxu1  ;;  %v4149_v12 = vsel %vm713_vm0, %v4094_v14, 0.0 }
 0x6f3   :  { %v4136_v23 = vadd.f32 %v4135_v55, %v4134_v11  ;;  %v4063_v43 = vpop.f32.mrb[99].mxu0  ;;  %v4103_v62 = vpop.f32.mrb[99].mxu1  ;;  %v4069_v54 = vadd.f32 %v5587_v2, %v4503_v8  ;;  %v4109_v36 = vadd.f32 %v5599_v15, %v4503_v8 }
 0x6f4   :  { %v4064_v7 = vadd.f32 %v4503_v8, %v4063_v43  ;;  %v4104_v1 = vadd.f32 %v4503_v8, %v4103_v62 }
 0x6f5   :  { %v4139_v60 = vsel %vm713_vm0, %v4069_v54, 0.0  ;;  %v4155_v57 = vsel %vm713_vm0, %v4109_v36, 0.0 }
 0x6f6   :  { %v4137_v4 = vsel %vm713_vm0, %v4064_v7, 0.0  ;;  %v5590_v27 = vpop.f32.mrb[100].mxu0  ;;  %v5602_v53 = vpop.f32.mrb[100].mxu1  ;;  %v4153_v0 = vsel %vm713_vm0, %v4104_v1, 0.0 }
 0x6f7   :  { %v4138_v13 = vadd.f32 %v4137_v4, %v4136_v23  ;;  %v4073_v19 = vpop.f32.mrb[101].mxu0  ;;  %v4113_v10 = vpop.f32.mrb[101].mxu1  ;;  %v4079_v48 = vadd.f32 %v5590_v27, %v4503_v8  ;;  %v4119_v28 = vadd.f32 %v5602_v53, %v4503_v8 }
 0x6f8   :  { %v4074_v47 = vadd.f32 %v4503_v8, %v4073_v19  ;;  %v4114_v56 = vadd.f32 %v4503_v8, %v4113_v10 }
 0x6f9   :  { %v4140_v32 = vadd.f32 %v4139_v60, %v4138_v13  ;;  %v4143_v30 = vsel %vm713_vm0, %v4079_v48, 0.0  ;;  %v4159_v34 = vsel %vm713_vm0, %v4119_v28, 0.0 }
 0x6fa   :  { %v4141_v61 = vsel %vm713_vm0, %v4074_v47, 0.0  ;;  %v5593_v50 = vpop.f32.mrb[102].mxu0  ;;  %v5605_v51 = vpop.f32.mrb[102].mxu1  ;;  %v4157_v25 = vsel %vm713_vm0, %v4114_v56, 0.0 }
 0x6fb   :  { %v4142_v42 = vadd.f32 %v4141_v61, %v4140_v32  ;;  %v4083_v21 = vpop.f32.mrb[103].mxu0  ;;  %v4123_v45 = vpop.f32.mrb[103].mxu1  ;;  %v4089_v31 = vadd.f32 %v5593_v50, %v4503_v8  ;;  %v4129_v52 = vadd.f32 %v5605_v51, %v4503_v8 }
 0x6fc   :  { %v4084_v5 = vadd.f32 %v4503_v8, %v4083_v21  ;;  %v4124_v35 = vadd.f32 %v4503_v8, %v4123_v45 }
 0x6fd   :  { %v4144_v41 = vadd.f32 %v4143_v30, %v4142_v42  ;;  %v4147_v3 = vsel %vm713_vm0, %v4089_v31, 0.0  ;;  %v4163_v20 = vsel %vm713_vm0, %v4129_v52, 0.0 }
 0x6fe   :  { %v4145_v9 = vsel %vm713_vm0, %v4084_v5, 0.0  ;;  %v4161_v6 = vsel %vm713_vm0, %v4124_v35, 0.0 }
 0x6ff   :  { %v4146_v16 = vadd.f32 %v4145_v9, %v4144_v41 }
 0x701   :  { %v4148_v37 = vadd.f32 %v4147_v3, %v4146_v16 }
 0x703   :  { %v4150_v46 = vadd.f32 %v4149_v12, %v4148_v37 }
 0x705   :  { %v4152_v63 = vadd.f32 %v4151_v33, %v4150_v46 }
 0x707   :  { %v4154_v38 = vadd.f32 %v4153_v0, %v4152_v63 }
 0x709   :  { %v4156_v39 = vadd.f32 %v4155_v57, %v4154_v38 }
 0x70b   :  { %v4158_v29 = vadd.f32 %v4157_v25, %v4156_v39 }
 0x70d   :  { %v4160_v26 = vadd.f32 %v4159_v34, %v4158_v29 }
 0x70f   :  { %v4162_v58 = vadd.f32 %v4161_v6, %v4160_v26 }
 0x711   :  { %v4164_v18 = vadd.f32 %v4163_v20, %v4162_v58 }
 0x713   :  { %v4165_v17 = vrot.slane %v4164_v18, 4 }
 0x715   :  { %v4166_v59 = vadd.f32 %v4165_v17, %v4164_v18 }
 0x717   :  { %v4167_v40 = vrot.slane %v4166_v59, 2 }
 0x719   :  { %v4168_v24 = vadd.f32 %v4167_v40, %v4166_v59 }
 0x71b   :  { %v4169_v55 = vrot.slane %v4168_v24, 1 }
 0x71d   :  { %v4170_v11 = vadd.f32 %v4169_v55, %v4168_v24 }
 0x71f   :  { %v4171_v2 = vmul.f32 0.0078125, %v4170_v11 }
 0x721   :  { %v8912_v15 = vsub.f32 %v8891_v49, %v4171_v2  ;;  %v8915_v23 = vsub.f32 %v8889_v22, %v4171_v2  ;;  %v8917_v8 = vsub.f32 %v4064_v7, %v4171_v2  ;;  %v8919_v43 = vsub.f32 %v4069_v54, %v4171_v2 }
 0x722   :  { %v8921_v62 = vsub.f32 %v4074_v47, %v4171_v2  ;;  %v8923_v4 = vsub.f32 %v4079_v48, %v4171_v2  ;;  %v8925_v27 = vsub.f32 %v4084_v5, %v4171_v2  ;;  %v8927_v53 = vsub.f32 %v4089_v31, %v4171_v2 }
 0x723   :  { %v8929_v13 = vsub.f32 %v4094_v14, %v4171_v2  ;;  %v8931_v19 = vsub.f32 %v4099_v44, %v4171_v2  ;;  %v8933_v49 = vsub.f32 %v4104_v1, %v4171_v2  ;;  %v8935_v22 = vsub.f32 %v4109_v36, %v4171_v2 }
 0x724   :  { %v8937_v7 = vsub.f32 %v4114_v56, %v4171_v2  ;;  %v8939_v54 = vsub.f32 %v4119_v28, %v4171_v2  ;;  %v8941_v10 = vsub.f32 %v4124_v35, %v4171_v2  ;;  %v8943_v60 = vsub.f32 %v4129_v52, %v4171_v2 }
 0x725   :  { %v4188_v48 = vmul.f32 %v8912_v15, %v8912_v15  ;;  %v4189_v47 = vmul.f32 %v8915_v23, %v8915_v23  ;;  %v4190_v32 = vmul.f32 %v8917_v8, %v8917_v8  ;;  %v4191_v61 = vmul.f32 %v8919_v43, %v8919_v43 }
 0x726   :  { %v4192_v21 = vmul.f32 %v8921_v62, %v8921_v62  ;;  %v4193_v31 = vmul.f32 %v8923_v4, %v8923_v4  ;;  %v4194_v14 = vmul.f32 %v8925_v27, %v8925_v27  ;;  %v4195_v44 = vmul.f32 %v8927_v53, %v8927_v53 }
 0x727   :  { %v4204_v50 = vsel %vm713_vm0, %v4188_v48, 0.0  ;;  %v4205_v51 = vsel %vm713_vm0, %v4189_v47, 0.0  ;;  %v4207_v45 = vsel %vm713_vm0, %v4190_v32, 0.0  ;;  %v4209_v5 = vsel %vm713_vm0, %v4191_v61, 0.0 }
 0x728   :  { %v4206_v42 = vadd.f32 %v4205_v51, %v4204_v50  ;;  %v4211_v9 = vsel %vm713_vm0, %v4192_v21, 0.0  ;;  %v4213_v3 = vsel %vm713_vm0, %v4193_v31, 0.0  ;;  %v4196_v12 = vmul.f32 %v8929_v13, %v8929_v13 }
 0x729   :  { %v4215_v1 = vsel %vm713_vm0, %v4194_v14, 0.0  ;;  %v4197_v33 = vmul.f32 %v8931_v19, %v8931_v19  ;;  %v4217_v36 = vsel %vm713_vm0, %v4195_v44, 0.0  ;;  %v4198_v0 = vmul.f32 %v8933_v49, %v8933_v49 }
 0x72a   :  { %v4208_v30 = vadd.f32 %v4207_v45, %v4206_v42  ;;  %v4219_v56 = vsel %vm713_vm0, %v4196_v12, 0.0  ;;  %v4199_v57 = vmul.f32 %v8935_v22, %v8935_v22  ;;  %v4200_v25 = vmul.f32 %v8937_v7, %v8937_v7 }
 0x72b   :  { %v4221_v28 = vsel %vm713_vm0, %v4197_v33, 0.0  ;;  %v4223_v35 = vsel %vm713_vm0, %v4198_v0, 0.0  ;;  %v4201_v34 = vmul.f32 %v8939_v54, %v8939_v54  ;;  %v4202_v6 = vmul.f32 %v8941_v10, %v8941_v10 }
 0x72c   :  { %v4210_v41 = vadd.f32 %v4209_v5, %v4208_v30  ;;  %v4225_v52 = vsel %vm713_vm0, %v4199_v57, 0.0  ;;  %v4227_v58 = vsel %vm713_vm0, %v4200_v25, 0.0  ;;  %v4203_v18 = vmul.f32 %v8943_v60, %v8943_v60 }
 0x72d   :  { %v4229_v17 = vsel %vm713_vm0, %v4201_v34, 0.0  ;;  %v4231_v40 = vsel %vm713_vm0, %v4202_v6, 0.0 }
 0x72e   :  { %v4212_v16 = vadd.f32 %v4211_v9, %v4210_v41  ;;  %v4233_v55 = vsel %vm713_vm0, %v4203_v18, 0.0  ;;  %v4520_v41 = vld [vmem:[%s9082_s16] ss:$0 sm:$0xff] }
 0x730   :  { %v4214_v37 = vadd.f32 %v4213_v3, %v4212_v16 }
 0x732   :  { %v4216_v46 = vadd.f32 %v4215_v1, %v4214_v37 }
 0x734   :  { %v4218_v63 = vadd.f32 %v4217_v36, %v4216_v46 }
 0x736   :  { %v4220_v38 = vadd.f32 %v4219_v56, %v4218_v63 }
 0x738   :  { %v4222_v39 = vadd.f32 %v4221_v28, %v4220_v38 }
 0x73a   :  { %v4224_v29 = vadd.f32 %v4223_v35, %v4222_v39 }
 0x73c   :  { %v4226_v26 = vadd.f32 %v4225_v52, %v4224_v29 }
 0x73e   :  { %v4228_v20 = vadd.f32 %v4227_v58, %v4226_v26 }
 0x740   :  { %v4230_v59 = vadd.f32 %v4229_v17, %v4228_v20 }
 0x742   :  { %v4232_v24 = vadd.f32 %v4231_v40, %v4230_v59  ;;  %v9145_v59 = vld [vmem:[#allocation5_spill] sm:$0xff] }
 0x744   :  { %v4234_v11 = vadd.f32 %v4233_v55, %v4232_v24  ;;  %v9146_v24 = vld [vmem:[#allocation6_spill] sm:$0xff] }
 0x746   :  { %v4235_v2 = vrot.slane %v4234_v11, 4 }
 0x748   :  { %v4236_v48 = vadd.f32 %v4235_v2, %v4234_v11  ;;  %v9147_v11 = vld [vmem:[#allocation7_spill] sm:$0xff] }
 0x74a   :  { %v4237_v47 = vrot.slane %v4236_v48, 2 }
 0x74c   :  { %v4238_v32 = vadd.f32 %v4237_v47, %v4236_v48  ;;  %v9148_v48 = vld [vmem:[#allocation8_spill] sm:$0xff] }
 0x74e   :  { %v4239_v61 = vrot.slane %v4238_v32, 1 }
 0x750   :  { %v4240_v50 = vadd.f32 %v4239_v61, %v4238_v32  ;;  %v9149_v32 = vld [vmem:[#allocation9_spill] sm:$0xff] }
 0x752   :  { %v4241_v51 = vmul.f32 0.0078125, %v4240_v50  ;;  %v9150_v50 = vld [vmem:[#allocation10_spill] sm:$0xff] }
 0x754   :  { %v4242_v42 = vadd.f32 1e-05, %v4241_v51 }
 0x756   :  { %6160 = vrsqrt.f32 %v4242_v42  ;;  %v9151_v42 = vld [vmem:[#allocation11_spill] sm:$0xff] }
 0x760   :  { %v6161_v21 = vpop.eup %6160 }
 0x761   :  { %v4244_v45 = vmul.f32 %v6161_v21, %v8912_v15  ;;  %v4245_v30 = vmul.f32 %v6161_v21, %v8915_v23  ;;  %v4246_v31 = vmul.f32 %v6161_v21, %v8917_v8  ;;  %v4247_v5 = vmul.f32 %v6161_v21, %v8919_v43 }
 0x762   :  { %v4248_v14 = vmul.f32 %v6161_v21, %v8921_v62  ;;  %v4249_v9 = vmul.f32 %v6161_v21, %v8923_v4  ;;  %v4250_v16 = vmul.f32 %v6161_v21, %v8925_v27  ;;  %v4251_v44 = vmul.f32 %v6161_v21, %v8927_v53 }
 0x763   :  { %v4252_v15 = vmul.f32 %v6161_v21, %v8929_v13  ;;  %v4253_v23 = vmul.f32 %v6161_v21, %v8931_v19  ;;  %v4254_v8 = vmul.f32 %v6161_v21, %v8933_v49  ;;  %v4255_v43 = vmul.f32 %v6161_v21, %v8935_v22  ;;  %v4521_v13 = vld [vmem:[%s9083_s17] ss:$0 sm:$0xff]  ;;  %s6187_s17 = smov [#allocation2]  }
 0x764   :  { %v4256_v3 = vmul.f32 %v6161_v21, %v8937_v7  ;;  %v4257_v37 = vmul.f32 %v6161_v21, %v8939_v54  ;;  %v4258_v62 = vmul.f32 %v6161_v21, %v8941_v10  ;;  %v4259_v4 = vmul.f32 %v6161_v21, %v8943_v60  ;;  %s4341_s7 = sshll.u32 %s6187_s17, 4  ;;  %s9031_s7 = int_to_ptr.vmem [resolvable:$true] %s4341_s7 }
 0x765   :  { %v4266_v12 = vmul.f32 %v4520_v41, %v4244_v45  ;;  %v4267_v27 = vmul.f32 %v4520_v41, %v4245_v30  ;;  %v4268_v1 = vmul.f32 %v4520_v41, %v4246_v31  ;;  %v4269_v53 = vmul.f32 %v4520_v41, %v4247_v5  ;;  %v9152_v45 = vld [vmem:[#allocation12_spill] sm:$0xff]  ;;  %v9153_v31 = vld [vmem:[#allocation13_spill] sm:$0xff]  ;;  %s6162_s11 = scalar_lea.vmem %s9031_s7, 2048  ;;  %p6167_p1 = scmp.lt.s32.totalorder %s9031_s7, %s9031_s7 }
 0x766   :  { %v4270_v19 = vmul.f32 %v4520_v41, %v4248_v14  ;;  %v4271_v49 = vmul.f32 %v4520_v41, %v4249_v9  ;;  %v4272_v46 = vmul.f32 %v4520_v41, %v4250_v16  ;;  %v4273_v22 = vmul.f32 %v4520_v41, %v4251_v44  ;;  %v9155_v9 = vld [vmem:[#allocation15_spill] sm:$0xff]  ;;  %v9156_v44 = vld [vmem:[#allocation16_spill] sm:$0xff]  ;;  %p6163_p0 = scmp.ne.s32.totalorder %s9031_s7, %s6162_s11  ;;  %p6168_p2 = scmp.lt.s32.totalorder %s6162_s11, %s6162_s11 }
 0x767   :  { %v4274_v33 = vmul.f32 %v4520_v41, %v4252_v15  ;;  %v4275_v7 = vmul.f32 %v4520_v41, %v4253_v23  ;;  %v4276_v36 = vmul.f32 %v4520_v41, %v4254_v8  ;;  %v4277_v54 = vmul.f32 %v4520_v41, %v4255_v43  ;;  %v9157_v23 = vld [vmem:[#allocation17_spill] sm:$0xff]  ;;  %v9158_v43 = vld [vmem:[#allocation18_spill] sm:$0xff] }
 0x768   :  { %v4278_v63 = vmul.f32 %v4520_v41, %v4256_v3  ;;  %v4279_v10 = vmul.f32 %v4520_v41, %v4257_v37  ;;  %v4280_v0 = vmul.f32 %v4520_v41, %v4258_v62  ;;  %v4281_v60 = vmul.f32 %v4520_v41, %v4259_v4  ;;  %v9154_v41 = vld [vmem:[#allocation14_spill] sm:$0xff]  ;;  %v9159_v37 = vld [vmem:[#allocation19_spill] sm:$0xff]  ;;  %v9160_v4 = vld [vmem:[#allocation20_spill] sm:$0xff]  ;;  %p6169_p3 = por %p6168_p2, %p6167_p1 }
 0x769   :  { %v4288_v56 = vadd.f32 %v4521_v13, %v4266_v12  ;;  %v4289_v38 = vadd.f32 %v4521_v13, %v4267_v27  ;;  %v4290_v57 = vadd.f32 %v4521_v13, %v4268_v1  ;;  %v4291_v28 = vadd.f32 %v4521_v13, %v4269_v53 }
 0x76a   :  { %v4292_v39 = vadd.f32 %v4521_v13, %v4270_v19  ;;  %v4293_v25 = vadd.f32 %v4521_v13, %v4271_v49  ;;  %v4294_v35 = vadd.f32 %v4521_v13, %v4272_v46  ;;  %v4295_v29 = vadd.f32 %v4521_v13, %v4273_v22  ;;  %p6170_p4 = pnand %p6169_p3, %p6163_p0 }
 0x76b   :  { %v4296_v34 = vadd.f32 %v4521_v13, %v4274_v33  ;;  %v4297_v52 = vadd.f32 %v4521_v13, %v4275_v7  ;;  %v4298_v26 = vadd.f32 %v4521_v13, %v4276_v36  ;;  %v4299_v6 = vadd.f32 %v4521_v13, %v4277_v54 }
 0x76c   :  { %v4300_v58 = vadd.f32 %v4521_v13, %v4278_v63  ;;  %v4301_v20 = vadd.f32 %v4521_v13, %v4279_v10  ;;  %v4302_v18 = vadd.f32 %v4521_v13, %v4280_v0  ;;  %v4303_v17 = vadd.f32 %v4521_v13, %v4281_v60 }
 0x76d   :  { %v4304_v40 = vadd.f32 %v4288_v56, %v9145_v59  ;;  %v4305_v55 = vadd.f32 %v4289_v38, %v9146_v24  ;;  %v4306_v2 = vadd.f32 %v4290_v57, %v9147_v11  ;;  %v4307_v47 = vadd.f32 %v4291_v28, %v9148_v48 }
 0x76e   :  { %v4308_v61 = vadd.f32 %v4292_v39, %v9149_v32  ;;  %v4309_v51 = vadd.f32 %v4293_v25, %v9150_v50  ;;  %v4310_v21 = vadd.f32 %v4294_v35, %v9151_v42  ;;  %v4311_v30 = vadd.f32 %v4295_v29, %v9152_v45 }
 0x76f   :  { %v4312_v5 = vadd.f32 %v4296_v34, %v9153_v31  ;;  %v4313_v14 = vadd.f32 %v4297_v52, %v9154_v41  ;;  %v4314_v16 = vadd.f32 %v4298_v26, %v9155_v9  ;;  %v4315_v15 = vadd.f32 %v4299_v6, %v9156_v44  ;;  %4320 = vst.msk [vmem:[#allocation2] sm:$0xff] %vm713_vm0, %v4304_v40 }
 0x770   :  { %4321 = vst.msk [vmem:[#allocation2 + $0x8] sm:$0xff] %vm713_vm0, %v4305_v55  ;;  %4322 = vst.msk [vmem:[#allocation2 + $0x10] sm:$0xff] %vm713_vm0, %v4306_v2  ;;  %v4316_v8 = vadd.f32 %v4300_v58, %v9157_v23  ;;  %v4317_v3 = vadd.f32 %v4301_v20, %v9158_v43  ;;  %v4318_v62 = vadd.f32 %v4302_v18, %v9159_v37 }
 0x771   :  { %4323 = vst.msk [vmem:[#allocation2 + $0x18] sm:$0xff] %vm713_vm0, %v4307_v47  ;;  %v4319_v12 = vadd.f32 %v4303_v17, %v9160_v4  ;;  %4324 = vst.msk [vmem:[#allocation2 + $0x20] sm:$0xff] %vm713_vm0, %v4308_v61 }
 0x772   :  { %4325 = vst.msk [vmem:[#allocation2 + $0x28] sm:$0xff] %vm713_vm0, %v4309_v51  ;;  %4326 = vst.msk [vmem:[#allocation2 + $0x30] sm:$0xff] %vm713_vm0, %v4310_v21 }
 0x773   :  { %4327 = vst.msk [vmem:[#allocation2 + $0x38] sm:$0xff] %vm713_vm0, %v4311_v30  ;;  %4328 = vst.msk [vmem:[#allocation2 + $0x40] sm:$0xff] %vm713_vm0, %v4312_v5 }
 0x774   :  { %4329 = vst.msk [vmem:[#allocation2 + $0x48] sm:$0xff] %vm713_vm0, %v4313_v14  ;;  %4330 = vst.msk [vmem:[#allocation2 + $0x50] sm:$0xff] %vm713_vm0, %v4314_v16 }
 0x775   :  { %4331 = vst.msk [vmem:[#allocation2 + $0x58] sm:$0xff] %vm713_vm0, %v4315_v15  ;;  %4332 = vst.msk [vmem:[#allocation2 + $0x60] sm:$0xff] %vm713_vm0, %v4316_v8 }
 0x776   :  { %4333 = vst.msk [vmem:[#allocation2 + $0x68] sm:$0xff] %vm713_vm0, %v4317_v3  ;;  %4334 = vst.msk [vmem:[#allocation2 + $0x70] sm:$0xff] %vm713_vm0, %v4318_v62 }
 0x777   :  { %4335 = vst.msk [vmem:[#allocation2 + $0x78] sm:$0xff] %vm713_vm0, %v4319_v12 }
 0x778   :  { %6173 = shalt.err (!%p6170_p4)
}
 0x779   :  { %s6174_s22 = scalar_lea.hbm %s9084_s18, 2048 }
 0x77a   :  { %p6175_p5 = scmp.ne.s32.totalorder %s9084_s18, %s6174_s22  ;;  %p6178_p6 = scmp.lt.u32.totalorder %s6174_s22, %s9084_s18 }
 0x77c   :  { %p6180_p7 = pnand %p6178_p6, %p6175_p5 }
 0x77e   :  { %6183 = shalt.err (!%p6180_p7)
}
 0x77f   :  { %s6188_s25 = smov 128   ;;  %s6189_s9 = smov 8  }
 0x780   :  { %4347 = dma.vmem_to_hbm [thread:$0]  %s9031_s7, 2048, %s9084_s18, [#allocation3], %s6188_s25, %s6188_s25, %s6189_s9  }
 0x781   :  { %6184 = dma.done.wait [#allocation3], 2048  }
 0x782   :  { %6185 = vsyncadd [#allocation3], 4294965248 }
 0x783   :  { %4351 = vsyncpa [#allocation3], 1 }

// kernel: cmt_block_forward.2
= control target key start
LH: loop header
LB: loop body
LE: loop exit
PB: predicated region body
PF: predicated region fallthrough
CT: control target
= control target key end

     0   :  { %s15705_s0 = inlined_call_operand.hbm [shape: f32[128,32], index: 0, kind: input, shape index: {}]   ;;  %s15706_s1 = inlined_call_operand.vmem [shape: f32[9,128,128], index: 1, kind: input, shape index: {}]   ;;  %s15707_s2 = inlined_call_operand.vmem [shape: f32[4,64,128], index: 2, kind: input, shape index: {}]   ;;  %s15708_s3 = inlined_call_operand.vmem [shape: f32[128,128], index: 3, kind: input, shape index: {}]   ;;  %s15709_s4 = inlined_call_operand.vmem [shape: f32[9,32], index: 4, kind: input, shape index: {}]   ;;  %s15710_s5 = inlined_call_operand.vmem [shape: f32[1,32], index: 5, kind: input, shape index: {}]   ;;  %s15711_s6 = inlined_call_operand.vmem [shape: f32[128,1], index: 6, kind: input, shape index: {}]   ;;  %s15712_s7 = inlined_call_operand.vmem [shape: f32[128,1], index: 7, kind: input, shape index: {}]   ;;  %s15713_s8 = inlined_call_operand.vmem [shape: f32[4,32], index: 8, kind: input, shape index: {}]   ;;  %s15714_s9 = inlined_call_operand.hbm [shape: f32[1,32], index: 9, kind: input, shape index: {}]   ;;  %s15715_s10 = inlined_call_operand.hbm [shape: f32[4,32], index: 10, kind: input, shape index: {}]   ;;  %s15716_s11 = inlined_call_operand.hbm [shape: f32[1,32], index: 11, kind: input, shape index: {}]   ;;  %s15717_s12 = inlined_call_operand.vmem [shape: f32[32,32], index: 12, kind: input, shape index: {}]   ;;  %s15718_s13 = inlined_call_operand.hbm [shape: f32[1,32], index: 13, kind: input, shape index: {}]   ;;  %s15719_s14 = inlined_call_operand.vmem [shape: f32[32,32], index: 14, kind: input, shape index: {}]   ;;  %s15720_s15 = inlined_call_operand.hbm [shape: f32[1,32], index: 15, kind: input, shape index: {}]   ;;  %s15721_s16 = inlined_call_operand.vmem [shape: f32[32,32], index: 16, kind: input, shape index: {}]   ;;  %s15722_s17 = inlined_call_operand.hbm [shape: f32[1,32], index: 17, kind: input, shape index: {}]   ;;  %s15723_s18 = inlined_call_operand.vmem [shape: f32[4,64,32], index: 18, kind: input, shape index: {}]   ;;  %s15724_s19 = inlined_call_operand.vmem [shape: f32[32,32], index: 19, kind: input, shape index: {}]   ;;  %s15725_s20 = inlined_call_operand.hbm [shape: f32[1,32], index: 20, kind: input, shape index: {}]   ;;  %s15726_s21 = inlined_call_operand.vmem [shape: f32[128,32], index: 21, kind: output, shape index: {0}]   ;;  %s15727_s22 = inlined_call_operand.vmem [shape: f32[128,32], index: 22, kind: output, shape index: {1}]  }
   0x1   :  { %15739 = sst [smem:[#allocation31_spill]] %s15705_s0 }
   0x2   :  { %15740 = sst [smem:[#allocation32_spill]] %s15706_s1 }
   0x3   :  { %15741 = sst [smem:[#allocation33_spill]] %s15707_s2 }
   0x4   :  { %15742 = sst [smem:[#allocation34_spill]] %s15708_s3 }
   0x5   :  { %15743 = sst [smem:[#allocation35_spill]] %s15709_s4 }
   0x6   :  { %15744 = sst [smem:[#allocation36_spill]] %s15710_s5 }
   0x7   :  { %15745 = sst [smem:[#allocation37_spill]] %s15711_s6 }
   0x8   :  { %28 = vsyncpa [#allocation3], 0 }
   0x9   :  { %29 = vsyncpa [#allocation5], 0 }
   0xa   :  { %30 = vsyncpa [#allocation8], 0 }
   0xb   :  { %31 = vsyncpa [#allocation11], 0 }
   0xc   :  { %32 = vsyncpa [#allocation14], 0  ;;  %s11948_s3 = smov [#allocation4]   ;;  %s11949_s29 = smov [#allocation7]  }
   0xd   :  { %s67_s28 = sshll.u32 %s11948_s3, 4  ;;  %s87_s30 = sshll.u32 %s11949_s29, 4  ;;  %s68_s28 = int_to_ptr.vmem [resolvable:$true] %s67_s28  ;;  %s88_s30 = int_to_ptr.vmem [resolvable:$true] %s87_s30 }
   0xe   :  { %s11762_s23 = scalar_lea.hbm %s15714_s9, 16 }
   0xf   :  { %p11763_p0 = scmp.ne.s32.totalorder %s15714_s9, %s11762_s23  ;;  %p11766_p1 = scmp.lt.u32.totalorder %s11762_s23, %s15714_s9 }
  0x11   :  { %p11768_p2 = pnand %p11766_p1, %p11763_p0 }
  0x13   :  { %11771 = shalt.err (!%p11768_p2)
}
  0x14   :  { %s11772_s25 = scalar_lea.vmem %s68_s28, 16  ;;  %s11776_s26 = scalar_lea.vmem %s68_s28, 32 }
  0x15   :  { %p11773_p3 = scmp.ne.s32.totalorder %s68_s28, %s11772_s25  ;;  %p11777_p4 = scmp.lt.s32.totalorder %s68_s28, %s68_s28 }
  0x16   :  { %p11778_p5 = scmp.lt.s32.totalorder %s11776_s26, %s11772_s25 }
  0x18   :  { %p11779_p6 = por %p11778_p5, %p11777_p4 }
  0x1a   :  { %p11780_p7 = pnand %p11779_p6, %p11773_p3 }
  0x1c   :  { %11783 = shalt.err (!%p11780_p7)
}
  0x1d   :  { %70 = dma.hbm_to_vmem [thread:$0]  %s15714_s9, 16, %s68_s28, [#allocation5]  }
  0x1e   :  { %s11784_s4 = scalar_lea.hbm %s15716_s11, 16 }
  0x1f   :  { %p11785_p8 = scmp.ne.s32.totalorder %s15716_s11, %s11784_s4  ;;  %p11788_p9 = scmp.lt.u32.totalorder %s11784_s4, %s15716_s11 }
  0x21   :  { %p11790_p10 = pnand %p11788_p9, %p11785_p8 }
  0x23   :  { %11793 = shalt.err (!%p11790_p10)
}
  0x24   :  { %s11794_s24 = scalar_lea.vmem %s88_s30, 16  ;;  %s11798_s6 = scalar_lea.vmem %s88_s30, 32 }
  0x25   :  { %p11795_p11 = scmp.ne.s32.totalorder %s88_s30, %s11794_s24  ;;  %p11799_p12 = scmp.lt.s32.totalorder %s88_s30, %s88_s30 }
  0x26   :  { %p11800_p13 = scmp.lt.s32.totalorder %s11798_s6, %s11794_s24 }
  0x28   :  { %p11801_p0 = por %p11800_p13, %p11799_p12 }
  0x2a   :  { %p11802_p1 = pnand %p11801_p0, %p11795_p11 }
  0x2c   :  { %11805 = shalt.err (!%p11802_p1)
}
  0x2d   :  { %90 = dma.hbm_to_vmem [thread:$0]  %s15716_s11, 16, %s88_s30, [#allocation8]  }
  0x2e   :  { %s11950_s25 = smov [#allocation10]   ;;  %s11951_s2 = smov [#allocation2]  }
  0x2f   :  { %s111_s26 = sshll.u32 %s11950_s25, 4  ;;  %s38_s27 = sshll.u32 %s11951_s2, 4  ;;  %s112_s26 = int_to_ptr.vmem [resolvable:$true] %s111_s26  ;;  %s12101_s27 = int_to_ptr.vmem [resolvable:$true] %s38_s27 }
  0x30   :  { %s11806_s4 = scalar_lea.hbm %s15720_s15, 16 }
  0x31   :  { %p11807_p2 = scmp.ne.s32.totalorder %s15720_s15, %s11806_s4  ;;  %p11810_p3 = scmp.lt.u32.totalorder %s11806_s4, %s15720_s15 }
  0x33   :  { %p11812_p4 = pnand %p11810_p3, %p11807_p2 }
  0x35   :  { %11815 = shalt.err (!%p11812_p4)
}
  0x36   :  { %s11816_s11 = scalar_lea.vmem %s112_s26, 16  ;;  %s11820_s30 = scalar_lea.vmem %s112_s26, 32 }
  0x37   :  { %p11817_p5 = scmp.ne.s32.totalorder %s112_s26, %s11816_s11  ;;  %p11821_p6 = scmp.lt.s32.totalorder %s112_s26, %s112_s26 }
  0x38   :  { %p11822_p7 = scmp.lt.s32.totalorder %s11820_s30, %s11816_s11 }
  0x3a   :  { %p11823_p8 = por %p11822_p7, %p11821_p6 }
  0x3c   :  { %p11824_p9 = pnand %p11823_p8, %p11817_p5 }
  0x3e   :  { %11827 = shalt.err (!%p11824_p9)
}
  0x3f   :  { %114 = dma.hbm_to_vmem [thread:$0]  %s15720_s15, 16, %s112_s26, [#allocation11]  }
  0x40   :  { %s15746_s25 = sld [smem:[#allocation31_spill]] }
  0x46   :  { %s11828_s2 = scalar_lea.hbm %s15746_s25, 2048 }
  0x47   :  { %p11829_p10 = scmp.ne.s32.totalorder %s15746_s25, %s11828_s2  ;;  %p11832_p11 = scmp.lt.u32.totalorder %s11828_s2, %s15746_s25 }
  0x49   :  { %p11834_p12 = pnand %p11832_p11, %p11829_p10 }
  0x4b   :  { %11837 = shalt.err (!%p11834_p12)
}
  0x4c   :  { %s11838_s23 = scalar_lea.vmem %s12101_s27, 2048  ;;  %p11843_p0 = scmp.lt.s32.totalorder %s12101_s27, %s12101_s27 }
  0x4d   :  { %p11839_p13 = scmp.ne.s32.totalorder %s12101_s27, %s11838_s23  ;;  %p11844_p1 = scmp.lt.s32.totalorder %s11838_s23, %s11838_s23 }
  0x4f   :  { %p11845_p2 = por %p11844_p1, %p11843_p0 }
  0x51   :  { %p11846_p3 = pnand %p11845_p2, %p11839_p13 }
  0x53   :  { %11849 = shalt.err (!%p11846_p3)
}
  0x54   :  { %s11952_s15 = smov 128   ;;  %s11953_s26 = smov 8  }
  0x55   :  { %44 = dma.hbm_to_vmem [thread:$0]  %s15746_s25, 2048, %s12101_s27, [#allocation3], %s11952_s15, %s11952_s15, %s11953_s26  }
  0x56   :  { %s11954_s11 = smov [#allocation6]   ;;  %s11955_s24 = smov [#allocation9]  }
  0x57   :  { %s77_s30 = sshll.u32 %s11954_s11, 4  ;;  %s99_s6 = sshll.u32 %s11955_s24, 4  ;;  %s78_s30 = int_to_ptr.vmem [resolvable:$true] %s77_s30  ;;  %s100_s6 = int_to_ptr.vmem [resolvable:$true] %s99_s6 }
  0x58   :  { %s11850_s2 = scalar_lea.hbm %s15715_s10, 64 }
  0x59   :  { %p11851_p4 = scmp.ne.s32.totalorder %s15715_s10, %s11850_s2  ;;  %p11854_p5 = scmp.lt.u32.totalorder %s11850_s2, %s15715_s10 }
  0x5b   :  { %p11856_p6 = pnand %p11854_p5, %p11851_p4 }
  0x5d   :  { %11859 = shalt.err (!%p11856_p6)
}
  0x5e   :  { %s11860_s27 = scalar_lea.vmem %s78_s30, 64  ;;  %p11865_p8 = scmp.lt.s32.totalorder %s78_s30, %s78_s30 }
  0x5f   :  { %p11861_p7 = scmp.ne.s32.totalorder %s78_s30, %s11860_s27  ;;  %p11866_p9 = scmp.lt.s32.totalorder %s11860_s27, %s11860_s27 }
  0x61   :  { %p11867_p10 = por %p11866_p9, %p11865_p8 }
  0x63   :  { %p11868_p11 = pnand %p11867_p10, %p11861_p7 }
  0x65   :  { %11871 = shalt.err (!%p11868_p11)
}
  0x66   :  { %80 = dma.hbm_to_vmem [thread:$0]  %s15715_s10, 64, %s78_s30, [#allocation5]  }
  0x67   :  { %s11872_s1 = scalar_lea.hbm %s15718_s13, 16 }
  0x68   :  { %p11873_p12 = scmp.ne.s32.totalorder %s15718_s13, %s11872_s1  ;;  %p11876_p13 = scmp.lt.u32.totalorder %s11872_s1, %s15718_s13 }
  0x6a   :  { %p11878_p0 = pnand %p11876_p13, %p11873_p12 }
  0x6c   :  { %11881 = shalt.err (!%p11878_p0)
}
  0x6d   :  { %s11882_s28 = scalar_lea.vmem %s100_s6, 16  ;;  %s11886_s2 = scalar_lea.vmem %s100_s6, 32 }
  0x6e   :  { %p11883_p1 = scmp.ne.s32.totalorder %s100_s6, %s11882_s28  ;;  %p11887_p2 = scmp.lt.s32.totalorder %s100_s6, %s100_s6 }
  0x6f   :  { %p11888_p3 = scmp.lt.s32.totalorder %s11886_s2, %s11882_s28 }
  0x71   :  { %p11889_p4 = por %p11888_p3, %p11887_p2 }
  0x73   :  { %p11890_p5 = pnand %p11889_p4, %p11883_p1 }
  0x75   :  { %11893 = shalt.err (!%p11890_p5)
}
  0x76   :  { %102 = dma.hbm_to_vmem [thread:$0]  %s15718_s13, 16, %s100_s6, [#allocation8]  }
  0x77   :  { %s11956_s3 = smov [#allocation12]   ;;  %s11957_s4 = smov [#allocation13]  }
  0x78   :  { %s123_s29 = sshll.u32 %s11956_s3, 4  ;;  %s137_s0 = sshll.u32 %s11957_s4, 4  ;;  %s124_s29 = int_to_ptr.vmem [resolvable:$true] %s123_s29  ;;  %s138_s0 = int_to_ptr.vmem [resolvable:$true] %s137_s0 }
  0x79   :  { %s11894_s23 = scalar_lea.hbm %s15722_s17, 16 }
  0x7a   :  { %p11895_p6 = scmp.ne.s32.totalorder %s15722_s17, %s11894_s23  ;;  %p11898_p7 = scmp.lt.u32.totalorder %s11894_s23, %s15722_s17 }
  0x7c   :  { %p11900_p8 = pnand %p11898_p7, %p11895_p6 }
  0x7e   :  { %11903 = shalt.err (!%p11900_p8)
}
  0x7f   :  { %s11904_s13 = scalar_lea.vmem %s124_s29, 16  ;;  %s11908_s6 = scalar_lea.vmem %s124_s29, 32 }
  0x80   :  { %p11905_p9 = scmp.ne.s32.totalorder %s124_s29, %s11904_s13  ;;  %p11909_p10 = scmp.lt.s32.totalorder %s124_s29, %s124_s29 }
  0x81   :  { %p11910_p11 = scmp.lt.s32.totalorder %s11908_s6, %s11904_s13 }
  0x83   :  { %p11911_p12 = por %p11910_p11, %p11909_p10 }
  0x85   :  { %p11912_p13 = pnand %p11911_p12, %p11905_p9 }
  0x87   :  { %11915 = shalt.err (!%p11912_p13)
}
  0x88   :  { %126 = dma.hbm_to_vmem [thread:$0]  %s15722_s17, 16, %s124_s29, [#allocation11]  }
  0x89   :  { %s11916_s2 = scalar_lea.hbm %s15725_s20, 16 }
  0x8a   :  { %p11917_p0 = scmp.ne.s32.totalorder %s15725_s20, %s11916_s2  ;;  %p11920_p1 = scmp.lt.u32.totalorder %s11916_s2, %s15725_s20 }
  0x8c   :  { %p11922_p2 = pnand %p11920_p1, %p11917_p0 }
  0x8e   :  { %11925 = shalt.err (!%p11922_p2)
}
  0x8f   :  { %s11926_s27 = scalar_lea.vmem %s138_s0, 16  ;;  %s11930_s25 = scalar_lea.vmem %s138_s0, 32 }
  0x90   :  { %p11927_p3 = scmp.ne.s32.totalorder %s138_s0, %s11926_s27  ;;  %p11931_p4 = scmp.lt.s32.totalorder %s138_s0, %s138_s0 }
  0x91   :  { %p11932_p5 = scmp.lt.s32.totalorder %s11930_s25, %s11926_s27 }
  0x93   :  { %p11933_p6 = por %p11932_p5, %p11931_p4 }
  0x95   :  { %p11934_p7 = pnand %p11933_p6, %p11927_p3 }
  0x97   :  { %11937 = shalt.err (!%p11934_p7)
}
  0x98   :  { %140 = dma.hbm_to_vmem [thread:$0]  %s15725_s20, 16, %s138_s0, [#allocation14]  }
  0x99   :  { %11938 = dma.done.wait [#allocation3], 2048  }
  0x9a   :  { %11939 = vsyncadd [#allocation3], 4294965248 }
  0x9b   :  { %11940 = dma.done.wait [#allocation5], 80  }
  0x9c   :  { %11941 = vsyncadd [#allocation5], 4294967216 }
  0x9d   :  { %11942 = dma.done.wait [#allocation8], 32  }
  0x9e   :  { %11943 = vsyncadd [#allocation8], 4294967264 }
  0x9f   :  { %11944 = dma.done.wait [#allocation11], 32  }
  0xa0   :  { %11945 = vsyncadd [#allocation11], 4294967264 }
  0xa1   :  { %11946 = dma.done.wait [#allocation14], 16  }
  0xa2   :  { %11947 = vsyncadd [#allocation14], 4294967280  ;;  %v165_v0 = vld [vmem:[#allocation2] sm:$0xff]  ;;  %v166_v1 = vld [vmem:[#allocation2 + $0x8] sm:$0xff]  ;;  %s15747_s23 = sld [smem:[#allocation32_spill]]  ;;  %s15748_s27 = sld [smem:[#allocation35_spill]] }
  0xa3   :  { %v167_v2 = vld [vmem:[#allocation2 + $0x10] sm:$0xff]  ;;  %v12180_v3 = vpack.c.bf16 %v166_v1, %v165_v0  ;;  %v168_v4 = vld [vmem:[#allocation2 + $0x18] sm:$0xff]  ;;  %v169_v6 = vld [vmem:[#allocation2 + $0x20] sm:$0xff]  ;;  %s15749_s17 = sld [smem:[#allocation36_spill]]  ;;  %s15750_s0 = sld [smem:[#allocation34_spill]]  ;;  %vm1988_vm0 = vcmask 261120  }
  0xa4   :  { %v12182_v5 = vpack.c.bf16 %v168_v4, %v167_v2  ;;  %v170_v7 = vld [vmem:[#allocation2 + $0x28] sm:$0xff]  ;;  %v171_v10 = vld [vmem:[#allocation2 + $0x30] sm:$0xff]  ;;  %v172_v11 = vld [vmem:[#allocation2 + $0x38] sm:$0xff]  ;;  %s15751_s5 = sld [smem:[#allocation37_spill]]  ;;  %vm3728_vm1 = vcmask 64512   ;;  %s11959_s20 = smov 120  }
  0xa5   :  { %10591 = vmatprep.subr.bf16.mxu0 %v12180_v3  ;;  %10623 = vmatprep.subr.bf16.mxu1 %v12180_v3  ;;  %v12190_v8 = vpack.c.bf16 %v170_v7, %v169_v6  ;;  %v12202_v13 = vpack.c.bf16 %v172_v11, %v171_v10  ;;  %v173_v14 = vld [vmem:[#allocation2 + $0x40] sm:$0xff]  ;;  %v174_v15 = vld [vmem:[#allocation2 + $0x48] sm:$0xff]  ;;  %v175_v17 = vld [vmem:[#allocation2 + $0x50] sm:$0xff]  ;;  %s11960_s15 = smov 112  }
  0xa6   :  { %10593 = vmatpush3.bf16.msra.mxu0 %v12180_v3  ;;  %10625 = vmatpush3.bf16.msra.mxu1 %v12180_v3  ;;  %v12208_v16 = vpack.c.bf16 %v174_v15, %v173_v14  ;;  %v176_v18 = vld [vmem:[#allocation2 + $0x58] sm:$0xff]  ;;  %v177_v20 = vld [vmem:[#allocation2 + $0x60] sm:$0xff]  ;;  %v178_v21 = vld [vmem:[#allocation2 + $0x68] sm:$0xff] }
  0xa7   :  { %10595 = vmatprep.subr.bf16.mxu0 %v12182_v5  ;;  %10627 = vmatprep.subr.bf16.mxu1 %v12182_v5  ;;  %v12214_v19 = vpack.c.bf16 %v176_v18, %v175_v17  ;;  %v12220_v22 = vpack.c.bf16 %v178_v21, %v177_v20  ;;  %v179_v23 = vld [vmem:[#allocation2 + $0x70] sm:$0xff]  ;;  %v180_v24 = vld [vmem:[#allocation2 + $0x78] sm:$0xff]  ;;  %vm14137_vm2 = vmpackc.low %vm3728_vm1, %vm3728_vm1 }
  0xa8   :  { %v191_v9 = vld [vmem:[%s15747_s23] sm:$0xff]  ;;  %v12226_v25 = vpack.c.bf16 %v180_v24, %v179_v23  ;;  %v192_v26 = vld [vmem:[%s15747_s23 + $0x8] sm:$0xff]  ;;  %v193_v28 = vld [vmem:[%s15747_s23 + $0x10] sm:$0xff] }
  0xa9   :  { %9326 = vmatprep.mubr.f32.mxu0 %v191_v9  ;;  %v8074_v12 = vld [vmem:[%s15747_s23 + $0x80] sm:$0xff]  ;;  %v8075_v27 = vld [vmem:[%s15747_s23 + $0x88] sm:$0xff]  ;;  %v8076_v29 = vld [vmem:[%s15747_s23 + $0x90] sm:$0xff] }
  0xaa   :  { %9382 = vmatprep.mubr.f32.mxu1 %v8074_v12  ;;  %10597 = vmatpush3.bf16.msra.mxu0 %v12182_v5  ;;  %v194_v30 = vld [vmem:[%s15747_s23 + $0x18] sm:$0xff]  ;;  %v195_v32 = vld [vmem:[%s15747_s23 + $0x20] sm:$0xff]  ;;  %v196_v34 = vld [vmem:[%s15747_s23 + $0x28] sm:$0xff] }
  0xab   :  { %10629 = vmatpush3.bf16.msra.mxu1 %v12182_v5  ;;  %10599 = vmatprep.subr.bf16.mxu0 %v12190_v8  ;;  %v8077_v31 = vld [vmem:[%s15747_s23 + $0x98] sm:$0xff]  ;;  %v8078_v33 = vld [vmem:[%s15747_s23 + $0xa0] sm:$0xff]  ;;  %v8079_v35 = vld [vmem:[%s15747_s23 + $0xa8] sm:$0xff] }
  0xac   :  { %10631 = vmatprep.subr.bf16.mxu1 %v12190_v8  ;;  %v197_v36 = vld [vmem:[%s15747_s23 + $0x30] sm:$0xff]  ;;  %v198_v38 = vld [vmem:[%s15747_s23 + $0x38] sm:$0xff]  ;;  %v199_v40 = vld [vmem:[%s15747_s23 + $0x40] sm:$0xff] }
  0xad   :  { %v8080_v37 = vld [vmem:[%s15747_s23 + $0xb0] sm:$0xff]  ;;  %v8081_v39 = vld [vmem:[%s15747_s23 + $0xb8] sm:$0xff]  ;;  %v8082_v41 = vld [vmem:[%s15747_s23 + $0xc0] sm:$0xff] }
  0xae   :  { %10601 = vmatpush3.bf16.msra.mxu0 %v12190_v8  ;;  %v200_v42 = vld [vmem:[%s15747_s23 + $0x48] sm:$0xff]  ;;  %v201_v44 = vld [vmem:[%s15747_s23 + $0x50] sm:$0xff]  ;;  %v202_v46 = vld [vmem:[%s15747_s23 + $0x58] sm:$0xff] }
  0xaf   :  { %10633 = vmatpush3.bf16.msra.mxu1 %v12190_v8  ;;  %10603 = vmatprep.subr.bf16.mxu0 %v12202_v13  ;;  %v8083_v43 = vld [vmem:[%s15747_s23 + $0xc8] sm:$0xff]  ;;  %v8084_v45 = vld [vmem:[%s15747_s23 + $0xd0] sm:$0xff]  ;;  %v8085_v47 = vld [vmem:[%s15747_s23 + $0xd8] sm:$0xff] }
  0xb0   :  { %10635 = vmatprep.subr.bf16.mxu1 %v12202_v13  ;;  %v203_v48 = vld [vmem:[%s15747_s23 + $0x60] sm:$0xff]  ;;  %v204_v50 = vld [vmem:[%s15747_s23 + $0x68] sm:$0xff]  ;;  %v205_v52 = vld [vmem:[%s15747_s23 + $0x70] sm:$0xff] }
  0xb1   :  { %v8086_v49 = vld [vmem:[%s15747_s23 + $0xe0] sm:$0xff]  ;;  %v8087_v51 = vld [vmem:[%s15747_s23 + $0xe8] sm:$0xff]  ;;  %v8088_v53 = vld [vmem:[%s15747_s23 + $0xf0] sm:$0xff] }
  0xb2   :  { %10605 = vmatpush3.bf16.msra.mxu0 %v12202_v13  ;;  %v206_v54 = vld [vmem:[%s15747_s23 + $0x78] sm:$0xff]  ;;  %v8090_v56 = vld [vmem:[%s15747_s23 + $0x100] sm:$0xff]  ;;  %v8091_v58 = vld [vmem:[%s15747_s23 + $0x108] sm:$0xff] }
  0xb3   :  { %10637 = vmatpush3.bf16.msra.mxu1 %v12202_v13  ;;  %10607 = vmatprep.subr.bf16.mxu0 %v12208_v16  ;;  %v8089_v55 = vld [vmem:[%s15747_s23 + $0xf8] sm:$0xff]  ;;  %v8106_v57 = vld [vmem:[%s15747_s23 + $0x180] sm:$0xff]  ;;  %v8107_v59 = vld [vmem:[%s15747_s23 + $0x188] sm:$0xff] }
  0xb4   :  { %10639 = vmatprep.subr.bf16.mxu1 %v12208_v16  ;;  %v8092_v60 = vld [vmem:[%s15747_s23 + $0x110] sm:$0xff]  ;;  %v8093_v62 = vld [vmem:[%s15747_s23 + $0x118] sm:$0xff]  ;;  %v8094_v0 = vld [vmem:[%s15747_s23 + $0x120] sm:$0xff] }
  0xb5   :  { %v8108_v61 = vld [vmem:[%s15747_s23 + $0x190] sm:$0xff]  ;;  %v8109_v63 = vld [vmem:[%s15747_s23 + $0x198] sm:$0xff]  ;;  %v8110_v1 = vld [vmem:[%s15747_s23 + $0x1a0] sm:$0xff] }
  0xb6   :  { %10609 = vmatpush3.bf16.msra.mxu0 %v12208_v16  ;;  %v8095_v2 = vld [vmem:[%s15747_s23 + $0x128] sm:$0xff]  ;;  %v8096_v6 = vld [vmem:[%s15747_s23 + $0x130] sm:$0xff]  ;;  %v8097_v9 = vld [vmem:[%s15747_s23 + $0x138] sm:$0xff] }
  0xb7   :  { %10641 = vmatpush3.bf16.msra.mxu1 %v12208_v16  ;;  %10611 = vmatprep.subr.bf16.mxu0 %v12214_v19  ;;  %v8111_v4 = vld [vmem:[%s15747_s23 + $0x1a8] sm:$0xff]  ;;  %v8112_v7 = vld [vmem:[%s15747_s23 + $0x1b0] sm:$0xff]  ;;  %v8113_v10 = vld [vmem:[%s15747_s23 + $0x1b8] sm:$0xff] }
  0xb8   :  { %10643 = vmatprep.subr.bf16.mxu1 %v12214_v19  ;;  %v8098_v11 = vld [vmem:[%s15747_s23 + $0x140] sm:$0xff]  ;;  %v8099_v14 = vld [vmem:[%s15747_s23 + $0x148] sm:$0xff]  ;;  %v8100_v17 = vld [vmem:[%s15747_s23 + $0x150] sm:$0xff] }
  0xb9   :  { %v8114_v12 = vld [vmem:[%s15747_s23 + $0x1c0] sm:$0xff]  ;;  %v8115_v15 = vld [vmem:[%s15747_s23 + $0x1c8] sm:$0xff]  ;;  %v8116_v18 = vld [vmem:[%s15747_s23 + $0x1d0] sm:$0xff] }
  0xba   :  { %10613 = vmatpush3.bf16.msra.mxu0 %v12214_v19  ;;  %v8101_v20 = vld [vmem:[%s15747_s23 + $0x158] sm:$0xff]  ;;  %v8102_v23 = vld [vmem:[%s15747_s23 + $0x160] sm:$0xff] }
  0xbb   :  { %10645 = vmatpush3.bf16.msra.mxu1 %v12214_v19  ;;  %10615 = vmatprep.subr.bf16.mxu0 %v12220_v22  ;;  %v8117_v21 = vld [vmem:[%s15747_s23 + $0x1d8] sm:$0xff]  ;;  %v8118_v24 = vld [vmem:[%s15747_s23 + $0x1e0] sm:$0xff] }
  0xbc   :  { %10647 = vmatprep.subr.bf16.mxu1 %v12220_v22 }
  0xbe   :  { %10617 = vmatpush3.bf16.msra.mxu0 %v12220_v22 }
  0xbf   :  { %10649 = vmatpush3.bf16.msra.mxu1 %v12220_v22  ;;  %10619 = vmatprep.subr.bf16.mxu0 %v12226_v25 }
  0xc0   :  { %10651 = vmatprep.subr.bf16.mxu1 %v12226_v25 }
  0xc2   :  { %10621 = vmatpush3.bf16.msra.mxu0 %v12226_v25 }
  0xc3   :  { %10653 = vmatpush3.bf16.msra.mxu1 %v12226_v25  ;;  %10655 = vmatprep.subr.bf16.mxu0 %v12180_v3 }
  0xc4   :  { %10687 = vmatprep.subr.bf16.mxu1 %v12180_v3 }
  0xc5   :  { %9327 = vmatmul.mubr.f32.vlgmr.msra.gmra.mrb[0].mxu0 %v192_v26  ;;  %v8103_v26 = vld [vmem:[%s15747_s23 + $0x168] sm:$0xff] }
  0xc6   :  { %9383 = vmatmul.mubr.f32.vlgmr.msra.gmra.mrb[0].mxu1 %v8075_v27  ;;  %10657 = vmatpush3.bf16.msra.mxu0 %v12180_v3  ;;  %v8119_v27 = vld [vmem:[%s15747_s23 + $0x1e8] sm:$0xff] }
  0xc7   :  { %9329 = vmatprep.mubr.f32.mxu0 %v193_v28  ;;  %10689 = vmatpush3.bf16.msra.mxu1 %v12180_v3  ;;  %v8104_v28 = vld [vmem:[%s15747_s23 + $0x170] sm:$0xff] }
  0xc8   :  { %10659 = vmatprep.subr.bf16.mxu0 %v12182_v5  ;;  %9385 = vmatprep.mubr.f32.mxu1 %v8076_v29  ;;  %v8120_v29 = vld [vmem:[%s15747_s23 + $0x1f0] sm:$0xff] }
  0xc9   :  { %10691 = vmatprep.subr.bf16.mxu1 %v12182_v5  ;;  %9330 = vmatmul.mubr.f32.gmra.mrb[2].mxu0 %v194_v30  ;;  %v8105_v30 = vld [vmem:[%s15747_s23 + $0x178] sm:$0xff] }
  0xca   :  { %9386 = vmatmul.mubr.f32.gmra.mrb[2].mxu1 %v8077_v31  ;;  %10661 = vmatpush3.bf16.msra.mxu0 %v12182_v5  ;;  %v8121_v31 = vld [vmem:[%s15747_s23 + $0x1f8] sm:$0xff] }
  0xcb   :  { %9332 = vmatprep.mubr.f32.mxu0 %v195_v32  ;;  %10693 = vmatpush3.bf16.msra.mxu1 %v12182_v5  ;;  %v8122_v32 = vld [vmem:[%s15747_s23 + $0x200] sm:$0xff] }
  0xcc   :  { %10663 = vmatprep.subr.bf16.mxu0 %v12190_v8  ;;  %9388 = vmatprep.mubr.f32.mxu1 %v8078_v33  ;;  %v8138_v33 = vld [vmem:[%s15747_s23 + $0x280] sm:$0xff] }
  0xcd   :  { %10695 = vmatprep.subr.bf16.mxu1 %v12190_v8  ;;  %9333 = vmatmul.mubr.f32.gmra.mrb[4].mxu0 %v196_v34  ;;  %v8123_v34 = vld [vmem:[%s15747_s23 + $0x208] sm:$0xff] }
  0xce   :  { %9389 = vmatmul.mubr.f32.gmra.mrb[4].mxu1 %v8079_v35  ;;  %10665 = vmatpush3.bf16.msra.mxu0 %v12190_v8  ;;  %v8139_v35 = vld [vmem:[%s15747_s23 + $0x288] sm:$0xff] }
  0xcf   :  { %9335 = vmatprep.mubr.f32.mxu0 %v197_v36  ;;  %10697 = vmatpush3.bf16.msra.mxu1 %v12190_v8  ;;  %v8124_v36 = vld [vmem:[%s15747_s23 + $0x210] sm:$0xff] }
  0xd0   :  { %10667 = vmatprep.subr.bf16.mxu0 %v12202_v13  ;;  %9391 = vmatprep.mubr.f32.mxu1 %v8080_v37  ;;  %v8140_v37 = vld [vmem:[%s15747_s23 + $0x290] sm:$0xff] }
  0xd1   :  { %10699 = vmatprep.subr.bf16.mxu1 %v12202_v13  ;;  %9336 = vmatmul.mubr.f32.gmra.mrb[6].mxu0 %v198_v38  ;;  %v8125_v38 = vld [vmem:[%s15747_s23 + $0x218] sm:$0xff] }
  0xd2   :  { %9392 = vmatmul.mubr.f32.gmra.mrb[6].mxu1 %v8081_v39  ;;  %10669 = vmatpush3.bf16.msra.mxu0 %v12202_v13  ;;  %v8141_v39 = vld [vmem:[%s15747_s23 + $0x298] sm:$0xff] }
  0xd3   :  { %9338 = vmatprep.mubr.f32.mxu0 %v199_v40  ;;  %10701 = vmatpush3.bf16.msra.mxu1 %v12202_v13  ;;  %v8126_v40 = vld [vmem:[%s15747_s23 + $0x220] sm:$0xff] }
  0xd4   :  { %10671 = vmatprep.subr.bf16.mxu0 %v12208_v16  ;;  %9394 = vmatprep.mubr.f32.mxu1 %v8082_v41  ;;  %v8142_v41 = vld [vmem:[%s15747_s23 + $0x2a0] sm:$0xff] }
  0xd5   :  { %10703 = vmatprep.subr.bf16.mxu1 %v12208_v16  ;;  %9339 = vmatmul.mubr.f32.gmra.mrb[8].mxu0 %v200_v42  ;;  %v8127_v42 = vld [vmem:[%s15747_s23 + $0x228] sm:$0xff] }
  0xd6   :  { %9395 = vmatmul.mubr.f32.gmra.mrb[8].mxu1 %v8083_v43  ;;  %10673 = vmatpush3.bf16.msra.mxu0 %v12208_v16  ;;  %v8143_v43 = vld [vmem:[%s15747_s23 + $0x2a8] sm:$0xff] }
  0xd7   :  { %9341 = vmatprep.mubr.f32.mxu0 %v201_v44  ;;  %10705 = vmatpush3.bf16.msra.mxu1 %v12208_v16  ;;  %v8128_v44 = vld [vmem:[%s15747_s23 + $0x230] sm:$0xff] }
  0xd8   :  { %10675 = vmatprep.subr.bf16.mxu0 %v12214_v19  ;;  %9397 = vmatprep.mubr.f32.mxu1 %v8084_v45  ;;  %v8144_v45 = vld [vmem:[%s15747_s23 + $0x2b0] sm:$0xff] }
  0xd9   :  { %10707 = vmatprep.subr.bf16.mxu1 %v12214_v19  ;;  %9342 = vmatmul.mubr.f32.gmra.mrb[10].mxu0 %v202_v46  ;;  %v8129_v46 = vld [vmem:[%s15747_s23 + $0x238] sm:$0xff] }
  0xda   :  { %9398 = vmatmul.mubr.f32.gmra.mrb[10].mxu1 %v8085_v47  ;;  %10677 = vmatpush3.bf16.msra.mxu0 %v12214_v19  ;;  %v8145_v47 = vld [vmem:[%s15747_s23 + $0x2b8] sm:$0xff] }
  0xdb   :  { %9344 = vmatprep.mubr.f32.mxu0 %v203_v48  ;;  %10709 = vmatpush3.bf16.msra.mxu1 %v12214_v19  ;;  %v8130_v48 = vld [vmem:[%s15747_s23 + $0x240] sm:$0xff] }
  0xdc   :  { %10679 = vmatprep.subr.bf16.mxu0 %v12220_v22  ;;  %9400 = vmatprep.mubr.f32.mxu1 %v8086_v49  ;;  %v8146_v49 = vld [vmem:[%s15747_s23 + $0x2c0] sm:$0xff] }
  0xdd   :  { %10711 = vmatprep.subr.bf16.mxu1 %v12220_v22  ;;  %9345 = vmatmul.mubr.f32.gmra.mrb[12].mxu0 %v204_v50  ;;  %v8131_v50 = vld [vmem:[%s15747_s23 + $0x248] sm:$0xff] }
  0xde   :  { %9401 = vmatmul.mubr.f32.gmra.mrb[12].mxu1 %v8087_v51  ;;  %10681 = vmatpush3.bf16.msra.mxu0 %v12220_v22  ;;  %v8147_v51 = vld [vmem:[%s15747_s23 + $0x2c8] sm:$0xff] }
  0xdf   :  { %9347 = vmatprep.mubr.f32.mxu0 %v205_v52  ;;  %10713 = vmatpush3.bf16.msra.mxu1 %v12220_v22  ;;  %v8132_v52 = vld [vmem:[%s15747_s23 + $0x250] sm:$0xff] }
  0xe0   :  { %10683 = vmatprep.subr.bf16.mxu0 %v12226_v25  ;;  %9403 = vmatprep.mubr.f32.mxu1 %v8088_v53  ;;  %v8148_v53 = vld [vmem:[%s15747_s23 + $0x2d0] sm:$0xff] }
  0xe1   :  { %10715 = vmatprep.subr.bf16.mxu1 %v12226_v25  ;;  %9348 = vmatmul.mubr.f32.gmra.mrb[14].mxu0 %v206_v54  ;;  %v8133_v54 = vld [vmem:[%s15747_s23 + $0x258] sm:$0xff] }
  0xe2   :  { %9404 = vmatmul.mubr.f32.gmra.mrb[14].mxu1 %v8089_v55  ;;  %10685 = vmatpush3.bf16.msra.mxu0 %v12226_v25  ;;  %v8149_v55 = vld [vmem:[%s15747_s23 + $0x2d8] sm:$0xff] }
  0xe3   :  { %9438 = vmatprep.mubr.f32.mxu0 %v8090_v56  ;;  %10717 = vmatpush3.bf16.msra.mxu1 %v12226_v25  ;;  %v8134_v56 = vld [vmem:[%s15747_s23 + $0x260] sm:$0xff] }
  0xe4   :  { %10719 = vmatprep.subr.bf16.mxu0 %v12180_v3  ;;  %9494 = vmatprep.mubr.f32.mxu1 %v8106_v57  ;;  %v8150_v57 = vld [vmem:[%s15747_s23 + $0x2e0] sm:$0xff] }
  0xe5   :  { %10751 = vmatprep.subr.bf16.mxu1 %v12180_v3  ;;  %9439 = vmatmul.mubr.f32.vlgmr.msra.gmra.mrb[16].mxu0 %v8091_v58  ;;  %v8135_v58 = vld [vmem:[%s15747_s23 + $0x268] sm:$0xff] }
  0xe6   :  { %10721 = vmatpush3.bf16.msra.mxu0 %v12180_v3  ;;  %9495 = vmatmul.mubr.f32.vlgmr.msra.gmra.mrb[16].mxu1 %v8107_v59  ;;  %v8151_v59 = vld [vmem:[%s15747_s23 + $0x2e8] sm:$0xff] }
  0xe7   :  { %9441 = vmatprep.mubr.f32.mxu0 %v8092_v60  ;;  %10753 = vmatpush3.bf16.msra.mxu1 %v12180_v3  ;;  %v8136_v60 = vld [vmem:[%s15747_s23 + $0x270] sm:$0xff] }
  0xe8   :  { %10723 = vmatprep.subr.bf16.mxu0 %v12182_v5  ;;  %9497 = vmatprep.mubr.f32.mxu1 %v8108_v61  ;;  %v8152_v61 = vld [vmem:[%s15747_s23 + $0x2f0] sm:$0xff] }
  0xe9   :  { %9442 = vmatmul.mubr.f32.gmra.mrb[18].mxu0 %v8093_v62  ;;  %10755 = vmatprep.subr.bf16.mxu1 %v12182_v5  ;;  %v8137_v62 = vld [vmem:[%s15747_s23 + $0x278] sm:$0xff] }
  0xea   :  { %10725 = vmatpush3.bf16.msra.mxu0 %v12182_v5  ;;  %9498 = vmatmul.mubr.f32.gmra.mrb[18].mxu1 %v8109_v63  ;;  %v8153_v63 = vld [vmem:[%s15747_s23 + $0x2f8] sm:$0xff] }
  0xeb   :  { %9444 = vmatprep.mubr.f32.mxu0 %v8094_v0  ;;  %10757 = vmatpush3.bf16.msra.mxu1 %v12182_v5  ;;  %v8154_v0 = vld [vmem:[%s15747_s23 + $0x300] sm:$0xff] }
  0xec   :  { %10727 = vmatprep.subr.bf16.mxu0 %v12190_v8  ;;  %9500 = vmatprep.mubr.f32.mxu1 %v8110_v1  ;;  %v8170_v1 = vld [vmem:[%s15747_s23 + $0x380] sm:$0xff] }
  0xed   :  { %9445 = vmatmul.mubr.f32.gmra.mrb[20].mxu0 %v8095_v2  ;;  %10759 = vmatprep.subr.bf16.mxu1 %v12190_v8  ;;  %v8155_v2 = vld [vmem:[%s15747_s23 + $0x308] sm:$0xff] }
  0xee   :  { %10729 = vmatpush3.bf16.msra.mxu0 %v12190_v8  ;;  %9501 = vmatmul.mubr.f32.gmra.mrb[20].mxu1 %v8111_v4  ;;  %v8171_v4 = vld [vmem:[%s15747_s23 + $0x388] sm:$0xff] }
  0xef   :  { %9447 = vmatprep.mubr.f32.mxu0 %v8096_v6  ;;  %10761 = vmatpush3.bf16.msra.mxu1 %v12190_v8  ;;  %v8156_v6 = vld [vmem:[%s15747_s23 + $0x310] sm:$0xff] }
  0xf0   :  { %10731 = vmatprep.subr.bf16.mxu0 %v12202_v13  ;;  %9503 = vmatprep.mubr.f32.mxu1 %v8112_v7  ;;  %v8172_v7 = vld [vmem:[%s15747_s23 + $0x390] sm:$0xff] }
  0xf1   :  { %9448 = vmatmul.mubr.f32.gmra.mrb[22].mxu0 %v8097_v9  ;;  %10763 = vmatprep.subr.bf16.mxu1 %v12202_v13  ;;  %v8157_v9 = vld [vmem:[%s15747_s23 + $0x318] sm:$0xff] }
  0xf2   :  { %10733 = vmatpush3.bf16.msra.mxu0 %v12202_v13  ;;  %9504 = vmatmul.mubr.f32.gmra.mrb[22].mxu1 %v8113_v10  ;;  %v8173_v10 = vld [vmem:[%s15747_s23 + $0x398] sm:$0xff] }
  0xf3   :  { %9450 = vmatprep.mubr.f32.mxu0 %v8098_v11  ;;  %10765 = vmatpush3.bf16.msra.mxu1 %v12202_v13  ;;  %v8158_v11 = vld [vmem:[%s15747_s23 + $0x320] sm:$0xff] }
  0xf4   :  { %10735 = vmatprep.subr.bf16.mxu0 %v12208_v16  ;;  %9506 = vmatprep.mubr.f32.mxu1 %v8114_v12  ;;  %v8159_v12 = vld [vmem:[%s15747_s23 + $0x328] sm:$0xff] }
  0xf5   :  { %9451 = vmatmul.mubr.f32.gmra.mrb[24].mxu0 %v8099_v14  ;;  %10767 = vmatprep.subr.bf16.mxu1 %v12208_v16  ;;  %v8175_v14 = vld [vmem:[%s15747_s23 + $0x3a8] sm:$0xff] }
  0xf6   :  { %10737 = vmatpush3.bf16.msra.mxu0 %v12208_v16  ;;  %9507 = vmatmul.mubr.f32.gmra.mrb[24].mxu1 %v8115_v15  ;;  %v8160_v15 = vld [vmem:[%s15747_s23 + $0x330] sm:$0xff] }
  0xf7   :  { %9453 = vmatprep.mubr.f32.mxu0 %v8100_v17  ;;  %10769 = vmatpush3.bf16.msra.mxu1 %v12208_v16  ;;  %v8161_v17 = vld [vmem:[%s15747_s23 + $0x338] sm:$0xff] }
  0xf8   :  { %10739 = vmatprep.subr.bf16.mxu0 %v12214_v19  ;;  %9509 = vmatprep.mubr.f32.mxu1 %v8116_v18  ;;  %v8177_v18 = vld [vmem:[%s15747_s23 + $0x3b8] sm:$0xff] }
  0xf9   :  { %9454 = vmatmul.mubr.f32.gmra.mrb[26].mxu0 %v8101_v20  ;;  %10771 = vmatprep.subr.bf16.mxu1 %v12214_v19  ;;  %v8162_v20 = vld [vmem:[%s15747_s23 + $0x340] sm:$0xff] }
  0xfa   :  { %10741 = vmatpush3.bf16.msra.mxu0 %v12214_v19  ;;  %9510 = vmatmul.mubr.f32.gmra.mrb[26].mxu1 %v8117_v21  ;;  %v8163_v21 = vld [vmem:[%s15747_s23 + $0x348] sm:$0xff] }
  0xfb   :  { %9456 = vmatprep.mubr.f32.mxu0 %v8102_v23  ;;  %10773 = vmatpush3.bf16.msra.mxu1 %v12214_v19  ;;  %v8179_v23 = vld [vmem:[%s15747_s23 + $0x3c8] sm:$0xff] }
  0xfc   :  { %10743 = vmatprep.subr.bf16.mxu0 %v12220_v22  ;;  %9512 = vmatprep.mubr.f32.mxu1 %v8118_v24  ;;  %v8164_v24 = vld [vmem:[%s15747_s23 + $0x350] sm:$0xff] }
  0xfd   :  { %9457 = vmatmul.mubr.f32.gmra.mrb[28].mxu0 %v8103_v26  ;;  %10775 = vmatprep.subr.bf16.mxu1 %v12220_v22  ;;  %v8165_v26 = vld [vmem:[%s15747_s23 + $0x358] sm:$0xff] }
  0xfe   :  { %10745 = vmatpush3.bf16.msra.mxu0 %v12220_v22  ;;  %9513 = vmatmul.mubr.f32.gmra.mrb[28].mxu1 %v8119_v27  ;;  %v8181_v27 = vld [vmem:[%s15747_s23 + $0x3d8] sm:$0xff] }
  0xff   :  { %9459 = vmatprep.mubr.f32.mxu0 %v8104_v28  ;;  %10777 = vmatpush3.bf16.msra.mxu1 %v12220_v22  ;;  %v8166_v28 = vld [vmem:[%s15747_s23 + $0x360] sm:$0xff] }
 0x100   :  { %10747 = vmatprep.subr.bf16.mxu0 %v12226_v25  ;;  %9515 = vmatprep.mubr.f32.mxu1 %v8120_v29  ;;  %v8167_v29 = vld [vmem:[%s15747_s23 + $0x368] sm:$0xff] }
 0x101   :  { %9460 = vmatmul.mubr.f32.gmra.mrb[30].mxu0 %v8105_v30  ;;  %10779 = vmatprep.subr.bf16.mxu1 %v12226_v25  ;;  %v8183_v30 = vld [vmem:[%s15747_s23 + $0x3e8] sm:$0xff] }
 0x102   :  { %10749 = vmatpush3.bf16.msra.mxu0 %v12226_v25  ;;  %9516 = vmatmul.mubr.f32.gmra.mrb[30].mxu1 %v8121_v31  ;;  %v8168_v31 = vld [vmem:[%s15747_s23 + $0x370] sm:$0xff] }
 0x103   :  { %9550 = vmatprep.mubr.f32.mxu0 %v8122_v32  ;;  %10781 = vmatpush3.bf16.msra.mxu1 %v12226_v25  ;;  %v8169_v32 = vld [vmem:[%s15747_s23 + $0x378] sm:$0xff] }
 0x104   :  { %10783 = vmatprep.subr.bf16.mxu0 %v12180_v3  ;;  %9606 = vmatprep.mubr.f32.mxu1 %v8138_v33  ;;  %v8185_v33 = vld [vmem:[%s15747_s23 + $0x3f8] sm:$0xff] }
 0x105   :  { %9551 = vmatmul.mubr.f32.vlgmr.msra.gmra.mrb[32].mxu0 %v8123_v34  ;;  %10815 = vmatprep.subr.bf16.mxu1 %v12180_v3  ;;  %v8186_v34 = vld [vmem:[%s15747_s23 + $0x400] sm:$0xff] }
 0x106   :  { %10785 = vmatpush3.bf16.msra.mxu0 %v12180_v3  ;;  %9607 = vmatmul.mubr.f32.vlgmr.msra.gmra.mrb[32].mxu1 %v8139_v35  ;;  %v8188_v35 = vld [vmem:[%s15747_s23 + $0x410] sm:$0xff] }
 0x107   :  { %9553 = vmatprep.mubr.f32.mxu0 %v8124_v36  ;;  %10817 = vmatpush3.bf16.msra.mxu1 %v12180_v3  ;;  %v8189_v36 = vld [vmem:[%s15747_s23 + $0x418] sm:$0xff] }
 0x108   :  { %10787 = vmatprep.subr.bf16.mxu0 %v12182_v5  ;;  %9609 = vmatprep.mubr.f32.mxu1 %v8140_v37  ;;  %v8191_v37 = vld [vmem:[%s15747_s23 + $0x428] sm:$0xff] }
 0x109   :  { %9554 = vmatmul.mubr.f32.gmra.mrb[34].mxu0 %v8125_v38  ;;  %10819 = vmatprep.subr.bf16.mxu1 %v12182_v5  ;;  %v8192_v38 = vld [vmem:[%s15747_s23 + $0x430] sm:$0xff] }
 0x10a   :  { %10789 = vmatpush3.bf16.msra.mxu0 %v12182_v5  ;;  %9610 = vmatmul.mubr.f32.gmra.mrb[34].mxu1 %v8141_v39  ;;  %v8193_v39 = vld [vmem:[%s15747_s23 + $0x438] sm:$0xff] }
 0x10b   :  { %9556 = vmatprep.mubr.f32.mxu0 %v8126_v40  ;;  %10821 = vmatpush3.bf16.msra.mxu1 %v12182_v5  ;;  %v8194_v40 = vld [vmem:[%s15747_s23 + $0x440] sm:$0xff] }
 0x10c   :  { %10791 = vmatprep.subr.bf16.mxu0 %v12190_v8  ;;  %9612 = vmatprep.mubr.f32.mxu1 %v8142_v41  ;;  %v8195_v41 = vld [vmem:[%s15747_s23 + $0x448] sm:$0xff] }
 0x10d   :  { %9557 = vmatmul.mubr.f32.gmra.mrb[36].mxu0 %v8127_v42  ;;  %10823 = vmatprep.subr.bf16.mxu1 %v12190_v8  ;;  %v8196_v42 = vld [vmem:[%s15747_s23 + $0x450] sm:$0xff] }
 0x10e   :  { %10793 = vmatpush3.bf16.msra.mxu0 %v12190_v8  ;;  %9613 = vmatmul.mubr.f32.gmra.mrb[36].mxu1 %v8143_v43  ;;  %v8197_v43 = vld [vmem:[%s15747_s23 + $0x458] sm:$0xff] }
 0x10f   :  { %9559 = vmatprep.mubr.f32.mxu0 %v8128_v44  ;;  %10825 = vmatpush3.bf16.msra.mxu1 %v12190_v8  ;;  %v8198_v44 = vld [vmem:[%s15747_s23 + $0x460] sm:$0xff] }
 0x110   :  { %10795 = vmatprep.subr.bf16.mxu0 %v12202_v13  ;;  %9615 = vmatprep.mubr.f32.mxu1 %v8144_v45  ;;  %v8199_v45 = vld [vmem:[%s15747_s23 + $0x468] sm:$0xff] }
 0x111   :  { %9560 = vmatmul.mubr.f32.gmra.mrb[38].mxu0 %v8129_v46  ;;  %10827 = vmatprep.subr.bf16.mxu1 %v12202_v13  ;;  %v8200_v46 = vld [vmem:[%s15747_s23 + $0x470] sm:$0xff] }
 0x112   :  { %10797 = vmatpush3.bf16.msra.mxu0 %v12202_v13  ;;  %9616 = vmatmul.mubr.f32.gmra.mrb[38].mxu1 %v8145_v47  ;;  %v8201_v47 = vld [vmem:[%s15747_s23 + $0x478] sm:$0xff] }
 0x113   :  { %9562 = vmatprep.mubr.f32.mxu0 %v8130_v48  ;;  %10829 = vmatpush3.bf16.msra.mxu1 %v12202_v13  ;;  %v352_v48 = vlaneseq }
 0x114   :  { %10799 = vmatprep.subr.bf16.mxu0 %v12208_v16  ;;  %9618 = vmatprep.mubr.f32.mxu1 %v8146_v49 }
 0x115   :  { %9563 = vmatmul.mubr.f32.gmra.mrb[40].mxu0 %v8131_v50  ;;  %10831 = vmatprep.subr.bf16.mxu1 %v12208_v16  ;;  %v12772_v49 = vshrl.u32 %v352_v48, 7 }
 0x116   :  { %10801 = vmatpush3.bf16.msra.mxu0 %v12208_v16  ;;  %9619 = vmatmul.mubr.f32.gmra.mrb[40].mxu1 %v8147_v51 }
 0x117   :  { %9565 = vmatprep.mubr.f32.mxu0 %v8132_v52  ;;  %10833 = vmatpush3.bf16.msra.mxu1 %v12208_v16  ;;  %v12775_v50 = vsub.s32 0, %v12772_v49  ;;  %v12778_v51 = vsub.s32 1, %v12772_v49  ;;  %v12783_v52 = vld [vmem:[%s15748_s27] sm:$0xff] }
 0x118   :  { %10803 = vmatprep.subr.bf16.mxu0 %v12214_v19  ;;  %9621 = vmatprep.mubr.f32.mxu1 %v8148_v53 }
 0x119   :  { %9566 = vmatmul.mubr.f32.gmra.mrb[42].mxu0 %v8133_v54  ;;  %10835 = vmatprep.subr.bf16.mxu1 %v12214_v19  ;;  %v12787_v53 = vrot.slane %v12783_v52, %v12775_v50  ;;  %v12791_v54 = vrot.slane %v12783_v52, %v12778_v51 }
 0x11a   :  { %10805 = vmatpush3.bf16.msra.mxu0 %v12214_v19  ;;  %9622 = vmatmul.mubr.f32.gmra.mrb[42].mxu1 %v8149_v55  ;;  %v12796_v55 = vld [vmem:[%s15749_s17] ss:$0 sm:$0xff] }
 0x11b   :  { %9568 = vmatprep.mubr.f32.mxu0 %v8134_v56  ;;  %10837 = vmatpush3.bf16.msra.mxu1 %v12214_v19 }
 0x11c   :  { %10807 = vmatprep.subr.bf16.mxu0 %v12220_v22  ;;  %9624 = vmatprep.mubr.f32.mxu1 %v8150_v57 }
 0x11d   :  { %9569 = vmatmul.mubr.f32.gmra.mrb[44].mxu0 %v8135_v58  ;;  %10839 = vmatprep.subr.bf16.mxu1 %v12220_v22 }
 0x11e   :  { %10809 = vmatpush3.bf16.msra.mxu0 %v12220_v22  ;;  %9625 = vmatmul.mubr.f32.gmra.mrb[44].mxu1 %v8151_v59 }
 0x11f   :  { %9571 = vmatprep.mubr.f32.mxu0 %v8136_v60  ;;  %10841 = vmatpush3.bf16.msra.mxu1 %v12220_v22 }
 0x120   :  { %10811 = vmatprep.subr.bf16.mxu0 %v12226_v25  ;;  %9627 = vmatprep.mubr.f32.mxu1 %v8152_v61 }
 0x121   :  { %9572 = vmatmul.mubr.f32.gmra.mrb[46].mxu0 %v8137_v62  ;;  %10843 = vmatprep.subr.bf16.mxu1 %v12226_v25 }
 0x122   :  { %10813 = vmatpush3.bf16.msra.mxu0 %v12226_v25  ;;  %9628 = vmatmul.mubr.f32.gmra.mrb[46].mxu1 %v8153_v63 }
 0x123   :  { %9662 = vmatprep.mubr.f32.mxu0 %v8154_v0  ;;  %10845 = vmatpush3.bf16.msra.mxu1 %v12226_v25 }
 0x124   :  { %10847 = vmatprep.subr.bf16.mxu0 %v12180_v3  ;;  %9718 = vmatprep.mubr.f32.mxu1 %v8170_v1 }
 0x125   :  { %9663 = vmatmul.mubr.f32.vlgmr.msra.gmra.mrb[48].mxu0 %v8155_v2 }
 0x126   :  { %10849 = vmatpush3.bf16.msra.mxu0 %v12180_v3  ;;  %9719 = vmatmul.mubr.f32.vlgmr.msra.gmra.mrb[48].mxu1 %v8171_v4  ;;  %v8174_v3 = vld [vmem:[%s15747_s23 + $0x3a0] sm:$0xff] }
 0x127   :  { %9665 = vmatprep.mubr.f32.mxu0 %v8156_v6  ;;  %10851 = vmatprep.subr.bf16.mxu0 %v12182_v5 }
 0x128   :  { %9721 = vmatprep.mubr.f32.mxu1 %v8172_v7 }
 0x129   :  { %9666 = vmatmul.mubr.f32.gmra.mrb[50].mxu0 %v8157_v9 }
 0x12a   :  { %10853 = vmatpush3.bf16.msra.mxu0 %v12182_v5  ;;  %9722 = vmatmul.mubr.f32.gmra.mrb[50].mxu1 %v8173_v10  ;;  %v8176_v5 = vld [vmem:[%s15747_s23 + $0x3b0] sm:$0xff] }
 0x12b   :  { %9668 = vmatprep.mubr.f32.mxu0 %v8158_v11  ;;  %10855 = vmatprep.subr.bf16.mxu0 %v12190_v8 }
 0x12c   :  { %9724 = vmatprep.mubr.f32.mxu1 %v8174_v3 }
 0x12d   :  { %9669 = vmatmul.mubr.f32.gmra.mrb[52].mxu0 %v8159_v12 }
 0x12e   :  { %10857 = vmatpush3.bf16.msra.mxu0 %v12190_v8  ;;  %9725 = vmatmul.mubr.f32.gmra.mrb[52].mxu1 %v8175_v14  ;;  %v8178_v8 = vld [vmem:[%s15747_s23 + $0x3c0] sm:$0xff] }
 0x12f   :  { %9671 = vmatprep.mubr.f32.mxu0 %v8160_v15  ;;  %10859 = vmatprep.subr.bf16.mxu0 %v12202_v13 }
 0x130   :  { %9727 = vmatprep.mubr.f32.mxu1 %v8176_v5 }
 0x131   :  { %9672 = vmatmul.mubr.f32.gmra.mrb[54].mxu0 %v8161_v17 }
 0x132   :  { %10861 = vmatpush3.bf16.msra.mxu0 %v12202_v13  ;;  %9728 = vmatmul.mubr.f32.gmra.mrb[54].mxu1 %v8177_v18  ;;  %v8180_v13 = vld [vmem:[%s15747_s23 + $0x3d0] sm:$0xff] }
 0x133   :  { %9674 = vmatprep.mubr.f32.mxu0 %v8162_v20  ;;  %10863 = vmatprep.subr.bf16.mxu0 %v12208_v16 }
 0x134   :  { %9730 = vmatprep.mubr.f32.mxu1 %v8178_v8 }
 0x135   :  { %9675 = vmatmul.mubr.f32.gmra.mrb[56].mxu0 %v8163_v21 }
 0x136   :  { %10865 = vmatpush3.bf16.msra.mxu0 %v12208_v16  ;;  %9731 = vmatmul.mubr.f32.gmra.mrb[56].mxu1 %v8179_v23  ;;  %v8182_v16 = vld [vmem:[%s15747_s23 + $0x3e0] sm:$0xff] }
 0x137   :  { %9677 = vmatprep.mubr.f32.mxu0 %v8164_v24  ;;  %10867 = vmatprep.subr.bf16.mxu0 %v12214_v19 }
 0x138   :  { %9733 = vmatprep.mubr.f32.mxu1 %v8180_v13 }
 0x139   :  { %9678 = vmatmul.mubr.f32.gmra.mrb[58].mxu0 %v8165_v26 }
 0x13a   :  { %10869 = vmatpush3.bf16.msra.mxu0 %v12214_v19  ;;  %9734 = vmatmul.mubr.f32.gmra.mrb[58].mxu1 %v8181_v27  ;;  %v8184_v19 = vld [vmem:[%s15747_s23 + $0x3f0] sm:$0xff] }
 0x13b   :  { %9680 = vmatprep.mubr.f32.mxu0 %v8166_v28  ;;  %10871 = vmatprep.subr.bf16.mxu0 %v12220_v22 }
 0x13c   :  { %9736 = vmatprep.mubr.f32.mxu1 %v8182_v16 }
 0x13d   :  { %9681 = vmatmul.mubr.f32.gmra.mrb[60].mxu0 %v8167_v29 }
 0x13e   :  { %10873 = vmatpush3.bf16.msra.mxu0 %v12220_v22  ;;  %9737 = vmatmul.mubr.f32.gmra.mrb[60].mxu1 %v8183_v30  ;;  %v8187_v22 = vld [vmem:[%s15747_s23 + $0x408] sm:$0xff] }
 0x13f   :  { %9683 = vmatprep.mubr.f32.mxu0 %v8168_v31  ;;  %10875 = vmatprep.subr.bf16.mxu0 %v12226_v25 }
 0x140   :  { %9739 = vmatprep.mubr.f32.mxu1 %v8184_v19 }
 0x141   :  { %9684 = vmatmul.mubr.f32.gmra.mrb[62].mxu0 %v8169_v32 }
 0x142   :  { %10877 = vmatpush3.bf16.msra.mxu0 %v12226_v25  ;;  %9740 = vmatmul.mubr.f32.gmra.mrb[62].mxu1 %v8185_v33  ;;  %v8190_v25 = vld [vmem:[%s15747_s23 + $0x420] sm:$0xff] }
 0x143   :  { %9774 = vmatprep.mubr.f32.mxu0 %v8186_v34 }
 0x145   :  { %9775 = vmatmul.mubr.f32.vlgmr.msra.gmra.mrb[64].mxu0 %v8187_v22 }
 0x146   :  { %9777 = vmatprep.mubr.f32.mxu0 %v8188_v35 }
 0x149   :  { %9778 = vmatmul.mubr.f32.gmra.mrb[66].mxu0 %v8189_v36 }
 0x14a   :  { %9780 = vmatprep.mubr.f32.mxu0 %v8190_v25 }
 0x14d   :  { %9781 = vmatmul.mubr.f32.gmra.mrb[68].mxu0 %v8191_v37 }
 0x14e   :  { %9783 = vmatprep.mubr.f32.mxu0 %v8192_v38 }
 0x151   :  { %9784 = vmatmul.mubr.f32.gmra.mrb[70].mxu0 %v8193_v39 }
 0x152   :  { %9786 = vmatprep.mubr.f32.mxu0 %v8194_v40 }
 0x155   :  { %9787 = vmatmul.mubr.f32.gmra.mrb[72].mxu0 %v8195_v41 }
 0x156   :  { %9789 = vmatprep.mubr.f32.mxu0 %v8196_v42 }
 0x159   :  { %9790 = vmatmul.mubr.f32.gmra.mrb[74].mxu0 %v8197_v43 }
 0x15a   :  { %9792 = vmatprep.mubr.f32.mxu0 %v8198_v44 }
 0x15d   :  { %9793 = vmatmul.mubr.f32.gmra.mrb[76].mxu0 %v8199_v45 }
 0x15e   :  { %9795 = vmatprep.mubr.f32.mxu0 %v8200_v46 }
 0x161   :  { %9796 = vmatmul.mubr.f32.gmra.mrb[78].mxu0 %v8201_v47 }
 0x198   :  { %v9328_v56 = vpop.f32.mrb[0].mxu0 }
 0x199   :  { %v9384_v57 = vpop.f32.mrb[0].mxu1  ;;  %v357_v58 = vmul.f32 %v9328_v56, %v12787_v53  ;;  %v273_v59 = vpop.f32.mrb[1].mxu0 }
 0x19a   :  { %v555_v60 = vmul.f32 %v9384_v57, %v12791_v54  ;;  %v471_v61 = vpop.f32.mrb[1].mxu1  ;;  %v356_v62 = vmul.f32 %v12787_v53, %v273_v59 }
 0x19b   :  { %v554_v63 = vmul.f32 %v12791_v54, %v471_v61  ;;  %v373_v0 = vadd.f32 %v12796_v55, %v357_v58 }
 0x19c   :  { %v372_v1 = vadd.f32 %v12796_v55, %v356_v62  ;;  %v9331_v2 = vpop.f32.mrb[2].mxu0 }
 0x19d   :  { %v9387_v4 = vpop.f32.mrb[2].mxu1  ;;  %v12804_v6 = vadd.f32 %v555_v60, %v373_v0  ;;  %v359_v7 = vmul.f32 %v9331_v2, %v12787_v53  ;;  %v283_v9 = vpop.f32.mrb[3].mxu0 }
 0x19e   :  { %v557_v10 = vmul.f32 %v9387_v4, %v12791_v54  ;;  %v481_v11 = vpop.f32.mrb[3].mxu1  ;;  %v12808_v3 = vadd.f32 %v554_v63, %v372_v1  ;;  %v358_v12 = vmul.f32 %v12787_v53, %v283_v9 }
 0x19f   :  { %v556_v14 = vmul.f32 %v12791_v54, %v481_v11  ;;  %v375_v15 = vadd.f32 %v12796_v55, %v359_v7 }
 0x1a0   :  { %v374_v5 = vadd.f32 %v12796_v55, %v358_v12  ;;  %v9334_v17 = vpop.f32.mrb[4].mxu0 }
 0x1a1   :  { %v9390_v18 = vpop.f32.mrb[4].mxu1  ;;  %v12814_v20 = vadd.f32 %v557_v10, %v375_v15  ;;  %v361_v8 = vmul.f32 %v9334_v17, %v12787_v53  ;;  %v293_v21 = vpop.f32.mrb[5].mxu0  ;;  %v12859_v17 = vsub.s32 2, %v12772_v49 }
 0x1a2   :  { %v559_v23 = vmul.f32 %v9390_v18, %v12791_v54  ;;  %v491_v24 = vpop.f32.mrb[5].mxu1  ;;  %v12818_v13 = vadd.f32 %v556_v14, %v374_v5  ;;  %v360_v26 = vmul.f32 %v12787_v53, %v293_v21 }
 0x1a3   :  { %v558_v27 = vmul.f32 %v12791_v54, %v491_v24  ;;  %v377_v28 = vadd.f32 %v12796_v55, %v361_v8 }
 0x1a4   :  { %v376_v16 = vadd.f32 %v12796_v55, %v360_v26  ;;  %v9337_v29 = vpop.f32.mrb[6].mxu0 }
 0x1a5   :  { %v9393_v30 = vpop.f32.mrb[6].mxu1  ;;  %v12824_v31 = vadd.f32 %v559_v23, %v377_v28  ;;  %v363_v19 = vmul.f32 %v9337_v29, %v12787_v53  ;;  %v303_v32 = vpop.f32.mrb[7].mxu0  ;;  %v12866_v23 = vsub.s32 3, %v12772_v49 }
 0x1a6   :  { %v561_v33 = vmul.f32 %v9393_v30, %v12791_v54  ;;  %v501_v34 = vpop.f32.mrb[7].mxu1  ;;  %v12828_v22 = vadd.f32 %v558_v27, %v376_v16  ;;  %v362_v35 = vmul.f32 %v12787_v53, %v303_v32 }
 0x1a7   :  { %v560_v36 = vmul.f32 %v12791_v54, %v501_v34  ;;  %v379_v25 = vadd.f32 %v12796_v55, %v363_v19 }
 0x1a8   :  { %v378_v37 = vadd.f32 %v12796_v55, %v362_v35  ;;  %v9340_v38 = vpop.f32.mrb[8].mxu0 }
 0x1a9   :  { %v9396_v39 = vpop.f32.mrb[8].mxu1  ;;  %v12834_v40 = vadd.f32 %v561_v33, %v379_v25  ;;  %v365_v41 = vmul.f32 %v9340_v38, %v12787_v53  ;;  %v313_v42 = vpop.f32.mrb[9].mxu0  ;;  %v12876_v33 = vrot.slane %v12783_v52, %v12859_v17  ;;  %v12884_v25 = vrot.slane %v12783_v52, %v12866_v23 }
 0x1aa   :  { %v563_v43 = vmul.f32 %v9396_v39, %v12791_v54  ;;  %v511_v44 = vpop.f32.mrb[9].mxu1  ;;  %v12838_v45 = vadd.f32 %v560_v36, %v378_v37  ;;  %v364_v46 = vmul.f32 %v12787_v53, %v313_v42 }
 0x1ab   :  { %v562_v47 = vmul.f32 %v12791_v54, %v511_v44  ;;  %v381_v48 = vadd.f32 %v12796_v55, %v365_v41 }
 0x1ac   :  { %v380_v56 = vadd.f32 %v12796_v55, %v364_v46  ;;  %v9343_v57 = vpop.f32.mrb[10].mxu0 }
 0x1ad   :  { %v9399_v58 = vpop.f32.mrb[10].mxu1  ;;  %v12844_v59 = vadd.f32 %v563_v43, %v381_v48  ;;  %v367_v60 = vmul.f32 %v9343_v57, %v12787_v53  ;;  %v323_v61 = vpop.f32.mrb[11].mxu0 }
 0x1ae   :  { %v565_v62 = vmul.f32 %v9399_v58, %v12791_v54  ;;  %v521_v63 = vpop.f32.mrb[11].mxu1  ;;  %v12848_v0 = vadd.f32 %v562_v47, %v380_v56  ;;  %v366_v1 = vmul.f32 %v12787_v53, %v323_v61 }
 0x1af   :  { %v564_v2 = vmul.f32 %v12791_v54, %v521_v63  ;;  %v383_v4 = vadd.f32 %v12796_v55, %v367_v60 }
 0x1b0   :  { %v382_v7 = vadd.f32 %v12796_v55, %v366_v1  ;;  %v9346_v9 = vpop.f32.mrb[12].mxu0 }
 0x1b1   :  { %v9402_v10 = vpop.f32.mrb[12].mxu1  ;;  %v12854_v11 = vadd.f32 %v565_v62, %v383_v4  ;;  %v369_v12 = vmul.f32 %v9346_v9, %v12787_v53  ;;  %v333_v14 = vpop.f32.mrb[13].mxu0 }
 0x1b2   :  { %v567_v15 = vmul.f32 %v9402_v10, %v12791_v54  ;;  %v531_v5 = vpop.f32.mrb[13].mxu1  ;;  %v12861_v18 = vadd.f32 %v564_v2, %v382_v7  ;;  %v368_v8 = vmul.f32 %v12787_v53, %v333_v14 }
 0x1b3   :  { %v566_v21 = vmul.f32 %v12791_v54, %v531_v5  ;;  %v385_v24 = vadd.f32 %v12796_v55, %v369_v12 }
 0x1b4   :  { %v384_v26 = vadd.f32 %v12796_v55, %v368_v8  ;;  %v9349_v27 = vpop.f32.mrb[14].mxu0 }
 0x1b5   :  { %v9405_v28 = vpop.f32.mrb[14].mxu1  ;;  %v12870_v16 = vadd.f32 %v567_v15, %v385_v24  ;;  %v371_v29 = vmul.f32 %v9349_v27, %v12787_v53  ;;  %v343_v30 = vpop.f32.mrb[15].mxu0 }
 0x1b6   :  { %v569_v19 = vmul.f32 %v9405_v28, %v12791_v54  ;;  %v541_v32 = vpop.f32.mrb[15].mxu1  ;;  %v12878_v34 = vadd.f32 %v566_v21, %v384_v26  ;;  %v370_v35 = vmul.f32 %v12787_v53, %v343_v30 }
 0x1b7   :  { %v568_v36 = vmul.f32 %v12791_v54, %v541_v32  ;;  %v387_v37 = vadd.f32 %v12796_v55, %v371_v29 }
 0x1b8   :  { %v386_v38 = vadd.f32 %v12796_v55, %v370_v35  ;;  %v9440_v39 = vpop.f32.mrb[16].mxu0 }
 0x1b9   :  { %v12888_v41 = vadd.f32 %v569_v19, %v387_v37  ;;  %v753_v42 = vmul.f32 %v9440_v39, %v12876_v33  ;;  %v669_v43 = vpop.f32.mrb[17].mxu0  ;;  %v9496_v44 = vpop.f32.mrb[16].mxu1 }
 0x1ba   :  { %v12891_v46 = vadd.f32 %v568_v36, %v386_v38  ;;  %v752_v53 = vmul.f32 %v12876_v33, %v669_v43  ;;  %v951_v54 = vmul.f32 %v9496_v44, %v12884_v25  ;;  %v867_v47 = vpop.f32.mrb[17].mxu1 }
 0x1bb   :  { %v769_v48 = vadd.f32 %v753_v42, %v12804_v6  ;;  %v950_v56 = vmul.f32 %v12884_v25, %v867_v47 }
 0x1bc   :  { %v768_v55 = vadd.f32 %v752_v53, %v12808_v3  ;;  %v9443_v57 = vpop.f32.mrb[18].mxu0  ;;  %v2005_v3 = vld [vmem:[%s15750_s0] sm:$0xff] }
 0x1bd   :  { %v12898_v58 = vadd.f32 %v951_v54, %v769_v48  ;;  %v755_v60 = vmul.f32 %v9443_v57, %v12876_v33  ;;  %v679_v61 = vpop.f32.mrb[19].mxu0  ;;  %v9499_v62 = vpop.f32.mrb[18].mxu1  ;;  %9830 = vmatprep.mubr.f32.mxu1 %v2005_v3  ;;  %9886 = vmatprep.mubr.f32.mxu0 %v2005_v3 }
 0x1be   :  { %v12901_v63 = vadd.f32 %v950_v56, %v768_v55  ;;  %v754_v1 = vmul.f32 %v12876_v33, %v679_v61  ;;  %v953_v2 = vmul.f32 %v9499_v62, %v12884_v25  ;;  %v877_v4 = vpop.f32.mrb[19].mxu1 }
 0x1bf   :  { %v771_v6 = vadd.f32 %v755_v60, %v12814_v20  ;;  %v952_v7 = vmul.f32 %v12884_v25, %v877_v4 }
 0x1c0   :  { %v770_v9 = vadd.f32 %v754_v1, %v12818_v13  ;;  %v9446_v10 = vpop.f32.mrb[20].mxu0 }
 0x1c1   :  { %v12911_v12 = vadd.f32 %v953_v2, %v771_v6  ;;  %v757_v14 = vmul.f32 %v9446_v10, %v12876_v33  ;;  %v689_v15 = vpop.f32.mrb[21].mxu0  ;;  %v9502_v5 = vpop.f32.mrb[20].mxu1 }
 0x1c2   :  { %v12914_v8 = vadd.f32 %v952_v7, %v770_v9  ;;  %v756_v20 = vmul.f32 %v12876_v33, %v689_v15  ;;  %v955_v21 = vmul.f32 %v9502_v5, %v12884_v25  ;;  %v887_v24 = vpop.f32.mrb[21].mxu1 }
 0x1c3   :  { %v773_v26 = vadd.f32 %v757_v14, %v12824_v31  ;;  %v954_v13 = vmul.f32 %v12884_v25, %v887_v24 }
 0x1c4   :  { %v772_v27 = vadd.f32 %v756_v20, %v12828_v22  ;;  %v9449_v28 = vpop.f32.mrb[22].mxu0 }
 0x1c5   :  { %v12921_v29 = vadd.f32 %v955_v21, %v773_v26  ;;  %v759_v30 = vmul.f32 %v9449_v28, %v12876_v33  ;;  %v699_v19 = vpop.f32.mrb[23].mxu0  ;;  %v9505_v32 = vpop.f32.mrb[22].mxu1  ;;  %v1146_v21 = vsub.s32 4, %v12772_v49 }
 0x1c6   :  { %v12924_v35 = vadd.f32 %v954_v13, %v772_v27  ;;  %v758_v36 = vmul.f32 %v12876_v33, %v699_v19  ;;  %v957_v37 = vmul.f32 %v9505_v32, %v12884_v25  ;;  %v897_v38 = vpop.f32.mrb[23].mxu1  ;;  %v1344_v27 = vsub.s32 5, %v12772_v49 }
 0x1c7   :  { %v775_v31 = vadd.f32 %v759_v30, %v12834_v40  ;;  %v956_v39 = vmul.f32 %v12884_v25, %v897_v38 }
 0x1c8   :  { %v774_v22 = vadd.f32 %v758_v36, %v12838_v45  ;;  %v9452_v42 = vpop.f32.mrb[24].mxu0 }
 0x1c9   :  { %v12931_v43 = vadd.f32 %v957_v37, %v775_v31  ;;  %v761_v44 = vmul.f32 %v9452_v42, %v12876_v33  ;;  %v709_v53 = vpop.f32.mrb[25].mxu0  ;;  %v9508_v54 = vpop.f32.mrb[24].mxu1  ;;  %v12967_v31 = vrot.slane %v12783_v52, %v1146_v21 }
 0x1ca   :  { %v12934_v47 = vadd.f32 %v956_v39, %v774_v22  ;;  %v760_v48 = vmul.f32 %v12876_v33, %v709_v53  ;;  %v959_v56 = vmul.f32 %v9508_v54, %v12884_v25  ;;  %v907_v55 = vpop.f32.mrb[25].mxu1 }
 0x1cb   :  { %v777_v40 = vadd.f32 %v761_v44, %v12844_v59  ;;  %v958_v57 = vmul.f32 %v12884_v25, %v907_v55  ;;  %v12974_v44 = vrot.slane %v12783_v52, %v1344_v27 }
 0x1cc   :  { %v776_v45 = vadd.f32 %v760_v48, %v12848_v0  ;;  %v9455_v60 = vpop.f32.mrb[26].mxu0 }
 0x1cd   :  { %v12941_v61 = vadd.f32 %v959_v56, %v777_v40  ;;  %v763_v62 = vmul.f32 %v9455_v60, %v12876_v33  ;;  %v719_v1 = vpop.f32.mrb[27].mxu0  ;;  %v9511_v2 = vpop.f32.mrb[26].mxu1 }
 0x1ce   :  { %v12944_v4 = vadd.f32 %v958_v57, %v776_v45  ;;  %v762_v6 = vmul.f32 %v12876_v33, %v719_v1  ;;  %v961_v7 = vmul.f32 %v9511_v2, %v12884_v25  ;;  %v917_v3 = vpop.f32.mrb[27].mxu1 }
 0x1cf   :  { %v779_v59 = vadd.f32 %v763_v62, %v12854_v11  ;;  %v960_v9 = vmul.f32 %v12884_v25, %v917_v3 }
 0x1d0   :  { %v778_v0 = vadd.f32 %v762_v6, %v12861_v18  ;;  %v9458_v10 = vpop.f32.mrb[28].mxu0 }
 0x1d1   :  { %v12951_v14 = vadd.f32 %v961_v7, %v779_v59  ;;  %v765_v15 = vmul.f32 %v9458_v10, %v12876_v33  ;;  %v729_v5 = vpop.f32.mrb[29].mxu0  ;;  %v9514_v20 = vpop.f32.mrb[28].mxu1 }
 0x1d2   :  { %v12955_v24 = vadd.f32 %v960_v9, %v778_v0  ;;  %v764_v26 = vmul.f32 %v12876_v33, %v729_v5  ;;  %v963_v13 = vmul.f32 %v9514_v20, %v12884_v25  ;;  %v927_v11 = vpop.f32.mrb[29].mxu1 }
 0x1d3   :  { %v781_v18 = vadd.f32 %v765_v15, %v12870_v16  ;;  %v962_v28 = vmul.f32 %v12884_v25, %v927_v11 }
 0x1d4   :  { %v780_v30 = vadd.f32 %v764_v26, %v12878_v34  ;;  %v9461_v19 = vpop.f32.mrb[30].mxu0 }
 0x1d5   :  { %v12963_v32 = vadd.f32 %v963_v13, %v781_v18  ;;  %v767_v36 = vmul.f32 %v9461_v19, %v12876_v33  ;;  %v739_v37 = vpop.f32.mrb[31].mxu0  ;;  %v9517_v38 = vpop.f32.mrb[30].mxu1 }
 0x1d6   :  { %v12969_v39 = vadd.f32 %v962_v28, %v780_v30  ;;  %v766_v22 = vmul.f32 %v12876_v33, %v739_v37  ;;  %v965_v16 = vmul.f32 %v9517_v38, %v12884_v25  ;;  %v937_v42 = vpop.f32.mrb[31].mxu1 }
 0x1d7   :  { %v783_v34 = vadd.f32 %v767_v36, %v12888_v41  ;;  %v964_v53 = vmul.f32 %v12884_v25, %v937_v42 }
 0x1d8   :  { %v782_v54 = vadd.f32 %v766_v22, %v12891_v46  ;;  %v9552_v48 = vpop.f32.mrb[32].mxu0 }
 0x1d9   :  { %v12979_v56 = vadd.f32 %v965_v16, %v783_v34  ;;  %v1149_v55 = vmul.f32 %v9552_v48, %v12967_v31  ;;  %v1065_v40 = vpop.f32.mrb[33].mxu0  ;;  %v9608_v57 = vpop.f32.mrb[32].mxu1 }
 0x1da   :  { %v12982_v33 = vadd.f32 %v964_v53, %v782_v54  ;;  %v1148_v45 = vmul.f32 %v12967_v31, %v1065_v40  ;;  %v1347_v60 = vmul.f32 %v9608_v57, %v12974_v44  ;;  %v1263_v62 = vpop.f32.mrb[33].mxu1 }
 0x1db   :  { %v1165_v41 = vadd.f32 %v1149_v55, %v12898_v58  ;;  %v1346_v25 = vmul.f32 %v12974_v44, %v1263_v62 }
 0x1dc   :  { %v1164_v46 = vadd.f32 %v1148_v45, %v12901_v63  ;;  %v9555_v1 = vpop.f32.mrb[34].mxu0 }
 0x1dd   :  { %v12989_v2 = vadd.f32 %v1347_v60, %v1165_v41  ;;  %v1151_v6 = vmul.f32 %v9555_v1, %v12967_v31  ;;  %v1075_v7 = vpop.f32.mrb[35].mxu0  ;;  %v9611_v3 = vpop.f32.mrb[34].mxu1 }
 0x1de   :  { %v12992_v59 = vadd.f32 %v1346_v25, %v1164_v46  ;;  %v1150_v9 = vmul.f32 %v12967_v31, %v1075_v7  ;;  %v1349_v0 = vmul.f32 %v9611_v3, %v12974_v44  ;;  %v1273_v10 = vpop.f32.mrb[35].mxu1 }
 0x1df   :  { %v1167_v58 = vadd.f32 %v1151_v6, %v12911_v12  ;;  %v1348_v15 = vmul.f32 %v12974_v44, %v1273_v10 }
 0x1e0   :  { %v1166_v63 = vadd.f32 %v1150_v9, %v12914_v8  ;;  %v9558_v5 = vpop.f32.mrb[36].mxu0 }
 0x1e1   :  { %v12999_v20 = vadd.f32 %v1349_v0, %v1167_v58  ;;  %v1153_v21 = vmul.f32 %v9558_v5, %v12967_v31  ;;  %v1085_v26 = vpop.f32.mrb[37].mxu0  ;;  %v9614_v13 = vpop.f32.mrb[36].mxu1 }
 0x1e2   :  { %v13002_v11 = vadd.f32 %v1348_v15, %v1166_v63  ;;  %v1152_v27 = vmul.f32 %v12967_v31, %v1085_v26  ;;  %v1351_v18 = vmul.f32 %v9614_v13, %v12974_v44  ;;  %v1283_v28 = vpop.f32.mrb[37].mxu1 }
 0x1e3   :  { %v1169_v12 = vadd.f32 %v1153_v21, %v12921_v29  ;;  %v1350_v30 = vmul.f32 %v12974_v44, %v1283_v28 }
 0x1e4   :  { %v1168_v8 = vadd.f32 %v1152_v27, %v12924_v35  ;;  %v9561_v19 = vpop.f32.mrb[38].mxu0 }
 0x1e5   :  { %v13009_v36 = vadd.f32 %v1351_v18, %v1169_v12  ;;  %v1155_v37 = vmul.f32 %v9561_v19, %v12967_v31  ;;  %v1095_v38 = vpop.f32.mrb[39].mxu0  ;;  %v9617_v22 = vpop.f32.mrb[38].mxu1  ;;  %v1542_v18 = vsub.s32 6, %v12772_v49 }
 0x1e6   :  { %v13012_v16 = vadd.f32 %v1350_v30, %v1168_v8  ;;  %v1154_v42 = vmul.f32 %v12967_v31, %v1095_v38  ;;  %v1353_v34 = vmul.f32 %v9617_v22, %v12974_v44  ;;  %v1293_v53 = vpop.f32.mrb[39].mxu1  ;;  %v1740_v8 = vsub.s32 7, %v12772_v49 }
 0x1e7   :  { %v1171_v29 = vadd.f32 %v1155_v37, %v12931_v43  ;;  %v1352_v54 = vmul.f32 %v12974_v44, %v1293_v53 }
 0x1e8   :  { %v1170_v35 = vadd.f32 %v1154_v42, %v12934_v47  ;;  %v9564_v48 = vpop.f32.mrb[40].mxu0 }
 0x1e9   :  { %v13019_v55 = vadd.f32 %v1353_v34, %v1171_v29  ;;  %v1157_v40 = vmul.f32 %v9564_v48, %v12967_v31  ;;  %v1105_v57 = vpop.f32.mrb[41].mxu0  ;;  %v9620_v45 = vpop.f32.mrb[40].mxu1  ;;  %v13055_v29 = vrot.slane %v12783_v52, %v1542_v18  ;;  %v13062_v48 = vrot.slane %v12783_v52, %v1740_v8 }
 0x1ea   :  { %v13022_v60 = vadd.f32 %v1352_v54, %v1170_v35  ;;  %v1156_v62 = vmul.f32 %v12967_v31, %v1105_v57  ;;  %v1355_v41 = vmul.f32 %v9620_v45, %v12974_v44  ;;  %v1303_v25 = vpop.f32.mrb[41].mxu1 }
 0x1eb   :  { %v1173_v43 = vadd.f32 %v1157_v40, %v12941_v61  ;;  %v1354_v46 = vmul.f32 %v12974_v44, %v1303_v25 }
 0x1ec   :  { %v1172_v47 = vadd.f32 %v1156_v62, %v12944_v4  ;;  %v9567_v1 = vpop.f32.mrb[42].mxu0 }
 0x1ed   :  { %v13029_v6 = vadd.f32 %v1355_v41, %v1173_v43  ;;  %v1159_v7 = vmul.f32 %v9567_v1, %v12967_v31  ;;  %v1115_v3 = vpop.f32.mrb[43].mxu0  ;;  %v9623_v9 = vpop.f32.mrb[42].mxu1 }
 0x1ee   :  { %v13032_v0 = vadd.f32 %v1354_v46, %v1172_v47  ;;  %v1158_v10 = vmul.f32 %v12967_v31, %v1115_v3  ;;  %v1357_v58 = vmul.f32 %v9623_v9, %v12974_v44  ;;  %v1313_v15 = vpop.f32.mrb[43].mxu1 }
 0x1ef   :  { %v1175_v61 = vadd.f32 %v1159_v7, %v12951_v14  ;;  %v1356_v63 = vmul.f32 %v12974_v44, %v1313_v15 }
 0x1f0   :  { %v1174_v4 = vadd.f32 %v1158_v10, %v12955_v24  ;;  %v9570_v5 = vpop.f32.mrb[44].mxu0 }
 0x1f1   :  { %v13039_v21 = vadd.f32 %v1357_v58, %v1175_v61  ;;  %v1161_v26 = vmul.f32 %v9570_v5, %v12967_v31  ;;  %v1125_v13 = vpop.f32.mrb[45].mxu0  ;;  %v9626_v27 = vpop.f32.mrb[44].mxu1 }
 0x1f2   :  { %v13043_v28 = vadd.f32 %v1356_v63, %v1174_v4  ;;  %v1160_v12 = vmul.f32 %v12967_v31, %v1125_v13  ;;  %v1359_v30 = vmul.f32 %v9626_v27, %v12974_v44  ;;  %v1323_v14 = vpop.f32.mrb[45].mxu1 }
 0x1f3   :  { %v1177_v24 = vadd.f32 %v1161_v26, %v12963_v32  ;;  %v1358_v19 = vmul.f32 %v12974_v44, %v1323_v14 }
 0x1f4   :  { %v1176_v37 = vadd.f32 %v1160_v12, %v12969_v39  ;;  %v9573_v38 = vpop.f32.mrb[46].mxu0 }
 0x1f5   :  { %v13051_v22 = vadd.f32 %v1359_v30, %v1177_v24  ;;  %v1163_v42 = vmul.f32 %v9573_v38, %v12967_v31  ;;  %v1135_v34 = vpop.f32.mrb[47].mxu0  ;;  %v9629_v53 = vpop.f32.mrb[46].mxu1 }
 0x1f6   :  { %v13057_v54 = vadd.f32 %v1358_v19, %v1176_v37  ;;  %v1162_v49 = vmul.f32 %v12967_v31, %v1135_v34  ;;  %v1361_v32 = vmul.f32 %v9629_v53, %v12974_v44  ;;  %v1333_v35 = vpop.f32.mrb[47].mxu1 }
 0x1f7   :  { %v1179_v39 = vadd.f32 %v1163_v42, %v12979_v56  ;;  %v1360_v40 = vmul.f32 %v12974_v44, %v1333_v35 }
 0x1f8   :  { %v1178_v57 = vadd.f32 %v1162_v49, %v12982_v33  ;;  %v9664_v45 = vpop.f32.mrb[48].mxu0 }
 0x1f9   :  { %v13067_v62 = vadd.f32 %v1361_v32, %v1179_v39  ;;  %v1545_v41 = vmul.f32 %v9664_v45, %v13055_v29  ;;  %v1461_v25 = vpop.f32.mrb[49].mxu0  ;;  %v9720_v43 = vpop.f32.mrb[48].mxu1 }
 0x1fa   :  { %v13070_v31 = vadd.f32 %v1360_v40, %v1178_v57  ;;  %v1544_v46 = vmul.f32 %v13055_v29, %v1461_v25  ;;  %v1743_v52 = vmul.f32 %v9720_v43, %v13062_v48  ;;  %v1659_v47 = vpop.f32.mrb[49].mxu1 }
 0x1fb   :  { %v1561_v56 = vadd.f32 %v1545_v41, %v12989_v2  ;;  %v1742_v44 = vmul.f32 %v13062_v48, %v1659_v47 }
 0x1fc   :  { %v1560_v33 = vadd.f32 %v1544_v46, %v12992_v59  ;;  %v9667_v1 = vpop.f32.mrb[50].mxu0 }
 0x1fd   :  { %v13077_v7 = vadd.f32 %v1743_v52, %v1561_v56  ;;  %v1547_v3 = vmul.f32 %v9667_v1, %v13055_v29  ;;  %v1471_v9 = vpop.f32.mrb[51].mxu0  ;;  %v9723_v10 = vpop.f32.mrb[50].mxu1 }
 0x1fe   :  { %v13080_v58 = vadd.f32 %v1742_v44, %v1560_v33  ;;  %v1546_v15 = vmul.f32 %v13055_v29, %v1471_v9  ;;  %v1745_v61 = vmul.f32 %v9723_v10, %v13062_v48  ;;  %v1669_v63 = vpop.f32.mrb[51].mxu1 }
 0x1ff   :  { %v1563_v2 = vadd.f32 %v1547_v3, %v12999_v20  ;;  %v1744_v4 = vmul.f32 %v13062_v48, %v1669_v63 }
 0x200   :  { %v1562_v59 = vadd.f32 %v1546_v15, %v13002_v11  ;;  %v9670_v5 = vpop.f32.mrb[52].mxu0 }
 0x201   :  { %v13087_v26 = vadd.f32 %v1745_v61, %v1563_v2  ;;  %v1549_v13 = vmul.f32 %v9670_v5, %v13055_v29  ;;  %v1481_v27 = vpop.f32.mrb[53].mxu0  ;;  %v9726_v18 = vpop.f32.mrb[52].mxu1 }
 0x202   :  { %v13090_v12 = vadd.f32 %v1744_v4, %v1562_v59  ;;  %v1548_v30 = vmul.f32 %v13055_v29, %v1481_v27  ;;  %v1747_v14 = vmul.f32 %v9726_v18, %v13062_v48  ;;  %v1679_v8 = vpop.f32.mrb[53].mxu1 }
 0x203   :  { %v1565_v20 = vadd.f32 %v1549_v13, %v13009_v36  ;;  %v1746_v24 = vmul.f32 %v13062_v48, %v1679_v8 }
 0x204   :  { %v1564_v11 = vadd.f32 %v1548_v30, %v13012_v16  ;;  %v9673_v19 = vpop.f32.mrb[54].mxu0 }
 0x205   :  { %v13097_v37 = vadd.f32 %v1747_v14, %v1565_v20  ;;  %v1551_v38 = vmul.f32 %v9673_v19, %v13055_v29  ;;  %v1491_v42 = vpop.f32.mrb[55].mxu0  ;;  %v9729_v34 = vpop.f32.mrb[54].mxu1 }
 0x206   :  { %v13100_v53 = vadd.f32 %v1746_v24, %v1564_v11  ;;  %v1550_v49 = vmul.f32 %v13055_v29, %v1491_v42  ;;  %v1749_v32 = vmul.f32 %v9729_v34, %v13062_v48  ;;  %v1689_v35 = vpop.f32.mrb[55].mxu1 }
 0x207   :  { %v1567_v36 = vadd.f32 %v1551_v38, %v13019_v55  ;;  %v1748_v39 = vmul.f32 %v13062_v48, %v1689_v35 }
 0x208   :  { %v1566_v16 = vadd.f32 %v1550_v49, %v13022_v60  ;;  %v9676_v40 = vpop.f32.mrb[56].mxu0 }
 0x209   :  { %v13107_v57 = vadd.f32 %v1749_v32, %v1567_v36  ;;  %v1553_v45 = vmul.f32 %v9676_v40, %v13055_v29  ;;  %v1501_v41 = vpop.f32.mrb[57].mxu0  ;;  %v9732_v25 = vpop.f32.mrb[56].mxu1 }
 0x20a   :  { %v13110_v43 = vadd.f32 %v1748_v39, %v1566_v16  ;;  %v1552_v46 = vmul.f32 %v13055_v29, %v1501_v41  ;;  %v1751_v52 = vmul.f32 %v9732_v25, %v13062_v48  ;;  %v1699_v47 = vpop.f32.mrb[57].mxu1 }
 0x20b   :  { %v1569_v55 = vadd.f32 %v1553_v45, %v13029_v6  ;;  %v1750_v56 = vmul.f32 %v13062_v48, %v1699_v47  ;;  %v11742_v47 = vld [vmem:[#allocation2 + $0x8] sm:$0xff] }
 0x20c   :  { %v1568_v60 = vadd.f32 %v1552_v46, %v13032_v0  ;;  %v9679_v44 = vpop.f32.mrb[58].mxu0 }
 0x20d   :  { %v13117_v33 = vadd.f32 %v1751_v52, %v1569_v55  ;;  %v1555_v1 = vmul.f32 %v9679_v44, %v13055_v29  ;;  %v1511_v3 = vpop.f32.mrb[59].mxu0  ;;  %v9735_v9 = vpop.f32.mrb[58].mxu1 }
 0x20e   :  { %v13120_v10 = vadd.f32 %v1750_v56, %v1568_v60  ;;  %v1554_v15 = vmul.f32 %v13055_v29, %v1511_v3  ;;  %v1753_v61 = vmul.f32 %v9735_v9, %v13062_v48  ;;  %v1709_v63 = vpop.f32.mrb[59].mxu1  ;;  %v11743_v56 = vld [vmem:[#allocation2] sm:$0xff]  ;;  %v11744_v9 = vld [vmem:[#allocation2 + $0x18] sm:$0xff] }
 0x20f   :  { %v1571_v6 = vadd.f32 %v1555_v1, %v13039_v21  ;;  %v1752_v2 = vmul.f32 %v13062_v48, %v1709_v63 }
 0x210   :  { %v1570_v0 = vadd.f32 %v1554_v15, %v13043_v28  ;;  %v9682_v4 = vpop.f32.mrb[60].mxu0 }
 0x211   :  { %v13127_v59 = vadd.f32 %v1753_v61, %v1571_v6  ;;  %v1557_v5 = vmul.f32 %v9682_v4, %v13055_v29  ;;  %v1521_v13 = vpop.f32.mrb[61].mxu0  ;;  %v9738_v27 = vpop.f32.mrb[60].mxu1  ;;  %v11745_v6 = vld [vmem:[#allocation2 + $0x10] sm:$0xff] }
 0x212   :  { %v13130_v18 = vadd.f32 %v1752_v2, %v1570_v0  ;;  %v1556_v30 = vmul.f32 %v13055_v29, %v1521_v13  ;;  %v1755_v14 = vmul.f32 %v9738_v27, %v13062_v48  ;;  %v1719_v8 = vpop.f32.mrb[61].mxu1  ;;  %v11746_v13 = vld [vmem:[#allocation2 + $0x28] sm:$0xff] }
 0x213   :  { %v1573_v21 = vadd.f32 %v1557_v5, %v13051_v22  ;;  %v1754_v20 = vmul.f32 %v13062_v48, %v1719_v8  ;;  %v13147_v22 = vld [vmem:[%s15748_s27 + $0x8] ss:$0 sm:$0xff]  ;;  %s11961_s27 = smov 104  }
 0x214   :  { %v1572_v28 = vadd.f32 %v1556_v30, %v13057_v54  ;;  %v9685_v24 = vpop.f32.mrb[62].mxu0 }
 0x215   :  { %v13137_v11 = vadd.f32 %v1755_v14, %v1573_v21  ;;  %v1559_v19 = vmul.f32 %v9685_v24, %v13055_v29  ;;  %v1531_v38 = vpop.f32.mrb[63].mxu0  ;;  %v9741_v42 = vpop.f32.mrb[62].mxu1 }
 0x216   :  { %v13140_v34 = vadd.f32 %v1754_v20, %v1572_v28  ;;  %v1558_v49 = vmul.f32 %v13055_v29, %v1531_v38  ;;  %v1757_v32 = vmul.f32 %v9741_v42, %v13062_v48  ;;  %v1729_v35 = vpop.f32.mrb[63].mxu1 }
 0x217   :  { %v1575_v54 = vadd.f32 %v1559_v19, %v13067_v62  ;;  %v1756_v36 = vmul.f32 %v13062_v48, %v1729_v35  ;;  %v11748_v19 = vld [vmem:[#allocation2 + $0x38] sm:$0xff] }
 0x218   :  { %v1574_v39 = vadd.f32 %v1558_v49, %v13070_v31  ;;  %v9776_v16 = vpop.f32.mrb[64].mxu0 }
 0x219   :  { %v13152_v40 = vadd.f32 %v1757_v32, %v1575_v54  ;;  %v1941_v45 = vmul.f32 %v9776_v16, %v13147_v22  ;;  %v1857_v29 = vpop.f32.mrb[65].mxu0  ;;  %v11750_v16 = vld [vmem:[#allocation2 + $0x48] sm:$0xff] }
 0x21a   :  { %v13155_v41 = vadd.f32 %v1756_v36, %v1574_v39  ;;  %v1940_v25 = vmul.f32 %v13147_v22, %v1857_v29 }
 0x21b   :  { %v1957_v46 = vadd.f32 %v1941_v45, %v13077_v7 }
 0x21c   :  { %v1956_v52 = vadd.f32 %v1940_v25, %v13080_v58  ;;  %v9779_v62 = vpop.f32.mrb[66].mxu0 }
 0x21d   :  { %v13160_v48 = vadd.f32 %v11742_v47, %v1957_v46  ;;  %v1943_v31 = vmul.f32 %v9779_v62, %v13147_v22  ;;  %v1867_v55 = vpop.f32.mrb[67].mxu0 }
 0x21e   :  { %v13163_v60 = vadd.f32 %v11743_v56, %v1956_v52  ;;  %v1942_v44 = vmul.f32 %v13147_v22, %v1867_v55  ;;  %v11752_v55 = vld [vmem:[#allocation2 + $0x58] sm:$0xff] }
 0x21f   :  { %1990 = vst.msk [vmem:[%s15726_s21 + $0x8] sm:$0xff] %vm1988_vm0, %v13160_v48  ;;  %v1959_v7 = vadd.f32 %v1943_v31, %v13087_v26 }
 0x220   :  { %1989 = vst.msk [vmem:[%s15726_s21] sm:$0xff] %vm1988_vm0, %v13163_v60  ;;  %v1958_v58 = vadd.f32 %v1942_v44, %v13090_v12  ;;  %v9782_v1 = vpop.f32.mrb[68].mxu0  ;;  %v10878_v3 = vpack.c.bf16 %v13160_v48, %v13163_v60 }
 0x221   :  { %v13180_v15 = vadd.f32 %v11744_v9, %v1959_v7  ;;  %v1945_v61 = vmul.f32 %v9782_v1, %v13147_v22  ;;  %v1877_v63 = vpop.f32.mrb[69].mxu0 }
 0x222   :  { %v13183_v26 = vadd.f32 %v11745_v6, %v1958_v58  ;;  %v1944_v2 = vmul.f32 %v13147_v22, %v1877_v63  ;;  %10879 = vmatprep.subr.bf16.mxu1 %v10878_v3  ;;  %v11754_v63 = vld [vmem:[#allocation2 + $0x68] sm:$0xff] }
 0x223   :  { %1992 = vst.msk [vmem:[%s15726_s21 + $0x18] sm:$0xff] %vm1988_vm0, %v13180_v15  ;;  %v1961_v12 = vadd.f32 %v1945_v61, %v13097_v37  ;;  %10881 = vmatpush3.bf16.msra.mxu1 %v10878_v3  ;;  %v11747_v37 = vld [vmem:[#allocation2 + $0x20] sm:$0xff] }
 0x224   :  { %1991 = vst.msk [vmem:[%s15726_s21 + $0x10] sm:$0xff] %vm1988_vm0, %v13183_v26  ;;  %v1960_v0 = vadd.f32 %v1944_v2, %v13100_v53  ;;  %v9785_v4 = vpop.f32.mrb[70].mxu0  ;;  %v10882_v5 = vpack.c.bf16 %v13180_v15, %v13183_v26 }
 0x225   :  { %v13200_v27 = vadd.f32 %v11746_v13, %v1961_v12  ;;  %v1947_v30 = vmul.f32 %v9785_v4, %v13147_v22  ;;  %v1887_v14 = vpop.f32.mrb[71].mxu0  ;;  %v11756_v13 = vld [vmem:[#allocation2 + $0x78] sm:$0xff] }
 0x226   :  { %v13203_v8 = vadd.f32 %v11747_v37, %v1960_v0  ;;  %v1946_v21 = vmul.f32 %v13147_v22, %v1887_v14  ;;  %10883 = vmatprep.subr.bf16.mxu1 %v10882_v5  ;;  %v11757_v14 = vld [vmem:[#allocation2 + $0x70] sm:$0xff] }
 0x227   :  { %1994 = vst.msk [vmem:[%s15726_s21 + $0x28] sm:$0xff] %vm1988_vm0, %v13200_v27  ;;  %v1963_v53 = vadd.f32 %v1947_v30, %v13107_v57  ;;  %10885 = vmatpush3.bf16.msra.mxu1 %v10882_v5  ;;  %v11749_v57 = vld [vmem:[#allocation2 + $0x30] sm:$0xff] }
 0x228   :  { %1993 = vst.msk [vmem:[%s15726_s21 + $0x20] sm:$0xff] %vm1988_vm0, %v13203_v8  ;;  %v1962_v20 = vadd.f32 %v1946_v21, %v13110_v43  ;;  %v9788_v28 = vpop.f32.mrb[72].mxu0  ;;  %v10886_v24 = vpack.c.bf16 %v13200_v27, %v13203_v8  ;;  %v13324_v21 = vld [vmem:[%s15750_s0 + $0x10] sm:$0xff] }
 0x229   :  { %v13220_v38 = vadd.f32 %v11748_v19, %v1963_v53  ;;  %v1949_v42 = vmul.f32 %v9788_v28, %v13147_v22  ;;  %v1897_v49 = vpop.f32.mrb[73].mxu0  ;;  %v13331_v53 = vld [vmem:[%s15750_s0 + $0x18] sm:$0xff]  ;;  %v13343_v28 = vld [vmem:[%s15750_s0 + $0x28] sm:$0xff] }
 0x22a   :  { %v13223_v32 = vadd.f32 %v11749_v57, %v1962_v20  ;;  %v1948_v35 = vmul.f32 %v13147_v22, %v1897_v49  ;;  %10887 = vmatprep.subr.bf16.mxu1 %v10886_v24  ;;  %v13336_v20 = vld [vmem:[%s15750_s0 + $0x20] sm:$0xff]  ;;  %v13355_v19 = vld [vmem:[%s15750_s0 + $0x38] sm:$0xff]  ;;  %v13367_v49 = vld [vmem:[%s15750_s0 + $0x48] sm:$0xff] }
 0x22b   :  { %1996 = vst.msk [vmem:[%s15726_s21 + $0x38] sm:$0xff] %vm1988_vm0, %v13220_v38  ;;  %v1965_v43 = vadd.f32 %v1949_v42, %v13117_v33  ;;  %10889 = vmatpush3.bf16.msra.mxu1 %v10886_v24  ;;  %v11751_v33 = vld [vmem:[#allocation2 + $0x40] sm:$0xff]  ;;  %v13348_v24 = vld [vmem:[%s15750_s0 + $0x30] sm:$0xff] }
 0x22c   :  { %1995 = vst.msk [vmem:[%s15726_s21 + $0x30] sm:$0xff] %vm1988_vm0, %v13223_v32  ;;  %v1964_v54 = vadd.f32 %v1948_v35, %v13120_v10  ;;  %v9791_v36 = vpop.f32.mrb[74].mxu0  ;;  %v10890_v39 = vpack.c.bf16 %v13220_v38, %v13223_v32  ;;  %v13360_v42 = vld [vmem:[%s15750_s0 + $0x40] sm:$0xff]  ;;  %v13372_v57 = vld [vmem:[%s15750_s0 + $0x50] sm:$0xff]  ;;  %v13379_v35 = vld [vmem:[%s15750_s0 + $0x58] sm:$0xff] }
 0x22d   :  { %v13240_v45 = vadd.f32 %v11750_v16, %v1965_v43  ;;  %v1951_v29 = vmul.f32 %v9791_v36, %v13147_v22  ;;  %v1907_v25 = vpop.f32.mrb[75].mxu0  ;;  %v13384_v43 = vld [vmem:[%s15750_s0 + $0x60] sm:$0xff]  ;;  %v13396_v36 = vld [vmem:[%s15750_s0 + $0x70] sm:$0xff] }
 0x22e   :  { %v13243_v46 = vadd.f32 %v11751_v33, %v1964_v54  ;;  %v1950_v52 = vmul.f32 %v13147_v22, %v1907_v25  ;;  %10891 = vmatprep.subr.bf16.mxu1 %v10890_v39  ;;  %v13391_v54 = vld [vmem:[%s15750_s0 + $0x68] sm:$0xff]  ;;  %v2037_v16 = vld [vmem:[%s15712_s7] sm:$0xff]  ;;  %v11958_v25 = vmov 0  }
 0x22f   :  { %1998 = vst.msk [vmem:[%s15726_s21 + $0x48] sm:$0xff] %vm1988_vm0, %v13240_v45  ;;  %v1967_v10 = vadd.f32 %v1951_v29, %v13127_v59  ;;  %10893 = vmatpush3.bf16.msra.mxu1 %v10890_v39  ;;  %v11753_v59 = vld [vmem:[#allocation2 + $0x50] sm:$0xff]  ;;  %v13403_v39 = vld [vmem:[%s15750_s0 + $0x78] sm:$0xff]  ;;  %v2021_v29 = vld [vmem:[%s15751_s5] sm:$0xff]  ;;  %11333 = vset.pattern.permute.xlu1 %v11958_v25 }
 0x230   :  { %1997 = vst.msk [vmem:[%s15726_s21 + $0x40] sm:$0xff] %vm1988_vm0, %v13243_v46  ;;  %v1966_v62 = vadd.f32 %v1950_v52, %v13130_v18  ;;  %v9794_v47 = vpop.f32.mrb[76].mxu0  ;;  %v10894_v31 = vpack.c.bf16 %v13240_v45, %v13243_v46  ;;  %11332 = vset.pattern.permute.xlu0 %v11958_v25  ;;  %2505 = vperm.xlu1 %11333, %v2037_v16   ;;  %v2038_v33 = vld [vmem:[%s15712_s7 + $0x8] sm:$0xff]  ;;  %v2036_v16 = vld [vmem:[%s15751_s5 + $0x78] sm:$0xff] }
 0x231   :  { %v13260_v56 = vadd.f32 %v11752_v55, %v1967_v10  ;;  %v1953_v44 = vmul.f32 %v9794_v47, %v13147_v22  ;;  %v1917_v7 = vpop.f32.mrb[77].mxu0  ;;  %2409 = vperm.xlu0 %11332, %v2021_v29   ;;  %v2022_v52 = vld [vmem:[%s15751_s5 + $0x8] sm:$0xff]  ;;  %v2024_v10 = vld [vmem:[%s15751_s5 + $0x18] sm:$0xff]  ;;  %v2035_v29 = vld [vmem:[%s15751_s5 + $0x70] sm:$0xff] }
 0x232   :  { %v13263_v58 = vadd.f32 %v11753_v59, %v1966_v62  ;;  %v1952_v1 = vmul.f32 %v13147_v22, %v1917_v7  ;;  %10895 = vmatprep.subr.bf16.mxu1 %v10894_v31  ;;  %v2023_v62 = vld [vmem:[%s15751_s5 + $0x10] sm:$0xff]  ;;  %v2040_v47 = vld [vmem:[%s15712_s7 + $0x18] sm:$0xff]  ;;  %v2026_v55 = vld [vmem:[%s15751_s5 + $0x28] sm:$0xff] }
 0x233   :  { %2000 = vst.msk [vmem:[%s15726_s21 + $0x58] sm:$0xff] %vm1988_vm0, %v13260_v56  ;;  %v1969_v18 = vadd.f32 %v1953_v44, %v13137_v11  ;;  %10897 = vmatpush3.bf16.msra.mxu1 %v10894_v31  ;;  %v11755_v11 = vld [vmem:[#allocation2 + $0x60] sm:$0xff]  ;;  %v2039_v31 = vld [vmem:[%s15712_s7 + $0x10] sm:$0xff]  ;;  %v2042_v7 = vld [vmem:[%s15712_s7 + $0x28] sm:$0xff] }
 0x234   :  { %1999 = vst.msk [vmem:[%s15726_s21 + $0x50] sm:$0xff] %vm1988_vm0, %v13263_v58  ;;  %v1968_v3 = vadd.f32 %v1952_v1, %v13140_v34  ;;  %v9797_v9 = vpop.f32.mrb[78].mxu0  ;;  %v10898_v61 = vpack.c.bf16 %v13260_v56, %v13263_v58  ;;  %2510 = vperm.xlu1 %11333, %v2038_v33   ;;  %v2025_v44 = vld [vmem:[%s15751_s5 + $0x20] sm:$0xff]  ;;  %v2028_v1 = vld [vmem:[%s15751_s5 + $0x38] sm:$0xff]  ;;  %v2051_v33 = vld [vmem:[%s15712_s7 + $0x70] sm:$0xff] }
 0x235   :  { %v13280_v6 = vadd.f32 %v11754_v63, %v1969_v18  ;;  %v1955_v2 = vmul.f32 %v9797_v9, %v13147_v22  ;;  %v1927_v12 = vpop.f32.mrb[79].mxu0  ;;  %2414 = vperm.xlu0 %11332, %v2022_v52   ;;  %v2041_v59 = vld [vmem:[%s15712_s7 + $0x20] sm:$0xff]  ;;  %v2027_v18 = vld [vmem:[%s15751_s5 + $0x30] sm:$0xff]  ;;  %v2052_v25 = vld [vmem:[%s15712_s7 + $0x78] sm:$0xff] }
 0x236   :  { %v13283_v0 = vadd.f32 %v11755_v11, %v1968_v3  ;;  %v1954_v4 = vmul.f32 %v13147_v22, %v1927_v12  ;;  %10899 = vmatprep.subr.bf16.mxu1 %v10898_v61  ;;  %v2044_v3 = vld [vmem:[%s15712_s7 + $0x38] sm:$0xff]  ;;  %v2043_v9 = vld [vmem:[%s15712_s7 + $0x30] sm:$0xff]  ;;  %v2029_v63 = vld [vmem:[%s15751_s5 + $0x40] sm:$0xff] }
 0x237   :  { %2002 = vst.msk [vmem:[%s15726_s21 + $0x68] sm:$0xff] %vm1988_vm0, %v13280_v6  ;;  %v1971_v34 = vadd.f32 %v1955_v2, %v13152_v40  ;;  %10901 = vmatpush3.bf16.msra.mxu1 %v10898_v61  ;;  %v2030_v61 = vld [vmem:[%s15751_s5 + $0x48] sm:$0xff]  ;;  %v2045_v12 = vld [vmem:[%s15712_s7 + $0x40] sm:$0xff]  ;;  %v2032_v11 = vld [vmem:[%s15751_s5 + $0x58] sm:$0xff] }
 0x238   :  { %2001 = vst.msk [vmem:[%s15726_s21 + $0x60] sm:$0xff] %vm1988_vm0, %v13283_v0  ;;  %v1970_v5 = vadd.f32 %v1954_v4, %v13155_v41  ;;  %v10902_v22 = vpack.c.bf16 %v13280_v6, %v13283_v0  ;;  %v13319_v41 = vld [vmem:[%s15750_s0 + $0x8] sm:$0xff]  ;;  %2424 = vperm.xlu1 %11333, %v2024_v10   ;;  %v2031_v4 = vld [vmem:[%s15751_s5 + $0x50] sm:$0xff]  ;;  %s15752_s0 = sld [smem:[#allocation33_spill]] }
 0x239   :  { %v13300_v30 = vadd.f32 %v11756_v13, %v1971_v34  ;;  %2419 = vperm.xlu0 %11332, %v2023_v62   ;;  %v2046_v2 = vld [vmem:[%s15712_s7 + $0x48] sm:$0xff]  ;;  %v2048_v34 = vld [vmem:[%s15712_s7 + $0x58] sm:$0xff]  ;;  %v2033_v13 = vld [vmem:[%s15751_s5 + $0x60] sm:$0xff] }
 0x23a   :  { %v13302_v37 = vadd.f32 %v11757_v14, %v1970_v5  ;;  %10903 = vmatprep.subr.bf16.mxu1 %v10902_v22  ;;  %v2047_v5 = vld [vmem:[%s15712_s7 + $0x50] sm:$0xff]  ;;  %v2050_v14 = vld [vmem:[%s15712_s7 + $0x68] sm:$0xff] }
 0x23b   :  { %2004 = vst.msk [vmem:[%s15726_s21 + $0x78] sm:$0xff] %vm1988_vm0, %v13300_v30  ;;  %10905 = vmatpush3.bf16.msra.mxu1 %v10902_v22  ;;  %v2034_v22 = vld [vmem:[%s15751_s5 + $0x68] sm:$0xff] }
 0x23c   :  { %2003 = vst.msk [vmem:[%s15726_s21 + $0x70] sm:$0xff] %vm1988_vm0, %v13302_v37  ;;  %v10906_v40 = vpack.c.bf16 %v13300_v30, %v13302_v37  ;;  %2520 = vperm.xlu1 %11333, %v2040_v47  }
 0x23d   :  { %2515 = vperm.xlu0 %11332, %v2039_v31  }
 0x23e   :  { %10907 = vmatprep.subr.bf16.mxu1 %v10906_v40 }
 0x23f   :  { %10909 = vmatpush3.bf16.msra.mxu1 %v10906_v40  ;;  %v2049_v40 = vld [vmem:[%s15712_s7 + $0x60] sm:$0xff] }
 0x240   :  { %2434 = vperm.xlu1 %11333, %v2026_v55  }
 0x241   :  { %2429 = vperm.xlu0 %11332, %v2025_v44  }
 0x242   :  { %9831 = vmatmul.mubr.f32.vlgmr.msra.gmra.mrb[64].mxu1 %v13319_v41 }
 0x243   :  { %9833 = vmatprep.mubr.f32.mxu1 %v13324_v21 }
 0x244   :  { %2530 = vperm.xlu1 %11333, %v2042_v7  }
 0x245   :  { %2525 = vperm.xlu0 %11332, %v2041_v59  }
 0x246   :  { %9834 = vmatmul.mubr.f32.gmra.mrb[66].mxu1 %v13331_v53 }
 0x247   :  { %9836 = vmatprep.mubr.f32.mxu1 %v13336_v20 }
 0x248   :  { %2444 = vperm.xlu1 %11333, %v2028_v1  }
 0x249   :  { %2439 = vperm.xlu0 %11332, %v2027_v18  }
 0x24a   :  { %9837 = vmatmul.mubr.f32.gmra.mrb[68].mxu1 %v13343_v28 }
 0x24b   :  { %9839 = vmatprep.mubr.f32.mxu1 %v13348_v24 }
 0x24c   :  { %2540 = vperm.xlu1 %11333, %v2044_v3  }
 0x24d   :  { %2535 = vperm.xlu0 %11332, %v2043_v9  }
 0x24e   :  { %9840 = vmatmul.mubr.f32.gmra.mrb[70].mxu1 %v13355_v19 }
 0x24f   :  { %9842 = vmatprep.mubr.f32.mxu1 %v13360_v42 }
 0x250   :  { %2454 = vperm.xlu1 %11333, %v2030_v61  }
 0x251   :  { %2449 = vperm.xlu0 %11332, %v2029_v63  }
 0x252   :  { %9843 = vmatmul.mubr.f32.gmra.mrb[72].mxu1 %v13367_v49 }
 0x253   :  { %9845 = vmatprep.mubr.f32.mxu1 %v13372_v57 }
 0x254   :  { %2550 = vperm.xlu1 %11333, %v2046_v2  }
 0x255   :  { %2545 = vperm.xlu0 %11332, %v2045_v12  }
 0x256   :  { %9846 = vmatmul.mubr.f32.gmra.mrb[74].mxu1 %v13379_v35 }
 0x257   :  { %9848 = vmatprep.mubr.f32.mxu1 %v13384_v43 }
 0x258   :  { %2464 = vperm.xlu1 %11333, %v2032_v11  }
 0x259   :  { %2459 = vperm.xlu0 %11332, %v2031_v4  }
 0x25a   :  { %9849 = vmatmul.mubr.f32.gmra.mrb[76].mxu1 %v13391_v54 }
 0x25b   :  { %9851 = vmatprep.mubr.f32.mxu1 %v13396_v36 }
 0x25c   :  { %2560 = vperm.xlu1 %11333, %v2048_v34  }
 0x25d   :  { %2555 = vperm.xlu0 %11332, %v2047_v5  }
 0x25e   :  { %9852 = vmatmul.mubr.f32.gmra.mrb[78].mxu1 %v13403_v39 }
 0x260   :  { %2474 = vperm.xlu1 %11333, %v2034_v22  }
 0x261   :  { %2469 = vperm.xlu0 %11332, %v2033_v13  }
 0x264   :  { %2570 = vperm.xlu1 %11333, %v2050_v14  }
 0x265   :  { %2565 = vperm.xlu0 %11332, %v2049_v40  }
 0x268   :  { %2484 = vperm.xlu1 %11333, %v2036_v16  }
 0x269   :  { %2479 = vperm.xlu0 %11332, %v2035_v29  }
 0x26c   :  { %2580 = vperm.xlu1 %11333, %v2052_v25  }
 0x26d   :  { %2575 = vperm.xlu0 %11332, %v2051_v33  }
 0x315   :  { %v9832_v52 = vpop.f32.mrb[64].mxu1 }
 0x316   :  { %v13503_v10 = vsub.f32 %v13160_v48, %v9832_v52  ;;  %v2119_v62 = vpop.f32.mrb[65].mxu1 }
 0x317   :  { %v13506_v47 = vsub.f32 %v13163_v60, %v2119_v62 }
 0x318   :  { %v2215_v31 = vmul.f32 %v13503_v10, %v13503_v10 }
 0x319   :  { %v2214_v55 = vmul.f32 %v13506_v47, %v13506_v47  ;;  %v9835_v44 = vpop.f32.mrb[66].mxu1 }
 0x31a   :  { %v13513_v7 = vsub.f32 %v13180_v15, %v9835_v44  ;;  %v2129_v59 = vpop.f32.mrb[67].mxu1 }
 0x31b   :  { %v13516_v1 = vsub.f32 %v13183_v26, %v2129_v59  ;;  %v10910_v48 = vpack.c.bf16 %v2215_v31, %v2214_v55 }
 0x31c   :  { %v2217_v18 = vmul.f32 %v13513_v7, %v13513_v7 }
 0x31d   :  { %v2216_v60 = vmul.f32 %v13516_v1, %v13516_v1  ;;  %v9838_v3 = vpop.f32.mrb[68].mxu1  ;;  %10911 = vmatprep.subr.bf16.mxu0 %v10910_v48 }
 0x31e   :  { %v13523_v9 = vsub.f32 %v13200_v27, %v9838_v3  ;;  %v2139_v61 = vpop.f32.mrb[69].mxu1  ;;  %10913 = vmatpush3.bf16.msra.mxu0 %v10910_v48 }
 0x31f   :  { %v13526_v15 = vsub.f32 %v13203_v8, %v2139_v61  ;;  %v10914_v63 = vpack.c.bf16 %v2217_v18, %v2216_v60 }
 0x320   :  { %v2219_v26 = vmul.f32 %v13523_v9, %v13523_v9 }
 0x321   :  { %v2218_v2 = vmul.f32 %v13526_v15, %v13526_v15  ;;  %v9841_v12 = vpop.f32.mrb[70].mxu1  ;;  %10915 = vmatprep.subr.bf16.mxu0 %v10914_v63 }
 0x322   :  { %v13533_v11 = vsub.f32 %v13220_v38, %v9841_v12  ;;  %v2149_v4 = vpop.f32.mrb[71].mxu1  ;;  %10917 = vmatpush3.bf16.msra.mxu0 %v10914_v63 }
 0x323   :  { %v13536_v27 = vsub.f32 %v13223_v32, %v2149_v4  ;;  %v10918_v34 = vpack.c.bf16 %v2219_v26, %v2218_v2 }
 0x324   :  { %v2221_v8 = vmul.f32 %v13533_v11, %v13533_v11 }
 0x325   :  { %v2220_v5 = vmul.f32 %v13536_v27, %v13536_v27  ;;  %v9844_v22 = vpop.f32.mrb[72].mxu1  ;;  %10919 = vmatprep.subr.bf16.mxu0 %v10918_v34 }
 0x326   :  { %v13543_v13 = vsub.f32 %v13240_v45, %v9844_v22  ;;  %v2159_v14 = vpop.f32.mrb[73].mxu1  ;;  %10921 = vmatpush3.bf16.msra.mxu0 %v10918_v34 }
 0x327   :  { %v13546_v38 = vsub.f32 %v13243_v46, %v2159_v14  ;;  %v10922_v40 = vpack.c.bf16 %v2221_v8, %v2220_v5 }
 0x328   :  { %v2223_v32 = vmul.f32 %v13543_v13, %v13543_v13 }
 0x329   :  { %v2222_v16 = vmul.f32 %v13546_v38, %v13546_v38  ;;  %v9847_v29 = vpop.f32.mrb[74].mxu1  ;;  %10923 = vmatprep.subr.bf16.mxu0 %v10922_v40 }
 0x32a   :  { %v13553_v25 = vsub.f32 %v13260_v56, %v9847_v29  ;;  %v2169_v33 = vpop.f32.mrb[75].mxu1  ;;  %10925 = vmatpush3.bf16.msra.mxu0 %v10922_v40 }
 0x32b   :  { %v13556_v45 = vsub.f32 %v13263_v58, %v2169_v33  ;;  %v10926_v52 = vpack.c.bf16 %v2223_v32, %v2222_v16 }
 0x32c   :  { %v2225_v46 = vmul.f32 %v13553_v25, %v13553_v25 }
 0x32d   :  { %v2224_v62 = vmul.f32 %v13556_v45, %v13556_v45  ;;  %v9850_v31 = vpop.f32.mrb[76].mxu1  ;;  %10927 = vmatprep.subr.bf16.mxu0 %v10926_v52 }
 0x32e   :  { %v13563_v55 = vsub.f32 %v13280_v6, %v9850_v31  ;;  %v2179_v44 = vpop.f32.mrb[77].mxu1  ;;  %10929 = vmatpush3.bf16.msra.mxu0 %v10926_v52 }
 0x32f   :  { %v13566_v56 = vsub.f32 %v13283_v0, %v2179_v44  ;;  %v10930_v59 = vpack.c.bf16 %v2225_v46, %v2224_v62 }
 0x330   :  { %v2227_v58 = vmul.f32 %v13563_v55, %v13563_v55 }
 0x331   :  { %v2226_v48 = vmul.f32 %v13566_v56, %v13566_v56  ;;  %v9853_v18 = vpop.f32.mrb[78].mxu1  ;;  %10931 = vmatprep.subr.bf16.mxu0 %v10930_v59 }
 0x332   :  { %v13573_v60 = vsub.f32 %v13300_v30, %v9853_v18  ;;  %v2189_v3 = vpop.f32.mrb[79].mxu1  ;;  %10933 = vmatpush3.bf16.msra.mxu0 %v10930_v59  ;;  %v2599_v30 = vld [vmem:[%s15717_s12] sm:$0xff] }
 0x333   :  { %v13576_v6 = vsub.f32 %v13302_v37, %v2189_v3  ;;  %v10934_v61 = vpack.c.bf16 %v2227_v58, %v2226_v48  ;;  %v2600_v37 = vld [vmem:[%s15717_s12 + $0x8] sm:$0xff] }
 0x334   :  { %v2229_v0 = vmul.f32 %v13573_v60, %v13573_v60 }
 0x335   :  { %v2228_v63 = vmul.f32 %v13576_v6, %v13576_v6  ;;  %10935 = vmatprep.subr.bf16.mxu0 %v10934_v61 }
 0x336   :  { %10937 = vmatpush3.bf16.msra.mxu0 %v10934_v61 }
 0x337   :  { %v10938_v26 = vpack.c.bf16 %v2229_v0, %v2228_v63 }
 0x339   :  { %10939 = vmatprep.subr.bf16.mxu0 %v10938_v26 }
 0x33a   :  { %10941 = vmatpush3.bf16.msra.mxu0 %v10938_v26 }
 0x33d   :  { %9887 = vmatmul.mubr.f32.vlgmr.msra.gmra.mrb[80].mxu0 %v13319_v41  ;;  %v10942_v41 = vpack.c.bf16 %v2600_v37, %v2599_v30 }
 0x33e   :  { %9889 = vmatprep.mubr.f32.mxu0 %v13324_v21  ;;  %v2601_v21 = vld [vmem:[%s15717_s12 + $0x10] sm:$0xff] }
 0x33f   :  { %10943 = vmatprep.subr.bf16.mxu1 %v10942_v41 }
 0x340   :  { %10945 = vmatpush3.bf16.msra.mxu1 %v10942_v41 }
 0x341   :  { %9890 = vmatmul.mubr.f32.gmra.mrb[82].mxu0 %v13331_v53  ;;  %v2602_v53 = vld [vmem:[%s15717_s12 + $0x18] sm:$0xff] }
 0x342   :  { %9892 = vmatprep.mubr.f32.mxu0 %v13336_v20  ;;  %v10946_v20 = vpack.c.bf16 %v2602_v53, %v2601_v21 }
 0x344   :  { %10947 = vmatprep.subr.bf16.mxu1 %v10946_v20 }
 0x345   :  { %9893 = vmatmul.mubr.f32.gmra.mrb[84].mxu0 %v13343_v28  ;;  %10949 = vmatpush3.bf16.msra.mxu1 %v10946_v20  ;;  %v2821_v28 = vld [vmem:[%s15752_s0] sm:$0xff] }
 0x346   :  { %9895 = vmatprep.mubr.f32.mxu0 %v13348_v24  ;;  %v2506_v24 = vpop.permute.xlu1 %2505 }
 0x349   :  { %9896 = vmatmul.mubr.f32.gmra.mrb[86].mxu0 %v13355_v19  ;;  %v2410_v19 = vpop.permute.xlu0 %2409 }
 0x34a   :  { %9898 = vmatprep.mubr.f32.mxu0 %v13360_v42  ;;  %v2511_v42 = vpop.permute.xlu1 %2510 }
 0x34d   :  { %9899 = vmatmul.mubr.f32.gmra.mrb[88].mxu0 %v13367_v49  ;;  %v2415_v49 = vpop.permute.xlu0 %2414 }
 0x34e   :  { %9901 = vmatprep.mubr.f32.mxu0 %v13372_v57  ;;  %v2425_v57 = vpop.permute.xlu1 %2424 }
 0x351   :  { %9902 = vmatmul.mubr.f32.gmra.mrb[90].mxu0 %v13379_v35  ;;  %v13612_v35 = vpop.permute.xlu0 %2419 }
 0x352   :  { %9904 = vmatprep.mubr.f32.mxu0 %v13384_v43  ;;  %v13614_v43 = vpop.permute.xlu1 %2520 }
 0x355   :  { %9905 = vmatmul.mubr.f32.gmra.mrb[92].mxu0 %v13391_v54  ;;  %v13616_v54 = vpop.permute.xlu0 %2515 }
 0x356   :  { %9907 = vmatprep.mubr.f32.mxu0 %v13396_v36  ;;  %v13618_v36 = vpop.permute.xlu1 %2434 }
 0x359   :  { %9908 = vmatmul.mubr.f32.gmra.mrb[94].mxu0 %v13403_v39  ;;  %v13620_v39 = vpop.permute.xlu0 %2429 }
 0x35a   :  { %9974 = vmatprep.mubr.f32.mxu0 %v2821_v28  ;;  %v13622_v2 = vpop.permute.xlu1 %2530 }
 0x35d   :  { %v13624_v12 = vpop.permute.xlu0 %2525 }
 0x35e   :  { %v13626_v4 = vpop.permute.xlu1 %2444 }
 0x361   :  { %v13628_v34 = vpop.permute.xlu0 %2439 }
 0x362   :  { %v13630_v8 = vpop.permute.xlu1 %2540 }
 0x365   :  { %v13632_v5 = vpop.permute.xlu0 %2535 }
 0x366   :  { %v13634_v16 = vpop.permute.xlu1 %2454 }
 0x369   :  { %v13636_v29 = vpop.permute.xlu0 %2449 }
 0x36a   :  { %v13638_v44 = vpop.permute.xlu1 %2550 }
 0x36d   :  { %v13640_v48 = vpop.permute.xlu0 %2545 }
 0x36e   :  { %v13643_v41 = vpop.permute.xlu1 %2464 }
 0x371   :  { %v13646_v53 = vpop.permute.xlu0 %2459 }
 0x410   :  { %v9888_v22 = vpop.f32.mrb[80].mxu0 }
 0x411   :  { %v2302_v14 = vadd.f32 1e-05, %v9888_v22  ;;  %v2296_v40 = vpop.f32.mrb[81].mxu0 }
 0x412   :  { %v2297_v32 = vadd.f32 1e-05, %v2296_v40 }
 0x413   :  { %11454 = vrsqrt.f32 %v2302_v14 }
 0x414   :  { %11456 = vrsqrt.f32 %v2297_v32  ;;  %v9891_v33 = vpop.f32.mrb[82].mxu0 }
 0x415   :  { %v2312_v52 = vadd.f32 1e-05, %v9891_v33  ;;  %v2306_v46 = vpop.f32.mrb[83].mxu0 }
 0x416   :  { %v2307_v62 = vadd.f32 1e-05, %v2306_v46 }
 0x417   :  { %11458 = vrsqrt.f32 %v2312_v52 }
 0x418   :  { %11460 = vrsqrt.f32 %v2307_v62  ;;  %v9894_v31 = vpop.f32.mrb[84].mxu0 }
 0x419   :  { %v2322_v59 = vadd.f32 1e-05, %v9894_v31  ;;  %v2316_v58 = vpop.f32.mrb[85].mxu0 }
 0x41a   :  { %v2317_v18 = vadd.f32 1e-05, %v2316_v58 }
 0x41b   :  { %11462 = vrsqrt.f32 %v2322_v59 }
 0x41c   :  { %11464 = vrsqrt.f32 %v2317_v18  ;;  %v9897_v3 = vpop.f32.mrb[86].mxu0  ;;  %v13650_v18 = vpop.permute.xlu1 %2560 }
 0x41d   :  { %v11455_v61 = vpop.eup %11454  ;;  %v2332_v0 = vadd.f32 1e-05, %v9897_v3  ;;  %v2326_v63 = vpop.f32.mrb[87].mxu0 }
 0x41e   :  { %v11457_v26 = vpop.eup %11456  ;;  %v2392_v30 = vmul.f32 %v11455_v61, %v13503_v10  ;;  %v2327_v37 = vadd.f32 1e-05, %v2326_v63 }
 0x41f   :  { %11466 = vrsqrt.f32 %v2332_v0  ;;  %v2391_v21 = vmul.f32 %v11457_v26, %v13506_v47 }
 0x420   :  { %11468 = vrsqrt.f32 %v2327_v37  ;;  %v9900_v20 = vpop.f32.mrb[88].mxu0  ;;  %v2488_v28 = vmul.f32 %v2415_v49, %v2392_v30 }
 0x421   :  { %v11459_v22 = vpop.eup %11458  ;;  %v2342_v14 = vadd.f32 1e-05, %v9900_v20  ;;  %v2336_v40 = vpop.f32.mrb[89].mxu0  ;;  %v2487_v32 = vmul.f32 %v2410_v19, %v2391_v21 }
 0x422   :  { %v11461_v33 = vpop.eup %11460  ;;  %v2337_v52 = vadd.f32 1e-05, %v2336_v40  ;;  %v2584_v46 = vadd.f32 %v2511_v42, %v2488_v28  ;;  %v2394_v10 = vmul.f32 %v11459_v22, %v13513_v7  ;;  %v13656_v7 = vpop.permute.xlu0 %2555 }
 0x423   :  { %11470 = vrsqrt.f32 %v2342_v14  ;;  %v2583_v62 = vadd.f32 %v2506_v24, %v2487_v32  ;;  %v2393_v31 = vmul.f32 %v11461_v33, %v13516_v1  ;;  %v13675_v22 = vpop.permute.xlu1 %2474 }
 0x424   :  { %11472 = vrsqrt.f32 %v2337_v52  ;;  %v9903_v47 = vpop.f32.mrb[90].mxu0  ;;  %v2490_v59 = vmul.f32 %v2425_v57, %v2394_v10 }
 0x425   :  { %v11463_v58 = vpop.eup %11462  ;;  %v2352_v49 = vadd.f32 1e-05, %v9903_v47  ;;  %v2346_v3 = vpop.f32.mrb[91].mxu0  ;;  %9918 = vmatprep.mubr.msk.f32.mxu1 %vm1988_vm0, %v2583_v62  ;;  %v13653_v19 = vpack.c.bf16 %v2584_v46, %v2583_v62  ;;  %v2489_v42 = vmul.f32 %v13612_v35, %v2393_v31 }
 0x426   :  { %v11465_v61 = vpop.eup %11464  ;;  %v2347_v24 = vadd.f32 1e-05, %v2346_v3  ;;  %9919 = vmatmul.mubr.msk.f32.vlgmr.msra.gmra.mrb[80].mxu1 %vm1988_vm0, %v2584_v46  ;;  %v2586_v1 = vadd.f32 %v13614_v43, %v2490_v59  ;;  %v2396_v57 = vmul.f32 %v11463_v58, %v13523_v9 }
 0x427   :  { %11474 = vrsqrt.f32 %v2352_v49  ;;  %10951 = vmatprep.subr.bf16.mxu0 %v13653_v19  ;;  %10983 = vmatprep.subr.bf16.mxu1 %v13653_v19  ;;  %v2585_v0 = vadd.f32 %v13616_v54, %v2489_v42  ;;  %v2395_v63 = vmul.f32 %v11465_v61, %v13526_v15 }
 0x428   :  { %11476 = vrsqrt.f32 %v2347_v24  ;;  %v9906_v35 = vpop.f32.mrb[92].mxu0  ;;  %10953 = vmatpush3.bf16.msra.mxu0 %v13653_v19  ;;  %10985 = vmatpush3.bf16.msra.mxu1 %v13653_v19  ;;  %v2492_v26 = vmul.f32 %v13618_v36, %v2396_v57 }
 0x429   :  { %v11467_v43 = vpop.eup %11466  ;;  %v2362_v30 = vadd.f32 1e-05, %v9906_v35  ;;  %v2356_v9 = vpop.f32.mrb[93].mxu0  ;;  %9921 = vmatprep.mubr.msk.f32.mxu1 %vm1988_vm0, %v2585_v0  ;;  %v13669_v37 = vpack.c.bf16 %v2586_v1, %v2585_v0  ;;  %v2491_v21 = vmul.f32 %v13620_v39, %v2395_v63 }
 0x42a   :  { %v11469_v54 = vpop.eup %11468  ;;  %v2357_v20 = vadd.f32 1e-05, %v2356_v9  ;;  %9922 = vmatmul.mubr.msk.f32.gmra.mrb[82].mxu1 %vm1988_vm0, %v2586_v1  ;;  %v2588_v15 = vadd.f32 %v13622_v2, %v2492_v26  ;;  %v2398_v28 = vmul.f32 %v11467_v43, %v13533_v11  ;;  %v13681_v39 = vpop.permute.xlu0 %2469 }
 0x42b   :  { %11478 = vrsqrt.f32 %v2362_v30  ;;  %10955 = vmatprep.subr.bf16.mxu0 %v13669_v37  ;;  %10987 = vmatprep.subr.bf16.mxu1 %v13669_v37  ;;  %v2587_v36 = vadd.f32 %v13624_v12, %v2491_v21  ;;  %v2397_v14 = vmul.f32 %v11469_v54, %v13536_v27 }
 0x42c   :  { %11480 = vrsqrt.f32 %v2357_v20  ;;  %v9909_v40 = vpop.f32.mrb[94].mxu0  ;;  %10957 = vmatpush3.bf16.msra.mxu0 %v13669_v37  ;;  %10989 = vmatpush3.bf16.msra.mxu1 %v13669_v37  ;;  %v2494_v11 = vmul.f32 %v13626_v4, %v2398_v28  ;;  %v2822_v28 = vld [vmem:[%s15752_s0 + $0x8] sm:$0xff] }
 0x42d   :  { %v11471_v2 = vpop.eup %11470  ;;  %v2372_v32 = vadd.f32 1e-05, %v9909_v40  ;;  %v2366_v33 = vpop.f32.mrb[95].mxu0  ;;  %9924 = vmatprep.mubr.msk.f32.mxu1 %vm1988_vm0, %v2587_v36  ;;  %v13687_v52 = vpack.c.bf16 %v2588_v15, %v2587_v36  ;;  %v2493_v12 = vmul.f32 %v13628_v34, %v2397_v14  ;;  %v2823_v36 = vld [vmem:[%s15752_s0 + $0x10] sm:$0xff]  ;;  %v8225_v40 = vld [vmem:[%s15752_s0 + $0x58] sm:$0xff] }
 0x42e   :  { %v11473_v27 = vpop.eup %11472  ;;  %v2367_v46 = vadd.f32 1e-05, %v2366_v33  ;;  %9925 = vmatmul.mubr.msk.f32.gmra.mrb[84].mxu1 %vm1988_vm0, %v2588_v15  ;;  %v2590_v10 = vadd.f32 %v13630_v8, %v2494_v11  ;;  %v2400_v62 = vmul.f32 %v11471_v2, %v13543_v13  ;;  %v2571_v8 = vpop.permute.xlu1 %2570  ;;  %v8222_v15 = vld [vmem:[%s15752_s0 + $0x40] sm:$0xff]  ;;  %v8224_v14 = vld [vmem:[%s15752_s0 + $0x50] sm:$0xff]  ;;  %v2826_v2 = vld [vmem:[%s15752_s0 + $0x28] sm:$0xff] }
 0x42f   :  { %11482 = vrsqrt.f32 %v2372_v32  ;;  %10959 = vmatprep.subr.bf16.mxu0 %v13687_v52  ;;  %10991 = vmatprep.subr.bf16.mxu1 %v13687_v52  ;;  %v2589_v4 = vadd.f32 %v13632_v5, %v2493_v12  ;;  %v2399_v31 = vmul.f32 %v11473_v27, %v13546_v38  ;;  %v2566_v49 = vpop.permute.xlu0 %2565  ;;  %v8226_v11 = vld [vmem:[%s15752_s0 + $0x60] sm:$0xff]  ;;  %v8227_v32 = vld [vmem:[%s15752_s0 + $0x68] sm:$0xff]  ;;  %v8228_v33 = vld [vmem:[%s15752_s0 + $0x70] sm:$0xff] }
 0x430   :  { %11484 = vrsqrt.f32 %v2367_v46  ;;  %10961 = vmatpush3.bf16.msra.mxu0 %v13687_v52  ;;  %10993 = vmatpush3.bf16.msra.mxu1 %v13687_v52  ;;  %v2496_v34 = vmul.f32 %v13634_v16, %v2400_v62  ;;  %v2828_v12 = vld [vmem:[%s15752_s0 + $0x38] sm:$0xff]  ;;  %v8238_v46 = vld [vmem:[%s15752_s0 + $0xc0] sm:$0xff]  ;;  %v8239_v62 = vld [vmem:[%s15752_s0 + $0xc8] sm:$0xff] }
 0x431   :  { %v11475_v47 = vpop.eup %11474  ;;  %9927 = vmatprep.mubr.msk.f32.mxu1 %vm1988_vm0, %v2589_v4  ;;  %v13701_v13 = vpack.c.bf16 %v2590_v10, %v2589_v4  ;;  %v2495_v59 = vmul.f32 %v13636_v29, %v2399_v31  ;;  %v8229_v27 = vld [vmem:[%s15752_s0 + $0x78] sm:$0xff]  ;;  %v8232_v4 = vld [vmem:[%s15752_s0 + $0x90] sm:$0xff] }
 0x432   :  { %v11477_v58 = vpop.eup %11476  ;;  %9928 = vmatmul.mubr.msk.f32.gmra.mrb[86].mxu1 %vm1988_vm0, %v2590_v10  ;;  %v2592_v38 = vadd.f32 %v13638_v44, %v2496_v34  ;;  %v2402_v5 = vmul.f32 %v11475_v47, %v13553_v25  ;;  %v2485_v24 = vpop.permute.xlu1 %2484  ;;  %v8231_v10 = vld [vmem:[%s15752_s0 + $0x88] sm:$0xff]  ;;  %v8240_v31 = vld [vmem:[%s15752_s0 + $0xd0] sm:$0xff]  ;;  %v8233_v34 = vld [vmem:[%s15752_s0 + $0x98] sm:$0xff] }
 0x433   :  { %10963 = vmatprep.subr.bf16.mxu0 %v13701_v13  ;;  %10995 = vmatprep.subr.bf16.mxu1 %v13701_v13  ;;  %v2591_v16 = vadd.f32 %v13640_v48, %v2495_v59  ;;  %v2401_v3 = vmul.f32 %v11477_v58, %v13556_v45  ;;  %v2480_v57 = vpop.permute.xlu0 %2479  ;;  %v8241_v47 = vld [vmem:[%s15752_s0 + $0xd8] sm:$0xff]  ;;  %v8235_v59 = vld [vmem:[%s15752_s0 + $0xa8] sm:$0xff] }
 0x434   :  { %10965 = vmatpush3.bf16.msra.mxu0 %v13701_v13  ;;  %10997 = vmatpush3.bf16.msra.mxu1 %v13701_v13  ;;  %v2498_v29 = vmul.f32 %v13643_v41, %v2402_v5  ;;  %v8243_v58 = vld [vmem:[%s15752_s0 + $0xe8] sm:$0xff]  ;;  %v8237_v5 = vld [vmem:[%s15752_s0 + $0xb8] sm:$0xff] }
 0x435   :  { %v11479_v42 = vpop.eup %11478  ;;  %9930 = vmatprep.mubr.msk.f32.mxu1 %vm1988_vm0, %v2591_v16  ;;  %v13715_v44 = vpack.c.bf16 %v2592_v38, %v2591_v16  ;;  %v2497_v25 = vmul.f32 %v13646_v53, %v2401_v3  ;;  %v8245_v16 = vld [vmem:[%s15752_s0 + $0xf8] sm:$0xff]  ;;  %v3436_v3 = vld [vmem:[%s15719_s14] sm:$0xff] }
 0x436   :  { %v11481_v61 = vpop.eup %11480  ;;  %9931 = vmatmul.mubr.msk.f32.gmra.mrb[88].mxu1 %vm1988_vm0, %v2592_v38  ;;  %v2594_v48 = vadd.f32 %v13650_v18, %v2498_v29  ;;  %v2404_v45 = vmul.f32 %v11479_v42, %v13563_v55  ;;  %v2581_v30 = vpop.permute.xlu1 %2580  ;;  %v8244_v38 = vld [vmem:[%s15752_s0 + $0xf0] sm:$0xff]  ;;  %v3437_v29 = vld [vmem:[%s15719_s14 + $0x8] sm:$0xff] }
 0x437   :  { %10967 = vmatprep.subr.bf16.mxu0 %v13715_v44  ;;  %10999 = vmatprep.subr.bf16.mxu1 %v13715_v44  ;;  %v2593_v41 = vadd.f32 %v13656_v7, %v2497_v25  ;;  %v2403_v1 = vmul.f32 %v11481_v61, %v13566_v56  ;;  %v2576_v54 = vpop.permute.xlu0 %2575  ;;  %v11078_v42 = vpack.c.bf16 %v3437_v29, %v3436_v3  ;;  %v3439_v25 = vld [vmem:[%s15719_s14 + $0x18] sm:$0xff] }
 0x438   :  { %10969 = vmatpush3.bf16.msra.mxu0 %v13715_v44  ;;  %11001 = vmatpush3.bf16.msra.mxu1 %v13715_v44  ;;  %v2500_v53 = vmul.f32 %v13675_v22, %v2404_v45  ;;  %v8223_v22 = vld [vmem:[%s15752_s0 + $0x48] sm:$0xff] }
 0x439   :  { %v11483_v0 = vpop.eup %11482  ;;  %9933 = vmatprep.mubr.msk.f32.mxu1 %vm1988_vm0, %v2593_v41  ;;  %v13729_v55 = vpack.c.bf16 %v2594_v48, %v2593_v41  ;;  %v2499_v18 = vmul.f32 %v13681_v39, %v2403_v1  ;;  %v2824_v39 = vld [vmem:[%s15752_s0 + $0x18] sm:$0xff]  ;;  %v3577_v45 = vld [vmem:[%s15721_s16 + $0x8] sm:$0xff] }
 0x43a   :  { %v11485_v63 = vpop.eup %11484  ;;  %9934 = vmatmul.mubr.msk.f32.gmra.mrb[90].mxu1 %vm1988_vm0, %v2594_v48  ;;  %v2596_v7 = vadd.f32 %v2571_v8, %v2500_v53  ;;  %v2406_v56 = vmul.f32 %v11483_v0, %v13573_v60  ;;  %v8234_v8 = vld [vmem:[%s15752_s0 + $0xa0] sm:$0xff]  ;;  %v8203_v41 = vld [vmem:[#allocation9] ss:$0 sm:$0xff] }
 0x43b   :  { %10971 = vmatprep.subr.bf16.mxu0 %v13729_v55  ;;  %11003 = vmatprep.subr.bf16.mxu1 %v13729_v55  ;;  %v2595_v35 = vadd.f32 %v2566_v49, %v2499_v18  ;;  %v2405_v26 = vmul.f32 %v11485_v63, %v13576_v6  ;;  %v8236_v49 = vld [vmem:[%s15752_s0 + $0xb0] sm:$0xff]  ;;  %v3576_v48 = vld [vmem:[%s15721_s16] sm:$0xff] }
 0x43c   :  { %10973 = vmatpush3.bf16.msra.mxu0 %v13729_v55  ;;  %11005 = vmatpush3.bf16.msra.mxu1 %v13729_v55  ;;  %v2502_v43 = vmul.f32 %v2485_v24, %v2406_v56  ;;  %v13898_v24 = vpack.c.bf16 %v3577_v45, %v3576_v48 }
 0x43d   :  { %9936 = vmatprep.mubr.msk.f32.mxu1 %vm1988_vm0, %v2595_v35  ;;  %v13740_v9 = vpack.c.bf16 %v2596_v7, %v2595_v35  ;;  %v2501_v21 = vmul.f32 %v2480_v57, %v2405_v26 }
 0x43e   :  { %9937 = vmatmul.mubr.msk.f32.gmra.mrb[92].mxu1 %vm1988_vm0, %v2596_v7  ;;  %v2598_v60 = vadd.f32 %v2581_v30, %v2502_v43 }
 0x43f   :  { %10975 = vmatprep.subr.bf16.mxu0 %v13740_v9  ;;  %11007 = vmatprep.subr.bf16.mxu1 %v13740_v9  ;;  %v2597_v6 = vadd.f32 %v2576_v54, %v2501_v21 }
 0x440   :  { %10977 = vmatpush3.bf16.msra.mxu0 %v13740_v9  ;;  %11009 = vmatpush3.bf16.msra.mxu1 %v13740_v9 }
 0x441   :  { %9939 = vmatprep.mubr.msk.f32.mxu1 %vm1988_vm0, %v2597_v6  ;;  %v13748_v20 = vpack.c.bf16 %v2598_v60, %v2597_v6 }
 0x442   :  { %9940 = vmatmul.mubr.msk.f32.gmra.mrb[94].mxu1 %vm1988_vm0, %v2598_v60 }
 0x443   :  { %10979 = vmatprep.subr.bf16.mxu0 %v13748_v20  ;;  %11011 = vmatprep.subr.bf16.mxu1 %v13748_v20 }
 0x444   :  { %10981 = vmatpush3.bf16.msra.mxu0 %v13748_v20  ;;  %11013 = vmatpush3.bf16.msra.mxu1 %v13748_v20 }
 0x445   :  { %11015 = vmatprep.subr.bf16.mxu0 %v13653_v19  ;;  %11047 = vmatprep.subr.bf16.mxu1 %v13653_v19 }
 0x446   :  { %10018 = vmatprep.mubr.f32.mxu1 %v8222_v15 }
 0x447   :  { %9975 = vmatmul.mubr.f32.vlgmr.msra.gmra.mrb[96].mxu0 %v2822_v28  ;;  %10019 = vmatmul.mubr.f32.vlgmr.msra.gmra.mrb[96].mxu1 %v8223_v22 }
 0x448   :  { %11017 = vmatpush3.bf16.msra.mxu0 %v13653_v19  ;;  %11049 = vmatpush3.bf16.msra.mxu1 %v13653_v19  ;;  %v2825_v19 = vld [vmem:[%s15752_s0 + $0x20] sm:$0xff] }
 0x449   :  { %11019 = vmatprep.subr.bf16.mxu0 %v13669_v37  ;;  %11051 = vmatprep.subr.bf16.mxu1 %v13669_v37 }
 0x44a   :  { %9977 = vmatprep.mubr.f32.mxu0 %v2823_v36  ;;  %10021 = vmatprep.mubr.f32.mxu1 %v8224_v14 }
 0x44b   :  { %9978 = vmatmul.mubr.f32.gmra.mrb[98].mxu0 %v2824_v39  ;;  %10022 = vmatmul.mubr.f32.gmra.mrb[98].mxu1 %v8225_v40 }
 0x44c   :  { %11021 = vmatpush3.bf16.msra.mxu0 %v13669_v37  ;;  %11053 = vmatpush3.bf16.msra.mxu1 %v13669_v37  ;;  %v2827_v37 = vld [vmem:[%s15752_s0 + $0x30] sm:$0xff] }
 0x44d   :  { %11023 = vmatprep.subr.bf16.mxu0 %v13687_v52  ;;  %11055 = vmatprep.subr.bf16.mxu1 %v13687_v52 }
 0x44e   :  { %9980 = vmatprep.mubr.f32.mxu0 %v2825_v19  ;;  %10024 = vmatprep.mubr.f32.mxu1 %v8226_v11 }
 0x44f   :  { %9981 = vmatmul.mubr.f32.gmra.mrb[100].mxu0 %v2826_v2  ;;  %10025 = vmatmul.mubr.f32.gmra.mrb[100].mxu1 %v8227_v32  ;;  %v13934_v2 = vld [vmem:[%s15713_s8] sm:$0xf] }
 0x450   :  { %11025 = vmatpush3.bf16.msra.mxu0 %v13687_v52  ;;  %11057 = vmatpush3.bf16.msra.mxu1 %v13687_v52  ;;  %v8230_v52 = vld [vmem:[%s15752_s0 + $0x80] sm:$0xff] }
 0x451   :  { %11027 = vmatprep.subr.bf16.mxu0 %v13701_v13  ;;  %11059 = vmatprep.subr.bf16.mxu1 %v13701_v13  ;;  %v13936_v32 = vld [vmem:[#allocation6] sm:$0xf] }
 0x452   :  { %9983 = vmatprep.mubr.f32.mxu0 %v2827_v37  ;;  %10027 = vmatprep.mubr.f32.mxu1 %v8228_v33 }
 0x453   :  { %9984 = vmatmul.mubr.f32.gmra.mrb[102].mxu0 %v2828_v12  ;;  %10028 = vmatmul.mubr.f32.gmra.mrb[102].mxu1 %v8229_v27  ;;  %v13942_v27 = vrot.slane %v13934_v2, %v12775_v50 }
 0x454   :  { %11029 = vmatpush3.bf16.msra.mxu0 %v13701_v13  ;;  %11061 = vmatpush3.bf16.msra.mxu1 %v13701_v13  ;;  %v8242_v13 = vld [vmem:[%s15752_s0 + $0xe0] sm:$0xff] }
 0x455   :  { %11031 = vmatprep.subr.bf16.mxu0 %v13715_v44  ;;  %11063 = vmatprep.subr.bf16.mxu1 %v13715_v44 }
 0x456   :  { %10062 = vmatprep.mubr.f32.mxu0 %v8230_v52  ;;  %10106 = vmatprep.mubr.f32.mxu1 %v8238_v46  ;;  %v13948_v46 = vrot.slane %v13936_v32, %v12775_v50 }
 0x458   :  { %11033 = vmatpush3.bf16.msra.mxu0 %v13715_v44  ;;  %11065 = vmatpush3.bf16.msra.mxu1 %v13715_v44  ;;  %v3438_v44 = vld [vmem:[%s15719_s14 + $0x10] sm:$0xff] }
 0x459   :  { %11035 = vmatprep.subr.bf16.mxu0 %v13729_v55  ;;  %11067 = vmatprep.subr.bf16.mxu1 %v13729_v55  ;;  %v11082_v61 = vpack.c.bf16 %v3439_v25, %v3438_v44 }
 0x45c   :  { %11037 = vmatpush3.bf16.msra.mxu0 %v13729_v55  ;;  %11069 = vmatpush3.bf16.msra.mxu1 %v13729_v55 }
 0x45d   :  { %11039 = vmatprep.subr.bf16.mxu0 %v13740_v9  ;;  %11071 = vmatprep.subr.bf16.mxu1 %v13740_v9 }
 0x460   :  { %11041 = vmatpush3.bf16.msra.mxu0 %v13740_v9  ;;  %11073 = vmatpush3.bf16.msra.mxu1 %v13740_v9 }
 0x461   :  { %11043 = vmatprep.subr.bf16.mxu0 %v13748_v20  ;;  %11075 = vmatprep.subr.bf16.mxu1 %v13748_v20 }
 0x464   :  { %11045 = vmatpush3.bf16.msra.mxu0 %v13748_v20  ;;  %11077 = vmatpush3.bf16.msra.mxu1 %v13748_v20 }
 0x465   :  { %11079 = vmatprep.subr.bf16.mxu1 %v11078_v42 }
 0x467   :  { %10063 = vmatmul.mubr.f32.vlgmr.msra.gmra.mrb[104].mxu0 %v8231_v10  ;;  %10107 = vmatmul.mubr.f32.vlgmr.msra.gmra.mrb[104].mxu1 %v8239_v62  ;;  %v13952_v10 = vrot.slane %v13934_v2, %v12778_v51  ;;  %v13956_v62 = vrot.slane %v13936_v32, %v12778_v51 }
 0x468   :  { %10065 = vmatprep.mubr.f32.mxu0 %v8232_v4  ;;  %10109 = vmatprep.mubr.f32.mxu1 %v8240_v31  ;;  %v13958_v4 = vld [vmem:[#allocation4] ss:$0 sm:$0xff]  ;;  %v13960_v31 = vld [vmem:[#allocation7] ss:$0 sm:$0xff] }
 0x469   :  { %11081 = vmatpush3.bf16.msra.mxu1 %v11078_v42 }
 0x46a   :  { %11083 = vmatprep.subr.bf16.mxu1 %v11082_v61 }
 0x46b   :  { %10066 = vmatmul.mubr.f32.gmra.mrb[106].mxu0 %v8233_v34  ;;  %10110 = vmatmul.mubr.f32.gmra.mrb[106].mxu1 %v8241_v47 }
 0x46c   :  { %10068 = vmatprep.mubr.f32.mxu0 %v8234_v8  ;;  %10112 = vmatprep.mubr.f32.mxu1 %v8242_v13 }
 0x46d   :  { %11085 = vmatpush3.bf16.msra.mxu1 %v11082_v61 }
 0x46e   :  { %11087 = vmatprep.subr.bf16.mxu1 %v13898_v24 }
 0x46f   :  { %10069 = vmatmul.mubr.f32.gmra.mrb[108].mxu0 %v8235_v59  ;;  %10113 = vmatmul.mubr.f32.gmra.mrb[108].mxu1 %v8243_v58 }
 0x470   :  { %10071 = vmatprep.mubr.f32.mxu0 %v8236_v49  ;;  %10115 = vmatprep.mubr.f32.mxu1 %v8244_v38 }
 0x473   :  { %10072 = vmatmul.mubr.f32.gmra.mrb[110].mxu0 %v8237_v5  ;;  %10116 = vmatmul.mubr.f32.gmra.mrb[110].mxu1 %v8245_v16 }
 0x4f9   :  { %v9920_v1 = vpop.f32.mrb[80].mxu1 }
 0x4fa   :  { %v13901_v57 = vadd.f32 %v9920_v1, %v8203_v41  ;;  %v2724_v53 = vpop.f32.mrb[81].mxu1 }
 0x4fb   :  { %v13903_v0 = vadd.f32 %v8203_v41, %v2724_v53 }
 0x4fd   :  { %v9923_v55 = vpop.f32.mrb[82].mxu1  ;;  %10166 = vmatprep.mubr.msk.f32.mxu0 %vm3728_vm1, %v13903_v0 }
 0x4fe   :  { %v13907_v18 = vadd.f32 %v9923_v55, %v8203_v41  ;;  %v2734_v63 = vpop.f32.mrb[83].mxu1 }
 0x4ff   :  { %v13909_v7 = vadd.f32 %v8203_v41, %v2734_v63 }
 0x501   :  { %v9926_v56 = vpop.f32.mrb[84].mxu1 }
 0x502   :  { %v13911_v35 = vadd.f32 %v9926_v56, %v8203_v41  ;;  %v2744_v26 = vpop.f32.mrb[85].mxu1 }
 0x503   :  { %v13913_v43 = vadd.f32 %v8203_v41, %v2744_v26 }
 0x505   :  { %v9929_v30 = vpop.f32.mrb[86].mxu1 }
 0x506   :  { %v13915_v9 = vadd.f32 %v9929_v30, %v8203_v41  ;;  %v2754_v21 = vpop.f32.mrb[87].mxu1 }
 0x507   :  { %v13917_v54 = vadd.f32 %v8203_v41, %v2754_v21 }
 0x509   :  { %v9932_v60 = vpop.f32.mrb[88].mxu1 }
 0x50a   :  { %v13919_v6 = vadd.f32 %v9932_v60, %v8203_v41  ;;  %v2764_v20 = vpop.f32.mrb[89].mxu1 }
 0x50b   :  { %v13921_v15 = vadd.f32 %v8203_v41, %v2764_v20 }
 0x50d   :  { %v9935_v28 = vpop.f32.mrb[90].mxu1 }
 0x50e   :  { %v13923_v22 = vadd.f32 %v9935_v28, %v8203_v41  ;;  %v2774_v36 = vpop.f32.mrb[91].mxu1 }
 0x50f   :  { %v13925_v14 = vadd.f32 %v8203_v41, %v2774_v36 }
 0x510   :  { %15753 = vst [vmem:[#allocation20_spill] sm:$0xff] %v13923_v22 }
 0x511   :  { %15754 = vst [vmem:[#allocation21_spill] sm:$0xff] %v13925_v14  ;;  %v9938_v39 = vpop.f32.mrb[92].mxu1 }
 0x512   :  { %v13927_v40 = vadd.f32 %v9938_v39, %v8203_v41  ;;  %v2784_v19 = vpop.f32.mrb[93].mxu1 }
 0x513   :  { %v13929_v11 = vadd.f32 %v8203_v41, %v2784_v19 }
 0x515   :  { %15755 = vst [vmem:[#allocation22_spill] sm:$0xff] %v13929_v11  ;;  %v9941_v37 = vpop.f32.mrb[94].mxu1 }
 0x516   :  { %v13938_v33 = vadd.f32 %v9941_v37, %v8203_v41  ;;  %v2794_v12 = vpop.f32.mrb[95].mxu1 }
 0x517   :  { %v13944_v52 = vadd.f32 %v8203_v41, %v2794_v12 }
 0x518   :  { %15756 = vst [vmem:[#allocation23_spill] sm:$0xff] %v13938_v33 }
 0x519   :  { %15757 = vst [vmem:[#allocation24_spill] sm:$0xff] %v13944_v52 }
 0x51a   :  { %v9976_v34 = vpop.f32.mrb[96].mxu0  ;;  %v10020_v47 = vpop.f32.mrb[96].mxu1 }
 0x51b   :  { %v2939_v8 = vmul.f32 %v9976_v34, %v13942_v27  ;;  %v2959_v13 = vmul.f32 %v9976_v34, %v13948_v46  ;;  %v2895_v50 = vpop.f32.mrb[97].mxu0  ;;  %v3093_v59 = vmul.f32 %v10020_v47, %v13952_v10  ;;  %v3113_v58 = vmul.f32 %v10020_v47, %v13956_v62  ;;  %v3049_v49 = vpop.f32.mrb[97].mxu1 }
 0x51c   :  { %v2938_v38 = vmul.f32 %v13942_v27, %v2895_v50  ;;  %v2958_v51 = vmul.f32 %v13948_v46, %v2895_v50  ;;  %v3092_v5 = vmul.f32 %v13952_v10, %v3049_v49  ;;  %v3112_v16 = vmul.f32 %v13956_v62, %v3049_v49 }
 0x51d   :  { %v2947_v3 = vadd.f32 %v13958_v4, %v2939_v8  ;;  %v2967_v29 = vadd.f32 %v13960_v31, %v2959_v13 }
 0x51e   :  { %v2946_v42 = vadd.f32 %v13958_v4, %v2938_v38  ;;  %v2966_v44 = vadd.f32 %v13960_v31, %v2958_v51  ;;  %v9979_v25 = vpop.f32.mrb[98].mxu0  ;;  %v10023_v61 = vpop.f32.mrb[98].mxu1 }
 0x51f   :  { %v13974_v48 = vadd.f32 %v3093_v59, %v2947_v3  ;;  %v13976_v45 = vadd.f32 %v3113_v58, %v2967_v29  ;;  %v2941_v41 = vmul.f32 %v9979_v25, %v13942_v27  ;;  %v2961_v1 = vmul.f32 %v9979_v25, %v13948_v46  ;;  %v2905_v53 = vpop.f32.mrb[99].mxu0  ;;  %v3059_v55 = vpop.f32.mrb[99].mxu1 }
 0x520   :  { %v13980_v63 = vadd.f32 %v3092_v5, %v2946_v42  ;;  %v13982_v56 = vadd.f32 %v3112_v16, %v2966_v44  ;;  %v2940_v26 = vmul.f32 %v13942_v27, %v2905_v53  ;;  %v2960_v30 = vmul.f32 %v13948_v46, %v2905_v53 }
 0x521   :  { %v2949_v21 = vadd.f32 %v13958_v4, %v2941_v41  ;;  %v2969_v60 = vadd.f32 %v13960_v31, %v2961_v1  ;;  %v3095_v20 = vmul.f32 %v10023_v61, %v13952_v10  ;;  %v3115_v28 = vmul.f32 %v10023_v61, %v13956_v62 }
 0x522   :  { %v2948_v36 = vadd.f32 %v13958_v4, %v2940_v26  ;;  %v2968_v39 = vadd.f32 %v13960_v31, %v2960_v30  ;;  %v3094_v19 = vmul.f32 %v13952_v10, %v3059_v55  ;;  %v3114_v37 = vmul.f32 %v13956_v62, %v3059_v55  ;;  %v9982_v12 = vpop.f32.mrb[100].mxu0  ;;  %v10026_v34 = vpop.f32.mrb[100].mxu1 }
 0x523   :  { %v13994_v47 = vadd.f32 %v3095_v20, %v2949_v21  ;;  %v13996_v8 = vadd.f32 %v3115_v28, %v2969_v60  ;;  %v2943_v13 = vmul.f32 %v9982_v12, %v13942_v27  ;;  %v2963_v50 = vmul.f32 %v9982_v12, %v13948_v46  ;;  %v2915_v59 = vpop.f32.mrb[101].mxu0  ;;  %v3069_v58 = vpop.f32.mrb[101].mxu1 }
 0x524   :  { %v14000_v49 = vadd.f32 %v3094_v19, %v2948_v36  ;;  %v14002_v38 = vadd.f32 %v3114_v37, %v2968_v39  ;;  %v2942_v51 = vmul.f32 %v13942_v27, %v2915_v59  ;;  %v2962_v5 = vmul.f32 %v13948_v46, %v2915_v59 }
 0x525   :  { %v2951_v16 = vadd.f32 %v13958_v4, %v2943_v13  ;;  %v2971_v3 = vadd.f32 %v13960_v31, %v2963_v50  ;;  %v3097_v29 = vmul.f32 %v10026_v34, %v13952_v10  ;;  %v3117_v42 = vmul.f32 %v10026_v34, %v13956_v62 }
 0x526   :  { %v2950_v44 = vadd.f32 %v13958_v4, %v2942_v51  ;;  %v2970_v25 = vadd.f32 %v13960_v31, %v2962_v5  ;;  %v3096_v61 = vmul.f32 %v13952_v10, %v3069_v58  ;;  %v3116_v41 = vmul.f32 %v13956_v62, %v3069_v58  ;;  %v9985_v1 = vpop.f32.mrb[102].mxu0  ;;  %v10029_v53 = vpop.f32.mrb[102].mxu1 }
 0x527   :  { %v14014_v55 = vadd.f32 %v3097_v29, %v2951_v16  ;;  %v14016_v26 = vadd.f32 %v3117_v42, %v2971_v3  ;;  %v2945_v30 = vmul.f32 %v9985_v1, %v13942_v27  ;;  %v2965_v21 = vmul.f32 %v9985_v1, %v13948_v46  ;;  %v2925_v60 = vpop.f32.mrb[103].mxu0  ;;  %v3079_v20 = vpop.f32.mrb[103].mxu1 }
 0x528   :  { %v14020_v28 = vadd.f32 %v3096_v61, %v2950_v44  ;;  %v14022_v36 = vadd.f32 %v3116_v41, %v2970_v25  ;;  %v2944_v39 = vmul.f32 %v13942_v27, %v2925_v60  ;;  %v2964_v19 = vmul.f32 %v13948_v46, %v2925_v60 }
 0x529   :  { %v2953_v37 = vadd.f32 %v13958_v4, %v2945_v30  ;;  %v2973_v12 = vadd.f32 %v13960_v31, %v2965_v21  ;;  %v3099_v34 = vmul.f32 %v10029_v53, %v13952_v10  ;;  %v3119_v13 = vmul.f32 %v10029_v53, %v13956_v62 }
 0x52a   :  { %v2952_v50 = vadd.f32 %v13958_v4, %v2944_v39  ;;  %v2972_v59 = vadd.f32 %v13960_v31, %v2964_v19  ;;  %v3098_v58 = vmul.f32 %v13952_v10, %v3079_v20  ;;  %v3118_v51 = vmul.f32 %v13956_v62, %v3079_v20 }
 0x52b   :  { %v14034_v5 = vadd.f32 %v3099_v34, %v2953_v37  ;;  %v14036_v27 = vadd.f32 %v3119_v13, %v2973_v12  ;;  %v14044_v3 = vrot.slane %v13934_v2, %v12859_v17  ;;  %v14048_v4 = vrot.slane %v13936_v32, %v12859_v17 }
 0x52c   :  { %v14038_v46 = vadd.f32 %v3098_v58, %v2952_v50  ;;  %v14040_v16 = vadd.f32 %v3118_v51, %v2972_v59  ;;  %v14052_v10 = vrot.slane %v13934_v2, %v12866_v23  ;;  %v14056_v62 = vrot.slane %v13936_v32, %v12866_v23  ;;  %v3578_v2 = vld [vmem:[%s15721_s16 + $0x10] sm:$0xff]  ;;  %v3579_v23 = vld [vmem:[%s15721_s16 + $0x18] sm:$0xff] }
 0x52d   :  { %v11090_v12 = vpack.c.bf16 %v3579_v23, %v3578_v2 }
 0x53a   :  { %v10064_v31 = vpop.f32.mrb[104].mxu0  ;;  %v10108_v29 = vpop.f32.mrb[104].mxu1 }
 0x53b   :  { %v3247_v42 = vmul.f32 %v10064_v31, %v14044_v3  ;;  %v3267_v44 = vmul.f32 %v10064_v31, %v14048_v4  ;;  %v3203_v25 = vpop.f32.mrb[105].mxu0  ;;  %v3401_v61 = vmul.f32 %v10108_v29, %v14052_v10  ;;  %v3421_v17 = vmul.f32 %v10108_v29, %v14056_v62  ;;  %v3357_v41 = vpop.f32.mrb[105].mxu1 }
 0x53c   :  { %v3246_v32 = vmul.f32 %v14044_v3, %v3203_v25  ;;  %v3266_v1 = vmul.f32 %v14048_v4, %v3203_v25  ;;  %v3400_v53 = vmul.f32 %v14052_v10, %v3357_v41  ;;  %v3420_v30 = vmul.f32 %v14056_v62, %v3357_v41 }
 0x53d   :  { %v3255_v21 = vadd.f32 %v3247_v42, %v13974_v48  ;;  %v3275_v60 = vadd.f32 %v3267_v44, %v13976_v45 }
 0x53e   :  { %v3254_v20 = vadd.f32 %v3246_v32, %v13980_v63  ;;  %v3274_v39 = vadd.f32 %v3266_v1, %v13982_v56  ;;  %v10067_v19 = vpop.f32.mrb[106].mxu0  ;;  %v10111_v37 = vpop.f32.mrb[106].mxu1 }
 0x53f   :  { %v3409_v34 = vadd.f32 %v3401_v61, %v3255_v21  ;;  %v14076_v13 = vadd.f32 %v3421_v17, %v3275_v60  ;;  %v3249_v50 = vmul.f32 %v10067_v19, %v14044_v3  ;;  %v3269_v59 = vmul.f32 %v10067_v19, %v14048_v4  ;;  %v3213_v58 = vpop.f32.mrb[107].mxu0  ;;  %v3367_v51 = vpop.f32.mrb[107].mxu1 }
 0x540   :  { %v3408_v31 = vadd.f32 %v3400_v53, %v3254_v20  ;;  %v14080_v48 = vadd.f32 %v3420_v30, %v3274_v39  ;;  %v3248_v45 = vmul.f32 %v14044_v3, %v3213_v58  ;;  %v3268_v63 = vmul.f32 %v14048_v4, %v3213_v58 }
 0x541   :  { %v3257_v56 = vadd.f32 %v3249_v50, %v13994_v47  ;;  %v3277_v29 = vadd.f32 %v3269_v59, %v13996_v8  ;;  %v3403_v42 = vmul.f32 %v10111_v37, %v14052_v10  ;;  %v3423_v44 = vmul.f32 %v10111_v37, %v14056_v62 }
 0x542   :  { %v3256_v25 = vadd.f32 %v3248_v45, %v14000_v49  ;;  %v3276_v61 = vadd.f32 %v3268_v63, %v14002_v38  ;;  %v3402_v17 = vmul.f32 %v14052_v10, %v3367_v51  ;;  %v3422_v41 = vmul.f32 %v14056_v62, %v3367_v51  ;;  %v10070_v2 = vpop.f32.mrb[108].mxu0  ;;  %10126 = vmatprep.mubr.msk.f32.mxu1 %vm1988_vm0, %v3408_v31  ;;  %v10114_v23 = vpop.f32.mrb[108].mxu1 }
 0x543   :  { %v3411_v32 = vadd.f32 %v3403_v42, %v3257_v56  ;;  %v3431_v47 = vadd.f32 %v3423_v44, %v3277_v29  ;;  %v3251_v8 = vmul.f32 %v10070_v2, %v14044_v3  ;;  %v3271_v1 = vmul.f32 %v10070_v2, %v14048_v4  ;;  %v3223_v53 = vpop.f32.mrb[109].mxu0  ;;  %10127 = vmatmul.mubr.msk.f32.vlgmr.msra.gmra.mrb[112].mxu1 %vm1988_vm0, %v3409_v34  ;;  %v3377_v49 = vpop.f32.mrb[109].mxu1 }
 0x544   :  { %v3410_v30 = vadd.f32 %v3402_v17, %v3256_v25  ;;  %v3430_v38 = vadd.f32 %v3422_v41, %v3276_v61  ;;  %v3250_v21 = vmul.f32 %v14044_v3, %v3223_v53  ;;  %v3270_v60 = vmul.f32 %v14048_v4, %v3223_v53  ;;  %11089 = vmatpush3.bf16.msra.mxu1 %v13898_v24 }
 0x545   :  { %v3259_v20 = vadd.f32 %v3251_v8, %v14014_v55  ;;  %v3279_v39 = vadd.f32 %v3271_v1, %v14016_v26  ;;  %v3405_v19 = vmul.f32 %v10114_v23, %v14052_v10  ;;  %v3425_v37 = vmul.f32 %v10114_v23, %v14056_v62  ;;  %11091 = vmatprep.subr.bf16.mxu1 %v11090_v12 }
 0x546   :  { %v3258_v34 = vadd.f32 %v3250_v21, %v14020_v28  ;;  %v3278_v50 = vadd.f32 %v3270_v60, %v14022_v36  ;;  %v3404_v59 = vmul.f32 %v14052_v10, %v3377_v49  ;;  %v3424_v58 = vmul.f32 %v14056_v62, %v3377_v49  ;;  %v10073_v51 = vpop.f32.mrb[110].mxu0  ;;  %10129 = vmatprep.mubr.msk.f32.mxu1 %vm1988_vm0, %v3410_v30  ;;  %v10117_v24 = vpop.f32.mrb[110].mxu1 }
 0x547   :  { %v3413_v55 = vadd.f32 %v3405_v19, %v3259_v20  ;;  %v3433_v31 = vadd.f32 %v3425_v37, %v3279_v39  ;;  %v3253_v26 = vmul.f32 %v10073_v51, %v14044_v3  ;;  %v3273_v45 = vmul.f32 %v10073_v51, %v14048_v4  ;;  %v3233_v63 = vpop.f32.mrb[111].mxu0  ;;  %10130 = vmatmul.mubr.msk.f32.gmra.mrb[114].mxu1 %vm1988_vm0, %v3411_v32  ;;  %v3387_v28 = vpop.f32.mrb[111].mxu1  ;;  %v8255_v51 = vld [vmem:[#allocation12] ss:$0 sm:$0xff] }
 0x548   :  { %v3412_v56 = vadd.f32 %v3404_v59, %v3258_v34  ;;  %v3432_v36 = vadd.f32 %v3424_v58, %v3278_v50  ;;  %v3252_v29 = vmul.f32 %v14044_v3, %v3233_v63  ;;  %v3272_v42 = vmul.f32 %v14048_v4, %v3233_v63  ;;  %11093 = vmatpush3.bf16.msra.mxu1 %v11090_v12 }
 0x549   :  { %v3261_v44 = vadd.f32 %v3253_v26, %v14034_v5  ;;  %v3281_v25 = vadd.f32 %v3273_v45, %v14036_v27  ;;  %v3407_v61 = vmul.f32 %v10117_v24, %v14052_v10  ;;  %v3427_v17 = vmul.f32 %v10117_v24, %v14056_v62 }
 0x54a   :  { %v3260_v41 = vadd.f32 %v3252_v29, %v14038_v46  ;;  %v3280_v2 = vadd.f32 %v3272_v42, %v14040_v16  ;;  %v3406_v23 = vmul.f32 %v14052_v10, %v3387_v28  ;;  %v3426_v32 = vmul.f32 %v14056_v62, %v3387_v28  ;;  %10132 = vmatprep.mubr.msk.f32.mxu1 %vm1988_vm0, %v3412_v56  ;;  %v8246_v46 = vld [vmem:[#allocation10] ss:$0 sm:$0xff] }
 0x54b   :  { %v3415_v3 = vadd.f32 %v3407_v61, %v3261_v44  ;;  %v3435_v4 = vadd.f32 %v3427_v17, %v3281_v25  ;;  %10133 = vmatmul.mubr.msk.f32.gmra.mrb[116].mxu1 %vm1988_vm0, %v3413_v55 }
 0x54c   :  { %v3414_v5 = vadd.f32 %v3406_v23, %v3260_v41  ;;  %v3434_v27 = vadd.f32 %v3426_v32, %v3280_v2 }
 0x54e   :  { %10135 = vmatprep.mubr.msk.f32.mxu1 %vm1988_vm0, %v3414_v5 }
 0x54f   :  { %10136 = vmatmul.mubr.msk.f32.gmra.mrb[118].mxu1 %vm1988_vm0, %v3415_v3 }
 0x550   :  { %10146 = vmatprep.mubr.msk.f32.mxu1 %vm1988_vm0, %v14080_v48 }
 0x553   :  { %10147 = vmatmul.mubr.msk.f32.vlgmr.msra.gmra.mrb[120].mxu1 %vm1988_vm0, %v14076_v13 }
 0x554   :  { %10149 = vmatprep.mubr.msk.f32.mxu1 %vm1988_vm0, %v3430_v38 }
 0x557   :  { %10150 = vmatmul.mubr.msk.f32.gmra.mrb[122].mxu1 %vm1988_vm0, %v3431_v47 }
 0x558   :  { %10152 = vmatprep.mubr.msk.f32.mxu1 %vm1988_vm0, %v3432_v36 }
 0x55b   :  { %10153 = vmatmul.mubr.msk.f32.gmra.mrb[124].mxu1 %vm1988_vm0, %v3433_v31 }
 0x55c   :  { %10155 = vmatprep.mubr.msk.f32.mxu1 %vm1988_vm0, %v3434_v27 }
 0x55f   :  { %10156 = vmatmul.mubr.msk.f32.gmra.mrb[126].mxu1 %vm1988_vm0, %v3435_v4 }
 0x616   :  { %v10128_v16 = vpop.f32.mrb[112].mxu1 }
 0x617   :  { %v3543_v10 = vadd.f32 %v10128_v16, %v8246_v46  ;;  %v3537_v62 = vpop.f32.mrb[113].mxu1 }
 0x618   :  { %v3538_v12 = vadd.f32 %v8246_v46, %v3537_v62 }
 0x61a   :  { %v10131_v48 = vpop.f32.mrb[114].mxu1  ;;  %v11094_v47 = vpack.c.bf16 %v3543_v10, %v3538_v12  ;;  %v14141_v8 = vpack.i.bf16 %v3543_v10, %v3538_v12  ;;  %v3879_v12 = vld [vmem:[%s15723_s18 + $0x8] sm:$0xff] }
 0x61b   :  { %v3553_v1 = vadd.f32 %v10131_v48, %v8246_v46  ;;  %v3547_v53 = vpop.f32.mrb[115].mxu1 }
 0x61c   :  { %v3548_v49 = vadd.f32 %v8246_v46, %v3547_v53  ;;  %11096 = vmatprep.subr.msk.bf16.mxu0 %vm14137_vm2, %v11094_v47 }
 0x61d   :  { %11099 = vmatpush3.bf16.xpose.msk.msra.mxu0 %vm14137_vm2, %v11094_v47 }
 0x61e   :  { %v10134_v30 = vpop.f32.mrb[116].mxu1  ;;  %v11100_v38 = vpack.c.bf16 %v3553_v1, %v3548_v49  ;;  %v14147_v21 = vpack.i.bf16 %v3553_v1, %v3548_v49  ;;  %v3878_v1 = vld [vmem:[%s15723_s18] sm:$0xff] }
 0x61f   :  { %v3563_v60 = vadd.f32 %v10134_v30, %v8246_v46  ;;  %v3557_v20 = vpop.f32.mrb[117].mxu1 }
 0x620   :  { %v3558_v39 = vadd.f32 %v8246_v46, %v3557_v20  ;;  %11102 = vmatprep.subr.msk.bf16.mxu0 %vm14137_vm2, %v11100_v38 }
 0x622   :  { %v10137_v19 = vpop.f32.mrb[118].mxu1  ;;  %v14151_v37 = vpack.i.bf16 %v3563_v60, %v3558_v39  ;;  %v14153_v34 = vpack.c.bf16 %v3563_v60, %v3558_v39  ;;  %v3880_v39 = vld [vmem:[%s15723_s18 + $0x10] sm:$0xff] }
 0x623   :  { %v3573_v50 = vadd.f32 %v10137_v19, %v8246_v46  ;;  %v3567_v59 = vpop.f32.mrb[119].mxu1 }
 0x624   :  { %v3568_v58 = vadd.f32 %v8246_v46, %v3567_v59 }
 0x625   :  { %11105 = vmatpush3.bf16.xpose.msk.msra.mxu0 %vm14137_vm2, %v11100_v38 }
 0x626   :  { %v10148_v24 = vpop.f32.mrb[120].mxu1  ;;  %v14157_v55 = vpack.c.bf16 %v3573_v50, %v3568_v58  ;;  %v14159_v31 = vpack.i.bf16 %v3573_v50, %v3568_v58  ;;  %v3881_v58 = vld [vmem:[%s15723_s18 + $0x18] sm:$0xff] }
 0x627   :  { %v3683_v26 = vadd.f32 %v10148_v24, %v8255_v51  ;;  %v3677_v45 = vpop.f32.mrb[121].mxu1 }
 0x628   :  { %v3678_v63 = vadd.f32 %v8255_v51, %v3677_v45  ;;  %v3882_v45 = vld [vmem:[%s15723_s18 + $0x20] sm:$0xff] }
 0x62a   :  { %v10151_v28 = vpop.f32.mrb[122].mxu1  ;;  %v11106_v56 = vpack.c.bf16 %v3683_v26, %v3678_v63  ;;  %v14161_v36 = vpack.i.bf16 %v3683_v26, %v3678_v63 }
 0x62b   :  { %v3693_v29 = vadd.f32 %v10151_v28, %v8255_v51  ;;  %v3687_v42 = vpop.f32.mrb[123].mxu1 }
 0x62c   :  { %v3688_v44 = vadd.f32 %v8255_v51, %v3687_v42  ;;  %10167 = vmatmul.mubr.msk.f32.vlgmr.msra.gmra.mrb[112].mxu0 %vm3728_vm1, %v13901_v57  ;;  %11107 = vmatprep.subr.bf16.mxu1 %v11106_v56  ;;  %v3883_v42 = vld [vmem:[%s15723_s18 + $0x28] sm:$0xff] }
 0x62d   :  { %10169 = vmatprep.mubr.msk.f32.mxu0 %vm3728_vm1, %v13909_v7  ;;  %11109 = vmatpush3.bf16.msra.mxu1 %v11106_v56 }
 0x62e   :  { %v10154_v25 = vpop.f32.mrb[124].mxu1  ;;  %v11110_v61 = vpack.c.bf16 %v3693_v29, %v3688_v44  ;;  %v14167_v17 = vpack.i.bf16 %v3693_v29, %v3688_v44 }
 0x62f   :  { %v3703_v41 = vadd.f32 %v10154_v25, %v8255_v51  ;;  %v3697_v2 = vpop.f32.mrb[125].mxu1 }
 0x630   :  { %v3698_v23 = vadd.f32 %v8255_v51, %v3697_v2  ;;  %10170 = vmatmul.mubr.msk.f32.gmra.mrb[114].mxu0 %vm3728_vm1, %v13907_v18  ;;  %11111 = vmatprep.subr.bf16.mxu1 %v11110_v61 }
 0x631   :  { %10172 = vmatprep.mubr.msk.f32.mxu0 %vm3728_vm1, %v13913_v43  ;;  %11113 = vmatpush3.bf16.msra.mxu1 %v11110_v61 }
 0x632   :  { %v10157_v32 = vpop.f32.mrb[126].mxu1  ;;  %v14173_v3 = vpack.c.bf16 %v3703_v41, %v3698_v23  ;;  %v14175_v4 = vpack.i.bf16 %v3703_v41, %v3698_v23 }
 0x633   :  { %v3713_v5 = vadd.f32 %v10157_v32, %v8255_v51  ;;  %v3707_v27 = vpop.f32.mrb[127].mxu1 }
 0x634   :  { %v3708_v46 = vadd.f32 %v8255_v51, %v3707_v27  ;;  %10173 = vmatmul.mubr.msk.f32.gmra.mrb[116].mxu0 %vm3728_vm1, %v13911_v35 }
 0x635   :  { %10175 = vmatprep.mubr.msk.f32.mxu0 %vm3728_vm1, %v13917_v54 }
 0x636   :  { %v14181_v16 = vpack.c.bf16 %v3713_v5, %v3708_v46  ;;  %v14183_v10 = vpack.i.bf16 %v3713_v5, %v3708_v46  ;;  %v3885_v5 = vld [vmem:[%s15723_s18 + $0x38] sm:$0xff] }
 0x638   :  { %10176 = vmatmul.mubr.msk.f32.gmra.mrb[118].mxu0 %vm3728_vm1, %v13915_v9 }
 0x6ff   :  { %v10168_v62 = vpop.f32.mrb[112].mxu0 }
 0x700   :  { %v3871_v48 = vmul.f32 0.35355338, %v10168_v62  ;;  %v3831_v47 = vpop.f32.mrb[113].mxu0 }
 0x701   :  { %v3870_v53 = vmul.f32 0.35355338, %v3831_v47 }
 0x702   :  { %v3887_v49 = vadd.f32 %v3879_v12, %v3871_v48  ;;  %v3884_v48 = vld [vmem:[%s15723_s18 + $0x30] sm:$0xff] }
 0x703   :  { %v10171_v30 = vpop.f32.mrb[114].mxu0  ;;  %v3886_v38 = vadd.f32 %v3878_v1, %v3870_v53 }
 0x704   :  { %v3841_v60 = vpop.f32.mrb[115].mxu0  ;;  %v3897_v20 = vsel %vm1988_vm0, %v3887_v49, -inf  ;;  %v3873_v19 = vmul.f32 0.35355338, %v10171_v30 }
 0x705   :  { %v3872_v50 = vmul.f32 0.35355338, %v3841_v60  ;;  %3898 = vmax.xlane.f32.xlu1 %v3897_v20  ;;  %v3894_v59 = vsel %vm1988_vm0, %v3886_v38, -inf }
 0x706   :  { %3895 = vmax.xlane.f32.xlu0 %v3894_v59  ;;  %v3889_v29 = vadd.f32 %v3881_v58, %v3873_v19 }
 0x707   :  { %v10174_v51 = vpop.f32.mrb[116].mxu0  ;;  %v3888_v24 = vadd.f32 %v3880_v39, %v3872_v50 }
 0x708   :  { %v3851_v26 = vpop.f32.mrb[117].mxu0  ;;  %v3875_v63 = vmul.f32 0.35355338, %v10174_v51  ;;  %v3903_v2 = vsel %vm1988_vm0, %v3889_v29, -inf }
 0x709   :  { %v3874_v28 = vmul.f32 0.35355338, %v3851_v26  ;;  %v3900_v56 = vsel %vm1988_vm0, %v3888_v24, -inf }
 0x70a   :  { %3901 = vmax.xlane.f32.xlu0 %v3900_v56  ;;  %v3891_v32 = vadd.f32 %v3883_v42, %v3875_v63 }
 0x70b   :  { %v10177_v44 = vpop.f32.mrb[118].mxu0  ;;  %v3890_v25 = vadd.f32 %v3882_v45, %v3874_v28 }
 0x70c   :  { %v3861_v61 = vpop.f32.mrb[119].mxu0  ;;  %v3877_v41 = vmul.f32 0.35355338, %v10177_v44  ;;  %v3909_v27 = vsel %vm1988_vm0, %v3891_v32, -inf }
 0x70d   :  { %v3906_v23 = vsel %vm1988_vm0, %v3890_v25, -inf  ;;  %v3876_v12 = vmul.f32 0.35355338, %v3861_v61 }
 0x70e   :  { %3904 = vmax.xlane.f32.xlu0 %v3903_v2  ;;  %3907 = vmax.xlane.f32.xlu1 %v3906_v23  ;;  %v3893_v46 = vadd.f32 %v3885_v5, %v3877_v41 }
 0x70f   :  { %v14224_v47 = vadd.f32 %v3884_v48, %v3876_v12 }
 0x710   :  { %v3915_v62 = vsel %vm1988_vm0, %v3893_v46, -inf }
 0x711   :  { %v3912_v1 = vsel %vm1988_vm0, %v14224_v47, -inf }
 0x712   :  { %3910 = vmax.xlane.f32.xlu0 %v3909_v27 }
 0x716   :  { %3916 = vmax.xlane.f32.xlu0 %v3915_v62 }
 0x71f   :  { %11335 = vrot.lane.b32.xlu1 %v14141_v8, %s11959_s20 }
 0x723   :  { %11345 = vrot.lane.b32.xlu1 %v14141_v8, %s11960_s15 }
 0x72c   :  { %11340 = vrot.lane.b32.xlu0 %v14147_v21, %s11959_s20 }
 0x747   :  { %3913 = vmax.xlane.f32.xlu1 %v3912_v1 }
 0x758   :  { %4248 = vrot.lane.b32.xlu1 %v13903_v0, %s11959_s20 }
 0x792   :  { %v3899_v53 = vpop.xlane.xlu1 %3898 }
 0x793   :  { %v3919_v30 = vsub.f32 %v3887_v49, %v3899_v53  ;;  %v3896_v60 = vpop.xlane.xlu0 %3895 }
 0x794   :  { %v3918_v20 = vsub.f32 %v3886_v38, %v3896_v60 }
 0x795   :  { %v3928_v39 = vmul.f32 1.442695, %v3919_v30 }
 0x796   :  { %v3926_v19 = vmul.f32 1.442695, %v3918_v20 }
 0x797   :  { %11486 = vpow2.f32 %v3928_v39  ;;  %v3902_v50 = vpop.xlane.xlu0 %3901 }
 0x798   :  { %11488 = vpow2.f32 %v3926_v19  ;;  %v3920_v59 = vsub.f32 %v3888_v24, %v3902_v50 }
 0x79a   :  { %v3930_v58 = vmul.f32 1.442695, %v3920_v59 }
 0x79b   :  { %v3905_v51 = vpop.xlane.xlu0 %3904  ;;  %v3908_v26 = vpop.xlane.xlu1 %3907 }
 0x79c   :  { %11490 = vpow2.f32 %v3930_v58  ;;  %v3921_v45 = vsub.f32 %v3889_v29, %v3905_v51  ;;  %v3922_v63 = vsub.f32 %v3890_v25, %v3908_v26 }
 0x79e   :  { %v3932_v28 = vmul.f32 1.442695, %v3921_v45  ;;  %v3934_v56 = vmul.f32 1.442695, %v3922_v63 }
 0x79f   :  { %v3911_v42 = vpop.xlane.xlu0 %3910  ;;  %v11336_v44 = vpop.permute.xlu1 %11335 }
 0x7a0   :  { %11492 = vpow2.f32 %v3932_v28  ;;  %v3923_v49 = vsub.f32 %v3891_v32, %v3911_v42  ;;  %v11338_v61 = vunpack.i.h.bf16 %v11336_v44  ;;  %v11337_v38 = vunpack.i.l.bf16 %v11336_v44 }
 0x7a1   :  { %v14230_v41 = vpop.eup %11486  ;;  %11494 = vpow2.f32 %v3934_v56 }
 0x7a2   :  { %v14232_v2 = vpop.eup %11488  ;;  %v3936_v24 = vmul.f32 1.442695, %v3923_v49  ;;  %v14234_v23 = vpack.c.bf16 %v11338_v61, %v11337_v38  ;;  %v3945_v29 = vsel %vm1988_vm0, %v14230_v41, 0.0 }
 0x7a3   :  { %3946 = vadd.xlane.f32.xlu0 %v3945_v29  ;;  %v3917_v25 = vpop.xlane.xlu0 %3916  ;;  %v3942_v5 = vsel %vm1988_vm0, %v14232_v2, 0.0  ;;  %v11346_v19 = vpop.permute.xlu1 %11345 }
 0x7a4   :  { %11496 = vpow2.f32 %v3936_v24  ;;  %v3925_v32 = vsub.f32 %v3893_v46, %v3917_v25  ;;  %11116 = vmatprep.subr.msk.bf16.mxu1 %vm14137_vm2, %v14234_v23  ;;  %3943 = vadd.xlane.f32.xlu1 %v3942_v5 }
 0x7a6   :  { %v14243_v27 = vpop.eup %11490  ;;  %v3940_v62 = vmul.f32 1.442695, %v3925_v32 }
 0x7a7   :  { %v3948_v12 = vsel %vm1988_vm0, %v14243_v27, 0.0 }
 0x7a8   :  { %11498 = vpow2.f32 %v3940_v62  ;;  %3949 = vadd.xlane.f32.xlu1 %v3948_v12 }
 0x7aa   :  { %v14247_v48 = vpop.eup %11492 }
 0x7ab   :  { %v14249_v1 = vpop.eup %11494  ;;  %v3951_v46 = vsel %vm1988_vm0, %v14247_v48, 0.0 }
 0x7ac   :  { %3952 = vadd.xlane.f32.xlu0 %v3951_v46  ;;  %v3954_v53 = vsel %vm1988_vm0, %v14249_v1, 0.0  ;;  %v11347_v46 = vunpack.i.l.bf16 %v11346_v19 }
 0x7ad   :  { %3955 = vadd.xlane.f32.xlu1 %v3954_v53 }
 0x7ae   :  { %v14255_v30 = vpop.eup %11496 }
 0x7af   :  { %v3957_v60 = vsel %vm1988_vm0, %v14255_v30, 0.0 }
 0x7b0   :  { %3958 = vadd.xlane.f32.xlu0 %v3957_v60 }
 0x7b2   :  { %v14259_v20 = vpop.eup %11498 }
 0x7b3   :  { %v3963_v39 = vsel %vm1988_vm0, %v14259_v20, 0.0 }
 0x7b4   :  { %3964 = vadd.xlane.f32.xlu0 %v3963_v39 }
 0x7be   :  { %4252 = vrot.lane.b32.xlu1 %v13909_v7, %s11959_s20 }
 0x7ca   :  { %4250 = vrot.lane.b32.xlu0 %v13901_v57, %s11959_s20 }
 0x7ce   :  { %4254 = vrot.lane.b32.xlu0 %v13907_v18, %s11959_s20 }
 0x7d2   :  { %4256 = vrot.lane.b32.xlu0 %v13913_v43, %s11959_s20 }
 0x7d4   :  { %v3914_v50 = vpop.xlane.xlu1 %3913 }
 0x7d5   :  { %v3924_v59 = vsub.f32 %v14224_v47, %v3914_v50  ;;  %v11341_v47 = vpop.permute.xlu0 %11340 }
 0x7d6   :  { %4260 = vrot.lane.b32.xlu0 %v13917_v54, %s11959_s20  ;;  %v11343_v38 = vunpack.i.h.bf16 %v11341_v47  ;;  %v11342_v24 = vunpack.i.l.bf16 %v11341_v47 }
 0x7d7   :  { %v3938_v58 = vmul.f32 1.442695, %v3924_v59 }
 0x7d8   :  { %v4249_v45 = vpop.permute.xlu1 %4248  ;;  %v11120_v62 = vpack.c.bf16 %v11343_v38, %v11342_v24 }
 0x7d9   :  { %11500 = vpow2.f32 %v3938_v58 }
 0x7da   :  { %4796 = vrot.lane.b32.xlu0 %v13903_v0, %s11960_s15 }
 0x7de   :  { %4800 = vrot.lane.b32.xlu0 %v13909_v7, %s11960_s15 }
 0x7e2   :  { %4804 = vrot.lane.b32.xlu0 %v13913_v43, %s11960_s15 }
 0x7e3   :  { %v14280_v51 = vpop.eup %11500 }
 0x7e4   :  { %v3960_v26 = vsel %vm1988_vm0, %v14280_v51, 0.0 }
 0x7e5   :  { %3961 = vadd.xlane.f32.xlu1 %v3960_v26 }
 0x7e6   :  { %4808 = vrot.lane.b32.xlu0 %v13917_v54, %s11960_s15 }
 0x7f6   :  { %11350 = vrot.lane.b32.xlu1 %v14147_v21, %s11960_s15 }
 0x7fa   :  { %4258 = vrot.lane.b32.xlu1 %v13911_v35, %s11959_s20 }
 0x7fe   :  { %4262 = vrot.lane.b32.xlu1 %v13915_v9, %s11959_s20 }
 0x802   :  { %4798 = vrot.lane.b32.xlu1 %v13901_v57, %s11960_s15 }
 0x806   :  { %4802 = vrot.lane.b32.xlu1 %v13907_v18, %s11960_s15 }
 0x80a   :  { %4806 = vrot.lane.b32.xlu1 %v13911_v35, %s11960_s15 }
 0x80e   :  { %4810 = vrot.lane.b32.xlu1 %v13915_v9, %s11960_s15 }
 0x830   :  { %v3947_v63 = vpop.xlane.xlu0 %3946 }
 0x831   :  { %11502 = vrcp.f32 %v3947_v63  ;;  %v3944_v28 = vpop.xlane.xlu1 %3943 }
 0x832   :  { %11504 = vrcp.f32 %v3944_v28 }
 0x835   :  { %v3950_v56 = vpop.xlane.xlu1 %3949 }
 0x836   :  { %11506 = vrcp.f32 %v3950_v56 }
 0x839   :  { %v3953_v42 = vpop.xlane.xlu0 %3952 }
 0x83a   :  { %11508 = vrcp.f32 %v3953_v42  ;;  %v3956_v44 = vpop.xlane.xlu1 %3955 }
 0x83b   :  { %v11503_v49 = vpop.eup %11502  ;;  %11510 = vrcp.f32 %v3956_v44 }
 0x83c   :  { %v11505_v61 = vpop.eup %11504  ;;  %v3975_v5 = vmul.f32 %v11503_v49, %v14230_v41  ;;  %v11348_v41 = vunpack.i.h.bf16 %v11346_v19 }
 0x83d   :  { %v3959_v29 = vpop.xlane.xlu0 %3958  ;;  %v3974_v25 = vmul.f32 %v11505_v61, %v14232_v2 }
 0x83e   :  { %11512 = vrcp.f32 %v3959_v29  ;;  %v11134_v59 = vpack.c.bf16 %v11348_v41, %v11347_v46 }
 0x83f   :  { %10186 = vmatprep.mubr.msk.f32.mxu1 %vm1988_vm0, %v3974_v25  ;;  %v3716_v25 = vld [vmem:[%s15724_s19] sm:$0xff] }
 0x840   :  { %v11507_v32 = vpop.eup %11506  ;;  %10187 = vmatmul.mubr.msk.f32.vlgmr.msra.gmra.mrb[128].mxu1 %vm1988_vm0, %v3975_v5  ;;  %10198 = vmatprep.subr.mxu0 %v3716_v25 }
 0x841   :  { %11119 = vmatpush3.bf16.xpose.msk.msra.mxu1 %vm14137_vm2, %v14234_v23  ;;  %v3976_v12 = vmul.f32 %v11507_v32, %v14243_v27  ;;  %v3965_v27 = vpop.xlane.xlu0 %3964  ;;  %10199 = vmatpush3.msra.mxu0 %v3716_v25 }
 0x842   :  { %11122 = vmatprep.subr.msk.bf16.mxu1 %vm14137_vm2, %v11120_v62  ;;  %11514 = vrcp.f32 %v3965_v27 }
 0x843   :  { %10189 = vmatprep.mubr.msk.f32.mxu1 %vm1988_vm0, %v3976_v12 }
 0x844   :  { %v11509_v2 = vpop.eup %11508 }
 0x845   :  { %v11511_v53 = vpop.eup %11510  ;;  %v3977_v60 = vmul.f32 %v11509_v2, %v14247_v48  ;;  %v4253_v48 = vpop.permute.xlu1 %4252 }
 0x846   :  { %v3978_v39 = vmul.f32 %v11511_v53, %v14249_v1  ;;  %v4251_v19 = vpop.permute.xlu0 %4250 }
 0x847   :  { %10190 = vmatmul.mubr.msk.f32.gmra.mrb[130].mxu1 %vm1988_vm0, %v3977_v60 }
 0x848   :  { %v11513_v50 = vpop.eup %11512  ;;  %10192 = vmatprep.mubr.msk.f32.mxu1 %vm1988_vm0, %v3978_v39 }
 0x849   :  { %11125 = vmatpush3.bf16.xpose.msk.msra.mxu1 %vm14137_vm2, %v11120_v62  ;;  %v3979_v23 = vmul.f32 %v11513_v50, %v14255_v30 }
 0x84a   :  { %11136 = vmatprep.subr.msk.bf16.mxu1 %vm14137_vm2, %v11134_v59  ;;  %v4255_v58 = vpop.permute.xlu0 %4254 }
 0x84b   :  { %10193 = vmatmul.mubr.msk.f32.gmra.mrb[132].mxu1 %vm1988_vm0, %v3979_v23 }
 0x84c   :  { %v11515_v26 = vpop.eup %11514 }
 0x84d   :  { %v3981_v30 = vmul.f32 %v11515_v26, %v14259_v20 }
 0x84e   :  { %v4257_v56 = vpop.permute.xlu0 %4256 }
 0x852   :  { %v4261_v61 = vpop.permute.xlu0 %4260 }
 0x872   :  { %v3962_v1 = vpop.xlane.xlu1 %3961 }
 0x873   :  { %11516 = vrcp.f32 %v3962_v1 }
 0x876   :  { %v11351_v47 = vpop.permute.xlu1 %11350 }
 0x877   :  { %v11353_v42 = vunpack.i.h.bf16 %v11351_v47  ;;  %v11352_v44 = vunpack.i.l.bf16 %v11351_v47 }
 0x879   :  { %v11140_v38 = vpack.c.bf16 %v11353_v42, %v11352_v44  ;;  %v8341_v42 = vld [vmem:[%s15723_s18 + $0x80] sm:$0xff] }
 0x87a   :  { %v4259_v49 = vpop.permute.xlu1 %4258 }
 0x87d   :  { %v11517_v63 = vpop.eup %11516 }
 0x87e   :  { %v3980_v28 = vmul.f32 %v11517_v63, %v14280_v51  ;;  %v4263_v20 = vpop.permute.xlu1 %4262  ;;  %v4797_v51 = vpop.permute.xlu0 %4796 }
 0x880   :  { %10195 = vmatprep.mubr.msk.f32.mxu1 %vm1988_vm0, %v3980_v28  ;;  %v8342_v28 = vld [vmem:[%s15723_s18 + $0x88] sm:$0xff] }
 0x881   :  { %10196 = vmatmul.mubr.msk.f32.gmra.mrb[134].mxu1 %vm1988_vm0, %v3981_v30 }
 0x882   :  { %10220 = vmatprep.mubr.msk.f32.mxu1 %vm3728_vm1, %v4249_v45  ;;  %v4799_v45 = vpop.permute.xlu1 %4798  ;;  %v4801_v24 = vpop.permute.xlu0 %4800 }
 0x885   :  { %10221 = vmatmul.mubr.msk.f32.vlgmr.msra.gmra.mrb[136].mxu1 %vm3728_vm1, %v4251_v19 }
 0x886   :  { %11139 = vmatpush3.bf16.xpose.msk.msra.mxu1 %vm14137_vm2, %v11134_v59  ;;  %10223 = vmatprep.mubr.msk.f32.mxu1 %vm3728_vm1, %v4253_v48  ;;  %v4803_v29 = vpop.permute.xlu1 %4802  ;;  %v4805_v5 = vpop.permute.xlu0 %4804 }
 0x887   :  { %11142 = vmatprep.subr.msk.bf16.mxu1 %vm14137_vm2, %v11140_v38 }
 0x889   :  { %10224 = vmatmul.mubr.msk.f32.gmra.mrb[138].mxu1 %vm3728_vm1, %v4255_v58 }
 0x88a   :  { %10226 = vmatprep.mubr.msk.f32.mxu1 %vm3728_vm1, %v4257_v56  ;;  %v4807_v32 = vpop.permute.xlu1 %4806  ;;  %v4809_v62 = vpop.permute.xlu0 %4808 }
 0x88d   :  { %10227 = vmatmul.mubr.msk.f32.gmra.mrb[140].mxu1 %vm3728_vm1, %v4259_v49 }
 0x88e   :  { %11145 = vmatpush3.bf16.xpose.msk.msra.mxu1 %vm14137_vm2, %v11140_v38  ;;  %10229 = vmatprep.mubr.msk.f32.mxu1 %vm3728_vm1, %v4261_v61  ;;  %v4811_v12 = vpop.permute.xlu1 %4810 }
 0x891   :  { %10230 = vmatmul.mubr.msk.f32.gmra.mrb[142].mxu1 %vm3728_vm1, %v4263_v20 }
 0x892   :  { %10274 = vmatprep.mubr.msk.f32.mxu1 %vm3728_vm1, %v4797_v51 }
 0x895   :  { %10275 = vmatmul.mubr.msk.f32.vlgmr.msra.gmra.mrb[144].mxu1 %vm3728_vm1, %v4799_v45  ;;  %v8343_v45 = vld [vmem:[%s15723_s18 + $0x90] sm:$0xff] }
 0x896   :  { %10277 = vmatprep.mubr.msk.f32.mxu1 %vm3728_vm1, %v4801_v24 }
 0x899   :  { %10278 = vmatmul.mubr.msk.f32.gmra.mrb[146].mxu1 %vm3728_vm1, %v4803_v29 }
 0x89a   :  { %10280 = vmatprep.mubr.msk.f32.mxu1 %vm3728_vm1, %v4805_v5  ;;  %v8344_v5 = vld [vmem:[%s15723_s18 + $0x98] sm:$0xff] }
 0x89d   :  { %10281 = vmatmul.mubr.msk.f32.gmra.mrb[148].mxu1 %vm3728_vm1, %v4807_v32 }
 0x89e   :  { %10283 = vmatprep.mubr.msk.f32.mxu1 %vm3728_vm1, %v4809_v62 }
 0x8a1   :  { %10284 = vmatmul.mubr.msk.f32.gmra.mrb[150].mxu1 %vm3728_vm1, %v4811_v12 }
 0x913   :  { %v10188_v2 = vpop.f32.mrb[128].mxu1 }
 0x914   :  { %v4072_v41 = vpop.f32.mrb[129].mxu1 }
 0x915   :  { %10200 = vmatprep.mubr.msk.f32.mxu0 %vm3728_vm1, %v4072_v41 }
 0x916   :  { %10201 = vmatmul.mubr.msk.f32.vlgmr.msra.gmra.mrb[120].mxu0 %vm3728_vm1, %v10188_v2  ;;  %v8345_v2 = vld [vmem:[%s15723_s18 + $0xa0] sm:$0xff] }
 0x91a   :  { %v10191_v46 = vpop.f32.mrb[130].mxu1 }
 0x91b   :  { %v4082_v53 = vpop.f32.mrb[131].mxu1 }
 0x91c   :  { %10203 = vmatprep.mubr.msk.f32.mxu0 %vm3728_vm1, %v4082_v53 }
 0x91d   :  { %10204 = vmatmul.mubr.msk.f32.gmra.mrb[122].mxu0 %vm3728_vm1, %v10191_v46 }
 0x91e   :  { %v10194_v60 = vpop.f32.mrb[132].mxu1 }
 0x91f   :  { %v4092_v39 = vpop.f32.mrb[133].mxu1 }
 0x920   :  { %10206 = vmatprep.mubr.msk.f32.mxu0 %vm3728_vm1, %v4092_v39  ;;  %v8346_v39 = vld [vmem:[%s15723_s18 + $0xa8] sm:$0xff] }
 0x921   :  { %10207 = vmatmul.mubr.msk.f32.gmra.mrb[124].mxu0 %vm3728_vm1, %v10194_v60 }
 0x954   :  { %v10197_v50 = vpop.f32.mrb[134].mxu1 }
 0x955   :  { %v4102_v59 = vpop.f32.mrb[135].mxu1 }
 0x956   :  { %10209 = vmatprep.mubr.msk.f32.mxu0 %vm3728_vm1, %v4102_v59 }
 0x957   :  { %10210 = vmatmul.mubr.msk.f32.gmra.mrb[126].mxu0 %vm3728_vm1, %v10197_v50 }
 0x958   :  { %v14358_v23 = vpop.f32.mrb[136].mxu1 }
 0x959   :  { %v14360_v27 = vpop.f32.mrb[137].mxu1 }
 0x95c   :  { %v14362_v48 = vpop.f32.mrb[138].mxu1 }
 0x95d   :  { %v14364_v1 = vpop.f32.mrb[139].mxu1 }
 0x960   :  { %v14366_v19 = vpop.f32.mrb[140].mxu1 }
 0x961   :  { %v14368_v58 = vpop.f32.mrb[141].mxu1 }
 0x964   :  { %v14370_v26 = vpop.f32.mrb[142].mxu1 }
 0x965   :  { %v14372_v47 = vpop.f32.mrb[143].mxu1 }
 0x968   :  { %v10276_v63 = vpop.f32.mrb[144].mxu1 }
 0x969   :  { %v4950_v56 = vmul.f32 0.35355338, %v10276_v63  ;;  %v4910_v30 = vpop.f32.mrb[145].mxu1 }
 0x96a   :  { %v4949_v44 = vmul.f32 0.35355338, %v4910_v30 }
 0x96b   :  { %v4967_v49 = vadd.f32 %v8342_v28, %v4950_v56 }
 0x96c   :  { %v10279_v61 = vpop.f32.mrb[146].mxu1  ;;  %v4966_v38 = vadd.f32 %v8341_v42, %v4949_v44  ;;  %v8348_v44 = vld [vmem:[%s15723_s18 + $0xb8] sm:$0xff] }
 0x96d   :  { %v4920_v20 = vpop.f32.mrb[147].mxu1  ;;  %v4977_v51 = vsel %vm1988_vm0, %v4967_v49, -inf  ;;  %v4952_v24 = vmul.f32 0.35355338, %v10279_v61 }
 0x96e   :  { %v4951_v29 = vmul.f32 0.35355338, %v4920_v20  ;;  %4978 = vmax.xlane.f32.xlu1 %v4977_v51  ;;  %v4974_v25 = vsel %vm1988_vm0, %v4966_v38, -inf }
 0x96f   :  { %4975 = vmax.xlane.f32.xlu0 %v4974_v25  ;;  %v4969_v60 = vadd.f32 %v8344_v5, %v4952_v24  ;;  %v8347_v24 = vld [vmem:[%s15723_s18 + $0xb0] sm:$0xff] }
 0x970   :  { %v10282_v32 = vpop.f32.mrb[148].mxu1  ;;  %v4968_v62 = vadd.f32 %v8343_v45, %v4951_v29 }
 0x971   :  { %v4930_v12 = vpop.f32.mrb[149].mxu1  ;;  %v4954_v41 = vmul.f32 0.35355338, %v10282_v32  ;;  %v4983_v56 = vsel %vm1988_vm0, %v4969_v60, -inf }
 0x972   :  { %v4953_v46 = vmul.f32 0.35355338, %v4930_v12  ;;  %v4980_v53 = vsel %vm1988_vm0, %v4968_v62, -inf }
 0x973   :  { %4981 = vmax.xlane.f32.xlu0 %v4980_v53  ;;  %v4971_v42 = vadd.f32 %v8346_v39, %v4954_v41 }
 0x974   :  { %v10285_v50 = vpop.f32.mrb[150].mxu1  ;;  %v4970_v59 = vadd.f32 %v8345_v2, %v4953_v46 }
 0x975   :  { %v4940_v63 = vpop.f32.mrb[151].mxu1  ;;  %v4956_v28 = vmul.f32 0.35355338, %v10285_v50  ;;  %v4989_v61 = vsel %vm1988_vm0, %v4971_v42, -inf }
 0x976   :  { %v4986_v30 = vsel %vm1988_vm0, %v4970_v59, -inf  ;;  %v4955_v45 = vmul.f32 0.35355338, %v4940_v63 }
 0x977   :  { %4984 = vmax.xlane.f32.xlu0 %v4983_v56  ;;  %4987 = vmax.xlane.f32.xlu1 %v4986_v30  ;;  %v4973_v20 = vadd.f32 %v8348_v44, %v4956_v28 }
 0x978   :  { %v14411_v29 = vadd.f32 %v8347_v24, %v4955_v45 }
 0x979   :  { %v4995_v51 = vsel %vm1988_vm0, %v4973_v20, -inf }
 0x97a   :  { %v4992_v25 = vsel %vm1988_vm0, %v14411_v29, -inf }
 0x97b   :  { %4990 = vmax.xlane.f32.xlu0 %v4989_v61 }
 0x97f   :  { %4996 = vmax.xlane.f32.xlu0 %v4995_v51 }
 0x988   :  { %11355 = vrot.lane.b32.xlu1 %v14161_v36, %s11960_s15 }
 0x98c   :  { %11365 = vrot.lane.b32.xlu1 %v14141_v8, %s11961_s27 }
 0x995   :  { %11360 = vrot.lane.b32.xlu0 %v14167_v17, %s11960_s15 }
 0x9b0   :  { %4993 = vmax.xlane.f32.xlu1 %v4992_v25 }
 0x9c1   :  { %11370 = vrot.lane.b32.xlu1 %v14147_v21, %s11961_s27 }
 0x9fb   :  { %v4979_v5 = vpop.xlane.xlu1 %4978 }
 0x9fc   :  { %v4999_v32 = vsub.f32 %v4967_v49, %v4979_v5  ;;  %v4976_v8 = vpop.xlane.xlu0 %4975 }
 0x9fd   :  { %v4998_v12 = vsub.f32 %v4966_v38, %v4976_v8 }
 0x9fe   :  { %v5008_v2 = vmul.f32 1.442695, %v4999_v32 }
 0x9ff   :  { %v5006_v41 = vmul.f32 1.442695, %v4998_v12 }
 0xa00   :  { %11518 = vpow2.f32 %v5008_v2  ;;  %v4982_v46 = vpop.xlane.xlu0 %4981 }
 0xa01   :  { %11520 = vpow2.f32 %v5006_v41  ;;  %v5000_v53 = vsub.f32 %v4968_v62, %v4982_v46 }
 0xa03   :  { %v5010_v39 = vmul.f32 1.442695, %v5000_v53 }
 0xa04   :  { %v4985_v50 = vpop.xlane.xlu0 %4984  ;;  %v4988_v63 = vpop.xlane.xlu1 %4987 }
 0xa05   :  { %11522 = vpow2.f32 %v5010_v39  ;;  %v5001_v28 = vsub.f32 %v4969_v60, %v4985_v50  ;;  %v5002_v56 = vsub.f32 %v4970_v59, %v4988_v63 }
 0xa07   :  { %v5012_v30 = vmul.f32 1.442695, %v5001_v28  ;;  %v5014_v44 = vmul.f32 1.442695, %v5002_v56 }
 0xa08   :  { %v4991_v61 = vpop.xlane.xlu0 %4990  ;;  %v11356_v21 = vpop.permute.xlu1 %11355 }
 0xa09   :  { %11524 = vpow2.f32 %v5012_v30  ;;  %v5003_v49 = vsub.f32 %v4971_v42, %v4991_v61  ;;  %v11358_v51 = vunpack.i.h.bf16 %v11356_v21  ;;  %v11357_v38 = vunpack.i.l.bf16 %v11356_v21 }
 0xa0a   :  { %v14417_v45 = vpop.eup %11518  ;;  %11526 = vpow2.f32 %v5014_v44 }
 0xa0b   :  { %v14419_v24 = vpop.eup %11520  ;;  %v5016_v62 = vmul.f32 1.442695, %v5003_v49  ;;  %v5025_v25 = vsel %vm1988_vm0, %v14417_v45, 0.0  ;;  %v11146_v5 = vpack.c.bf16 %v11358_v51, %v11357_v38 }
 0xa0c   :  { %5026 = vadd.xlane.f32.xlu0 %v5025_v25  ;;  %v4997_v60 = vpop.xlane.xlu0 %4996  ;;  %v5022_v59 = vsel %vm1988_vm0, %v14419_v24, 0.0  ;;  %v11366_v32 = vpop.permute.xlu1 %11365 }
 0xa0d   :  { %11528 = vpow2.f32 %v5016_v62  ;;  %v5005_v42 = vsub.f32 %v4973_v20, %v4997_v60  ;;  %11147 = vmatprep.subr.bf16.mxu1 %v11146_v5  ;;  %5023 = vadd.xlane.f32.xlu1 %v5022_v59  ;;  %v11368_v2 = vunpack.i.h.bf16 %v11366_v32  ;;  %v11367_v53 = vunpack.i.l.bf16 %v11366_v32 }
 0xa0e   :  { %11149 = vmatpush3.bf16.msra.mxu1 %v11146_v5  ;;  %v4406_v59 = vmul.f32 0.35355338, %v14366_v19  ;;  %v8312_v19 = vld [vmem:[%s15723_s18 + $0x78] sm:$0xff] }
 0xa0f   :  { %v14425_v8 = vpop.eup %11522  ;;  %v5020_v12 = vmul.f32 1.442695, %v5005_v42  ;;  %v14435_v30 = vpack.c.bf16 %v11368_v2, %v11367_v53  ;;  %v4408_v42 = vmul.f32 0.35355338, %v14370_v26 }
 0xa10   :  { %v11361_v41 = vpop.permute.xlu0 %11360  ;;  %v5028_v46 = vsel %vm1988_vm0, %v14425_v8, 0.0 }
 0xa11   :  { %11530 = vpow2.f32 %v5020_v12  ;;  %v11363_v39 = vunpack.i.h.bf16 %v11361_v41  ;;  %v11362_v50 = vunpack.i.l.bf16 %v11361_v41  ;;  %5029 = vadd.xlane.f32.xlu1 %v5028_v46  ;;  %v14495_v2 = vadd.f32 %v8312_v19, %v4408_v42  ;;  %v8305_v46 = vld [vmem:[%s15723_s18 + $0x40] sm:$0xff] }
 0xa12   :  { %v4401_v41 = vmul.f32 0.35355338, %v14360_v27  ;;  %v8309_v27 = vld [vmem:[%s15723_s18 + $0x60] sm:$0xff] }
 0xa13   :  { %v14429_v63 = vpop.eup %11524  ;;  %v11150_v28 = vpack.c.bf16 %v11363_v39, %v11362_v50  ;;  %v4447_v26 = vsel %vm1988_vm0, %v14495_v2, -inf  ;;  %v8307_v39 = vld [vmem:[%s15723_s18 + $0x50] sm:$0xff] }
 0xa14   :  { %v14431_v20 = vpop.eup %11526  ;;  %v5031_v56 = vsel %vm1988_vm0, %v14429_v63, 0.0  ;;  %v14508_v53 = vadd.f32 %v8305_v46, %v4401_v41 }
 0xa15   :  { %5032 = vadd.xlane.f32.xlu0 %v5031_v56  ;;  %11151 = vmatprep.subr.bf16.mxu1 %v11150_v28  ;;  %v5034_v44 = vsel %vm1988_vm0, %v14431_v20, 0.0 }
 0xa16   :  { %5035 = vadd.xlane.f32.xlu1 %v5034_v44  ;;  %11153 = vmatpush3.bf16.msra.mxu1 %v11150_v28  ;;  %v4426_v28 = vsel %vm1988_vm0, %v14508_v53, -inf }
 0xa17   :  { %v14439_v61 = vpop.eup %11528  ;;  %11156 = vmatprep.subr.msk.bf16.mxu1 %vm14137_vm2, %v14435_v30 }
 0xa18   :  { %v5037_v21 = vsel %vm1988_vm0, %v14439_v61, 0.0 }
 0xa19   :  { %5038 = vadd.xlane.f32.xlu0 %v5037_v21  ;;  %v8311_v21 = vld [vmem:[%s15723_s18 + $0x70] sm:$0xff] }
 0xa1b   :  { %v14446_v49 = vpop.eup %11530 }
 0xa1c   :  { %v5043_v51 = vsel %vm1988_vm0, %v14446_v49, 0.0 }
 0xa1d   :  { %5044 = vadd.xlane.f32.xlu0 %v5043_v51 }
 0xa27   :  { %5342 = vrot.lane.b32.xlu1 %v13901_v57, %s11961_s27 }
 0xa33   :  { %5340 = vrot.lane.b32.xlu0 %v13903_v0, %s11961_s27  ;;  %v4402_v0 = vmul.f32 0.35355338, %v14358_v23  ;;  %v8310_v23 = vld [vmem:[%s15723_s18 + $0x68] sm:$0xff] }
 0xa37   :  { %5344 = vrot.lane.b32.xlu0 %v13909_v7, %s11961_s27  ;;  %v8306_v7 = vld [vmem:[%s15723_s18 + $0x48] sm:$0xff] }
 0xa3b   :  { %5348 = vrot.lane.b32.xlu0 %v13913_v43, %s11961_s27  ;;  %v4404_v43 = vmul.f32 0.35355338, %v14362_v48  ;;  %v14485_v48 = vadd.f32 %v8310_v23, %v4406_v59 }
 0xa3d   :  { %v4994_v38 = vpop.xlane.xlu1 %4993 }
 0xa3e   :  { %v5004_v62 = vsub.f32 %v14411_v29, %v4994_v38  ;;  %v14470_v29 = vadd.f32 %v8306_v7, %v4402_v0 }
 0xa3f   :  { %5352 = vrot.lane.b32.xlu0 %v13917_v54, %s11961_s27  ;;  %v8308_v54 = vld [vmem:[%s15723_s18 + $0x58] sm:$0xff] }
 0xa40   :  { %v5018_v25 = vmul.f32 1.442695, %v5004_v62  ;;  %v14475_v60 = vadd.f32 %v8308_v54, %v4404_v43  ;;  %v4429_v32 = vsel %vm1988_vm0, %v14470_v29, -inf }
 0xa41   :  { %v11371_v38 = vpop.permute.xlu1 %11370 }
 0xa42   :  { %11532 = vpow2.f32 %v5018_v25  ;;  %v4435_v12 = vsel %vm1988_vm0, %v14475_v60, -inf  ;;  %v11373_v59 = vunpack.i.h.bf16 %v11371_v38 }
 0xa4c   :  { %v14461_v5 = vpop.eup %11532 }
 0xa4d   :  { %v5040_v57 = vsel %vm1988_vm0, %v14461_v5, 0.0 }
 0xa4e   :  { %5041 = vadd.xlane.f32.xlu1 %v5040_v57 }
 0xa5e   :  { %4430 = vmax.xlane.f32.xlu0 %v4429_v32  ;;  %v11372_v32 = vunpack.i.l.bf16 %v11371_v38 }
 0xa5f   :  { %5346 = vrot.lane.b32.xlu1 %v13907_v18, %s11961_s27  ;;  %v4441_v18 = vsel %vm1988_vm0, %v14485_v48, -inf }
 0xa62   :  { %4436 = vmax.xlane.f32.xlu0 %v4435_v12 }
 0xa63   :  { %5350 = vrot.lane.b32.xlu1 %v13911_v35, %s11961_s27  ;;  %v4403_v35 = vmul.f32 0.35355338, %v14364_v1  ;;  %v4407_v1 = vmul.f32 0.35355338, %v14372_v47 }
 0xa65   :  { %v14513_v50 = vadd.f32 %v8307_v39, %v4403_v35 }
 0xa66   :  { %4442 = vmax.xlane.f32.xlu0 %v4441_v18  ;;  %v11160_v18 = vpack.c.bf16 %v11373_v59, %v11372_v32 }
 0xa67   :  { %5354 = vrot.lane.b32.xlu1 %v13915_v9, %s11961_s27  ;;  %v4405_v9 = vmul.f32 0.35355338, %v14368_v58  ;;  %v4432_v44 = vsel %vm1988_vm0, %v14513_v50, -inf  ;;  %v14529_v58 = vadd.f32 %v8311_v21, %v4407_v1 }
 0xa69   :  { %v14521_v56 = vadd.f32 %v8309_v27, %v4405_v9  ;;  %v4444_v62 = vsel %vm1988_vm0, %v14529_v58, -inf }
 0xa6a   :  { %4448 = vmax.xlane.f32.xlu0 %v4447_v26 }
 0xa6b   :  { %v4438_v51 = vsel %vm1988_vm0, %v14521_v56, -inf }
 0xa8b   :  { %4427 = vmax.xlane.f32.xlu1 %v4426_v28 }
 0xa8f   :  { %4433 = vmax.xlane.f32.xlu1 %v4432_v44 }
 0xa93   :  { %4439 = vmax.xlane.f32.xlu1 %v4438_v51 }
 0xa97   :  { %4445 = vmax.xlane.f32.xlu1 %v4444_v62 }
 0xa99   :  { %v5027_v47 = vpop.xlane.xlu0 %5026 }
 0xa9a   :  { %11534 = vrcp.f32 %v5027_v47  ;;  %v5024_v25 = vpop.xlane.xlu1 %5023 }
 0xa9b   :  { %11536 = vrcp.f32 %v5024_v25 }
 0xa9e   :  { %v5030_v57 = vpop.xlane.xlu1 %5029 }
 0xa9f   :  { %11538 = vrcp.f32 %v5030_v57 }
 0xaa2   :  { %v5033_v0 = vpop.xlane.xlu0 %5032 }
 0xaa3   :  { %11540 = vrcp.f32 %v5033_v0  ;;  %v5036_v7 = vpop.xlane.xlu1 %5035 }
 0xaa4   :  { %v11535_v43 = vpop.eup %11534  ;;  %11542 = vrcp.f32 %v5036_v7 }
 0xaa5   :  { %v11537_v54 = vpop.eup %11536  ;;  %v5055_v12 = vmul.f32 %v11535_v43, %v14417_v45 }
 0xaa6   :  { %v5039_v23 = vpop.xlane.xlu0 %5038  ;;  %v5054_v42 = vmul.f32 %v11537_v54, %v14419_v24 }
 0xaa7   :  { %11544 = vrcp.f32 %v5039_v23 }
 0xaa8   :  { %11375 = vrot.lane.b32.xlu1 %v14151_v37, %s11959_s20  ;;  %10294 = vmatprep.mubr.msk.f32.mxu1 %vm1988_vm0, %v5054_v42 }
 0xaa9   :  { %v11539_v19 = vpop.eup %11538  ;;  %10295 = vmatmul.mubr.msk.f32.vlgmr.msra.gmra.mrb[152].mxu1 %vm1988_vm0, %v5055_v12 }
 0xaaa   :  { %11159 = vmatpush3.bf16.xpose.msk.msra.mxu1 %vm14137_vm2, %v14435_v30  ;;  %v5056_v26 = vmul.f32 %v11539_v19, %v14425_v8  ;;  %v5343_v30 = vpop.permute.xlu1 %5342 }
 0xaab   :  { %11162 = vmatprep.subr.msk.bf16.mxu1 %vm14137_vm2, %v11160_v18 }
 0xaac   :  { %10297 = vmatprep.mubr.msk.f32.mxu1 %vm1988_vm0, %v5056_v26 }
 0xaad   :  { %v11541_v45 = vpop.eup %11540 }
 0xaae   :  { %v11543_v24 = vpop.eup %11542  ;;  %v5057_v41 = vmul.f32 %v11541_v45, %v14429_v63  ;;  %v5045_v63 = vpop.xlane.xlu0 %5044 }
 0xaaf   :  { %v5058_v46 = vmul.f32 %v11543_v24, %v14431_v20  ;;  %11546 = vrcp.f32 %v5045_v63  ;;  %v6049_v63 = vld [vmem:[%s15723_s18] sm:$0xff] }
 0xab0   :  { %10298 = vmatmul.mubr.msk.f32.gmra.mrb[154].mxu1 %vm1988_vm0, %v5057_v41 }
 0xab1   :  { %v11545_v35 = vpop.eup %11544  ;;  %10300 = vmatprep.mubr.msk.f32.mxu1 %vm1988_vm0, %v5058_v46 }
 0xab2   :  { %11165 = vmatpush3.bf16.xpose.msk.msra.mxu1 %vm14137_vm2, %v11160_v18  ;;  %v5059_v8 = vmul.f32 %v11545_v35, %v14439_v61  ;;  %v5341_v39 = vpop.permute.xlu0 %5340  ;;  %v6050_v35 = vld [vmem:[%s15723_s18 + $0x8] sm:$0xff] }
 0xab3   :  { %11176 = vmatprep.subr.msk.bf16.mxu1 %vm14137_vm2, %v14153_v34 }
 0xab4   :  { %10301 = vmatmul.mubr.msk.f32.gmra.mrb[156].mxu1 %vm1988_vm0, %v5059_v8 }
 0xab6   :  { %v5345_v61 = vpop.permute.xlu0 %5344 }
 0xab9   :  { %v11547_v9 = vpop.eup %11546 }
 0xaba   :  { %v5061_v1 = vmul.f32 %v11547_v9, %v14446_v49  ;;  %v5349_v21 = vpop.permute.xlu0 %5348 }
 0xadb   :  { %v5042_v20 = vpop.xlane.xlu1 %5041 }
 0xadc   :  { %11548 = vrcp.f32 %v5042_v20 }
 0xadf   :  { %v5347_v44 = vpop.permute.xlu1 %5346 }
 0xae3   :  { %v5351_v49 = vpop.permute.xlu1 %5350 }
 0xae6   :  { %v11549_v28 = vpop.eup %11548 }
 0xae7   :  { %v5060_v27 = vmul.f32 %v11549_v28, %v14461_v5  ;;  %v5353_v5 = vpop.permute.xlu0 %5352 }
 0xae9   :  { %10303 = vmatprep.mubr.msk.f32.mxu1 %vm1988_vm0, %v5060_v27  ;;  %v6052_v27 = vld [vmem:[%s15723_s18 + $0x18] sm:$0xff] }
 0xaea   :  { %10304 = vmatmul.mubr.msk.f32.gmra.mrb[158].mxu1 %vm1988_vm0, %v5061_v1 }
 0xaeb   :  { %10328 = vmatprep.mubr.msk.f32.mxu1 %vm3728_vm1, %v5341_v39 }
 0xaee   :  { %10329 = vmatmul.mubr.msk.f32.vlgmr.msra.gmra.mrb[160].mxu1 %vm3728_vm1, %v5343_v30 }
 0xaef   :  { %11179 = vmatpush3.bf16.xpose.msk.msra.mxu1 %vm14137_vm2, %v14153_v34  ;;  %10331 = vmatprep.mubr.msk.f32.mxu1 %vm3728_vm1, %v5345_v61  ;;  %v5355_v34 = vpop.permute.xlu1 %5354 }
 0xaf0   :  { %11182 = vmatprep.subr.msk.bf16.mxu1 %vm14137_vm2, %v14157_v55 }
 0xaf2   :  { %10332 = vmatmul.mubr.msk.f32.gmra.mrb[162].mxu1 %vm3728_vm1, %v5347_v44 }
 0xaf3   :  { %10334 = vmatprep.mubr.msk.f32.mxu1 %vm3728_vm1, %v5349_v21 }
 0xaf6   :  { %10335 = vmatmul.mubr.msk.f32.gmra.mrb[164].mxu1 %vm3728_vm1, %v5351_v49 }
 0xaf7   :  { %11185 = vmatpush3.bf16.xpose.msk.msra.mxu1 %vm14137_vm2, %v14157_v55  ;;  %10337 = vmatprep.mubr.msk.f32.mxu1 %vm3728_vm1, %v5353_v5 }
 0xaf8   :  { %11187 = vmatprep.subr.bf16.mxu1 %v14173_v3 }
 0xafa   :  { %10338 = vmatmul.mubr.msk.f32.gmra.mrb[166].mxu1 %vm3728_vm1, %v5355_v34  ;;  %v6051_v34 = vld [vmem:[%s15723_s18 + $0x10] sm:$0xff] }
 0xafb   :  { %10382 = vmatprep.mubr.msk.f32.mxu1 %vm3728_vm1, %v13921_v15 }
 0xafe   :  { %10383 = vmatmul.mubr.msk.f32.vlgmr.msra.gmra.mrb[168].mxu1 %vm3728_vm1, %v13919_v6 }
 0xaff   :  { %11189 = vmatpush3.bf16.msra.mxu1 %v14173_v3  ;;  %10385 = vmatprep.mubr.msk.f32.mxu1 %vm3728_vm1, %v13925_v14 }
 0xb00   :  { %11191 = vmatprep.subr.bf16.mxu1 %v14181_v16 }
 0xb02   :  { %10386 = vmatmul.mubr.msk.f32.gmra.mrb[170].mxu1 %vm3728_vm1, %v13923_v22 }
 0xb03   :  { %11193 = vmatpush3.bf16.msra.mxu1 %v14181_v16  ;;  %10388 = vmatprep.mubr.msk.f32.mxu1 %vm3728_vm1, %v13929_v11 }
 0xb06   :  { %10389 = vmatmul.mubr.msk.f32.gmra.mrb[172].mxu1 %vm3728_vm1, %v13927_v40 }
 0xb07   :  { %10391 = vmatprep.mubr.msk.f32.mxu1 %vm3728_vm1, %v13944_v52 }
 0xb0a   :  { %10392 = vmatmul.mubr.msk.f32.gmra.mrb[174].mxu1 %vm3728_vm1, %v13938_v33 }
 0xb18   :  { %v14600_v55 = vpop.xlane.xlu1 %4427 }
 0xb1c   :  { %v14602_v3 = vpop.xlane.xlu1 %4433 }
 0xb20   :  { %v14604_v51 = vpop.xlane.xlu1 %4439 }
 0xb24   :  { %v14606_v38 = vpop.xlane.xlu1 %4445 }
 0xb28   :  { %v11376_v16 = vpop.permute.xlu1 %11375 }
 0xb29   :  { %v11378_v62 = vunpack.i.h.bf16 %v11376_v16  ;;  %v11377_v47 = vunpack.i.l.bf16 %v11376_v16 }
 0xb2b   :  { %v14608_v25 = vpack.c.bf16 %v11378_v62, %v11377_v47  ;;  %v6053_v47 = vld [vmem:[%s15723_s18 + $0x20] sm:$0xff] }
 0xb2d   :  { %11196 = vmatprep.subr.msk.bf16.mxu1 %vm14137_vm2, %v14608_v25 }
 0xb7c   :  { %v14613_v57 = vpop.f32.mrb[152].mxu1 }
 0xb7d   :  { %v14615_v0 = vpop.f32.mrb[153].mxu1 }
 0xb83   :  { %v14617_v7 = vpop.f32.mrb[154].mxu1 }
 0xb84   :  { %15760 = vst [vmem:[#allocation25_spill] sm:$0xff] %v14617_v7  ;;  %v14619_v43 = vpop.f32.mrb[155].mxu1 }
 0xb85   :  { %15761 = vst [vmem:[#allocation26_spill] sm:$0xff] %v14619_v43 }
 0xb87   :  { %v14621_v54 = vpop.f32.mrb[156].mxu1 }
 0xb88   :  { %15762 = vst [vmem:[#allocation27_spill] sm:$0xff] %v14621_v54  ;;  %v14623_v59 = vpop.f32.mrb[157].mxu1 }
 0xb89   :  { %15763 = vst [vmem:[#allocation28_spill] sm:$0xff] %v14623_v59 }
 0xbbd   :  { %v14625_v32 = vpop.f32.mrb[158].mxu1 }
 0xbbe   :  { %15764 = vst [vmem:[#allocation29_spill] sm:$0xff] %v14625_v32  ;;  %v14627_v23 = vpop.f32.mrb[159].mxu1 }
 0xbbf   :  { %15765 = vst [vmem:[#allocation30_spill] sm:$0xff] %v14627_v23 }
 0xbc1   :  { %v14629_v42 = vpop.f32.mrb[160].mxu1 }
 0xbc2   :  { %v14631_v12 = vpop.f32.mrb[161].mxu1 }
 0xbc5   :  { %v14633_v19 = vpop.f32.mrb[162].mxu1 }
 0xbc6   :  { %v14635_v18 = vpop.f32.mrb[163].mxu1 }
 0xbc9   :  { %v14637_v26 = vpop.f32.mrb[164].mxu1 }
 0xbca   :  { %v14639_v45 = vpop.f32.mrb[165].mxu1 }
 0xbcd   :  { %v14641_v24 = vpop.f32.mrb[166].mxu1 }
 0xbce   :  { %v14643_v41 = vpop.f32.mrb[167].mxu1 }
 0xbd1   :  { %v10384_v46 = vpop.f32.mrb[168].mxu1 }
 0xbd2   :  { %v6042_v8 = vmul.f32 0.35355338, %v10384_v46  ;;  %v6002_v30 = vpop.f32.mrb[169].mxu1 }
 0xbd3   :  { %v6041_v20 = vmul.f32 0.35355338, %v6002_v30 }
 0xbd4   :  { %v14651_v39 = vadd.f32 %v6050_v35, %v6042_v8 }
 0xbd5   :  { %v14653_v9 = vadd.f32 %v6049_v63, %v6041_v20  ;;  %v10387_v28 = vpop.f32.mrb[170].mxu1  ;;  %v6054_v63 = vld [vmem:[%s15723_s18 + $0x28] sm:$0xff] }
 0xbd6   :  { %v6044_v1 = vmul.f32 0.35355338, %v10387_v28  ;;  %v6012_v61 = vpop.f32.mrb[171].mxu1  ;;  %v6068_v44 = vsel %vm1988_vm0, %v14651_v39, -inf }
 0xbd7   :  { %v6043_v21 = vmul.f32 0.35355338, %v6012_v61  ;;  %6069 = vmax.xlane.f32.xlu1 %v6068_v44  ;;  %v6065_v49 = vsel %vm1988_vm0, %v14653_v9, -inf }
 0xbd8   :  { %v6060_v5 = vadd.f32 %v6052_v27, %v6044_v1  ;;  %6066 = vmax.xlane.f32.xlu0 %v6065_v49 }
 0xbd9   :  { %v10390_v16 = vpop.f32.mrb[172].mxu1  ;;  %v6059_v35 = vadd.f32 %v6051_v34, %v6043_v21  ;;  %v6056_v21 = vld [vmem:[%s15723_s18 + $0x38] sm:$0xff] }
 0xbda   :  { %v6022_v62 = vpop.f32.mrb[173].mxu1  ;;  %v6074_v46 = vsel %vm1988_vm0, %v6060_v5, -inf  ;;  %v6046_v8 = vmul.f32 0.35355338, %v10390_v16 }
 0xbdb   :  { %v6045_v30 = vmul.f32 0.35355338, %v6022_v62  ;;  %v6071_v44 = vsel %vm1988_vm0, %v6059_v35, -inf }
 0xbdc   :  { %6075 = vmax.xlane.f32.xlu0 %v6074_v46  ;;  %v6062_v1 = vadd.f32 %v6054_v63, %v6046_v8  ;;  %v6055_v46 = vld [vmem:[%s15723_s18 + $0x30] sm:$0xff]  ;;  %v14716_v63 = vpop.xlane.xlu0 %4430 }
 0xbdd   :  { %v6061_v20 = vadd.f32 %v6053_v47, %v6045_v30  ;;  %v10393_v28 = vpop.f32.mrb[174].mxu1 }
 0xbde   :  { %v6032_v27 = vpop.f32.mrb[175].mxu1  ;;  %v6048_v61 = vmul.f32 0.35355338, %v10393_v28  ;;  %v6080_v16 = vsel %vm1988_vm0, %v6062_v1, -inf }
 0xbdf   :  { %v6077_v49 = vsel %vm1988_vm0, %v6061_v20, -inf  ;;  %v6047_v47 = vmul.f32 0.35355338, %v6032_v27 }
 0xbe0   :  { %6072 = vmax.xlane.f32.xlu0 %v6071_v44  ;;  %6078 = vmax.xlane.f32.xlu1 %v6077_v49  ;;  %v6064_v34 = vadd.f32 %v6056_v21, %v6048_v61  ;;  %v14718_v28 = vpop.xlane.xlu0 %4436 }
 0xbe1   :  { %v14694_v8 = vadd.f32 %v6055_v46, %v6047_v47 }
 0xbe2   :  { %v6086_v62 = vsel %vm1988_vm0, %v6064_v34, -inf }
 0xbe3   :  { %v6083_v30 = vsel %vm1988_vm0, %v14694_v8, -inf }
 0xbe4   :  { %6081 = vmax.xlane.f32.xlu0 %v6080_v16  ;;  %v14720_v27 = vpop.xlane.xlu0 %4442 }
 0xbe8   :  { %6087 = vmax.xlane.f32.xlu0 %v6086_v62  ;;  %v14722_v61 = vpop.xlane.xlu0 %4448 }
 0xbf1   :  { %11385 = vrot.lane.b32.xlu1 %v14151_v37, %s11960_s15 }
 0xbfe   :  { %11380 = vrot.lane.b32.xlu0 %v14159_v31, %s11959_s20 }
 0xc02   :  { %6421 = vrot.lane.b32.xlu0 %v13919_v6, %s11959_s20 }
 0xc06   :  { %6425 = vrot.lane.b32.xlu0 %v13923_v22, %s11959_s20 }
 0xc0a   :  { %6427 = vrot.lane.b32.xlu0 %v13929_v11, %s11959_s20 }
 0xc0e   :  { %6431 = vrot.lane.b32.xlu0 %v13944_v52, %s11959_s20 }
 0xc12   :  { %6966 = vrot.lane.b32.xlu0 %v13921_v15, %s11960_s15 }
 0xc15   :  { %6084 = vmax.xlane.f32.xlu1 %v6083_v30 }
 0xc16   :  { %6970 = vrot.lane.b32.xlu0 %v13925_v14, %s11960_s15 }
 0xc26   :  { %6419 = vrot.lane.b32.xlu1 %v13921_v15, %s11959_s20 }
 0xc2a   :  { %6423 = vrot.lane.b32.xlu1 %v13925_v14, %s11959_s20 }
 0xc2e   :  { %11390 = vrot.lane.b32.xlu1 %v14159_v31, %s11960_s15 }
 0xc32   :  { %6429 = vrot.lane.b32.xlu1 %v13927_v40, %s11959_s20 }
 0xc36   :  { %6433 = vrot.lane.b32.xlu1 %v13938_v33, %s11959_s20 }
 0xc3a   :  { %6968 = vrot.lane.b32.xlu1 %v13919_v6, %s11960_s15 }
 0xc3e   :  { %6972 = vrot.lane.b32.xlu1 %v13923_v22, %s11960_s15 }
 0xc64   :  { %v6070_v44 = vpop.xlane.xlu1 %6069 }
 0xc65   :  { %v6090_v49 = vsub.f32 %v14651_v39, %v6070_v44  ;;  %v6067_v21 = vpop.xlane.xlu0 %6066 }
 0xc66   :  { %v6089_v16 = vsub.f32 %v14653_v9, %v6067_v21 }
 0xc67   :  { %v6099_v62 = vmul.f32 1.442695, %v6090_v49 }
 0xc68   :  { %v6097_v47 = vmul.f32 1.442695, %v6089_v16 }
 0xc69   :  { %11550 = vpow2.f32 %v6099_v62  ;;  %v6076_v46 = vpop.xlane.xlu0 %6075 }
 0xc6a   :  { %11552 = vpow2.f32 %v6097_v47  ;;  %v6092_v30 = vsub.f32 %v6060_v5, %v6076_v46 }
 0xc6c   :  { %v6103_v14 = vmul.f32 1.442695, %v6092_v30 }
 0xc6d   :  { %v6073_v22 = vpop.xlane.xlu0 %6072  ;;  %v6079_v32 = vpop.xlane.xlu1 %6078 }
 0xc6e   :  { %11554 = vpow2.f32 %v6103_v14  ;;  %v6091_v23 = vsub.f32 %v6059_v35, %v6073_v22  ;;  %v6093_v54 = vsub.f32 %v6061_v20, %v6079_v32 }
 0xc70   :  { %v6101_v59 = vmul.f32 1.442695, %v6091_v23  ;;  %v6105_v7 = vmul.f32 1.442695, %v6093_v54 }
 0xc71   :  { %v6082_v43 = vpop.xlane.xlu0 %6081  ;;  %v14756_v62 = vpop.permute.xlu1 %11385 }
 0xc72   :  { %11556 = vpow2.f32 %v6101_v59  ;;  %v6094_v39 = vsub.f32 %v6062_v1, %v6082_v43 }
 0xc73   :  { %v14726_v44 = vpop.eup %11550  ;;  %11558 = vpow2.f32 %v6105_v7 }
 0xc74   :  { %v14728_v9 = vpop.eup %11552  ;;  %v6107_v49 = vmul.f32 1.442695, %v6094_v39  ;;  %v6116_v5 = vsel %vm1988_vm0, %v14726_v44, 0.0  ;;  %v4450_v39 = vsub.f32 %v14508_v53, %v14600_v55 }
 0xc75   :  { %6117 = vadd.xlane.f32.xlu0 %v6116_v5  ;;  %v6088_v21 = vpop.xlane.xlu0 %6087  ;;  %v6113_v22 = vsel %vm1988_vm0, %v14728_v9, 0.0  ;;  %v4452_v5 = vsub.f32 %v14513_v50, %v14602_v3  ;;  %v4457_v50 = vsub.f32 %v14495_v2, %v14722_v61 }
 0xc76   :  { %11560 = vpow2.f32 %v6107_v49  ;;  %v6096_v14 = vsub.f32 %v6064_v34, %v6088_v21  ;;  %6114 = vadd.xlane.f32.xlu1 %v6113_v22  ;;  %v4458_v49 = vmul.f32 1.442695, %v4450_v39  ;;  %v4453_v22 = vsub.f32 %v14475_v60, %v14718_v28 }
 0xc77   :  { %v4472_v60 = vmul.f32 1.442695, %v4457_v50 }
 0xc78   :  { %v14734_v54 = vpop.eup %11554  ;;  %v6111_v43 = vmul.f32 1.442695, %v6096_v14  ;;  %v4462_v14 = vmul.f32 1.442695, %v4452_v5  ;;  %v4456_v5 = vsub.f32 %v14529_v58, %v14606_v38 }
 0xc79   :  { %v6122_v59 = vsel %vm1988_vm0, %v14734_v54, 0.0 }
 0xc7a   :  { %11562 = vpow2.f32 %v6111_v43  ;;  %6123 = vadd.xlane.f32.xlu0 %v6122_v59  ;;  %v4455_v59 = vsub.f32 %v14485_v48, %v14720_v27 }
 0xc7c   :  { %v14738_v7 = vpop.eup %11556  ;;  %v4468_v53 = vmul.f32 1.442695, %v4455_v59 }
 0xc7d   :  { %v6119_v32 = vsel %vm1988_vm0, %v14738_v7, 0.0  ;;  %v14742_v23 = vpop.eup %11558 }
 0xc7e   :  { %6120 = vadd.xlane.f32.xlu1 %v6119_v32  ;;  %v6125_v1 = vsel %vm1988_vm0, %v14742_v23, 0.0 }
 0xc80   :  { %v14744_v35 = vpop.eup %11560 }
 0xc81   :  { %v6128_v20 = vsel %vm1988_vm0, %v14744_v35, 0.0 }
 0xc82   :  { %6129 = vadd.xlane.f32.xlu0 %v6128_v20  ;;  %6126 = vadd.xlane.f32.xlu1 %v6125_v1 }
 0xc84   :  { %v14750_v34 = vpop.eup %11562 }
 0xc85   :  { %v6134_v16 = vsel %vm1988_vm0, %v14750_v34, 0.0 }
 0xc86   :  { %6135 = vadd.xlane.f32.xlu0 %v6134_v16  ;;  %v4451_v16 = vsub.f32 %v14470_v29, %v14716_v63 }
 0xc9c   :  { %6974 = vrot.lane.b32.xlu0 %v13929_v11, %s11960_s15 }
 0xca0   :  { %6978 = vrot.lane.b32.xlu0 %v13944_v52, %s11960_s15 }
 0xca2   :  { %v6085_v47 = vpop.xlane.xlu1 %6084 }
 0xca3   :  { %v6095_v46 = vsub.f32 %v14694_v8, %v6085_v47  ;;  %v4464_v8 = vmul.f32 1.442695, %v4453_v22  ;;  %v4460_v47 = vmul.f32 1.442695, %v4451_v16 }
 0xca5   :  { %v6109_v30 = vmul.f32 1.442695, %v6095_v46  ;;  %v4454_v46 = vsub.f32 %v14521_v56, %v14604_v51 }
 0xca6   :  { %v14805_v39 = vpop.permute.xlu1 %6419 }
 0xca7   :  { %11564 = vpow2.f32 %v6109_v30  ;;  %v14803_v30 = vpop.permute.xlu0 %11380 }
 0xca8   :  { %11566 = vpow2.f32 %v4458_v49  ;;  %v4466_v49 = vmul.f32 1.442695, %v4454_v46  ;;  %v5496_v46 = vmul.f32 0.35355338, %v14633_v19  ;;  %v8382_v19 = vld [vmem:[%s15723_s18 + $0xe8] sm:$0xff]  ;;  %v11382_v52 = vunpack.i.l.bf16 %v14803_v30 }
 0xca9   :  { %11568 = vpow2.f32 %v4462_v14 }
 0xcaa   :  { %11570 = vpow2.f32 %v4464_v8  ;;  %v14811_v14 = vpop.permute.xlu1 %6423 }
 0xcab   :  { %11572 = vpow2.f32 %v4468_v53  ;;  %v14809_v22 = vpop.permute.xlu0 %6421 }
 0xcac   :  { %11574 = vpow2.f32 %v4472_v60 }
 0xcad   :  { %11576 = vpow2.f32 %v4460_v47 }
 0xcae   :  { %11578 = vpow2.f32 %v4466_v49  ;;  %v14817_v56 = vpop.permute.xlu1 %11390 }
 0xcaf   :  { %v14815_v29 = vpop.permute.xlu0 %6425 }
 0xcb1   :  { %v14765_v21 = vpop.eup %11564 }
 0xcb2   :  { %v6131_v43 = vsel %vm1988_vm0, %v14765_v21, 0.0  ;;  %v14775_v55 = vpop.eup %11566  ;;  %v14827_v8 = vpop.permute.xlu1 %6429 }
 0xcb3   :  { %6132 = vadd.xlane.f32.xlu1 %v6131_v43  ;;  %v4474_v3 = vsel %vm1988_vm0, %v14775_v55, 0.0  ;;  %v14779_v28 = vpop.eup %11568  ;;  %v4470_v43 = vmul.f32 1.442695, %v4456_v5  ;;  %v14825_v38 = vpop.permute.xlu0 %6427  ;;  %v8380_v5 = vld [vmem:[%s15723_s18 + $0xd8] sm:$0xff] }
 0xcb4   :  { %v4480_v48 = vsel %vm1988_vm0, %v14779_v28, 0.0  ;;  %v14783_v27 = vpop.eup %11570 }
 0xcb5   :  { %v4483_v2 = vsel %vm1988_vm0, %v14783_v27, 0.0  ;;  %v14789_v61 = vpop.eup %11572  ;;  %11580 = vpow2.f32 %v4470_v43 }
 0xcb6   :  { %v4489_v32 = vsel %vm1988_vm0, %v14789_v61, 0.0  ;;  %v14795_v20 = vpop.eup %11574  ;;  %v14835_v60 = vpop.permute.xlu1 %6433 }
 0xcb7   :  { %v4495_v1 = vsel %vm1988_vm0, %v14795_v20, 0.0  ;;  %v14819_v51 = vpop.eup %11576  ;;  %v14833_v50 = vpop.permute.xlu0 %6431 }
 0xcb8   :  { %v4477_v63 = vsel %vm1988_vm0, %v14819_v51, 0.0  ;;  %v14823_v58 = vpop.eup %11578 }
 0xcb9   :  { %v4486_v59 = vsel %vm1988_vm0, %v14823_v58, 0.0 }
 0xcbf   :  { %4475 = vadd.xlane.f32.xlu0 %v4474_v3  ;;  %v14831_v53 = vpop.eup %11580 }
 0xcc0   :  { %v4492_v3 = vsel %vm1988_vm0, %v14831_v53, 0.0 }
 0xcc3   :  { %4481 = vadd.xlane.f32.xlu0 %v4480_v48  ;;  %v14839_v48 = vpop.permute.xlu0 %6966 }
 0xcc4   :  { %6976 = vrot.lane.b32.xlu1 %v13927_v40, %s11960_s15 }
 0xcc7   :  { %4484 = vadd.xlane.f32.xlu0 %v4483_v2  ;;  %v14841_v2 = vpop.permute.xlu1 %6968  ;;  %v14847_v16 = vpop.permute.xlu0 %6970 }
 0xcc8   :  { %6980 = vrot.lane.b32.xlu1 %v13938_v33, %s11960_s15 }
 0xccb   :  { %4490 = vadd.xlane.f32.xlu0 %v4489_v32  ;;  %v5494_v32 = vmul.f32 0.35355338, %v14629_v42  ;;  %v14852_v49 = vpop.permute.xlu1 %6972  ;;  %v5498_v42 = vmul.f32 0.35355338, %v14637_v26 }
 0xccf   :  { %4496 = vadd.xlane.f32.xlu0 %v4495_v1  ;;  %v8378_v1 = vld [vmem:[%s15723_s18 + $0xc8] sm:$0xff] }
 0xcd0   :  { %v14849_v47 = vadd.f32 %v8378_v1, %v5494_v32  ;;  %v14867_v32 = vadd.f32 %v8382_v19, %v5498_v42  ;;  %v5500_v1 = vmul.f32 0.35355338, %v14641_v24  ;;  %v11383_v19 = vunpack.i.h.bf16 %v14803_v30 }
 0xce5   :  { %11400 = vrot.lane.b32.xlu0 %v14167_v17, %s11959_s20 }
 0xcec   :  { %4478 = vadd.xlane.f32.xlu1 %v4477_v63  ;;  %v14857_v63 = vadd.f32 %v8380_v5, %v5496_v46  ;;  %v8384_v46 = vld [vmem:[%s15723_s18 + $0xf8] sm:$0xff] }
 0xcee   :  { %v5527_v26 = vsel %vm1988_vm0, %v14857_v63, -inf }
 0xcf0   :  { %4487 = vadd.xlane.f32.xlu1 %v4486_v59 }
 0xcf4   :  { %4493 = vadd.xlane.f32.xlu1 %v4492_v3  ;;  %v5521_v3 = vsel %vm1988_vm0, %v14849_v47, -inf }
 0xd02   :  { %v6118_v43 = vpop.xlane.xlu0 %6117 }
 0xd03   :  { %11582 = vrcp.f32 %v6118_v43  ;;  %v6115_v59 = vpop.xlane.xlu1 %6114  ;;  %v14875_v43 = vadd.f32 %v8384_v46, %v5500_v1 }
 0xd04   :  { %11584 = vrcp.f32 %v6115_v59  ;;  %5522 = vmax.xlane.f32.xlu0 %v5521_v3  ;;  %v5533_v3 = vsel %vm1988_vm0, %v14867_v32, -inf }
 0xd05   :  { %11395 = vrot.lane.b32.xlu1 %v14161_v36, %s11959_s20 }
 0xd07   :  { %v6124_v5 = vpop.xlane.xlu0 %6123 }
 0xd08   :  { %5528 = vmax.xlane.f32.xlu0 %v5527_v26  ;;  %11586 = vrcp.f32 %v6124_v5  ;;  %v5539_v26 = vsel %vm1988_vm0, %v14875_v43, -inf  ;;  %v11200_v5 = vpack.c.bf16 %v11383_v19, %v11382_v52  ;;  %v5495_v19 = vmul.f32 0.35355338, %v14635_v18 }
 0xd09   :  { %v5499_v18 = vmul.f32 0.35355338, %v14643_v41 }
 0xd0b   :  { %v6121_v59 = vpop.xlane.xlu1 %6120 }
 0xd0c   :  { %11588 = vrcp.f32 %v6121_v59  ;;  %5534 = vmax.xlane.f32.xlu0 %v5533_v3 }
 0xd0d   :  { %v11583_v42 = vpop.eup %11582 }
 0xd0e   :  { %v11585_v24 = vpop.eup %11584  ;;  %v6146_v46 = vmul.f32 %v11583_v42, %v14726_v44 }
 0xd0f   :  { %v6130_v33 = vpop.xlane.xlu0 %6129  ;;  %v6127_v11 = vpop.xlane.xlu1 %6126  ;;  %v6145_v1 = vmul.f32 %v11585_v24, %v14728_v9  ;;  %v11388_v9 = vunpack.i.h.bf16 %v14756_v62 }
 0xd10   :  { %11590 = vrcp.f32 %v6130_v33  ;;  %5540 = vmax.xlane.f32.xlu0 %v5539_v26  ;;  %v11387_v33 = vunpack.i.l.bf16 %v14756_v62 }
 0xd11   :  { %11592 = vrcp.f32 %v6127_v11  ;;  %10402 = vmatprep.mubr.msk.f32.mxu1 %vm1988_vm0, %v6145_v1 }
 0xd12   :  { %10403 = vmatmul.mubr.msk.f32.vlgmr.msra.gmra.mrb[176].mxu1 %vm1988_vm0, %v6146_v46  ;;  %v11587_v30 = vpop.eup %11586  ;;  %v11214_v3 = vpack.c.bf16 %v11388_v9, %v11387_v33 }
 0xd13   :  { %11199 = vmatpush3.bf16.xpose.msk.msra.mxu1 %vm14137_vm2, %v14608_v25  ;;  %v6148_v44 = vmul.f32 %v11587_v30, %v14734_v54  ;;  %v5493_v54 = vmul.f32 0.35355338, %v14631_v12  ;;  %v8381_v12 = vld [vmem:[%s15723_s18 + $0xe0] sm:$0xff]  ;;  %v8383_v30 = vld [vmem:[%s15723_s18 + $0xf0] sm:$0xff]  ;;  %v6136_v33 = vpop.xlane.xlu0 %6135 }
 0xd14   :  { %11202 = vmatprep.subr.msk.bf16.mxu1 %vm14137_vm2, %v11200_v5  ;;  %11594 = vrcp.f32 %v6136_v33 }
 0xd16   :  { %v11589_v59 = vpop.eup %11588 }
 0xd17   :  { %v6147_v11 = vmul.f32 %v11589_v59, %v14738_v7  ;;  %v8377_v7 = vld [vmem:[%s15723_s18 + $0xc0] sm:$0xff] }
 0xd18   :  { %v14910_v24 = vadd.f32 %v8377_v7, %v5493_v54  ;;  %v11393_v7 = vunpack.i.h.bf16 %v14817_v56 }
 0xd19   :  { %10405 = vmatprep.mubr.msk.f32.mxu1 %vm1988_vm0, %v6147_v11  ;;  %v6975_v11 = vpop.permute.xlu0 %6974 }
 0xd1a   :  { %v11591_v52 = vpop.eup %11590  ;;  %10406 = vmatmul.mubr.msk.f32.gmra.mrb[178].mxu1 %vm1988_vm0, %v6148_v44  ;;  %v5518_v1 = vsel %vm1988_vm0, %v14910_v24, -inf }
 0xd1b   :  { %v11593_v25 = vpop.eup %11592  ;;  %11205 = vmatpush3.bf16.xpose.msk.msra.mxu1 %vm14137_vm2, %v11200_v5  ;;  %v6150_v42 = vmul.f32 %v11591_v52, %v14744_v35  ;;  %v8379_v35 = vld [vmem:[%s15723_s18 + $0xd0] sm:$0xff] }
 0xd1c   :  { %11216 = vmatprep.subr.msk.bf16.mxu1 %vm14137_vm2, %v11214_v3  ;;  %v6149_v62 = vmul.f32 %v11593_v25, %v14742_v23  ;;  %v14916_v26 = vadd.f32 %v8379_v35, %v5495_v19  ;;  %v5497_v23 = vmul.f32 0.35355338, %v14639_v45  ;;  %v14932_v45 = vadd.f32 %v8383_v30, %v5499_v18 }
 0xd1d   :  { %v6979_v44 = vpop.permute.xlu0 %6978  ;;  %v11392_v19 = vunpack.i.l.bf16 %v14817_v56 }
 0xd1e   :  { %10408 = vmatprep.mubr.msk.f32.mxu1 %vm1988_vm0, %v6149_v62  ;;  %v14924_v46 = vadd.f32 %v8381_v12, %v5497_v23  ;;  %v5524_v5 = vsel %vm1988_vm0, %v14916_v26, -inf  ;;  %v5536_v9 = vsel %vm1988_vm0, %v14932_v45, -inf  ;;  %v11595_v52 = vpop.eup %11594 }
 0xd1f   :  { %10409 = vmatmul.mubr.msk.f32.gmra.mrb[180].mxu1 %vm1988_vm0, %v6150_v42  ;;  %v6152_v54 = vmul.f32 %v11595_v52, %v14750_v34  ;;  %v11220_v35 = vpack.c.bf16 %v11393_v7, %v11392_v19 }
 0xd20   :  { %v5530_v59 = vsel %vm1988_vm0, %v14924_v46, -inf }
 0xd29   :  { %5519 = vmax.xlane.f32.xlu1 %v5518_v1 }
 0xd2d   :  { %5525 = vmax.xlane.f32.xlu1 %v5524_v5 }
 0xd31   :  { %5531 = vmax.xlane.f32.xlu1 %v5530_v59 }
 0xd35   :  { %5537 = vmax.xlane.f32.xlu1 %v5536_v9 }
 0xd40   :  { %v6133_v41 = vpop.xlane.xlu1 %6132 }
 0xd41   :  { %11596 = vrcp.f32 %v6133_v41 }
 0xd4b   :  { %v11597_v25 = vpop.eup %11596 }
 0xd4c   :  { %v4476_v42 = vpop.xlane.xlu0 %4475  ;;  %v6151_v62 = vmul.f32 %v11597_v25, %v14765_v21 }
 0xd4d   :  { %11598 = vrcp.f32 %v4476_v42 }
 0xd4e   :  { %10411 = vmatprep.mubr.msk.f32.mxu1 %vm1988_vm0, %v6151_v62 }
 0xd4f   :  { %10412 = vmatmul.mubr.msk.f32.gmra.mrb[182].mxu1 %vm1988_vm0, %v6152_v54 }
 0xd50   :  { %10436 = vmatprep.mubr.msk.f32.mxu1 %vm3728_vm1, %v14805_v39  ;;  %v4482_v39 = vpop.xlane.xlu0 %4481 }
 0xd53   :  { %10437 = vmatmul.mubr.msk.f32.vlgmr.msra.gmra.mrb[184].mxu1 %vm3728_vm1, %v14809_v22 }
 0xd54   :  { %11219 = vmatpush3.bf16.xpose.msk.msra.mxu1 %vm14137_vm2, %v11214_v3  ;;  %10439 = vmatprep.mubr.msk.f32.mxu1 %vm3728_vm1, %v14811_v14  ;;  %v4485_v14 = vpop.xlane.xlu0 %4484 }
 0xd55   :  { %11222 = vmatprep.subr.msk.bf16.mxu1 %vm14137_vm2, %v11220_v35 }
 0xd57   :  { %v11599_v34 = vpop.eup %11598  ;;  %10440 = vmatmul.mubr.msk.f32.gmra.mrb[186].mxu1 %vm3728_vm1, %v14815_v29 }
 0xd58   :  { %10442 = vmatprep.mubr.msk.f32.mxu1 %vm3728_vm1, %v14825_v38  ;;  %v4506_v21 = vmul.f32 %v11599_v34, %v14775_v55  ;;  %v6977_v55 = vpop.permute.xlu1 %6976  ;;  %v4491_v29 = vpop.xlane.xlu0 %4490 }
 0xd5a   :  { %10240 = vmatprep.mubr.msk.f32.mxu0 %vm1988_vm0, %v4506_v21 }
 0xd5b   :  { %10443 = vmatmul.mubr.msk.f32.gmra.mrb[188].mxu1 %vm3728_vm1, %v14827_v8 }
 0xd5c   :  { %11225 = vmatpush3.bf16.xpose.msk.msra.mxu1 %vm14137_vm2, %v11220_v35  ;;  %10445 = vmatprep.mubr.msk.f32.mxu1 %vm3728_vm1, %v14833_v50  ;;  %v6981_v22 = vpop.permute.xlu1 %6980  ;;  %v4497_v38 = vpop.xlane.xlu0 %4496 }
 0xd5f   :  { %10446 = vmatmul.mubr.msk.f32.gmra.mrb[190].mxu1 %vm3728_vm1, %v14835_v60 }
 0xd60   :  { %10490 = vmatprep.mubr.msk.f32.mxu1 %vm3728_vm1, %v14839_v48  ;;  %v11401_v60 = vpop.permute.xlu0 %11400 }
 0xd63   :  { %10491 = vmatmul.mubr.msk.f32.vlgmr.msra.gmra.mrb[192].mxu1 %vm3728_vm1, %v14841_v2  ;;  %v11403_v2 = vunpack.i.h.bf16 %v11401_v60 }
 0xd64   :  { %10493 = vmatprep.mubr.msk.f32.mxu1 %vm3728_vm1, %v14847_v16  ;;  %v11402_v16 = vunpack.i.l.bf16 %v11401_v60 }
 0xd66   :  { %v11130_v1 = vpack.c.bf16 %v11403_v2, %v11402_v16 }
 0xd67   :  { %10494 = vmatmul.mubr.msk.f32.gmra.mrb[194].mxu1 %vm3728_vm1, %v14852_v49 }
 0xd68   :  { %10496 = vmatprep.mubr.msk.f32.mxu1 %vm3728_vm1, %v6975_v11 }
 0xd6b   :  { %10497 = vmatmul.mubr.msk.f32.gmra.mrb[196].mxu1 %vm3728_vm1, %v6977_v55 }
 0xd6c   :  { %10499 = vmatprep.mubr.msk.f32.mxu1 %vm3728_vm1, %v6979_v44 }
 0xd6f   :  { %10500 = vmatmul.mubr.msk.f32.gmra.mrb[198].mxu1 %vm3728_vm1, %v6981_v22 }
 0xd79   :  { %v4479_v56 = vpop.xlane.xlu1 %4478 }
 0xd7a   :  { %11600 = vrcp.f32 %v4479_v56 }
 0xd7b   :  { %11602 = vrcp.f32 %v4482_v39 }
 0xd7c   :  { %11604 = vrcp.f32 %v4485_v14 }
 0xd7d   :  { %v4488_v8 = vpop.xlane.xlu1 %4487 }
 0xd7e   :  { %11606 = vrcp.f32 %v4488_v8 }
 0xd7f   :  { %11608 = vrcp.f32 %v4491_v29 }
 0xd81   :  { %v4494_v50 = vpop.xlane.xlu1 %4493 }
 0xd82   :  { %11610 = vrcp.f32 %v4494_v50 }
 0xd83   :  { %11612 = vrcp.f32 %v4497_v38 }
 0xd84   :  { %v11601_v12 = vpop.eup %11600 }
 0xd85   :  { %v11396_v48 = vpop.permute.xlu1 %11395  ;;  %v11603_v18 = vpop.eup %11602  ;;  %v4507_v5 = vmul.f32 %v11601_v12, %v14819_v51 }
 0xd86   :  { %v11398_v49 = vunpack.i.h.bf16 %v11396_v48  ;;  %v11397_v3 = vunpack.i.l.bf16 %v11396_v48  ;;  %v11605_v30 = vpop.eup %11604  ;;  %v4508_v9 = vmul.f32 %v11603_v18, %v14779_v28 }
 0xd87   :  { %v4509_v41 = vmul.f32 %v11605_v30, %v14783_v27 }
 0xd88   :  { %v11126_v23 = vpack.c.bf16 %v11398_v49, %v11397_v3  ;;  %v11607_v33 = vpop.eup %11606 }
 0xd89   :  { %v11609_v11 = vpop.eup %11608  ;;  %v4510_v52 = vmul.f32 %v11607_v33, %v14823_v58 }
 0xd8a   :  { %11127 = vmatprep.subr.bf16.mxu0 %v11126_v23  ;;  %v4511_v51 = vmul.f32 %v11609_v11, %v14789_v61 }
 0xd8b   :  { %11129 = vmatpush3.bf16.msra.mxu0 %v11126_v23 }
 0xd8c   :  { %11131 = vmatprep.subr.bf16.mxu0 %v11130_v1  ;;  %v11611_v25 = vpop.eup %11610 }
 0xd8d   :  { %v11613_v42 = vpop.eup %11612  ;;  %v4512_v62 = vmul.f32 %v11611_v25, %v14831_v53 }
 0xd8e   :  { %v4513_v27 = vmul.f32 %v11613_v42, %v14795_v20 }
 0xd8f   :  { %11133 = vmatpush3.bf16.msra.mxu0 %v11130_v1 }
 0xd91   :  { %v5523_v59 = vpop.xlane.xlu0 %5522 }
 0xd92   :  { %10241 = vmatmul.mubr.msk.f32.vlgmr.msra.gmra.mrb[128].mxu0 %vm1988_vm0, %v4507_v5  ;;  %v5543_v53 = vsub.f32 %v14849_v47, %v5523_v59  ;;  %v15041_v59 = vld [vmem:[%s15724_s19 + $0x8] sm:$0xff] }
 0xd93   :  { %10243 = vmatprep.mubr.msk.f32.mxu0 %vm1988_vm0, %v4508_v9  ;;  %10252 = vmatprep.subr.mxu0 %v15041_v59 }
 0xd94   :  { %v5552_v21 = vmul.f32 1.442695, %v5543_v53  ;;  %10253 = vmatpush3.msra.mxu0 %v15041_v59  ;;  %v8479_v53 = vld [vmem:[%s15723_s18 + $0x88] sm:$0xff] }
 0xd95   :  { %v5529_v44 = vpop.xlane.xlu0 %5528 }
 0xd96   :  { %10244 = vmatmul.mubr.msk.f32.gmra.mrb[130].mxu0 %vm1988_vm0, %v4509_v41  ;;  %v5545_v39 = vsub.f32 %v14857_v63, %v5529_v44  ;;  %v15056_v44 = vld [vmem:[%s15724_s19 + $0x10] sm:$0xff] }
 0xd97   :  { %10246 = vmatprep.mubr.msk.f32.mxu0 %vm1988_vm0, %v4510_v52  ;;  %10306 = vmatprep.subr.mxu0 %v15056_v44 }
 0xd98   :  { %v5556_v29 = vmul.f32 1.442695, %v5545_v39 }
 0xd99   :  { %v5535_v28 = vpop.xlane.xlu0 %5534 }
 0xd9a   :  { %10247 = vmatmul.mubr.msk.f32.gmra.mrb[132].mxu0 %vm1988_vm0, %v4511_v51  ;;  %v5547_v47 = vsub.f32 %v14867_v32, %v5535_v28 }
 0xd9b   :  { %10249 = vmatprep.mubr.msk.f32.mxu0 %vm1988_vm0, %v4512_v62 }
 0xd9c   :  { %v5560_v63 = vmul.f32 1.442695, %v5547_v47 }
 0xd9d   :  { %v5541_v54 = vpop.xlane.xlu0 %5540 }
 0xd9e   :  { %v5549_v58 = vsub.f32 %v14875_v43, %v5541_v54  ;;  %10250 = vmatmul.mubr.msk.f32.gmra.mrb[134].mxu0 %vm1988_vm0, %v4513_v27 }
 0xda0   :  { %v5564_v7 = vmul.f32 1.442695, %v5549_v58 }
 0xda2   :  { %11614 = vpow2.f32 %v5564_v7 }
 0xdac   :  { %v14995_v19 = vpop.eup %11614 }
 0xdad   :  { %v5587_v61 = vsel %vm1988_vm0, %v14995_v19, 0.0 }
 0xdae   :  { %5588 = vadd.xlane.f32.xlu0 %v5587_v61 }
 0xdb6   :  { %v5520_v35 = vpop.xlane.xlu1 %5519 }
 0xdb7   :  { %v5542_v34 = vsub.f32 %v14910_v24, %v5520_v35 }
 0xdb9   :  { %v5550_v20 = vmul.f32 1.442695, %v5542_v34 }
 0xdba   :  { %v5526_v55 = vpop.xlane.xlu1 %5525 }
 0xdbb   :  { %11616 = vpow2.f32 %v5550_v20  ;;  %v5544_v43 = vsub.f32 %v14916_v26, %v5526_v55 }
 0xdbc   :  { %11618 = vpow2.f32 %v5552_v21  ;;  %v8478_v21 = vld [vmem:[%s15723_s18 + $0x80] sm:$0xff] }
 0xdbd   :  { %v5554_v22 = vmul.f32 1.442695, %v5544_v43 }
 0xdbe   :  { %v5532_v14 = vpop.xlane.xlu1 %5531 }
 0xdbf   :  { %11620 = vpow2.f32 %v5554_v22  ;;  %v5546_v56 = vsub.f32 %v14924_v46, %v5532_v14  ;;  %v8481_v22 = vld [vmem:[%s15723_s18 + $0x98] sm:$0xff] }
 0xdc0   :  { %11622 = vpow2.f32 %v5556_v29 }
 0xdc1   :  { %v5558_v24 = vmul.f32 1.442695, %v5546_v56 }
 0xdc2   :  { %v5538_v8 = vpop.xlane.xlu1 %5537 }
 0xdc3   :  { %11624 = vpow2.f32 %v5558_v24  ;;  %v5548_v60 = vsub.f32 %v14932_v45, %v5538_v8  ;;  %v8480_v24 = vld [vmem:[%s15723_s18 + $0x90] sm:$0xff] }
 0xdc4   :  { %11626 = vpow2.f32 %v5560_v63 }
 0xdc5   :  { %v15004_v38 = vpop.eup %11616  ;;  %v5562_v32 = vmul.f32 1.442695, %v5548_v60 }
 0xdc6   :  { %v5566_v50 = vsel %vm1988_vm0, %v15004_v38, 0.0  ;;  %v15009_v26 = vpop.eup %11618 }
 0xdc7   :  { %5567 = vadd.xlane.f32.xlu1 %v5566_v50  ;;  %v5569_v46 = vsel %vm1988_vm0, %v15009_v26, 0.0  ;;  %11628 = vpow2.f32 %v5562_v32 }
 0xdc9   :  { %v15014_v48 = vpop.eup %11620 }
 0xdca   :  { %v5572_v2 = vsel %vm1988_vm0, %v15014_v48, 0.0  ;;  %v15018_v16 = vpop.eup %11622 }
 0xdcb   :  { %5570 = vadd.xlane.f32.xlu1 %v5569_v46  ;;  %v5575_v49 = vsel %vm1988_vm0, %v15018_v16, 0.0 }
 0xdcd   :  { %v15022_v3 = vpop.eup %11624 }
 0xdce   :  { %v5578_v45 = vsel %vm1988_vm0, %v15022_v3, 0.0  ;;  %v15026_v23 = vpop.eup %11626 }
 0xdcf   :  { %5573 = vadd.xlane.f32.xlu1 %v5572_v2  ;;  %v5581_v1 = vsel %vm1988_vm0, %v15026_v23, 0.0 }
 0xdd1   :  { %v15030_v12 = vpop.eup %11628 }
 0xdd2   :  { %v5584_v18 = vsel %vm1988_vm0, %v15030_v12, 0.0 }
 0xdd3   :  { %5576 = vadd.xlane.f32.xlu1 %v5575_v49  ;;  %v8483_v49 = vld [vmem:[%s15723_s18 + $0xa8] sm:$0xff] }
 0xdd7   :  { %5579 = vadd.xlane.f32.xlu1 %v5578_v45 }
 0xddb   :  { %5582 = vadd.xlane.f32.xlu1 %v5581_v1 }
 0xddf   :  { %5585 = vadd.xlane.f32.xlu1 %v5584_v18 }
 0xde5   :  { %v15034_v5 = vpop.f32.mrb[176].mxu1 }
 0xde6   :  { %v15036_v30 = vpop.f32.mrb[177].mxu1 }
 0xded   :  { %v15045_v9 = vpop.f32.mrb[178].mxu1 }
 0xdee   :  { %v15047_v33 = vpop.f32.mrb[179].mxu1 }
 0xdf2   :  { %v15049_v41 = vpop.f32.mrb[180].mxu1 }
 0xdf3   :  { %v15051_v11 = vpop.f32.mrb[181].mxu1 }
 0xe22   :  { %v15059_v52 = vpop.f32.mrb[182].mxu1 }
 0xe23   :  { %v15061_v25 = vpop.f32.mrb[183].mxu1 }
 0xe26   :  { %v15063_v51 = vpop.f32.mrb[184].mxu1 }
 0xe27   :  { %v15065_v42 = vpop.f32.mrb[185].mxu1 }
 0xe2a   :  { %v15067_v28 = vpop.f32.mrb[186].mxu1 }
 0xe2b   :  { %v15069_v62 = vpop.f32.mrb[187].mxu1 }
 0xe2e   :  { %v15071_v27 = vpop.f32.mrb[188].mxu1 }
 0xe2f   :  { %v15073_v54 = vpop.f32.mrb[189].mxu1 }
 0xe32   :  { %v15075_v58 = vpop.f32.mrb[190].mxu1 }
 0xe33   :  { %v15077_v7 = vpop.f32.mrb[191].mxu1 }
 0xe36   :  { %v10492_v61 = vpop.f32.mrb[192].mxu1 }
 0xe37   :  { %v7120_v35 = vmul.f32 0.35355338, %v10492_v61  ;;  %v7080_v34 = vpop.f32.mrb[193].mxu1 }
 0xe38   :  { %v7119_v20 = vmul.f32 0.35355338, %v7080_v34 }
 0xe39   :  { %v15085_v55 = vadd.f32 %v8479_v53, %v7120_v35  ;;  %v8482_v35 = vld [vmem:[%s15723_s18 + $0xa0] sm:$0xff] }
 0xe3a   :  { %v15087_v43 = vadd.f32 %v8478_v21, %v7119_v20  ;;  %v10495_v39 = vpop.f32.mrb[194].mxu1 }
 0xe3b   :  { %v7122_v14 = vmul.f32 0.35355338, %v10495_v39  ;;  %v7090_v29 = vpop.f32.mrb[195].mxu1  ;;  %v7146_v56 = vsel %vm1988_vm0, %v15085_v55, -inf  ;;  %v8485_v39 = vld [vmem:[%s15723_s18 + $0xb8] sm:$0xff] }
 0xe3c   :  { %v7121_v47 = vmul.f32 0.35355338, %v7090_v29  ;;  %7147 = vmax.xlane.f32.xlu0 %v7146_v56  ;;  %v7143_v8 = vsel %vm1988_vm0, %v15087_v43, -inf  ;;  %v8484_v56 = vld [vmem:[%s15723_s18 + $0xb0] sm:$0xff] }
 0xe3d   :  { %v15099_v50 = vadd.f32 %v8481_v22, %v7122_v14  ;;  %7144 = vmax.xlane.f32.xlu1 %v7143_v8 }
 0xe3e   :  { %v10498_v63 = vpop.f32.mrb[196].mxu1  ;;  %v15101_v60 = vadd.f32 %v8480_v24, %v7121_v47 }
 0xe3f   :  { %v7124_v46 = vmul.f32 0.35355338, %v10498_v63  ;;  %v7100_v32 = vpop.f32.mrb[197].mxu1  ;;  %v7152_v2 = vsel %vm1988_vm0, %v15099_v50, -inf }
 0xe40   :  { %7153 = vmax.xlane.f32.xlu0 %v7152_v2  ;;  %v7123_v18 = vmul.f32 0.35355338, %v7100_v32  ;;  %v7149_v53 = vsel %vm1988_vm0, %v15101_v60, -inf }
 0xe41   :  { %v15108_v1 = vadd.f32 %v8483_v49, %v7124_v46 }
 0xe42   :  { %v10501_v45 = vpop.f32.mrb[198].mxu1  ;;  %v15115_v34 = vadd.f32 %v8482_v35, %v7123_v18  ;;  %v15768_v18 = vld [vmem:[#allocation28_spill] sm:$0xff]  ;;  %v15771_v35 = vld [vmem:[#allocation29_spill] sm:$0xff] }
 0xe43   :  { %v7110_v61 = vpop.f32.mrb[199].mxu1  ;;  %v7126_v21 = vmul.f32 0.35355338, %v10501_v45  ;;  %v7158_v20 = vsel %vm1988_vm0, %v15108_v1, -inf  ;;  %v15767_v45 = vld [vmem:[#allocation25_spill] sm:$0xff] }
 0xe44   :  { %7150 = vmax.xlane.f32.xlu0 %v7149_v53  ;;  %v7125_v14 = vmul.f32 0.35355338, %v7110_v61  ;;  %v7155_v29 = vsel %vm1988_vm0, %v15115_v34, -inf  ;;  %v15769_v61 = vld [vmem:[#allocation27_spill] sm:$0xff]  ;;  %v15770_v53 = vld [vmem:[#allocation30_spill] sm:$0xff] }
 0xe45   :  { %v15122_v22 = vadd.f32 %v8485_v39, %v7126_v21 }
 0xe46   :  { %v15131_v47 = vadd.f32 %v8484_v56, %v7125_v14 }
 0xe47   :  { %v7164_v24 = vsel %vm1988_vm0, %v15122_v22, -inf }
 0xe48   :  { %7159 = vmax.xlane.f32.xlu0 %v7158_v20  ;;  %v7161_v8 = vsel %vm1988_vm0, %v15131_v47, -inf }
 0xe4c   :  { %7156 = vmax.xlane.f32.xlu0 %v7155_v29  ;;  %v15180_v29 = vpop.xlane.xlu0 %5588 }
 0xe4e   :  { %11405 = vrot.lane.b32.xlu1 %v14161_v36, %s11961_s27 }
 0xe50   :  { %7165 = vmax.xlane.f32.xlu0 %v7164_v24 }
 0xe52   :  { %11415 = vrot.lane.b32.xlu1 %v14175_v4, %s11960_s15 }
 0xe54   :  { %7162 = vmax.xlane.f32.xlu0 %v7161_v8  ;;  %v5568_v49 = vpop.xlane.xlu1 %5567 }
 0xe55   :  { %11630 = vrcp.f32 %v5568_v49 }
 0xe56   :  { %11425 = vrot.lane.b32.xlu1 %v14151_v37, %s11961_s27 }
 0xe5a   :  { %11430 = vrot.lane.b32.xlu1 %v14159_v31, %s11961_s27 }
 0xe5e   :  { %7511 = vrot.lane.b32.xlu1 %v13919_v6, %s11961_s27 }
 0xe65   :  { %v10242_v36 = vpop.f32.mrb[128].mxu0 }
 0xe66   :  { %v4620_v63 = vpop.f32.mrb[129].mxu0 }
 0xe67   :  { %10254 = vmatprep.mubr.msk.f32.mxu0 %vm3728_vm1, %v4620_v63 }
 0xe68   :  { %10255 = vmatmul.mubr.msk.f32.vlgmr.msra.gmra.mrb[120].mxu0 %vm3728_vm1, %v10242_v36 }
 0xe69   :  { %v10245_v46 = vpop.f32.mrb[130].mxu0  ;;  %10307 = vmatpush3.msra.mxu0 %v15056_v44 }
 0xe6a   :  { %v4630_v32 = vpop.f32.mrb[131].mxu0  ;;  %11410 = vrot.lane.b32.xlu0 %v14167_v17, %s11961_s27  ;;  %v15766_v17 = vld [vmem:[#allocation26_spill] sm:$0xff] }
 0xe6b   :  { %10257 = vmatprep.mubr.msk.f32.mxu0 %vm3728_vm1, %v4630_v32 }
 0xe6c   :  { %10258 = vmatmul.mubr.msk.f32.gmra.mrb[122].mxu0 %vm3728_vm1, %v10245_v46 }
 0xe6d   :  { %v10248_v37 = vpop.f32.mrb[132].mxu0 }
 0xe6e   :  { %v4640_v31 = vpop.f32.mrb[133].mxu0  ;;  %11420 = vrot.lane.b32.xlu0 %v14183_v10, %s11960_s15 }
 0xe6f   :  { %10260 = vmatprep.mubr.msk.f32.mxu0 %vm3728_vm1, %v4640_v31 }
 0xe70   :  { %10261 = vmatmul.mubr.msk.f32.gmra.mrb[124].mxu0 %vm3728_vm1, %v10248_v37 }
 0xe71   :  { %v10251_v6 = vpop.f32.mrb[134].mxu0 }
 0xe72   :  { %v4650_v2 = vpop.f32.mrb[135].mxu0  ;;  %7509 = vrot.lane.b32.xlu0 %v13921_v15, %s11961_s27  ;;  %v11631_v15 = vpop.eup %11630 }
 0xe73   :  { %10263 = vmatprep.mubr.msk.f32.mxu0 %vm3728_vm1, %v4650_v2 }
 0xe74   :  { %10264 = vmatmul.mubr.msk.f32.gmra.mrb[126].mxu0 %vm3728_vm1, %v10251_v6 }
 0xe75   :  { %10308 = vmatprep.mubr.msk.f32.mxu0 %vm3728_vm1, %v14615_v0  ;;  %v5598_v0 = vmul.f32 %v11631_v15, %v15004_v38 }
 0xe78   :  { %10309 = vmatmul.mubr.msk.f32.vlgmr.msra.gmra.mrb[120].mxu0 %vm3728_vm1, %v14613_v57  ;;  %v5571_v57 = vpop.xlane.xlu1 %5570 }
 0xe79   :  { %10311 = vmatprep.mubr.msk.f32.mxu0 %vm3728_vm1, %v15766_v17 }
 0xe7c   :  { %10312 = vmatmul.mubr.msk.f32.gmra.mrb[122].mxu0 %vm3728_vm1, %v15767_v45  ;;  %v5574_v21 = vpop.xlane.xlu1 %5573 }
 0xe7d   :  { %10314 = vmatprep.mubr.msk.f32.mxu0 %vm3728_vm1, %v15768_v18 }
 0xe80   :  { %10315 = vmatmul.mubr.msk.f32.gmra.mrb[124].mxu0 %vm3728_vm1, %v15769_v61  ;;  %v5577_v20 = vpop.xlane.xlu1 %5576 }
 0xe81   :  { %10317 = vmatprep.mubr.msk.f32.mxu0 %vm3728_vm1, %v15770_v53 }
 0xe84   :  { %10318 = vmatmul.mubr.msk.f32.gmra.mrb[126].mxu0 %vm3728_vm1, %v15771_v35  ;;  %v5580_v39 = vpop.xlane.xlu1 %5579 }
 0xe85   :  { %10348 = vmatprep.mubr.msk.f32.mxu0 %vm1988_vm0, %v5598_v0 }
 0xe88   :  { %v15178_v14 = vpop.xlane.xlu1 %5582 }
 0xe8c   :  { %v15182_v56 = vpop.xlane.xlu1 %5585 }
 0xec9   :  { %v7148_v24 = vpop.xlane.xlu0 %7147 }
 0xeca   :  { %v7168_v8 = vsub.f32 %v15085_v55, %v7148_v24  ;;  %v7145_v36 = vpop.xlane.xlu1 %7144 }
 0xecb   :  { %v7167_v38 = vsub.f32 %v15087_v43, %v7145_v36 }
 0xecc   :  { %v7177_v63 = vmul.f32 1.442695, %v7168_v8 }
 0xecd   :  { %v7175_v46 = vmul.f32 1.442695, %v7167_v38  ;;  %v7154_v32 = vpop.xlane.xlu0 %7153 }
 0xece   :  { %11632 = vpow2.f32 %v7177_v63  ;;  %v7170_v37 = vsub.f32 %v15099_v50, %v7154_v32  ;;  %v11406_v31 = vpop.permute.xlu1 %11405 }
 0xecf   :  { %11634 = vpow2.f32 %v7175_v46  ;;  %v11408_v6 = vunpack.i.h.bf16 %v11406_v31  ;;  %v11407_v2 = vunpack.i.l.bf16 %v11406_v31 }
 0xed0   :  { %v7181_v49 = vmul.f32 1.442695, %v7170_v37 }
 0xed1   :  { %v11166_v17 = vpack.c.bf16 %v11408_v6, %v11407_v2  ;;  %v7151_v45 = vpop.xlane.xlu0 %7150 }
 0xed2   :  { %11636 = vpow2.f32 %v7181_v49  ;;  %v7169_v18 = vsub.f32 %v15101_v60, %v7151_v45  ;;  %v11416_v55 = vpop.permute.xlu1 %11415 }
 0xed3   :  { %v11418_v15 = vunpack.i.h.bf16 %v11416_v55  ;;  %v11417_v61 = vunpack.i.l.bf16 %v11416_v55  ;;  %11167 = vmatprep.subr.bf16.mxu0 %v11166_v17 }
 0xed4   :  { %v7179_v43 = vmul.f32 1.442695, %v7169_v18  ;;  %11169 = vmatpush3.bf16.msra.mxu0 %v11166_v17 }
 0xed5   :  { %v11226_v53 = vpack.c.bf16 %v11418_v15, %v11417_v61  ;;  %v7160_v0 = vpop.xlane.xlu0 %7159 }
 0xed6   :  { %11638 = vpow2.f32 %v7179_v43  ;;  %v7172_v50 = vsub.f32 %v15108_v1, %v7160_v0 }
 0xed7   :  { %11227 = vmatprep.subr.bf16.mxu1 %v11226_v53 }
 0xed8   :  { %v15189_v35 = vpop.eup %11632  ;;  %v7185_v24 = vmul.f32 1.442695, %v7172_v50  ;;  %11229 = vmatpush3.bf16.msra.mxu1 %v11226_v53 }
 0xed9   :  { %v15191_v8 = vpop.eup %11634  ;;  %v7157_v36 = vpop.xlane.xlu0 %7156  ;;  %v7194_v60 = vsel %vm1988_vm0, %v15189_v35, 0.0 }
 0xeda   :  { %11640 = vpow2.f32 %v7185_v24  ;;  %v7171_v38 = vsub.f32 %v15115_v34, %v7157_v36  ;;  %7195 = vadd.xlane.f32.xlu0 %v7194_v60  ;;  %v7191_v63 = vsel %vm1988_vm0, %v15191_v8, 0.0 }
 0xedb   :  { %7192 = vadd.xlane.f32.xlu1 %v7191_v63 }
 0xedc   :  { %v15198_v1 = vpop.eup %11636  ;;  %v7183_v46 = vmul.f32 1.442695, %v7171_v38 }
 0xedd   :  { %v7166_v32 = vpop.xlane.xlu0 %7165  ;;  %v7200_v37 = vsel %vm1988_vm0, %v15198_v1, 0.0 }
 0xede   :  { %11642 = vpow2.f32 %v7183_v46  ;;  %v7174_v31 = vsub.f32 %v15122_v22, %v7166_v32  ;;  %7201 = vadd.xlane.f32.xlu0 %v7200_v37 }
 0xedf   :  { %11644 = vrcp.f32 %v5571_v57 }
 0xee0   :  { %v15203_v6 = vpop.eup %11638  ;;  %11646 = vrcp.f32 %v5574_v21  ;;  %v7189_v34 = vmul.f32 1.442695, %v7174_v31 }
 0xee1   :  { %v7163_v2 = vpop.xlane.xlu0 %7162  ;;  %v7197_v49 = vsel %vm1988_vm0, %v15203_v6, 0.0 }
 0xee2   :  { %11648 = vpow2.f32 %v7189_v34  ;;  %v7173_v17 = vsub.f32 %v15131_v47, %v7163_v2  ;;  %7198 = vadd.xlane.f32.xlu1 %v7197_v49  ;;  %v11426_v47 = vpop.permute.xlu1 %11425 }
 0xee3   :  { %11650 = vrcp.f32 %v5577_v20  ;;  %v11428_v24 = vunpack.i.h.bf16 %v11426_v47 }
 0xee4   :  { %v15208_v45 = vpop.eup %11640  ;;  %11652 = vrcp.f32 %v5580_v39  ;;  %v7187_v18 = vmul.f32 1.442695, %v7173_v17 }
 0xee5   :  { %v11411_v22 = vpop.permute.xlu0 %11410  ;;  %v7206_v57 = vsel %vm1988_vm0, %v15208_v45, 0.0 }
 0xee6   :  { %11654 = vpow2.f32 %v7187_v18  ;;  %v11413_v21 = vunpack.i.h.bf16 %v11411_v22  ;;  %v11412_v55 = vunpack.i.l.bf16 %v11411_v22  ;;  %7207 = vadd.xlane.f32.xlu0 %v7206_v57  ;;  %v15773_v22 = vld [vmem:[#allocation21_spill] sm:$0xff]  ;;  %v15776_v57 = vld [vmem:[#allocation24_spill] sm:$0xff] }
 0xee7   :  { %11656 = vrcp.f32 %v15178_v14  ;;  %v11427_v14 = vunpack.i.l.bf16 %v11426_v47 }
 0xee8   :  { %v15213_v15 = vpop.eup %11642  ;;  %11658 = vrcp.f32 %v15182_v56  ;;  %v11170_v20 = vpack.c.bf16 %v11413_v21, %v11412_v55  ;;  %v6573_v21 = vmul.f32 0.35355338, %v15063_v51  ;;  %v11758_v55 = vld [vmem:[%s15723_s18 + $0x40] sm:$0xff]  ;;  %v6575_v51 = vmul.f32 0.35355338, %v15067_v28 }
 0xee9   :  { %v11645_v61 = vpop.eup %11644  ;;  %v11421_v43 = vpop.permute.xlu0 %11420  ;;  %v7203_v39 = vsel %vm1988_vm0, %v15213_v15, 0.0  ;;  %11660 = vrcp.f32 %v15180_v29  ;;  %v15226_v37 = vpack.c.bf16 %v11428_v24, %v11427_v14  ;;  %v6577_v24 = vmul.f32 0.35355338, %v15071_v27 }
 0xeea   :  { %v11647_v53 = vpop.eup %11646  ;;  %v11423_v0 = vunpack.i.h.bf16 %v11421_v43  ;;  %v11422_v50 = vunpack.i.l.bf16 %v11421_v43  ;;  %7204 = vadd.xlane.f32.xlu1 %v7203_v39  ;;  %11171 = vmatprep.subr.bf16.mxu0 %v11170_v20  ;;  %v5599_v56 = vmul.f32 %v11645_v61, %v15009_v26  ;;  %v11759_v61 = vld [vmem:[%s15723_s18 + $0x48] sm:$0xff] }
 0xeeb   :  { %11173 = vmatpush3.bf16.msra.mxu0 %v11170_v20  ;;  %v5600_v46 = vmul.f32 %v11647_v53, %v15014_v48  ;;  %v8444_v20 = vld [vmem:[%s15723_s18 + $0x50] sm:$0xff]  ;;  %v15272_v43 = vadd.f32 %v11759_v61, %v6573_v21 }
 0xeec   :  { %v15219_v36 = vpop.eup %11648  ;;  %v11230_v60 = vpack.c.bf16 %v11423_v0, %v11422_v50  ;;  %v8446_v0 = vld [vmem:[%s15723_s18 + $0x60] sm:$0xff] }
 0xeed   :  { %v11651_v38 = vpop.eup %11650  ;;  %v7212_v63 = vsel %vm1988_vm0, %v15219_v36, 0.0  ;;  %v6599_v28 = vsel %vm1988_vm0, %v15272_v43, -inf }
 0xeee   :  { %v11653_v32 = vpop.eup %11652  ;;  %7213 = vadd.xlane.f32.xlu0 %v7212_v63  ;;  %10349 = vmatmul.mubr.msk.f32.vlgmr.msra.gmra.mrb[136].mxu0 %vm1988_vm0, %v5599_v56  ;;  %v5601_v26 = vmul.f32 %v11651_v38, %v15018_v16  ;;  %v6578_v56 = vmul.f32 0.35355338, %v15077_v7  ;;  %v8448_v38 = vld [vmem:[%s15723_s18 + $0x70] sm:$0xff]  ;;  %v6579_v7 = vmul.f32 0.35355338, %v15075_v58 }
 0xeef   :  { %11231 = vmatprep.subr.bf16.mxu1 %v11230_v60  ;;  %10351 = vmatprep.mubr.msk.f32.mxu0 %vm1988_vm0, %v5600_v46  ;;  %v5602_v34 = vmul.f32 %v11653_v32, %v15022_v3  ;;  %v15772_v3 = vld [vmem:[#allocation20_spill] sm:$0xff] }
 0xef0   :  { %v15229_v29 = vpop.eup %11654  ;;  %11233 = vmatpush3.bf16.msra.mxu1 %v11230_v60  ;;  %v8447_v60 = vld [vmem:[%s15723_s18 + $0x68] sm:$0xff]  ;;  %v15307_v46 = vadd.f32 %v8448_v38, %v6578_v56 }
 0xef1   :  { %v11657_v31 = vpop.eup %11656  ;;  %11236 = vmatprep.subr.msk.bf16.mxu1 %vm14137_vm2, %v15226_v37  ;;  %v7209_v48 = vsel %vm1988_vm0, %v15229_v29, 0.0  ;;  %v15304_v63 = vadd.f32 %v8447_v60, %v6577_v24 }
 0xef2   :  { %v11659_v2 = vpop.eup %11658  ;;  %7210 = vadd.xlane.f32.xlu1 %v7209_v48  ;;  %10352 = vmatmul.mubr.msk.f32.gmra.mrb[138].mxu0 %vm1988_vm0, %v5601_v26  ;;  %v5603_v49 = vmul.f32 %v11657_v31, %v15026_v23  ;;  %v15774_v23 = vld [vmem:[#allocation22_spill] sm:$0xff]  ;;  %v8449_v26 = vld [vmem:[%s15723_s18 + $0x78] sm:$0xff] }
 0xef3   :  { %10354 = vmatprep.mubr.msk.f32.mxu0 %vm1988_vm0, %v5602_v34  ;;  %v11661_v17 = vpop.eup %11660  ;;  %v5604_v16 = vmul.f32 %v11659_v2, %v15030_v12  ;;  %v15775_v12 = vld [vmem:[#allocation23_spill] sm:$0xff]  ;;  %v15314_v31 = vadd.f32 %v8449_v26, %v6579_v7  ;;  %v6611_v48 = vsel %vm1988_vm0, %v15304_v63, -inf  ;;  %v6614_v34 = vsel %vm1988_vm0, %v15307_v46, -inf  ;;  %v15325_v2 = vld [vmem:[%s15724_s19 + $0x18] sm:$0xff] }
 0xef4   :  { %v5605_v18 = vmul.f32 %v11661_v17, %v14995_v19  ;;  %v6572_v19 = vmul.f32 0.35355338, %v15065_v42  ;;  %v8445_v42 = vld [vmem:[%s15723_s18 + $0x58] sm:$0xff]  ;;  %10360 = vmatprep.subr.mxu0 %v15325_v2  ;;  %v11431_v17 = vpop.permute.xlu1 %11430 }
 0xef5   :  { %v15286_v50 = vadd.f32 %v8445_v42, %v6575_v51  ;;  %v6617_v58 = vsel %vm1988_vm0, %v15314_v31, -inf  ;;  %10361 = vmatpush3.msra.mxu0 %v15325_v2  ;;  %v11433_v21 = vunpack.i.h.bf16 %v11431_v17 }
 0xef6   :  { %10355 = vmatmul.mubr.msk.f32.gmra.mrb[140].mxu0 %vm1988_vm0, %v5603_v49  ;;  %v15263_v47 = vadd.f32 %v11758_v55, %v6572_v19  ;;  %v15332_v49 = vld [vmem:[%s15724_s19] sm:$0xff]  ;;  %v11432_v55 = vunpack.i.l.bf16 %v11431_v17 }
 0xef7   :  { %10357 = vmatprep.mubr.msk.f32.mxu0 %vm1988_vm0, %v5604_v16  ;;  %v6605_v27 = vsel %vm1988_vm0, %v15286_v50, -inf  ;;  %10414 = vmatprep.subr.mxu0 %v15332_v49  ;;  %v7510_v16 = vpop.permute.xlu0 %7509 }
 0xef8   :  { %v6596_v53 = vsel %vm1988_vm0, %v15263_v47, -inf  ;;  %v11240_v51 = vpack.c.bf16 %v11433_v21, %v11432_v55 }
 0xefa   :  { %10358 = vmatmul.mubr.msk.f32.gmra.mrb[142].mxu0 %vm1988_vm0, %v5605_v18  ;;  %v7512_v18 = vpop.permute.xlu1 %7511 }
 0xf03   :  { %7515 = vrot.lane.b32.xlu1 %v15772_v3, %s11961_s27 }
 0xf04   :  { %7513 = vrot.lane.b32.xlu0 %v15773_v22, %s11961_s27 }
 0xf07   :  { %7519 = vrot.lane.b32.xlu1 %v13927_v40, %s11961_s27  ;;  %v6574_v40 = vmul.f32 0.35355338, %v15069_v62  ;;  %v6576_v62 = vmul.f32 0.35355338, %v15073_v54 }
 0xf08   :  { %7517 = vrot.lane.b32.xlu0 %v15774_v23, %s11961_s27 }
 0xf09   :  { %v15278_v39 = vadd.f32 %v8444_v20, %v6574_v40  ;;  %v15291_v14 = vadd.f32 %v8446_v0, %v6576_v62 }
 0xf0b   :  { %7523 = vrot.lane.b32.xlu1 %v15775_v12, %s11961_s27  ;;  %v6602_v54 = vsel %vm1988_vm0, %v15278_v39, -inf  ;;  %v6608_v32 = vsel %vm1988_vm0, %v15291_v14, -inf }
 0xf0c   :  { %7521 = vrot.lane.b32.xlu0 %v15776_v57, %s11961_s27 }
 0xf2b   :  { %6597 = vmax.xlane.f32.xlu0 %v6596_v53 }
 0xf2f   :  { %6603 = vmax.xlane.f32.xlu0 %v6602_v54  ;;  %6600 = vmax.xlane.f32.xlu1 %v6599_v28 }
 0xf33   :  { %6606 = vmax.xlane.f32.xlu0 %v6605_v27  ;;  %6609 = vmax.xlane.f32.xlu1 %v6608_v32 }
 0xf37   :  { %6612 = vmax.xlane.f32.xlu0 %v6611_v48  ;;  %6615 = vmax.xlane.f32.xlu1 %v6614_v34 }
 0xf3b   :  { %6618 = vmax.xlane.f32.xlu0 %v6617_v58 }
 0xf67   :  { %v7196_v3 = vpop.xlane.xlu0 %7195 }
 0xf68   :  { %11662 = vrcp.f32 %v7196_v3  ;;  %v7193_v22 = vpop.xlane.xlu1 %7192 }
 0xf69   :  { %11664 = vrcp.f32 %v7193_v22 }
 0xf6b   :  { %v7202_v23 = vpop.xlane.xlu0 %7201 }
 0xf6c   :  { %11666 = vrcp.f32 %v7202_v23 }
 0xf6f   :  { %v7199_v12 = vpop.xlane.xlu1 %7198 }
 0xf70   :  { %11668 = vrcp.f32 %v7199_v12 }
 0xf72   :  { %v11663_v57 = vpop.eup %11662 }
 0xf73   :  { %v11665_v19 = vpop.eup %11664  ;;  %v7208_v40 = vpop.xlane.xlu0 %7207  ;;  %v7224_v61 = vmul.f32 %v11663_v57, %v15189_v35 }
 0xf74   :  { %v7223_v20 = vmul.f32 %v11665_v19, %v15191_v8  ;;  %11670 = vrcp.f32 %v7208_v40 }
 0xf76   :  { %10510 = vmatprep.mubr.msk.f32.mxu1 %vm1988_vm0, %v7223_v20  ;;  %v11667_v62 = vpop.eup %11666 }
 0xf77   :  { %v7205_v42 = vpop.xlane.xlu1 %7204  ;;  %10511 = vmatmul.mubr.msk.f32.vlgmr.msra.gmra.mrb[200].mxu1 %vm1988_vm0, %v7224_v61  ;;  %v7226_v0 = vmul.f32 %v11667_v62, %v15198_v1 }
 0xf78   :  { %11672 = vrcp.f32 %v7205_v42  ;;  %11239 = vmatpush3.bf16.xpose.msk.msra.mxu1 %vm14137_vm2, %v15226_v37 }
 0xf79   :  { %11242 = vmatprep.subr.msk.bf16.mxu1 %vm14137_vm2, %v11240_v51 }
 0xf7a   :  { %v11669_v53 = vpop.eup %11668 }
 0xf7b   :  { %v7225_v8 = vmul.f32 %v11669_v53, %v15203_v6  ;;  %v7214_v35 = vpop.xlane.xlu0 %7213 }
 0xf7c   :  { %11674 = vrcp.f32 %v7214_v35 }
 0xf7d   :  { %10513 = vmatprep.mubr.msk.f32.mxu1 %vm1988_vm0, %v7225_v8 }
 0xf7e   :  { %10514 = vmatmul.mubr.msk.f32.gmra.mrb[202].mxu1 %vm1988_vm0, %v7226_v0  ;;  %v11671_v37 = vpop.eup %11670 }
 0xf7f   :  { %v7211_v28 = vpop.xlane.xlu1 %7210  ;;  %v7228_v54 = vmul.f32 %v11671_v37, %v15208_v45  ;;  %v7514_v13 = vpop.permute.xlu0 %7513 }
 0xf80   :  { %11676 = vrcp.f32 %v7211_v28  ;;  %11245 = vmatpush3.bf16.xpose.msk.msra.mxu1 %vm14137_vm2, %v11240_v51 }
 0xf82   :  { %v11673_v24 = vpop.eup %11672 }
 0xf83   :  { %v7227_v56 = vmul.f32 %v11673_v24, %v15213_v15  ;;  %v7516_v15 = vpop.permute.xlu1 %7515  ;;  %v7518_v45 = vpop.permute.xlu0 %7517 }
 0xf85   :  { %10516 = vmatprep.mubr.msk.f32.mxu1 %vm1988_vm0, %v7227_v56 }
 0xf86   :  { %10517 = vmatmul.mubr.msk.f32.gmra.mrb[204].mxu1 %vm1988_vm0, %v7228_v54  ;;  %v11675_v1 = vpop.eup %11674 }
 0xf87   :  { %v7230_v38 = vmul.f32 %v11675_v1, %v15219_v36  ;;  %v7520_v27 = vpop.permute.xlu1 %7519 }
 0xf8a   :  { %v11677_v6 = vpop.eup %11676 }
 0xf8b   :  { %v7229_v60 = vmul.f32 %v11677_v6, %v15229_v29  ;;  %v7522_v29 = vpop.permute.xlu0 %7521  ;;  %v7524_v36 = vpop.permute.xlu1 %7523 }
 0xf8d   :  { %10519 = vmatprep.mubr.msk.f32.mxu1 %vm1988_vm0, %v7229_v60 }
 0xf8e   :  { %10520 = vmatmul.mubr.msk.f32.gmra.mrb[206].mxu1 %vm1988_vm0, %v7230_v38 }
 0xf8f   :  { %10544 = vmatprep.mubr.msk.f32.mxu1 %vm3728_vm1, %v7510_v16 }
 0xf92   :  { %10545 = vmatmul.mubr.msk.f32.vlgmr.msra.gmra.mrb[208].mxu1 %vm3728_vm1, %v7512_v18 }
 0xf93   :  { %10547 = vmatprep.mubr.msk.f32.mxu1 %vm3728_vm1, %v7514_v13 }
 0xf96   :  { %10548 = vmatmul.mubr.msk.f32.gmra.mrb[210].mxu1 %vm3728_vm1, %v7516_v15 }
 0xf97   :  { %10550 = vmatprep.mubr.msk.f32.mxu1 %vm3728_vm1, %v7518_v45 }
 0xf9a   :  { %10551 = vmatmul.mubr.msk.f32.gmra.mrb[212].mxu1 %vm3728_vm1, %v7520_v27 }
 0xf9b   :  { %10553 = vmatprep.mubr.msk.f32.mxu1 %vm3728_vm1, %v7522_v29 }
 0xf9e   :  { %10554 = vmatmul.mubr.msk.f32.gmra.mrb[214].mxu1 %vm3728_vm1, %v7524_v36 }
 0xfb8   :  { %v6598_v7 = vpop.xlane.xlu0 %6597 }
 0xfb9   :  { %v6620_v32 = vsub.f32 %v15263_v47, %v6598_v7 }
 0xfbb   :  { %v6628_v26 = vmul.f32 1.442695, %v6620_v32 }
 0xfbc   :  { %v6604_v48 = vpop.xlane.xlu0 %6603  ;;  %v6601_v34 = vpop.xlane.xlu1 %6600 }
 0xfbd   :  { %11678 = vpow2.f32 %v6628_v26  ;;  %v6622_v58 = vsub.f32 %v15278_v39, %v6604_v48  ;;  %v6621_v17 = vsub.f32 %v15272_v43, %v6601_v34 }
 0xfbf   :  { %v6632_v16 = vmul.f32 1.442695, %v6622_v58  ;;  %v6630_v18 = vmul.f32 1.442695, %v6621_v17 }
 0xfc0   :  { %v6607_v3 = vpop.xlane.xlu0 %6606  ;;  %v6610_v22 = vpop.xlane.xlu1 %6609 }
 0xfc1   :  { %11680 = vpow2.f32 %v6632_v16  ;;  %v6623_v23 = vsub.f32 %v15286_v50, %v6607_v3  ;;  %v6624_v12 = vsub.f32 %v15291_v14, %v6610_v22  ;;  %v10350_v57 = vpop.f32.mrb[136].mxu0  ;;  %v8515_v16 = vld [vmem:[%s15723_s18 + $0xc8] sm:$0xff]  ;;  %v8514_v22 = vld [vmem:[%s15723_s18 + $0xc0] sm:$0xff] }
 0xfc2   :  { %11682 = vpow2.f32 %v6630_v18  ;;  %v5708_v47 = vpop.f32.mrb[137].mxu0 }
 0xfc3   :  { %v6634_v19 = vmul.f32 1.442695, %v6623_v23  ;;  %v6636_v21 = vmul.f32 1.442695, %v6624_v12  ;;  %10362 = vmatprep.mubr.msk.f32.mxu0 %vm3728_vm1, %v5708_v47 }
 0xfc4   :  { %v6613_v55 = vpop.xlane.xlu0 %6612  ;;  %v6616_v39 = vpop.xlane.xlu1 %6615  ;;  %10363 = vmatmul.mubr.msk.f32.vlgmr.msra.gmra.mrb[120].mxu0 %vm3728_vm1, %v10350_v57 }
 0xfc5   :  { %11684 = vpow2.f32 %v6634_v19  ;;  %v6625_v43 = vsub.f32 %v15304_v63, %v6613_v55  ;;  %v6626_v40 = vsub.f32 %v15307_v46, %v6616_v39  ;;  %v10353_v20 = vpop.f32.mrb[138].mxu0  ;;  %10415 = vmatpush3.msra.mxu0 %v15332_v49 }
 0xfc6   :  { %11686 = vpow2.f32 %v6636_v21  ;;  %v5718_v50 = vpop.f32.mrb[139].mxu0 }
 0xfc7   :  { %v15376_v14 = vpop.eup %11678  ;;  %v6638_v61 = vmul.f32 1.442695, %v6625_v43  ;;  %v6640_v51 = vmul.f32 1.442695, %v6626_v40  ;;  %10365 = vmatprep.mubr.msk.f32.mxu0 %vm3728_vm1, %v5718_v50  ;;  %v8517_v43 = vld [vmem:[%s15723_s18 + $0xd8] sm:$0xff] }
 0xfc8   :  { %v6619_v42 = vpop.xlane.xlu0 %6618  ;;  %10366 = vmatmul.mubr.msk.f32.gmra.mrb[122].mxu0 %vm3728_vm1, %v10353_v20  ;;  %v6644_v62 = vsel %vm1988_vm0, %v15376_v14, 0.0 }
 0xfc9   :  { %11688 = vpow2.f32 %v6638_v61  ;;  %v6627_v63 = vsub.f32 %v15314_v31, %v6619_v42  ;;  %6645 = vadd.xlane.f32.xlu1 %v6644_v62  ;;  %v10356_v46 = vpop.f32.mrb[140].mxu0 }
 0xfca   :  { %11690 = vpow2.f32 %v6640_v51  ;;  %v5728_v49 = vpop.f32.mrb[141].mxu0 }
 0xfcb   :  { %v15383_v53 = vpop.eup %11680  ;;  %v6642_v8 = vmul.f32 1.442695, %v6627_v63  ;;  %10368 = vmatprep.mubr.msk.f32.mxu0 %vm3728_vm1, %v5728_v49 }
 0xfcc   :  { %v15386_v35 = vpop.eup %11682  ;;  %10369 = vmatmul.mubr.msk.f32.gmra.mrb[124].mxu0 %vm3728_vm1, %v10356_v46  ;;  %v6650_v0 = vsel %vm1988_vm0, %v15383_v53, 0.0 }
 0xfcd   :  { %11692 = vpow2.f32 %v6642_v8  ;;  %6651 = vadd.xlane.f32.xlu1 %v6650_v0  ;;  %v6647_v31 = vsel %vm1988_vm0, %v15386_v35, 0.0  ;;  %v10359_v28 = vpop.f32.mrb[142].mxu0 }
 0xfce   :  { %6648 = vadd.xlane.f32.xlu0 %v6647_v31  ;;  %v5738_v37 = vpop.f32.mrb[143].mxu0  ;;  %v8519_v31 = vld [vmem:[%s15723_s18 + $0xe8] sm:$0xff] }
 0xfcf   :  { %v15393_v24 = vpop.eup %11684  ;;  %10371 = vmatprep.mubr.msk.f32.mxu0 %vm3728_vm1, %v5738_v37 }
 0xfd0   :  { %v15396_v56 = vpop.eup %11686  ;;  %10372 = vmatmul.mubr.msk.f32.gmra.mrb[126].mxu0 %vm3728_vm1, %v10359_v28  ;;  %v6653_v54 = vsel %vm1988_vm0, %v15393_v24, 0.0 }
 0xfd1   :  { %v6656_v1 = vsel %vm1988_vm0, %v15396_v56, 0.0  ;;  %10416 = vmatprep.mubr.msk.f32.mxu0 %vm3728_vm1, %v15036_v30 }
 0xfd2   :  { %6654 = vadd.xlane.f32.xlu0 %v6653_v54  ;;  %6657 = vadd.xlane.f32.xlu1 %v6656_v1  ;;  %v8518_v1 = vld [vmem:[%s15723_s18 + $0xe0] sm:$0xff] }
 0xfd3   :  { %v15405_v6 = vpop.eup %11688 }
 0xfd4   :  { %v15407_v60 = vpop.eup %11690  ;;  %10417 = vmatmul.mubr.msk.f32.vlgmr.msra.gmra.mrb[144].mxu0 %vm3728_vm1, %v15034_v5  ;;  %v6659_v38 = vsel %vm1988_vm0, %v15405_v6, 0.0 }
 0xfd5   :  { %v6662_v13 = vsel %vm1988_vm0, %v15407_v60, 0.0  ;;  %10419 = vmatprep.mubr.msk.f32.mxu0 %vm3728_vm1, %v15047_v33 }
 0xfd6   :  { %6660 = vadd.xlane.f32.xlu0 %v6659_v38  ;;  %6663 = vadd.xlane.f32.xlu1 %v6662_v13 }
 0xfd7   :  { %v15417_v30 = vpop.eup %11692 }
 0xfd8   :  { %10420 = vmatmul.mubr.msk.f32.gmra.mrb[146].mxu0 %vm3728_vm1, %v15045_v9  ;;  %v6665_v15 = vsel %vm1988_vm0, %v15417_v30, 0.0 }
 0xfd9   :  { %10422 = vmatprep.mubr.msk.f32.mxu0 %vm3728_vm1, %v15051_v11 }
 0xfda   :  { %6666 = vadd.xlane.f32.xlu0 %v6665_v15 }
 0xfdc   :  { %10423 = vmatmul.mubr.msk.f32.gmra.mrb[148].mxu0 %vm3728_vm1, %v15049_v41 }
 0xfdd   :  { %10425 = vmatprep.mubr.msk.f32.mxu0 %vm3728_vm1, %v15061_v25 }
 0xfe0   :  { %10426 = vmatmul.mubr.msk.f32.gmra.mrb[150].mxu0 %vm3728_vm1, %v15059_v52 }
 0xfe7   :  { %11435 = vrot.lane.b32.xlu1 %v14175_v4, %s11959_s20 }
 0xff0   :  { %11440 = vrot.lane.b32.xlu0 %v14183_v10, %s11959_s20 }
0x104a   :  { %v15435_v5 = vpop.f32.mrb[200].mxu1 }
0x104b   :  { %v15437_v9 = vpop.f32.mrb[201].mxu1 }
0x1051   :  { %v15439_v33 = vpop.f32.mrb[202].mxu1 }
0x1052   :  { %v15441_v11 = vpop.f32.mrb[203].mxu1 }
0x1056   :  { %v6646_v41 = vpop.xlane.xlu1 %6645 }
0x1057   :  { %11694 = vrcp.f32 %v6646_v41 }
0x1059   :  { %v15443_v25 = vpop.f32.mrb[204].mxu1 }
0x105a   :  { %v6652_v45 = vpop.xlane.xlu1 %6651  ;;  %v15445_v52 = vpop.f32.mrb[205].mxu1 }
0x105b   :  { %v6649_v27 = vpop.xlane.xlu0 %6648 }
0x105c   :  { %11696 = vrcp.f32 %v6649_v27 }
0x105d   :  { %11698 = vrcp.f32 %v6652_v45 }
0x105f   :  { %v6655_v29 = vpop.xlane.xlu0 %6654  ;;  %v6658_v36 = vpop.xlane.xlu1 %6657 }
0x1060   :  { %11700 = vrcp.f32 %v6655_v29 }
0x1061   :  { %v11695_v7 = vpop.eup %11694  ;;  %v15447_v32 = vpop.f32.mrb[206].mxu1  ;;  %11702 = vrcp.f32 %v6658_v36 }
0x1062   :  { %v15449_v26 = vpop.f32.mrb[207].mxu1  ;;  %v6676_v48 = vmul.f32 %v11695_v7, %v15376_v14  ;;  %v8516_v14 = vld [vmem:[%s15723_s18 + $0xd0] sm:$0xff]  ;;  %v8521_v7 = vld [vmem:[%s15723_s18 + $0xf8] sm:$0xff] }
0x1063   :  { %v6661_v34 = vpop.xlane.xlu0 %6660  ;;  %v6664_v58 = vpop.xlane.xlu1 %6663 }
0x1064   :  { %10456 = vmatprep.mubr.msk.f32.mxu0 %vm1988_vm0, %v6676_v48  ;;  %11704 = vrcp.f32 %v6661_v34 }
0x1065   :  { %v10546_v17 = vpop.f32.mrb[208].mxu1  ;;  %11706 = vrcp.f32 %v6664_v58 }
0x1066   :  { %v7663_v18 = vmul.f32 0.35355338, %v10546_v17  ;;  %v7623_v3 = vpop.f32.mrb[209].mxu1  ;;  %v11697_v13 = vpop.eup %11696  ;;  %v8520_v17 = vld [vmem:[%s15723_s18 + $0xf0] sm:$0xff] }
0x1067   :  { %v6667_v23 = vpop.xlane.xlu0 %6666  ;;  %v11436_v12 = vpop.permute.xlu1 %11435  ;;  %v7662_v57 = vmul.f32 0.35355338, %v7623_v3  ;;  %v6677_v48 = vmul.f32 %v11697_v13, %v15386_v35 }
0x1068   :  { %v15459_v47 = vadd.f32 %v8515_v16, %v7663_v18  ;;  %v11438_v19 = vunpack.i.h.bf16 %v11436_v12  ;;  %v11437_v21 = vunpack.i.l.bf16 %v11436_v12  ;;  %v11699_v45 = vpop.eup %11698  ;;  %11708 = vrcp.f32 %v6667_v23 }
0x1069   :  { %v15461_v55 = vadd.f32 %v8514_v22, %v7662_v57  ;;  %v10549_v39 = vpop.f32.mrb[210].mxu1  ;;  %v6678_v23 = vmul.f32 %v11699_v45, %v15383_v53 }
0x106a   :  { %v11206_v40 = vpack.c.bf16 %v11438_v19, %v11437_v21  ;;  %v7665_v20 = vmul.f32 0.35355338, %v10549_v39  ;;  %v7633_v50 = vpop.f32.mrb[211].mxu1  ;;  %v7689_v61 = vsel %vm1988_vm0, %v15459_v47, -inf  ;;  %v11701_v18 = vpop.eup %11700 }
0x106b   :  { %v11441_v51 = vpop.permute.xlu0 %11440  ;;  %v7664_v42 = vmul.f32 0.35355338, %v7633_v50  ;;  %7690 = vmax.xlane.f32.xlu0 %v7689_v61  ;;  %v7686_v62 = vsel %vm1988_vm0, %v15461_v55, -inf  ;;  %v11703_v35 = vpop.eup %11702  ;;  %v6679_v21 = vmul.f32 %v11701_v18, %v15393_v24 }
0x106c   :  { %v15473_v63 = vadd.f32 %v8517_v43, %v7665_v20  ;;  %v11443_v46 = vunpack.i.h.bf16 %v11441_v51  ;;  %v11442_v49 = vunpack.i.l.bf16 %v11441_v51  ;;  %11207 = vmatprep.subr.bf16.mxu0 %v11206_v40  ;;  %7687 = vmax.xlane.f32.xlu1 %v7686_v62  ;;  %v6680_v43 = vmul.f32 %v11703_v35, %v15396_v56  ;;  %v15526_v56 = vld [vmem:[#allocation13] ss:$0 sm:$0xff] }
0x106d   :  { %v15475_v8 = vadd.f32 %v8516_v14, %v7664_v42  ;;  %11209 = vmatpush3.bf16.msra.mxu0 %v11206_v40  ;;  %v10552_v0 = vpop.f32.mrb[212].mxu1 }
0x106e   :  { %v11210_v28 = vpack.c.bf16 %v11443_v46, %v11442_v49  ;;  %v7667_v37 = vmul.f32 0.35355338, %v10552_v0  ;;  %v7643_v54 = vpop.f32.mrb[213].mxu1  ;;  %v7695_v38 = vsel %vm1988_vm0, %v15473_v63, -inf  ;;  %v11705_v53 = vpop.eup %11704 }
0x106f   :  { %v7666_v15 = vmul.f32 0.35355338, %v7643_v54  ;;  %7696 = vmax.xlane.f32.xlu0 %v7695_v38  ;;  %v7692_v41 = vsel %vm1988_vm0, %v15475_v8, -inf  ;;  %v11707_v40 = vpop.eup %11706 }
0x1070   :  { %v15487_v27 = vadd.f32 %v8519_v31, %v7667_v37  ;;  %11211 = vmatprep.subr.bf16.mxu0 %v11210_v28  ;;  %7693 = vmax.xlane.f32.xlu1 %v7692_v41  ;;  %v6682_v24 = vmul.f32 %v11707_v40, %v15407_v60 }
0x1071   :  { %v15489_v29 = vadd.f32 %v8518_v1, %v7666_v15  ;;  %11213 = vmatpush3.bf16.msra.mxu0 %v11210_v28  ;;  %v10555_v36 = vpop.f32.mrb[214].mxu1 }
0x1072   :  { %v7669_v34 = vmul.f32 0.35355338, %v10555_v36  ;;  %v7653_v58 = vpop.f32.mrb[215].mxu1  ;;  %v7701_v16 = vsel %vm1988_vm0, %v15487_v27, -inf  ;;  %10468 = vmatprep.subr.mxu0 %v15041_v59  ;;  %v11709_v20 = vpop.eup %11708 }
0x1073   :  { %v7668_v3 = vmul.f32 0.35355338, %v7653_v58  ;;  %7702 = vmax.xlane.f32.xlu0 %v7701_v16  ;;  %v7698_v22 = vsel %vm1988_vm0, %v15489_v29, -inf }
0x1074   :  { %v15504_v12 = vadd.f32 %v8521_v7, %v7669_v34  ;;  %10457 = vmatmul.mubr.msk.f32.vlgmr.msra.gmra.mrb[152].mxu0 %vm1988_vm0, %v6677_v48  ;;  %7699 = vmax.xlane.f32.xlu1 %v7698_v22 }
0x1075   :  { %v15507_v57 = vadd.f32 %v8520_v17, %v7668_v3  ;;  %10459 = vmatprep.mubr.msk.f32.mxu0 %vm1988_vm0, %v6678_v23  ;;  %10469 = vmatpush3.msra.mxu0 %v15041_v59  ;;  %v6681_v59 = vmul.f32 %v11705_v53, %v15405_v6 }
0x1076   :  { %v7707_v19 = vsel %vm1988_vm0, %v15504_v12, -inf  ;;  %10522 = vmatprep.subr.mxu0 %v15056_v44  ;;  %v6683_v44 = vmul.f32 %v11709_v20, %v15417_v30 }
0x1077   :  { %7708 = vmax.xlane.f32.xlu0 %v7707_v19  ;;  %v7704_v39 = vsel %vm1988_vm0, %v15507_v57, -inf }
0x1078   :  { %10460 = vmatmul.mubr.msk.f32.gmra.mrb[154].mxu0 %vm1988_vm0, %v6679_v21  ;;  %7705 = vmax.xlane.f32.xlu1 %v7704_v39 }
0x1079   :  { %10462 = vmatprep.mubr.msk.f32.mxu0 %vm1988_vm0, %v6680_v43 }
0x107c   :  { %10463 = vmatmul.mubr.msk.f32.gmra.mrb[156].mxu0 %vm1988_vm0, %v6681_v59 }
0x107d   :  { %10465 = vmatprep.mubr.msk.f32.mxu0 %vm1988_vm0, %v6682_v24 }
0x1080   :  { %10466 = vmatmul.mubr.msk.f32.gmra.mrb[158].mxu0 %vm1988_vm0, %v6683_v44 }
0x1097   :  { %v10364_v50 = vpop.f32.mrb[120].mxu0 }
0x1098   :  { %v11254_v14 = vadd.f32 %v10364_v50, %v15526_v56  ;;  %v5837_v61 = vpop.f32.mrb[121].mxu0 }
0x1099   :  { %v11255_v51 = vadd.f32 %v15526_v56, %v5837_v61 }
0x109a   :  { %5885 = vst.msk [vmem:[%s15727_s22 + $0x8] sm:$0xff] %vm1988_vm0, %v11254_v14 }
0x109b   :  { %5884 = vst.msk [vmem:[%s15727_s22] sm:$0xff] %vm1988_vm0, %v11255_v51  ;;  %v10367_v6 = vpop.f32.mrb[122].mxu0 }
0x109c   :  { %v11256_v60 = vadd.f32 %v10367_v6, %v15526_v56  ;;  %v5847_v30 = vpop.f32.mrb[123].mxu0 }
0x109d   :  { %v11257_v42 = vadd.f32 %v15526_v56, %v5847_v30 }
0x109e   :  { %5887 = vst.msk [vmem:[%s15727_s22 + $0x18] sm:$0xff] %vm1988_vm0, %v11256_v60 }
0x109f   :  { %5886 = vst.msk [vmem:[%s15727_s22 + $0x10] sm:$0xff] %vm1988_vm0, %v11257_v42  ;;  %v10370_v62 = vpop.f32.mrb[124].mxu0  ;;  %v11761_v42 = vld [vmem:[%s15724_s19 + $0x10] sm:$0xff] }
0x10a0   :  { %v11258_v46 = vadd.f32 %v10370_v62, %v15526_v56  ;;  %v5857_v49 = vpop.f32.mrb[125].mxu0 }
0x10a1   :  { %v11259_v0 = vadd.f32 %v15526_v56, %v5857_v49 }
0x10a2   :  { %5889 = vst.msk [vmem:[%s15727_s22 + $0x28] sm:$0xff] %vm1988_vm0, %v11258_v46 }
0x10a3   :  { %5888 = vst.msk [vmem:[%s15727_s22 + $0x20] sm:$0xff] %vm1988_vm0, %v11259_v0  ;;  %v10373_v31 = vpop.f32.mrb[126].mxu0 }
0x10a4   :  { %v11260_v28 = vadd.f32 %v10373_v31, %v15526_v56  ;;  %v5867_v37 = vpop.f32.mrb[127].mxu0 }
0x10a5   :  { %v11261_v54 = vadd.f32 %v15526_v56, %v5867_v37 }
0x10a6   :  { %5891 = vst.msk [vmem:[%s15727_s22 + $0x38] sm:$0xff] %vm1988_vm0, %v11260_v28 }
0x10a7   :  { %5890 = vst.msk [vmem:[%s15727_s22 + $0x30] sm:$0xff] %vm1988_vm0, %v11261_v54 }
0x10f8   :  { %v7691_v1 = vpop.xlane.xlu0 %7690 }
0x10f9   :  { %v7711_v38 = vsub.f32 %v15459_v47, %v7691_v1  ;;  %v7688_v13 = vpop.xlane.xlu1 %7687 }
0x10fa   :  { %v7710_v15 = vsub.f32 %v15461_v55, %v7688_v13 }
0x10fb   :  { %v7720_v41 = vmul.f32 1.442695, %v7711_v38 }
0x10fc   :  { %v7718_v45 = vmul.f32 1.442695, %v7710_v15  ;;  %v7697_v36 = vpop.xlane.xlu0 %7696 }
0x10fd   :  { %11710 = vpow2.f32 %v7720_v41  ;;  %v7713_v7 = vsub.f32 %v15473_v63, %v7697_v36  ;;  %v7694_v48 = vpop.xlane.xlu1 %7693 }
0x10fe   :  { %11712 = vpow2.f32 %v7718_v45  ;;  %v7712_v34 = vsub.f32 %v15475_v8, %v7694_v48 }
0x10ff   :  { %v7724_v58 = vmul.f32 1.442695, %v7713_v7 }
0x1100   :  { %v7722_v17 = vmul.f32 1.442695, %v7712_v34  ;;  %v7703_v16 = vpop.xlane.xlu0 %7702 }
0x1101   :  { %11714 = vpow2.f32 %v7724_v58  ;;  %v7715_v18 = vsub.f32 %v15487_v27, %v7703_v16  ;;  %v7700_v47 = vpop.xlane.xlu1 %7699 }
0x1102   :  { %11716 = vpow2.f32 %v7722_v17  ;;  %v7714_v55 = vsub.f32 %v15489_v29, %v7700_v47 }
0x1103   :  { %v7728_v3 = vmul.f32 1.442695, %v7715_v18 }
0x1104   :  { %v7726_v22 = vmul.f32 1.442695, %v7714_v55  ;;  %v7709_v23 = vpop.xlane.xlu0 %7708 }
0x1105   :  { %11718 = vpow2.f32 %v7728_v3  ;;  %v7717_v63 = vsub.f32 %v15504_v12, %v7709_v23  ;;  %v7706_v35 = vpop.xlane.xlu1 %7705 }
0x1106   :  { %11720 = vpow2.f32 %v7726_v22  ;;  %v7716_v8 = vsub.f32 %v15507_v57, %v7706_v35 }
0x1107   :  { %v15576_v19 = vpop.eup %11710  ;;  %v7732_v21 = vmul.f32 1.442695, %v7717_v63 }
0x1108   :  { %v15578_v53 = vpop.eup %11712  ;;  %v7730_v27 = vmul.f32 1.442695, %v7716_v8  ;;  %v7737_v39 = vsel %vm1988_vm0, %v15576_v19, 0.0 }
0x1109   :  { %11722 = vpow2.f32 %v7732_v21  ;;  %7738 = vadd.xlane.f32.xlu0 %v7737_v39  ;;  %v7734_v29 = vsel %vm1988_vm0, %v15578_v53, 0.0 }
0x110a   :  { %11724 = vpow2.f32 %v7730_v27  ;;  %7735 = vadd.xlane.f32.xlu1 %v7734_v29 }
0x110b   :  { %v15584_v12 = vpop.eup %11714 }
0x110c   :  { %v15586_v43 = vpop.eup %11716  ;;  %v7743_v57 = vsel %vm1988_vm0, %v15584_v12, 0.0 }
0x110d   :  { %7744 = vadd.xlane.f32.xlu0 %v7743_v57  ;;  %v7740_v40 = vsel %vm1988_vm0, %v15586_v43, 0.0 }
0x110e   :  { %7741 = vadd.xlane.f32.xlu1 %v7740_v40 }
0x110f   :  { %v15592_v59 = vpop.eup %11718 }
0x1110   :  { %v15594_v20 = vpop.eup %11720  ;;  %v7749_v24 = vsel %vm1988_vm0, %v15592_v59, 0.0 }
0x1111   :  { %7750 = vadd.xlane.f32.xlu0 %v7749_v24  ;;  %v7746_v44 = vsel %vm1988_vm0, %v15594_v20, 0.0 }
0x1112   :  { %7747 = vadd.xlane.f32.xlu1 %v7746_v44 }
0x1113   :  { %v15600_v50 = vpop.eup %11722 }
0x1114   :  { %v15602_v14 = vpop.eup %11724  ;;  %v7755_v61 = vsel %vm1988_vm0, %v15600_v50, 0.0 }
0x1115   :  { %7756 = vadd.xlane.f32.xlu0 %v7755_v61  ;;  %v7752_v51 = vsel %vm1988_vm0, %v15602_v14, 0.0 }
0x1116   :  { %7753 = vadd.xlane.f32.xlu1 %v7752_v51 }
0x1127   :  { %11445 = vrot.lane.b32.xlu1 %v14175_v4, %s11961_s27 }
0x112b   :  { %11450 = vrot.lane.b32.xlu0 %v14183_v10, %s11961_s27 }
0x1147   :  { %v10458_v6 = vpop.f32.mrb[152].mxu0 }
0x1148   :  { %v6790_v60 = vpop.f32.mrb[153].mxu0 }
0x1149   :  { %10470 = vmatprep.mubr.msk.f32.mxu0 %vm3728_vm1, %v6790_v60 }
0x114a   :  { %10471 = vmatmul.mubr.msk.f32.vlgmr.msra.gmra.mrb[144].mxu0 %vm3728_vm1, %v10458_v6 }
0x114b   :  { %v10461_v30 = vpop.f32.mrb[154].mxu0  ;;  %10523 = vmatpush3.msra.mxu0 %v11761_v42 }
0x114c   :  { %v6800_v62 = vpop.f32.mrb[155].mxu0 }
0x114d   :  { %10473 = vmatprep.mubr.msk.f32.mxu0 %vm3728_vm1, %v6800_v62 }
0x114e   :  { %10474 = vmatmul.mubr.msk.f32.gmra.mrb[146].mxu0 %vm3728_vm1, %v10461_v30 }
0x114f   :  { %v10464_v4 = vpop.f32.mrb[156].mxu0 }
0x1150   :  { %v6810_v46 = vpop.f32.mrb[157].mxu0 }
0x1151   :  { %10476 = vmatprep.mubr.msk.f32.mxu0 %vm3728_vm1, %v6810_v46 }
0x1152   :  { %10477 = vmatmul.mubr.msk.f32.gmra.mrb[148].mxu0 %vm3728_vm1, %v10464_v4 }
0x1153   :  { %v10467_v10 = vpop.f32.mrb[158].mxu0 }
0x1154   :  { %v6820_v49 = vpop.f32.mrb[159].mxu0 }
0x1155   :  { %10479 = vmatprep.mubr.msk.f32.mxu0 %vm3728_vm1, %v6820_v49 }
0x1156   :  { %10480 = vmatmul.mubr.msk.f32.gmra.mrb[150].mxu0 %vm3728_vm1, %v10467_v10 }
0x1157   :  { %10524 = vmatprep.mubr.msk.f32.mxu0 %vm3728_vm1, %v15437_v9 }
0x115a   :  { %10525 = vmatmul.mubr.msk.f32.vlgmr.msra.gmra.mrb[144].mxu0 %vm3728_vm1, %v15435_v5 }
0x115b   :  { %10527 = vmatprep.mubr.msk.f32.mxu0 %vm3728_vm1, %v15441_v11 }
0x115e   :  { %10528 = vmatmul.mubr.msk.f32.gmra.mrb[146].mxu0 %vm3728_vm1, %v15439_v33 }
0x115f   :  { %10530 = vmatprep.mubr.msk.f32.mxu0 %vm3728_vm1, %v15445_v52 }
0x1162   :  { %10531 = vmatmul.mubr.msk.f32.gmra.mrb[148].mxu0 %vm3728_vm1, %v15443_v25 }
0x1163   :  { %10533 = vmatprep.mubr.msk.f32.mxu0 %vm3728_vm1, %v15449_v26 }
0x1166   :  { %10534 = vmatmul.mubr.msk.f32.gmra.mrb[150].mxu0 %vm3728_vm1, %v15447_v32 }
0x1196   :  { %v7739_v9 = vpop.xlane.xlu0 %7738 }
0x1197   :  { %v7736_v5 = vpop.xlane.xlu1 %7735 }
0x1198   :  { %11726 = vrcp.f32 %v7736_v5 }
0x1199   :  { %11728 = vrcp.f32 %v7739_v9 }
0x119a   :  { %v7745_v0 = vpop.xlane.xlu0 %7744 }
0x119b   :  { %v7742_v11 = vpop.xlane.xlu1 %7741 }
0x119c   :  { %11730 = vrcp.f32 %v7742_v11 }
0x119d   :  { %11732 = vrcp.f32 %v7745_v0 }
0x119e   :  { %v7751_v31 = vpop.xlane.xlu0 %7750 }
0x119f   :  { %v7748_v28 = vpop.xlane.xlu1 %7747 }
0x11a0   :  { %11734 = vrcp.f32 %v7748_v28 }
0x11a1   :  { %11736 = vrcp.f32 %v7751_v31 }
0x11a2   :  { %v11727_v33 = vpop.eup %11726  ;;  %v7757_v37 = vpop.xlane.xlu0 %7756 }
0x11a3   :  { %v7754_v54 = vpop.xlane.xlu1 %7753  ;;  %v7766_v52 = vmul.f32 %v11727_v33, %v15578_v53  ;;  %v11729_v45 = vpop.eup %11728 }
0x11a4   :  { %11738 = vrcp.f32 %v7754_v54  ;;  %v7767_v7 = vmul.f32 %v11729_v45, %v15576_v19 }
0x11a5   :  { %10564 = vmatprep.mubr.msk.f32.mxu0 %vm1988_vm0, %v7766_v52  ;;  %11740 = vrcp.f32 %v7757_v37 }
0x11a6   :  { %v11451_v25 = vpop.permute.xlu0 %11450  ;;  %v11731_v36 = vpop.eup %11730 }
0x11a7   :  { %v11446_v26 = vpop.permute.xlu1 %11445  ;;  %v11453_v1 = vunpack.i.h.bf16 %v11451_v25  ;;  %v11452_v32 = vunpack.i.l.bf16 %v11451_v25  ;;  %v11733_v48 = vpop.eup %11732  ;;  %v7768_v34 = vmul.f32 %v11731_v36, %v15586_v43 }
0x11a8   :  { %v11448_v38 = vunpack.i.h.bf16 %v11446_v26  ;;  %v11447_v13 = vunpack.i.l.bf16 %v11446_v26  ;;  %v7769_v17 = vmul.f32 %v11733_v48, %v15584_v12 }
0x11a9   :  { %v11250_v41 = vpack.c.bf16 %v11453_v1, %v11452_v32 }
0x11aa   :  { %v11246_v15 = vpack.c.bf16 %v11448_v38, %v11447_v13  ;;  %v11735_v58 = vpop.eup %11734 }
0x11ab   :  { %v11737_v16 = vpop.eup %11736  ;;  %v7770_v18 = vmul.f32 %v11735_v58, %v15594_v20 }
0x11ac   :  { %11247 = vmatprep.subr.bf16.mxu0 %v11246_v15  ;;  %v7771_v55 = vmul.f32 %v11737_v16, %v15592_v59 }
0x11ad   :  { %11249 = vmatpush3.bf16.msra.mxu0 %v11246_v15 }
0x11ae   :  { %11251 = vmatprep.subr.bf16.mxu0 %v11250_v41  ;;  %v11739_v47 = vpop.eup %11738 }
0x11af   :  { %v11741_v3 = vpop.eup %11740  ;;  %v7772_v22 = vmul.f32 %v11739_v47, %v15602_v14 }
0x11b1   :  { %11253 = vmatpush3.bf16.msra.mxu0 %v11250_v41 }
0x11b2   :  { %10576 = vmatprep.subr.mxu0 %v15325_v2 }
0x11b4   :  { %10565 = vmatmul.mubr.msk.f32.vlgmr.msra.gmra.mrb[160].mxu0 %vm1988_vm0, %v7767_v7 }
0x11b5   :  { %10567 = vmatprep.mubr.msk.f32.mxu0 %vm1988_vm0, %v7768_v34  ;;  %10577 = vmatpush3.msra.mxu0 %v15325_v2  ;;  %v7773_v2 = vmul.f32 %v11741_v3, %v15600_v50 }
0x11b8   :  { %10568 = vmatmul.mubr.msk.f32.gmra.mrb[162].mxu0 %vm1988_vm0, %v7769_v17 }
0x11b9   :  { %10570 = vmatprep.mubr.msk.f32.mxu0 %vm1988_vm0, %v7770_v18 }
0x11bc   :  { %10571 = vmatmul.mubr.msk.f32.gmra.mrb[164].mxu0 %vm1988_vm0, %v7771_v55 }
0x11bd   :  { %10573 = vmatprep.mubr.msk.f32.mxu0 %vm1988_vm0, %v7772_v22 }
0x11c0   :  { %10574 = vmatmul.mubr.msk.f32.gmra.mrb[166].mxu0 %vm1988_vm0, %v7773_v2 }
0x1287   :  { %v10566_v23 = vpop.f32.mrb[160].mxu0 }
0x1288   :  { %v7876_v63 = vpop.f32.mrb[161].mxu0 }
0x1289   :  { %10578 = vmatprep.mubr.msk.f32.mxu0 %vm3728_vm1, %v7876_v63 }
0x128a   :  { %10579 = vmatmul.mubr.msk.f32.vlgmr.msra.gmra.mrb[144].mxu0 %vm3728_vm1, %v10566_v23 }
0x128b   :  { %v10569_v35 = vpop.f32.mrb[162].mxu0 }
0x128c   :  { %v7886_v8 = vpop.f32.mrb[163].mxu0 }
0x128d   :  { %10581 = vmatprep.mubr.msk.f32.mxu0 %vm3728_vm1, %v7886_v8 }
0x128e   :  { %10582 = vmatmul.mubr.msk.f32.gmra.mrb[146].mxu0 %vm3728_vm1, %v10569_v35 }
0x128f   :  { %v10572_v19 = vpop.f32.mrb[164].mxu0 }
0x1290   :  { %v7896_v21 = vpop.f32.mrb[165].mxu0 }
0x1291   :  { %10584 = vmatprep.mubr.msk.f32.mxu0 %vm3728_vm1, %v7896_v21 }
0x1292   :  { %10585 = vmatmul.mubr.msk.f32.gmra.mrb[148].mxu0 %vm3728_vm1, %v10572_v19 }
0x1293   :  { %v10575_v53 = vpop.f32.mrb[166].mxu0 }
0x1294   :  { %v7906_v27 = vpop.f32.mrb[167].mxu0 }
0x1295   :  { %10587 = vmatprep.mubr.msk.f32.mxu0 %vm3728_vm1, %v7906_v27 }
0x1296   :  { %10588 = vmatmul.mubr.msk.f32.gmra.mrb[150].mxu0 %vm3728_vm1, %v10575_v53 }
0x135d   :  { %v10580_v39 = vpop.f32.mrb[144].mxu0 }
0x135e   :  { %v11262_v29 = vadd.f32 %v10580_v39, %v15526_v56  ;;  %v8005_v12 = vpop.f32.mrb[145].mxu0 }
0x135f   :  { %v11263_v43 = vadd.f32 %v15526_v56, %v8005_v12 }
0x1360   :  { %8053 = vst.msk [vmem:[%s15727_s22 + $0x48] sm:$0xff] %vm1988_vm0, %v11262_v29 }
0x1361   :  { %8052 = vst.msk [vmem:[%s15727_s22 + $0x40] sm:$0xff] %vm1988_vm0, %v11263_v43  ;;  %v10583_v57 = vpop.f32.mrb[146].mxu0 }
0x1362   :  { %v11264_v40 = vadd.f32 %v10583_v57, %v15526_v56  ;;  %v8015_v59 = vpop.f32.mrb[147].mxu0 }
0x1363   :  { %v11265_v20 = vadd.f32 %v15526_v56, %v8015_v59 }
0x1364   :  { %8055 = vst.msk [vmem:[%s15727_s22 + $0x58] sm:$0xff] %vm1988_vm0, %v11264_v40 }
0x1365   :  { %8054 = vst.msk [vmem:[%s15727_s22 + $0x50] sm:$0xff] %vm1988_vm0, %v11265_v20  ;;  %v10586_v24 = vpop.f32.mrb[148].mxu0 }
0x1366   :  { %v11266_v44 = vadd.f32 %v10586_v24, %v15526_v56  ;;  %v8025_v50 = vpop.f32.mrb[149].mxu0 }
0x1367   :  { %v11267_v14 = vadd.f32 %v15526_v56, %v8025_v50 }
0x1368   :  { %8057 = vst.msk [vmem:[%s15727_s22 + $0x68] sm:$0xff] %vm1988_vm0, %v11266_v44 }
0x1369   :  { %8056 = vst.msk [vmem:[%s15727_s22 + $0x60] sm:$0xff] %vm1988_vm0, %v11267_v14  ;;  %v10589_v61 = vpop.f32.mrb[150].mxu0 }
0x136a   :  { %v11268_v51 = vadd.f32 %v10589_v61, %v15526_v56  ;;  %v8035_v6 = vpop.f32.mrb[151].mxu0 }
0x136b   :  { %v11269_v60 = vadd.f32 %v15526_v56, %v8035_v6 }
0x136c   :  { %8059 = vst.msk [vmem:[%s15727_s22 + $0x78] sm:$0xff] %vm1988_vm0, %v11268_v51 }
0x136d   :  { %8058 = vst.msk [vmem:[%s15727_s22 + $0x70] sm:$0xff] %vm1988_vm0, %v11269_v60 }
0x136e   :  { %8068 = vsyncpa [#allocation3], 1 }
0x136f   :  { %8069 = vsyncpa [#allocation5], 1 }
0x1370   :  { %8070 = vsyncpa [#allocation8], 1 }
0x1371   :  { %8071 = vsyncpa [#allocation11], 1 }
0x1372   :  { %8072 = vsyncpa [#allocation14], 1 }

</bundles_post_ra>
